<compile_context>
chip_gen: v6e
topology: v6e:2x2x1
jax: 0.10.0
libtpu: 0.0.40
codegen_flags: <defaults>
</compile_context>

<pallas_src>
import math
from functools import partial

import jax
import jax.numpy as jnp
from jax.experimental import pallas as pl
from jax.experimental.pallas import tpu as pltpu

SSP_SHIFT = math.log(2.0)


def _ssp(x):
    """Shifted softplus, numerically stable: softplus(x) - log(2)."""
    return jnp.maximum(x, 0.0) + jnp.log1p(jnp.exp(-jnp.abs(x))) - SSP_SHIFT


# ----------------------------------------------------------------------------
# Generation-aware VMEM planning
# ----------------------------------------------------------------------------
def _vmem_capacity_bytes():
    """Per-core VMEM capacity; conservative 64 MiB (v7x) fallback."""
    try:
        get_info = getattr(pltpu, "get_tpu_info", None)
        if get_info is not None:
            info = get_info()
            cap = getattr(info, "vmem_capacity_bytes", None)
            if cap:
                return min(int(cap), 128 * 1024 * 1024)
    except Exception:
        pass
    return 64 * 1024 * 1024


def _vmem_plan():
    cap = _vmem_capacity_bytes()
    limit = int(cap * 0.75)        # ~96 MiB on 128-MiB parts, ~48 MiB on v7x
    budget = int(limit * 0.8)      # headroom for weights / compiler temps
    return limit, budget


def _pick_tile(n, per_row_bytes, budget, cap=1024, min_tiles=2):
    """Largest target-node tile (divisor of n, multiple of 8 unless == n) whose
    per-tile footprint fits `budget`; capped so the grid has >= `min_tiles`
    steps when possible (keeps both TensorCores busy on v7x)."""
    limit = max(8, budget // max(per_row_bytes, 1))
    limit = min(limit, cap, n)
    if min_tiles > 1 and n >= 16:
        limit = min(limit, max(8, n // min_tiles))
    t = limit - (limit % 8)
    while t >= 8 and n % t:
        t -= 8
    return t if t >= 8 else n


def _pick_source_chunk(n):
    """Source-chunk size for the interaction reduction axis. Must be a multiple
    of 128 (lane constraint on the (TN, SC) envelope block) or equal to n."""
    for cand in (512, 256, 128):
        if n % cand == 0 and n > cand:
            return cand
    return n


# ----------------------------------------------------------------------------
# Kernel 1: edge precompute (distances, mask, envelope, gaussian smear) fused
#           with the FIRST interaction block's lin1 projection.
# ----------------------------------------------------------------------------
def _make_edge_kernel(coeff: float, cutoff: float):
    pi_over_cutoff = math.pi / cutoff

    def kernel(pos_t_ref, pos_s_ref, bat_t_ref, bat_s_ref, off_ref,
               h_ref, lin1_w_ref,
               ea_ref, env_ref, h1_ref):
        p_t = pos_t_ref[...]                       # (TN, 3) target positions
        p_s = pos_s_ref[...]                       # (3, N)  all source positions
        TN = p_t.shape[0]
        N = p_s.shape[1]
        G = off_ref.shape[1]

        # pairwise distances without a (TN, N, 3) tensor
        dx = p_t[:, 0:1] - p_s[0:1, :]
        dy = p_t[:, 1:2] - p_s[1:2, :]
        dz = p_t[:, 2:3] - p_s[2:3, :]
        d = jnp.sqrt(jnp.maximum(dx * dx + dy * dy + dz * dz, 0.0))   # (TN, N)

        # edge mask: same molecule (int32 compare), not self, within cutoff
        row = jax.lax.broadcasted_iota(jnp.int32, (TN, N), 0) + pl.program_id(0) * TN
        col = jax.lax.broadcasted_iota(jnp.int32, (TN, N), 1)
        same_mol = bat_t_ref[...] == bat_s_ref[...]        # (TN,1)==(1,N) -> (TN,N)
        edge = jnp.logical_and(jnp.logical_and(same_mol, row != col), d <= cutoff)

        # cosine cutoff envelope fused with the mask
        env_ref[...] = jnp.where(edge, 0.5 * (jnp.cos(d * pi_over_cutoff) + 1.0), 0.0)

        # gaussian smearing, stored bf16 (re-read by every interaction block)
        diff = d[:, :, None] - off_ref[...].reshape(1, 1, G)          # (TN, N, G)
        ea_ref[...] = jnp.exp(coeff * diff * diff).astype(ea_ref.dtype)

        # first interaction block's lin1 projection (hoisted out of the
        # per-tile interaction kernel)
        h1_ref[...] = jnp.dot(h_ref[...].astype(jnp.bfloat16), lin1_w_ref[...],
                              preferred_element_type=jnp.float32).astype(h1_ref.dtype)

    return kernel


def edge_precompute(pos, batch_i, offset, h, lin1_w0_bf16, coeff, cutoff,
                    tile_n, vmem_limit):
    N = pos.shape[0]
    G = offset.shape[0]
    H = h.shape[1]
    F = lin1_w0_bf16.shape[1]
    grid = (N // tile_n,)
    ea, env, h1 = pl.pallas_call(
        _make_edge_kernel(coeff, cutoff),
        out_shape=(jax.ShapeDtypeStruct((N, N, G), jnp.bfloat16),
                   jax.ShapeDtypeStruct((N, N), jnp.float32),
                   jax.ShapeDtypeStruct((N, F), jnp.bfloat16)),
        grid=grid,
        in_specs=[
            pl.BlockSpec((tile_n, 3), lambda i: (i, 0)),   # target positions tile
            pl.BlockSpec((3, N), lambda i: (0, 0)),        # all positions (3, N)
            pl.BlockSpec((tile_n, 1), lambda i: (i, 0)),   # target batch ids (int32)
            pl.BlockSpec((1, N), lambda i: (0, 0)),        # source batch ids (int32)
            pl.BlockSpec((1, G), lambda i: (0, 0)),        # gaussian centers
            pl.BlockSpec((tile_n, H), lambda i: (i, 0)),   # h tile (for h1 of block 0)
            pl.BlockSpec((H, F), lambda i: (0, 0)),        # block-0 lin1 W (bf16)
        ],
        out_specs=[
            pl.BlockSpec((tile_n, N, G), lambda i: (i, 0, 0)),
            pl.BlockSpec((tile_n, N), lambda i: (i, 0)),
            pl.BlockSpec((tile_n, F), lambda i: (i, 0)),
        ],
        compiler_params=pltpu.CompilerParams(
            dimension_semantics=("parallel",),
            vmem_limit_bytes=vmem_limit),
    )(pos, pos.T, batch_i.reshape(N, 1), batch_i.reshape(1, N),
      offset.reshape(1, G), h, lin1_w0_bf16)
    return ea, env, h1


# ----------------------------------------------------------------------------
# Kernel 2: fused interaction block.
#   Grid = (target tiles, source chunks); the source axis is a reduction over
#   a VMEM scratch accumulator (bounds the live (TN, SC, F) temporaries).
#   The epilogue also produces the NEXT block's h1 projection (when chaining).
# ----------------------------------------------------------------------------
def _make_interaction_kernel(emit_next: bool):

    def kernel(*refs):
        if emit_next:
            (h_ref, h1_ref, ea_ref, env_ref,
             w1_ref, b1_ref, w2_ref, b2_ref,
             lin2_w_ref, lin2_b_ref, lin_w_ref, lin_b_ref, next_w_ref,
             out_ref, h1n_ref, m_acc) = refs
        else:
            (h_ref, h1_ref, ea_ref, env_ref,
             w1_ref, b1_ref, w2_ref, b2_ref,
             lin2_w_ref, lin2_b_ref, lin_w_ref, lin_b_ref,
             out_ref, m_acc) = refs

        c = pl.program_id(1)

        @pl.when(c == 0)
        def _():
            m_acc[...] = jnp.zeros_like(m_acc)

        TN, SC = env_ref.shape
        G = ea_ref.shape[2]
        F = w1_ref.shape[1]

        # edge filter MLP on this source chunk (bf16 MXU path, f32 accumulation)
        ea = ea_ref[...].reshape(TN * SC, G)                                   # bf16
        t = jnp.dot(ea, w1_ref[...], preferred_element_type=jnp.float32) + b1_ref[...]
        t = _ssp(t)
        w = jnp.dot(t.astype(jnp.bfloat16), w2_ref[...],
                    preferred_element_type=jnp.float32) + b2_ref[...]          # (TN*SC, F)

        # cosine-cutoff/mask envelope, accumulate messages over this chunk:
        #   m_i += sum_{j in chunk} h1_j * W_ij * env_ij
        wm = w.reshape(TN, SC, F) * env_ref[...][:, :, None]                   # (TN, SC, F)
        h1 = h1_ref[...].astype(jnp.float32)                                   # (SC, F)
        m_acc[...] += jnp.sum(wm * h1[None, :, :], axis=1)

        @pl.when(c == pl.num_programs(1) - 1)
        def _():
            # fused epilogue: lin2 + shifted softplus + lin + residual
            m = m_acc[...]
            x = _ssp(jnp.dot(m, lin2_w_ref[...], preferred_element_type=jnp.float32)
                     + lin2_b_ref[...])
            x = jnp.dot(x, lin_w_ref[...], preferred_element_type=jnp.float32) + lin_b_ref[...]
            h_new = h_ref[...] + x
            out_ref[...] = h_new
            if emit_next:
                # lin1 projection for the NEXT interaction block (hoisted)
                h1n_ref[...] = jnp.dot(h_new.astype(jnp.bfloat16), next_w_ref[...],
                                       preferred_element_type=jnp.float32
                                       ).astype(h1n_ref.dtype)

    return kernel


def interaction_block(h, h1, ea, env, blk, next_lin1_w, tile_n, src_chunk, vmem_limit):
    N, H = h.shape
    G = ea.shape[2]
    F = blk["mlp_w1"].shape[1]
    emit_next = next_lin1_w is not None
    grid = (N // tile_n, N // src_chunk)

    w1_bf = blk["mlp_w1"].astype(jnp.bfloat16)
    w2_bf = blk["mlp_w2"].astype(jnp.bfloat16)

    in_specs = [
        pl.BlockSpec((tile_n, H), lambda i, c: (i, 0)),               # h tile (residual)
        pl.BlockSpec((src_chunk, F), lambda i, c: (c, 0)),            # h1 source chunk
        pl.BlockSpec((tile_n, src_chunk, G), lambda i, c: (i, c, 0)), # edge_attr block
        pl.BlockSpec((tile_n, src_chunk), lambda i, c: (i, c)),       # envelope*mask block
        pl.BlockSpec((G, F), lambda i, c: (0, 0)),                    # mlp W1 (bf16)
        pl.BlockSpec((1, F), lambda i, c: (0, 0)),                    # mlp b1
        pl.BlockSpec((F, F), lambda i, c: (0, 0)),                    # mlp W2 (bf16)
        pl.BlockSpec((1, F), lambda i, c: (0, 0)),                    # mlp b2
        pl.BlockSpec((F, H), lambda i, c: (0, 0)),                    # lin2 W
        pl.BlockSpec((1, H), lambda i, c: (0, 0)),                    # lin2 b
        pl.BlockSpec((H, H), lambda i, c: (0, 0)),                    # lin W
        pl.BlockSpec((1, H), lambda i, c: (0, 0)),                    # lin b
    ]
    args = [h, h1, ea, env,
            w1_bf, blk["mlp_b1"].reshape(1, F),
            w2_bf, blk["mlp_b2"].reshape(1, F),
            blk["lin2_w"], blk["lin2_b"].reshape(1, H),
            blk["lin_w"], blk["lin_b"].reshape(1, H)]

    out_shape = [jax.ShapeDtypeStruct((N, H), jnp.float32)]
    out_specs = [pl.BlockSpec((tile_n, H), lambda i, c: (i, 0))]
    if emit_next:
        in_specs.append(pl.BlockSpec((H, F), lambda i, c: (0, 0)))    # next block's lin1 W
        args.append(next_lin1_w.astype(jnp.bfloat16))
        out_shape.append(jax.ShapeDtypeStruct((N, F), jnp.bfloat16))
        out_specs.append(pl.BlockSpec((tile_n, F), lambda i, c: (i, 0)))

    outs = pl.pallas_call(
        _make_interaction_kernel(emit_next),
        out_shape=tuple(out_shape),
        grid=grid,
        in_specs=in_specs,
        out_specs=out_specs,
        scratch_shapes=[pltpu.VMEM((tile_n, F), jnp.float32)],
        compiler_params=pltpu.CompilerParams(
            dimension_semantics=("parallel", "arbitrary"),
            vmem_limit_bytes=vmem_limit),
    )(*args)

    if emit_next:
        return outs[0], outs[1]
    h_out = outs[0] if isinstance(outs, (tuple, list)) else outs
    return h_out, None


# ----------------------------------------------------------------------------
# Kernel 3: fused readout (global_add_pool) + FC head (eval mode)
# ----------------------------------------------------------------------------
def _head_kernel(onehot_ref, h_ref,
                 w0_ref, b0_ref, s0_ref, t0_ref,
                 w1_ref, b1_ref, s1_ref, t1_ref,
                 w2_ref, b2_ref, s2_ref, t2_ref,
                 w3_ref, b3_ref,
                 out1_ref, out_ref):
    pooled = jnp.dot(onehot_ref[...], h_ref[...], preferred_element_type=jnp.float32)  # (B, H)
    out1_ref[...] = pooled
    x = pooled
    for w_ref, b_ref, s_ref, t_ref in ((w0_ref, b0_ref, s0_ref, t0_ref),
                                       (w1_ref, b1_ref, s1_ref, t1_ref),
                                       (w2_ref, b2_ref, s2_ref, t2_ref)):
        x = jnp.dot(x, w_ref[...], preferred_element_type=jnp.float32) + b_ref[...]
        x = jnp.where(x >= 0.0, x, 0.01 * x)        # LeakyReLU (Dropout = identity in eval)
        x = x * s_ref[...] + t_ref[...]             # BatchNorm1d eval, folded scale/shift
    out_ref[...] = jnp.dot(x, w3_ref[...], preferred_element_type=jnp.float32) + b3_ref[...]


def readout_head(onehot, h, fc_params, vmem_limit, eps=1e-5):
    B, N = onehot.shape
    H = h.shape[1]
    n_tasks = fc_params[-1]["w"].shape[1]
    Fc = fc_params[0]["w"].shape[1]

    args = [onehot, h]
    specs = [pl.BlockSpec((B, N), lambda i: (0, 0)),
             pl.BlockSpec((N, H), lambda i: (0, 0))]
    for layer in fc_params[:-1]:
        scale = layer["bn_gamma"] / jnp.sqrt(layer["bn_var"] + eps)
        shift = layer["bn_beta"] - layer["bn_mean"] * scale
        di, do = layer["w"].shape
        args += [layer["w"], layer["b"].reshape(1, do),
                 scale.reshape(1, do), shift.reshape(1, do)]
        specs += [pl.BlockSpec((di, do), lambda i: (0, 0)),
                  pl.BlockSpec((1, do), lambda i: (0, 0)),
                  pl.BlockSpec((1, do), lambda i: (0, 0)),
                  pl.BlockSpec((1, do), lambda i: (0, 0))]
    last = fc_params[-1]
    args += [last["w"], last["b"].reshape(1, n_tasks)]
    specs += [pl.BlockSpec((Fc, n_tasks), lambda i: (0, 0)),
              pl.BlockSpec((1, n_tasks), lambda i: (0, 0))]

    out1, out = pl.pallas_call(
        _head_kernel,
        out_shape=(jax.ShapeDtypeStruct((B, H), jnp.float32),
                   jax.ShapeDtypeStruct((B, n_tasks), jnp.float32)),
        grid=(1,),
        in_specs=specs,
        out_specs=[pl.BlockSpec((B, H), lambda i: (0, 0)),
                   pl.BlockSpec((B, n_tasks), lambda i: (0, 0))],
        compiler_params=pltpu.CompilerParams(
            dimension_semantics=("arbitrary",),
            vmem_limit_bytes=vmem_limit),
    )(*args)
    return out1, out


# ----------------------------------------------------------------------------
# Parameter initialization (deterministic, synthetic)
# ----------------------------------------------------------------------------
def _xavier(key, fan_in, fan_out):
    a = math.sqrt(6.0 / (fan_in + fan_out))
    # stored as (in, out) so kernels compute x @ W directly
    return jax.random.uniform(key, (fan_in, fan_out), jnp.float32, -a, a)


def init_params(key, hidden, filters, gaussians, n_interactions, fc_hidden, n_tasks):
    params = {}
    key, k = jax.random.split(key)
    emb = jax.random.normal(k, (100, hidden), jnp.float32)
    emb = emb.at[0].set(0.0)  # padding_idx=0
    params["embedding"] = emb

    blocks = []
    for _ in range(n_interactions):
        key, k1, k2, k3, k4, k5 = jax.random.split(key, 6)
        blocks.append({
            "mlp_w1": _xavier(k1, gaussians, filters), "mlp_b1": jnp.zeros((filters,), jnp.float32),
            "mlp_w2": _xavier(k2, filters, filters),   "mlp_b2": jnp.zeros((filters,), jnp.float32),
            "lin1_w": _xavier(k3, hidden, filters),    # no bias
            "lin2_w": _xavier(k4, filters, hidden),    "lin2_b": jnp.zeros((hidden,), jnp.float32),
            "lin_w":  _xavier(k5, hidden, hidden),     "lin_b":  jnp.zeros((hidden,), jnp.float32),
        })
    params["interactions"] = blocks

    # FC head: Lin(h,F)+LReLU+BN, Lin(F,F)+LReLU+BN, Lin(F,F)+LReLU+BN, Lin(F,1)
    fc = []
    dims = [(hidden, fc_hidden), (fc_hidden, fc_hidden), (fc_hidden, fc_hidden)]
    for (di, do) in dims:
        key, kw, kb = jax.random.split(key, 3)
        fc.append({
            "w": _xavier(kw, di, do),
            "b": jax.random.uniform(kb, (do,), jnp.float32, -0.1, 0.1),
            "bn_gamma": jnp.ones((do,), jnp.float32),
            "bn_beta": jnp.zeros((do,), jnp.float32),
            "bn_mean": jnp.zeros((do,), jnp.float32),
            "bn_var": jnp.ones((do,), jnp.float32),
        })
    key, kw, kb = jax.random.split(key, 3)
    fc.append({"w": _xavier(kw, fc_hidden, n_tasks),
               "b": jax.random.uniform(kb, (n_tasks,), jnp.float32, -0.1, 0.1)})
    params["fc"] = fc
    return params


# ----------------------------------------------------------------------------
# Forward pass
# ----------------------------------------------------------------------------
def schnet_forward(params, z, pos, batch, y, *, num_batches, cutoff, gaussians):
    N = z.shape[0]
    blocks = params["interactions"]
    F = blocks[0]["lin1_w"].shape[1]
    H = params["embedding"].shape[1]
    G = gaussians

    # --- embedding (glue: gather) ---
    h = params["embedding"][z]                                   # (N, hidden)

    # --- gaussian smearing constants ---
    offset = jnp.linspace(0.0, cutoff, gaussians).astype(jnp.float32)
    delta = cutoff / (gaussians - 1)
    coeff = -0.5 / (delta ** 2)

    # --- generation-aware VMEM plan + tile selection ---
    vmem_limit, budget = _vmem_plan()
    src_chunk = _pick_source_chunk(N)
    # interaction: per target-row x source-col bytes (bf16 ea x2buf, env, temps)
    bytes_pair = 4 * G + 12 + 16 * F
    tile_int = _pick_tile(N, src_chunk * bytes_pair, budget)
    # edge precompute: per target-row bytes (ea out + diff/exp temps + env/d)
    bytes_row_edge = N * (16 * G + 40) + 8 * H
    tile_edge = _pick_tile(N, bytes_row_edge, budget)

    # --- edge features + block-0 lin1 projection, computed ONCE ---
    batch_i = batch.astype(jnp.int32)
    ea, env, h1 = edge_precompute(pos.astype(jnp.float32), batch_i, offset, h,
                                  blocks[0]["lin1_w"].astype(jnp.bfloat16),
                                  coeff, cutoff, tile_edge, vmem_limit)

    # --- interaction blocks: one fused Pallas kernel per block ---
    for k, blk in enumerate(blocks):
        next_w = blocks[k + 1]["lin1_w"] if k + 1 < len(blocks) else None
        h, h1 = interaction_block(h, h1, ea, env, blk, next_w,
                                  tile_int, src_chunk, vmem_limit)

    # --- readout (global_add_pool as one-hot matmul) + FC head, fused ---
    onehot = (batch[None, :] == jnp.arange(num_batches)[:, None]).astype(jnp.float32)
    out1, out = readout_head(onehot, h, params["fc"], vmem_limit)

    return out.reshape(-1), y, out1


# ----------------------------------------------------------------------------
if __name__ == "__main__":
    # small synthetic config consistent with the module
    hidden_channels = 32
    num_filters = 32
    num_gaussians = 16
    num_interactions = 2
    cutoff = 10.0
    n_mols = 2
    atoms_per_mol = 16
    n_atoms = n_mols * atoms_per_mol

    root = jax.random.PRNGKey(0)
    kp, kz, kpos, ky = jax.random.split(root, 4)

    params = init_params(kp, hidden_channels, num_filters, num_gaussians,
                         num_interactions, fc_hidden=hidden_channels, n_tasks=1)

    z = jax.random.randint(kz, (n_atoms,), 1, 100)                    # atomic numbers
    pos = jax.random.normal(kpos, (n_atoms, 3), jnp.float32) * 1.5    # coordinates
    batch = jnp.repeat(jnp.arange(n_mols, dtype=jnp.int32), atoms_per_mol)
    y = jax.random.normal(ky, (n_mols,), jnp.float32)                 # data.y passthrough

    fwd = jax.jit(partial(schnet_forward, num_batches=n_mols,
                          cutoff=cutoff, gaussians=num_gaussians))
    out, y_out, out1 = fwd(params, z, pos, batch, y)
    jax.block_until_ready((out, y_out, out1))

    assert out.shape == (n_mols,)
    assert out1.shape == (n_mols, hidden_channels)
    assert bool(jnp.all(jnp.isfinite(out))) and bool(jnp.all(jnp.isfinite(out1)))
    print("KERNEL_OK")
</pallas_src>

<mosaic_0001>
module attributes {stable_mosaic.version = 11 : i64} {
  func.func @kernel(%arg0: i32, %arg1: memref<16x3xf32, #tpu.memory_space<vmem>>, %arg2: memref<3x32xf32, #tpu.memory_space<vmem>>, %arg3: memref<16x1xi32, #tpu.memory_space<vmem>>, %arg4: memref<1x32xi32, #tpu.memory_space<vmem>>, %arg5: memref<1x16xf32, #tpu.memory_space<vmem>>, %arg6: memref<16x32xf32, #tpu.memory_space<vmem>>, %arg7: memref<32x32xbf16, #tpu.memory_space<vmem>>, %arg8: memref<16x32x16xbf16, #tpu.memory_space<vmem>>, %arg9: memref<16x32xf32, #tpu.memory_space<vmem>>, %arg10: memref<16x32xbf16, #tpu.memory_space<vmem>>) attributes {dimension_semantics = [#tpu.dimension_semantics<parallel>], iteration_bounds = array<i64: 2>, scalar_prefetch = 0 : i64, scratch_operands = 0 : i64, tpu.core_type = #tpu.core_type<tc>, window_params = [{transform_indices = @transform_0, window_bounds = array<i64: 16, 3>}, {pipeline_mode = #tpu.pipeline_mode<synchronous>, transform_indices = @transform_1, window_bounds = array<i64: 3, 32>}, {transform_indices = @transform_2, window_bounds = array<i64: 16, 1>}, {pipeline_mode = #tpu.pipeline_mode<synchronous>, transform_indices = @transform_3, window_bounds = array<i64: 1, 32>}, {pipeline_mode = #tpu.pipeline_mode<synchronous>, transform_indices = @transform_4, window_bounds = array<i64: 1, 16>}, {transform_indices = @transform_5, window_bounds = array<i64: 16, 32>}, {pipeline_mode = #tpu.pipeline_mode<synchronous>, transform_indices = @transform_6, window_bounds = array<i64: 32, 32>}, {transform_indices = @transform_7, window_bounds = array<i64: 16, 32, 16>}, {transform_indices = @transform_8, window_bounds = array<i64: 16, 32>}, {transform_indices = @transform_9, window_bounds = array<i64: 16, 32>}]} {
    %c0 = arith.constant 0 : index
    %c0_0 = arith.constant 0 : index
    %0 = vector.load %arg1[%c0, %c0_0] : memref<16x3xf32, #tpu.memory_space<vmem>>, vector<16x3xf32>
    %c0_1 = arith.constant 0 : index
    %c0_2 = arith.constant 0 : index
    %1 = vector.load %arg2[%c0_1, %c0_2] : memref<3x32xf32, #tpu.memory_space<vmem>>, vector<3x32xf32>
    %2 = vector.extract_strided_slice %0 {offsets = [0, 0], sizes = [16, 1], strides = [1, 1]} : vector<16x3xf32> to vector<16x1xf32>
    %3 = vector.extract_strided_slice %1 {offsets = [0, 0], sizes = [1, 32], strides = [1, 1]} : vector<3x32xf32> to vector<1x32xf32>
    %4 = vector.broadcast %2 : vector<16x1xf32> to vector<16x32xf32>
    %5 = vector.broadcast %3 : vector<1x32xf32> to vector<16x32xf32>
    %6 = arith.subf %4, %5 : vector<16x32xf32>
    %7 = vector.extract_strided_slice %0 {offsets = [0, 1], sizes = [16, 1], strides = [1, 1]} : vector<16x3xf32> to vector<16x1xf32>
    %8 = vector.extract_strided_slice %1 {offsets = [1, 0], sizes = [1, 32], strides = [1, 1]} : vector<3x32xf32> to vector<1x32xf32>
    %9 = vector.broadcast %7 : vector<16x1xf32> to vector<16x32xf32>
    %10 = vector.broadcast %8 : vector<1x32xf32> to vector<16x32xf32>
    %11 = arith.subf %9, %10 : vector<16x32xf32>
    %12 = vector.extract_strided_slice %0 {offsets = [0, 2], sizes = [16, 1], strides = [1, 1]} : vector<16x3xf32> to vector<16x1xf32>
    %13 = vector.extract_strided_slice %1 {offsets = [2, 0], sizes = [1, 32], strides = [1, 1]} : vector<3x32xf32> to vector<1x32xf32>
    %14 = vector.broadcast %12 : vector<16x1xf32> to vector<16x32xf32>
    %15 = vector.broadcast %13 : vector<1x32xf32> to vector<16x32xf32>
    %16 = arith.subf %14, %15 : vector<16x32xf32>
    %17 = arith.mulf %6, %6 : vector<16x32xf32>
    %18 = arith.mulf %11, %11 : vector<16x32xf32>
    %19 = arith.addf %17, %18 : vector<16x32xf32>
    %20 = arith.mulf %16, %16 : vector<16x32xf32>
    %21 = arith.addf %19, %20 : vector<16x32xf32>
    %cst = arith.constant 0.000000e+00 : f32
    %22 = vector.broadcast %cst : f32 to vector<16x32xf32>
    %23 = arith.maximumf %21, %22 : vector<16x32xf32>
    %24 = math.sqrt %23 : vector<16x32xf32>
    %25 = tpu.iota {dimensions = array<i32: 0>} : vector<16x32xi32>
    %c16_i32 = arith.constant 16 : i32
    %26 = arith.muli %arg0, %c16_i32 : i32
    %27 = vector.broadcast %26 : i32 to vector<16x32xi32>
    %28 = arith.addi %25, %27 : vector<16x32xi32>
    %29 = tpu.iota {dimensions = array<i32: 1>} : vector<16x32xi32>
    %c0_3 = arith.constant 0 : index
    %c0_4 = arith.constant 0 : index
    %30 = vector.load %arg3[%c0_3, %c0_4] : memref<16x1xi32, #tpu.memory_space<vmem>>, vector<16x1xi32>
    %c0_5 = arith.constant 0 : index
    %c0_6 = arith.constant 0 : index
    %31 = vector.load %arg4[%c0_5, %c0_6] : memref<1x32xi32, #tpu.memory_space<vmem>>, vector<1x32xi32>
    %32 = vector.broadcast %30 : vector<16x1xi32> to vector<16x32xi32>
    %33 = vector.broadcast %31 : vector<1x32xi32> to vector<16x32xi32>
    %34 = arith.cmpi eq, %32, %33 : vector<16x32xi32>
    %35 = arith.cmpi ne, %28, %29 : vector<16x32xi32>
    %36 = arith.andi %34, %35 : vector<16x32xi1>
    %cst_7 = arith.constant 1.000000e+01 : f32
    %37 = vector.broadcast %cst_7 : f32 to vector<16x32xf32>
    %38 = arith.cmpf ole, %24, %37 : vector<16x32xf32>
    %39 = arith.andi %36, %38 : vector<16x32xi1>
    %cst_8 = arith.constant 0.314159274 : f32
    %40 = vector.broadcast %cst_8 : f32 to vector<16x32xf32>
    %41 = arith.mulf %24, %40 : vector<16x32xf32>
    %42 = math.cos %41 : vector<16x32xf32>
    %cst_9 = arith.constant 1.000000e+00 : f32
    %43 = vector.broadcast %cst_9 : f32 to vector<16x32xf32>
    %44 = arith.addf %42, %43 : vector<16x32xf32>
    %cst_10 = arith.constant 5.000000e-01 : f32
    %45 = vector.broadcast %cst_10 : f32 to vector<16x32xf32>
    %46 = arith.mulf %45, %44 : vector<16x32xf32>
    %cst_11 = arith.constant 0.000000e+00 : f32
    %47 = vector.broadcast %cst_11 : f32 to vector<16x32xf32>
    %48 = arith.select %39, %46, %47 : vector<16x32xi1>, vector<16x32xf32>
    %c0_12 = arith.constant 0 : index
    %c0_13 = arith.constant 0 : index
    %49 = vector.load %arg9[%c0_12, %c0_13] : memref<16x32xf32, #tpu.memory_space<vmem>>, vector<16x32xf32>
    tpu.vector_store %arg9[%c0_12, %c0_13], %48 {strides = array<i32>} : memref<16x32xf32, #tpu.memory_space<vmem>>, vector<16x32xf32>,
    %50 = vector.shape_cast %24 : vector<16x32xf32> to vector<16x32x1xf32>
    %c0_14 = arith.constant 0 : index
    %c0_15 = arith.constant 0 : index
    %51 = vector.load %arg5[%c0_14, %c0_15] : memref<1x16xf32, #tpu.memory_space<vmem>>, vector<1x16xf32>
    %52 = vector.shape_cast %51 : vector<1x16xf32> to vector<1x1x16xf32>
    %53 = vector.broadcast %50 : vector<16x32x1xf32> to vector<16x32x16xf32>
    %54 = vector.broadcast %52 : vector<1x1x16xf32> to vector<16x32x16xf32>
    %55 = arith.subf %53, %54 : vector<16x32x16xf32>
    %cst_16 = arith.constant -1.125000e+00 : f32
    %56 = vector.broadcast %cst_16 : f32 to vector<16x32x16xf32>
    %57 = arith.mulf %56, %55 : vector<16x32x16xf32>
    %58 = arith.mulf %57, %55 : vector<16x32x16xf32>
    %59 = math.exp %58 : vector<16x32x16xf32>
    %60 = arith.truncf %59 : vector<16x32x16xf32> to vector<16x32x16xbf16>
    %c0_17 = arith.constant 0 : index
    %c0_18 = arith.constant 0 : index
    %c0_19 = arith.constant 0 : index
    %61 = vector.load %arg8[%c0_17, %c0_18, %c0_19] : memref<16x32x16xbf16, #tpu.memory_space<vmem>>, vector<16x32x16xbf16>
    tpu.vector_store %arg8[%c0_17, %c0_18, %c0_19], %60 {strides = array<i32>} : memref<16x32x16xbf16, #tpu.memory_space<vmem>>, vector<16x32x16xbf16>,
    %c0_20 = arith.constant 0 : index
    %c0_21 = arith.constant 0 : index
    %62 = vector.load %arg6[%c0_20, %c0_21] : memref<16x32xf32, #tpu.memory_space<vmem>>, vector<16x32xf32>
    %63 = arith.truncf %62 : vector<16x32xf32> to vector<16x32xbf16>
    %c0_22 = arith.constant 0 : index
    %c0_23 = arith.constant 0 : index
    %64 = vector.load %arg7[%c0_22, %c0_23] : memref<32x32xbf16, #tpu.memory_space<vmem>>, vector<32x32xbf16>
    %cst_24 = arith.constant dense<0.000000e+00> : vector<16x32xf32>
    %65 = tpu.matmul %63, %64, %cst_24 {dimension_numbers = #tpu.dot_dimension_numbers<[1], [0], [0], [1], [0, 0, 1, 1], [], []>} : vector<16x32xbf16>, vector<32x32xbf16>, vector<16x32xf32> -> vector<16x32xf32>
    %66 = arith.truncf %65 : vector<16x32xf32> to vector<16x32xbf16>
    %c0_25 = arith.constant 0 : index
    %c0_26 = arith.constant 0 : index
    %67 = vector.load %arg10[%c0_25, %c0_26] : memref<16x32xbf16, #tpu.memory_space<vmem>>, vector<16x32xbf16>
    tpu.vector_store %arg10[%c0_25, %c0_26], %66 {strides = array<i32>} : memref<16x32xbf16, #tpu.memory_space<vmem>>, vector<16x32xbf16>,
    return
  }
  func.func @transform_0(%arg0: i32) -> (i32, i32) {
    %c0_i32 = arith.constant 0 : i32
    %c0_i32_0 = arith.constant 0 : i32
    return %arg0, %c0_i32 : i32, i32
  }
  func.func @transform_1(%arg0: i32) -> (i32, i32) {
    %c0_i32 = arith.constant 0 : i32
    %c0_i32_0 = arith.constant 0 : i32
    %c0_i32_1 = arith.constant 0 : i32
    return %c0_i32, %c0_i32_0 : i32, i32
  }
  func.func @transform_2(%arg0: i32) -> (i32, i32) {
    %c0_i32 = arith.constant 0 : i32
    %c0_i32_0 = arith.constant 0 : i32
    return %arg0, %c0_i32 : i32, i32
  }
  func.func @transform_3(%arg0: i32) -> (i32, i32) {
    %c0_i32 = arith.constant 0 : i32
    %c0_i32_0 = arith.constant 0 : i32
    %c0_i32_1 = arith.constant 0 : i32
    return %c0_i32, %c0_i32_0 : i32, i32
  }
  func.func @transform_4(%arg0: i32) -> (i32, i32) {
    %c0_i32 = arith.constant 0 : i32
    %c0_i32_0 = arith.constant 0 : i32
    %c0_i32_1 = arith.constant 0 : i32
    return %c0_i32, %c0_i32_0 : i32, i32
  }
  func.func @transform_5(%arg0: i32) -> (i32, i32) {
    %c0_i32 = arith.constant 0 : i32
    %c0_i32_0 = arith.constant 0 : i32
    return %arg0, %c0_i32 : i32, i32
  }
  func.func @transform_6(%arg0: i32) -> (i32, i32) {
    %c0_i32 = arith.constant 0 : i32
    %c0_i32_0 = arith.constant 0 : i32
    %c0_i32_1 = arith.constant 0 : i32
    return %c0_i32, %c0_i32_0 : i32, i32
  }
  func.func @transform_7(%arg0: i32) -> (i32, i32, i32) {
    %c0_i32 = arith.constant 0 : i32
    %c0_i32_0 = arith.constant 0 : i32
    %c0_i32_1 = arith.constant 0 : i32
    return %arg0, %c0_i32, %c0_i32_0 : i32, i32, i32
  }
  func.func @transform_8(%arg0: i32) -> (i32, i32) {
    %c0_i32 = arith.constant 0 : i32
    %c0_i32_0 = arith.constant 0 : i32
    return %arg0, %c0_i32 : i32, i32
  }
  func.func @transform_9(%arg0: i32) -> (i32, i32) {
    %c0_i32 = arith.constant 0 : i32
    %c0_i32_0 = arith.constant 0 : i32
    return %arg0, %c0_i32 : i32, i32
  }
}

module attributes {stable_mosaic.version = 11 : i64} {
  func.func @kernel(%arg0: i32, %arg1: i32, %arg2: memref<16x32xf32, #tpu.memory_space<vmem>>, %arg3: memref<32x32xbf16, #tpu.memory_space<vmem>>, %arg4: memref<16x32x16xbf16, #tpu.memory_space<vmem>>, %arg5: memref<16x32xf32, #tpu.memory_space<vmem>>, %arg6: memref<16x32xbf16, #tpu.memory_space<vmem>>, %arg7: memref<1x32xf32, #tpu.memory_space<vmem>>, %arg8: memref<32x32xbf16, #tpu.memory_space<vmem>>, %arg9: memref<1x32xf32, #tpu.memory_space<vmem>>, %arg10: memref<32x32xf32, #tpu.memory_space<vmem>>, %arg11: memref<1x32xf32, #tpu.memory_space<vmem>>, %arg12: memref<32x32xf32, #tpu.memory_space<vmem>>, %arg13: memref<1x32xf32, #tpu.memory_space<vmem>>, %arg14: memref<32x32xbf16, #tpu.memory_space<vmem>>, %arg15: memref<16x32xf32, #tpu.memory_space<vmem>>, %arg16: memref<16x32xbf16, #tpu.memory_space<vmem>>, %arg17: memref<16x32xf32, #tpu.memory_space<vmem>>) attributes {dimension_semantics = [#tpu.dimension_semantics<parallel>, #tpu.dimension_semantics<arbitrary>], iteration_bounds = array<i64: 2, 1>, scalar_prefetch = 0 : i64, scratch_operands = 1 : i64, tpu.core_type = #tpu.core_type<tc>, window_params = [{transform_indices = @transform_0, window_bounds = array<i64: 16, 32>}, {transform_indices = @transform_1, window_bounds = array<i64: 32, 32>}, {transform_indices = @transform_2, window_bounds = array<i64: 16, 32, 16>}, {transform_indices = @transform_3, window_bounds = array<i64: 16, 32>}, {pipeline_mode = #tpu.pipeline_mode<synchronous>, transform_indices = @transform_4, window_bounds = array<i64: 16, 32>}, {pipeline_mode = #tpu.pipeline_mode<synchronous>, transform_indices = @transform_5, window_bounds = array<i64: 1, 32>}, {pipeline_mode = #tpu.pipeline_mode<synchronous>, transform_indices = @transform_6, window_bounds = array<i64: 32, 32>}, {pipeline_mode = #tpu.pipeline_mode<synchronous>, transform_indices = @transform_7, window_bounds = array<i64: 1, 32>}, {pipeline_mode = #tpu.pipeline_mode<synchronous>, transform_indices = @transform_8, window_bounds = array<i64: 32, 32>}, {pipeline_mode = #tpu.pipeline_mode<synchronous>, transform_indices = @transform_9, window_bounds = array<i64: 1, 32>}, {pipeline_mode = #tpu.pipeline_mode<synchronous>, transform_indices = @transform_10, window_bounds = array<i64: 32, 32>}, {pipeline_mode = #tpu.pipeline_mode<synchronous>, transform_indices = @transform_11, window_bounds = array<i64: 1, 32>}, {pipeline_mode = #tpu.pipeline_mode<synchronous>, transform_indices = @transform_12, window_bounds = array<i64: 32, 32>}, {transform_indices = @transform_13, window_bounds = array<i64: 16, 32>}, {transform_indices = @transform_14, window_bounds = array<i64: 16, 32>}]} {
    %c0_i32 = arith.constant 0 : i32
    %0 = arith.cmpi eq, %arg1, %c0_i32 : i32
    %1 = arith.extui %0 : i1 to i32
    %c0_i32_0 = arith.constant 0 : i32
    %2 = arith.cmpi ne, %1, %c0_i32_0 : i32
    scf.if %2 {
      %cst_26 = arith.constant 0.000000e+00 : f32
      %43 = vector.broadcast %cst_26 : f32 to vector<16x32xf32>
      %c0_27 = arith.constant 0 : index
      %c0_28 = arith.constant 0 : index
      %44 = vector.load %arg17[%c0_27, %c0_28] : memref<16x32xf32, #tpu.memory_space<vmem>>, vector<16x32xf32>
      tpu.vector_store %arg17[%c0_27, %c0_28], %43 {strides = array<i32>} : memref<16x32xf32, #tpu.memory_space<vmem>>, vector<16x32xf32>,
    } else {
    }
    %c0 = arith.constant 0 : index
    %c0_1 = arith.constant 0 : index
    %c0_2 = arith.constant 0 : index
    %3 = vector.load %arg4[%c0, %c0_1, %c0_2] : memref<16x32x16xbf16, #tpu.memory_space<vmem>>, vector<16x32x16xbf16>
    %4 = vector.shape_cast %3 : vector<16x32x16xbf16> to vector<512x16xbf16>
    %c0_3 = arith.constant 0 : index
    %c0_4 = arith.constant 0 : index
    %5 = vector.load %arg6[%c0_3, %c0_4] : memref<16x32xbf16, #tpu.memory_space<vmem>>, vector<16x32xbf16>
    %cst = arith.constant dense<0.000000e+00> : vector<512x32xf32>
    %6 = tpu.matmul %4, %5, %cst {dimension_numbers = #tpu.dot_dimension_numbers<[1], [0], [0], [1], [0, 0, 1, 1], [], []>} : vector<512x16xbf16>, vector<16x32xbf16>, vector<512x32xf32> -> vector<512x32xf32>
    %c0_5 = arith.constant 0 : index
    %c0_6 = arith.constant 0 : index
    %7 = vector.load %arg7[%c0_5, %c0_6] : memref<1x32xf32, #tpu.memory_space<vmem>>, vector<1x32xf32>
    %8 = vector.broadcast %7 : vector<1x32xf32> to vector<512x32xf32>
    %9 = arith.addf %6, %8 : vector<512x32xf32>
    %cst_7 = arith.constant 0.000000e+00 : f32
    %10 = vector.broadcast %cst_7 : f32 to vector<512x32xf32>
    %11 = arith.maximumf %9, %10 : vector<512x32xf32>
    %12 = math.absf %9 : vector<512x32xf32>
    %cst_8 = arith.constant 0.000000e+00 : f32
    %13 = vector.broadcast %cst_8 : f32 to vector<512x32xf32>
    %14 = arith.subf %13, %12 : vector<512x32xf32>
    %15 = math.exp %14 : vector<512x32xf32>
    %16 = math.log1p %15 : vector<512x32xf32>
    %17 = arith.addf %11, %16 : vector<512x32xf32>
    %cst_9 = arith.constant 0.693147182 : f32
    %18 = vector.broadcast %cst_9 : f32 to vector<512x32xf32>
    %19 = arith.subf %17, %18 : vector<512x32xf32>
    %20 = arith.truncf %19 : vector<512x32xf32> to vector<512x32xbf16>
    %c0_10 = arith.constant 0 : index
    %c0_11 = arith.constant 0 : index
    %21 = vector.load %arg8[%c0_10, %c0_11] : memref<32x32xbf16, #tpu.memory_space<vmem>>, vector<32x32xbf16>
    %cst_12 = arith.constant dense<0.000000e+00> : vector<512x32xf32>
    %22 = tpu.matmul %20, %21, %cst_12 {dimension_numbers = #tpu.dot_dimension_numbers<[1], [0], [0], [1], [0, 0, 1, 1], [], []>} : vector<512x32xbf16>, vector<32x32xbf16>, vector<512x32xf32> -> vector<512x32xf32>
    %c0_13 = arith.constant 0 : index
    %c0_14 = arith.constant 0 : index
    %23 = vector.load %arg9[%c0_13, %c0_14] : memref<1x32xf32, #tpu.memory_space<vmem>>, vector<1x32xf32>
    %24 = vector.broadcast %23 : vector<1x32xf32> to vector<512x32xf32>
    %25 = arith.addf %22, %24 : vector<512x32xf32>
    %26 = vector.shape_cast %25 : vector<512x32xf32> to vector<16x32x32xf32>
    %c0_15 = arith.constant 0 : index
    %c0_16 = arith.constant 0 : index
    %27 = vector.load %arg5[%c0_15, %c0_16] : memref<16x32xf32, #tpu.memory_space<vmem>>, vector<16x32xf32>
    %28 = vector.shape_cast %27 : vector<16x32xf32> to vector<16x32x1xf32>
    %29 = vector.broadcast %28 : vector<16x32x1xf32> to vector<16x32x32xf32>
    %30 = arith.mulf %26, %29 : vector<16x32x32xf32>
    %c0_17 = arith.constant 0 : index
    %c0_18 = arith.constant 0 : index
    %31 = vector.load %arg3[%c0_17, %c0_18] : memref<32x32xbf16, #tpu.memory_space<vmem>>, vector<32x32xbf16>
    %32 = arith.extf %31 : vector<32x32xbf16> to vector<32x32xf32>
    %c0_19 = arith.constant 0 : index
    %c0_20 = arith.constant 0 : index
    %33 = vector.load %arg17[%c0_19, %c0_20] : memref<16x32xf32, #tpu.memory_space<vmem>>, vector<16x32xf32>
    %34 = vector.shape_cast %32 : vector<32x32xf32> to vector<1x32x32xf32>
    %35 = vector.broadcast %34 : vector<1x32x32xf32> to vector<16x32x32xf32>
    %36 = arith.mulf %30, %35 : vector<16x32x32xf32>
    %cst_21 = arith.constant dense<0.000000e+00> : vector<16x32xf32>
    %37 = vector.multi_reduction <add>, %36, %cst_21 [1] : vector<16x32x32xf32> to vector<16x32xf32>
    %38 = arith.addf %33, %37 : vector<16x32xf32>
    %c0_22 = arith.constant 0 : index
    %c0_23 = arith.constant 0 : index
    %39 = vector.load %arg17[%c0_22, %c0_23] : memref<16x32xf32, #tpu.memory_space<vmem>>, vector<16x32xf32>
    tpu.vector_store %arg17[%c0_22, %c0_23], %38 {strides = array<i32>} : memref<16x32xf32, #tpu.memory_space<vmem>>, vector<16x32xf32>,
    %c0_i32_24 = arith.constant 0 : i32
    %40 = arith.cmpi eq, %arg1, %c0_i32_24 : i32
    %41 = arith.extui %40 : i1 to i32
    %c0_i32_25 = arith.constant 0 : i32
    %42 = arith.cmpi ne, %41, %c0_i32_25 : i32
    scf.if %42 {
      %c0_26 = arith.constant 0 : index
      %c0_27 = arith.constant 0 : index
      %43 = vector.load %arg17[%c0_26, %c0_27] : memref<16x32xf32, #tpu.memory_space<vmem>>, vector<16x32xf32>
      %c0_28 = arith.constant 0 : index
      %c0_29 = arith.constant 0 : index
      %44 = vector.load %arg10[%c0_28, %c0_29] : memref<32x32xf32, #tpu.memory_space<vmem>>, vector<32x32xf32>
      %cst_30 = arith.constant dense<0.000000e+00> : vector<16x32xf32>
      %45 = tpu.matmul %43, %44, %cst_30 {dimension_numbers = #tpu.dot_dimension_numbers<[1], [0], [0], [1], [0, 0, 1, 1], [], []>} : vector<16x32xf32>, vector<32x32xf32>, vector<16x32xf32> -> vector<16x32xf32>
      %c0_31 = arith.constant 0 : index
      %c0_32 = arith.constant 0 : index
      %46 = vector.load %arg11[%c0_31, %c0_32] : memref<1x32xf32, #tpu.memory_space<vmem>>, vector<1x32xf32>
      %47 = vector.broadcast %46 : vector<1x32xf32> to vector<16x32xf32>
      %48 = arith.addf %45, %47 : vector<16x32xf32>
      %cst_33 = arith.constant 0.000000e+00 : f32
      %49 = vector.broadcast %cst_33 : f32 to vector<16x32xf32>
      %50 = arith.maximumf %48, %49 : vector<16x32xf32>
      %51 = math.absf %48 : vector<16x32xf32>
      %cst_34 = arith.constant 0.000000e+00 : f32
      %52 = vector.broadcast %cst_34 : f32 to vector<16x32xf32>
      %53 = arith.subf %52, %51 : vector<16x32xf32>
      %54 = math.exp %53 : vector<16x32xf32>
      %55 = math.log1p %54 : vector<16x32xf32>
      %56 = arith.addf %50, %55 : vector<16x32xf32>
      %cst_35 = arith.constant 0.693147182 : f32
      %57 = vector.broadcast %cst_35 : f32 to vector<16x32xf32>
      %58 = arith.subf %56, %57 : vector<16x32xf32>
      %c0_36 = arith.constant 0 : index
      %c0_37 = arith.constant 0 : index
      %59 = vector.load %arg12[%c0_36, %c0_37] : memref<32x32xf32, #tpu.memory_space<vmem>>, vector<32x32xf32>
      %cst_38 = arith.constant dense<0.000000e+00> : vector<16x32xf32>
      %60 = tpu.matmul %58, %59, %cst_38 {dimension_numbers = #tpu.dot_dimension_numbers<[1], [0], [0], [1], [0, 0, 1, 1], [], []>} : vector<16x32xf32>, vector<32x32xf32>, vector<16x32xf32> -> vector<16x32xf32>
      %c0_39 = arith.constant 0 : index
      %c0_40 = arith.constant 0 : index
      %61 = vector.load %arg13[%c0_39, %c0_40] : memref<1x32xf32, #tpu.memory_space<vmem>>, vector<1x32xf32>
      %62 = vector.broadcast %61 : vector<1x32xf32> to vector<16x32xf32>
      %63 = arith.addf %60, %62 : vector<16x32xf32>
      %c0_41 = arith.constant 0 : index
      %c0_42 = arith.constant 0 : index
      %64 = vector.load %arg2[%c0_41, %c0_42] : memref<16x32xf32, #tpu.memory_space<vmem>>, vector<16x32xf32>
      %65 = arith.addf %64, %63 : vector<16x32xf32>
      %c0_43 = arith.constant 0 : index
      %c0_44 = arith.constant 0 : index
      %66 = vector.load %arg15[%c0_43, %c0_44] : memref<16x32xf32, #tpu.memory_space<vmem>>, vector<16x32xf32>
      tpu.vector_store %arg15[%c0_43, %c0_44], %65 {strides = array<i32>} : memref<16x32xf32, #tpu.memory_space<vmem>>, vector<16x32xf32>,
      %67 = arith.truncf %65 : vector<16x32xf32> to vector<16x32xbf16>
      %c0_45 = arith.constant 0 : index
      %c0_46 = arith.constant 0 : index
      %68 = vector.load %arg14[%c0_45, %c0_46] : memref<32x32xbf16, #tpu.memory_space<vmem>>, vector<32x32xbf16>
      %cst_47 = arith.constant dense<0.000000e+00> : vector<16x32xf32>
      %69 = tpu.matmul %67, %68, %cst_47 {dimension_numbers = #tpu.dot_dimension_numbers<[1], [0], [0], [1], [0, 0, 1, 1], [], []>} : vector<16x32xbf16>, vector<32x32xbf16>, vector<16x32xf32> -> vector<16x32xf32>
      %70 = arith.truncf %69 : vector<16x32xf32> to vector<16x32xbf16>
      %c0_48 = arith.constant 0 : index
      %c0_49 = arith.constant 0 : index
      %71 = vector.load %arg16[%c0_48, %c0_49] : memref<16x32xbf16, #tpu.memory_space<vmem>>, vector<16x32xbf16>
      tpu.vector_store %arg16[%c0_48, %c0_49], %70 {strides = array<i32>} : memref<16x32xbf16, #tpu.memory_space<vmem>>, vector<16x32xbf16>,
    } else {
    }
    return
  }
  func.func @transform_0(%arg0: i32, %arg1: i32) -> (i32, i32) {
    %c0_i32 = arith.constant 0 : i32
    %c0_i32_0 = arith.constant 0 : i32
    return %arg0, %c0_i32 : i32, i32
  }
  func.func @transform_1(%arg0: i32, %arg1: i32) -> (i32, i32) {
    %c0_i32 = arith.constant 0 : i32
    %c0_i32_0 = arith.constant 0 : i32
    return %arg1, %c0_i32 : i32, i32
  }
  func.func @transform_2(%arg0: i32, %arg1: i32) -> (i32, i32, i32) {
    %c0_i32 = arith.constant 0 : i32
    %c0_i32_0 = arith.constant 0 : i32
    return %arg0, %arg1, %c0_i32 : i32, i32, i32
  }
  func.func @transform_3(%arg0: i32, %arg1: i32) -> (i32, i32) {
    %c0_i32 = arith.constant 0 : i32
    return %arg0, %arg1 : i32, i32
  }
  func.func @transform_4(%arg0: i32, %arg1: i32) -> (i32, i32) {
    %c0_i32 = arith.constant 0 : i32
    %c0_i32_0 = arith.constant 0 : i32
    %c0_i32_1 = arith.constant 0 : i32
    return %c0_i32, %c0_i32_0 : i32, i32
  }
  func.func @transform_5(%arg0: i32, %arg1: i32) -> (i32, i32) {
    %c0_i32 = arith.constant 0 : i32
    %c0_i32_0 = arith.constant 0 : i32
    %c0_i32_1 = arith.constant 0 : i32
    return %c0_i32, %c0_i32_0 : i32, i32
  }
  func.func @transform_6(%arg0: i32, %arg1: i32) -> (i32, i32) {
    %c0_i32 = arith.constant 0 : i32
    %c0_i32_0 = arith.constant 0 : i32
    %c0_i32_1 = arith.constant 0 : i32
    return %c0_i32, %c0_i32_0 : i32, i32
  }
  func.func @transform_7(%arg0: i32, %arg1: i32) -> (i32, i32) {
    %c0_i32 = arith.constant 0 : i32
    %c0_i32_0 = arith.constant 0 : i32
    %c0_i32_1 = arith.constant 0 : i32
    return %c0_i32, %c0_i32_0 : i32, i32
  }
  func.func @transform_8(%arg0: i32, %arg1: i32) -> (i32, i32) {
    %c0_i32 = arith.constant 0 : i32
    %c0_i32_0 = arith.constant 0 : i32
    %c0_i32_1 = arith.constant 0 : i32
    return %c0_i32, %c0_i32_0 : i32, i32
  }
  func.func @transform_9(%arg0: i32, %arg1: i32) -> (i32, i32) {
    %c0_i32 = arith.constant 0 : i32
    %c0_i32_0 = arith.constant 0 : i32
    %c0_i32_1 = arith.constant 0 : i32
    return %c0_i32, %c0_i32_0 : i32, i32
  }
  func.func @transform_10(%arg0: i32, %arg1: i32) -> (i32, i32) {
    %c0_i32 = arith.constant 0 : i32
    %c0_i32_0 = arith.constant 0 : i32
    %c0_i32_1 = arith.constant 0 : i32
    return %c0_i32, %c0_i32_0 : i32, i32
  }
  func.func @transform_11(%arg0: i32, %arg1: i32) -> (i32, i32) {
    %c0_i32 = arith.constant 0 : i32
    %c0_i32_0 = arith.constant 0 : i32
    %c0_i32_1 = arith.constant 0 : i32
    return %c0_i32, %c0_i32_0 : i32, i32
  }
  func.func @transform_12(%arg0: i32, %arg1: i32) -> (i32, i32) {
    %c0_i32 = arith.constant 0 : i32
    %c0_i32_0 = arith.constant 0 : i32
    %c0_i32_1 = arith.constant 0 : i32
    return %c0_i32, %c0_i32_0 : i32, i32
  }
  func.func @transform_13(%arg0: i32, %arg1: i32) -> (i32, i32) {
    %c0_i32 = arith.constant 0 : i32
    %c0_i32_0 = arith.constant 0 : i32
    return %arg0, %c0_i32 : i32, i32
  }
  func.func @transform_14(%arg0: i32, %arg1: i32) -> (i32, i32) {
    %c0_i32 = arith.constant 0 : i32
    %c0_i32_0 = arith.constant 0 : i32
    return %arg0, %c0_i32 : i32, i32
  }
}

module attributes {stable_mosaic.version = 11 : i64} {
  func.func @kernel(%arg0: i32, %arg1: i32, %arg2: memref<16x32xf32, #tpu.memory_space<vmem>>, %arg3: memref<32x32xbf16, #tpu.memory_space<vmem>>, %arg4: memref<16x32x16xbf16, #tpu.memory_space<vmem>>, %arg5: memref<16x32xf32, #tpu.memory_space<vmem>>, %arg6: memref<16x32xbf16, #tpu.memory_space<vmem>>, %arg7: memref<1x32xf32, #tpu.memory_space<vmem>>, %arg8: memref<32x32xbf16, #tpu.memory_space<vmem>>, %arg9: memref<1x32xf32, #tpu.memory_space<vmem>>, %arg10: memref<32x32xf32, #tpu.memory_space<vmem>>, %arg11: memref<1x32xf32, #tpu.memory_space<vmem>>, %arg12: memref<32x32xf32, #tpu.memory_space<vmem>>, %arg13: memref<1x32xf32, #tpu.memory_space<vmem>>, %arg14: memref<16x32xf32, #tpu.memory_space<vmem>>, %arg15: memref<16x32xf32, #tpu.memory_space<vmem>>) attributes {dimension_semantics = [#tpu.dimension_semantics<parallel>, #tpu.dimension_semantics<arbitrary>], iteration_bounds = array<i64: 2, 1>, scalar_prefetch = 0 : i64, scratch_operands = 1 : i64, tpu.core_type = #tpu.core_type<tc>, window_params = [{transform_indices = @transform_0, window_bounds = array<i64: 16, 32>}, {transform_indices = @transform_1, window_bounds = array<i64: 32, 32>}, {transform_indices = @transform_2, window_bounds = array<i64: 16, 32, 16>}, {transform_indices = @transform_3, window_bounds = array<i64: 16, 32>}, {pipeline_mode = #tpu.pipeline_mode<synchronous>, transform_indices = @transform_4, window_bounds = array<i64: 16, 32>}, {pipeline_mode = #tpu.pipeline_mode<synchronous>, transform_indices = @transform_5, window_bounds = array<i64: 1, 32>}, {pipeline_mode = #tpu.pipeline_mode<synchronous>, transform_indices = @transform_6, window_bounds = array<i64: 32, 32>}, {pipeline_mode = #tpu.pipeline_mode<synchronous>, transform_indices = @transform_7, window_bounds = array<i64: 1, 32>}, {pipeline_mode = #tpu.pipeline_mode<synchronous>, transform_indices = @transform_8, window_bounds = array<i64: 32, 32>}, {pipeline_mode = #tpu.pipeline_mode<synchronous>, transform_indices = @transform_9, window_bounds = array<i64: 1, 32>}, {pipeline_mode = #tpu.pipeline_mode<synchronous>, transform_indices = @transform_10, window_bounds = array<i64: 32, 32>}, {pipeline_mode = #tpu.pipeline_mode<synchronous>, transform_indices = @transform_11, window_bounds = array<i64: 1, 32>}, {transform_indices = @transform_12, window_bounds = array<i64: 16, 32>}]} {
    %c0_i32 = arith.constant 0 : i32
    %0 = arith.cmpi eq, %arg1, %c0_i32 : i32
    %1 = arith.extui %0 : i1 to i32
    %c0_i32_0 = arith.constant 0 : i32
    %2 = arith.cmpi ne, %1, %c0_i32_0 : i32
    scf.if %2 {
      %cst_26 = arith.constant 0.000000e+00 : f32
      %43 = vector.broadcast %cst_26 : f32 to vector<16x32xf32>
      %c0_27 = arith.constant 0 : index
      %c0_28 = arith.constant 0 : index
      %44 = vector.load %arg15[%c0_27, %c0_28] : memref<16x32xf32, #tpu.memory_space<vmem>>, vector<16x32xf32>
      tpu.vector_store %arg15[%c0_27, %c0_28], %43 {strides = array<i32>} : memref<16x32xf32, #tpu.memory_space<vmem>>, vector<16x32xf32>,
    } else {
    }
    %c0 = arith.constant 0 : index
    %c0_1 = arith.constant 0 : index
    %c0_2 = arith.constant 0 : index
    %3 = vector.load %arg4[%c0, %c0_1, %c0_2] : memref<16x32x16xbf16, #tpu.memory_space<vmem>>, vector<16x32x16xbf16>
    %4 = vector.shape_cast %3 : vector<16x32x16xbf16> to vector<512x16xbf16>
    %c0_3 = arith.constant 0 : index
    %c0_4 = arith.constant 0 : index
    %5 = vector.load %arg6[%c0_3, %c0_4] : memref<16x32xbf16, #tpu.memory_space<vmem>>, vector<16x32xbf16>
    %cst = arith.constant dense<0.000000e+00> : vector<512x32xf32>
    %6 = tpu.matmul %4, %5, %cst {dimension_numbers = #tpu.dot_dimension_numbers<[1], [0], [0], [1], [0, 0, 1, 1], [], []>} : vector<512x16xbf16>, vector<16x32xbf16>, vector<512x32xf32> -> vector<512x32xf32>
    %c0_5 = arith.constant 0 : index
    %c0_6 = arith.constant 0 : index
    %7 = vector.load %arg7[%c0_5, %c0_6] : memref<1x32xf32, #tpu.memory_space<vmem>>, vector<1x32xf32>
    %8 = vector.broadcast %7 : vector<1x32xf32> to vector<512x32xf32>
    %9 = arith.addf %6, %8 : vector<512x32xf32>
    %cst_7 = arith.constant 0.000000e+00 : f32
    %10 = vector.broadcast %cst_7 : f32 to vector<512x32xf32>
    %11 = arith.maximumf %9, %10 : vector<512x32xf32>
    %12 = math.absf %9 : vector<512x32xf32>
    %cst_8 = arith.constant 0.000000e+00 : f32
    %13 = vector.broadcast %cst_8 : f32 to vector<512x32xf32>
    %14 = arith.subf %13, %12 : vector<512x32xf32>
    %15 = math.exp %14 : vector<512x32xf32>
    %16 = math.log1p %15 : vector<512x32xf32>
    %17 = arith.addf %11, %16 : vector<512x32xf32>
    %cst_9 = arith.constant 0.693147182 : f32
    %18 = vector.broadcast %cst_9 : f32 to vector<512x32xf32>
    %19 = arith.subf %17, %18 : vector<512x32xf32>
    %20 = arith.truncf %19 : vector<512x32xf32> to vector<512x32xbf16>
    %c0_10 = arith.constant 0 : index
    %c0_11 = arith.constant 0 : index
    %21 = vector.load %arg8[%c0_10, %c0_11] : memref<32x32xbf16, #tpu.memory_space<vmem>>, vector<32x32xbf16>
    %cst_12 = arith.constant dense<0.000000e+00> : vector<512x32xf32>
    %22 = tpu.matmul %20, %21, %cst_12 {dimension_numbers = #tpu.dot_dimension_numbers<[1], [0], [0], [1], [0, 0, 1, 1], [], []>} : vector<512x32xbf16>, vector<32x32xbf16>, vector<512x32xf32> -> vector<512x32xf32>
    %c0_13 = arith.constant 0 : index
    %c0_14 = arith.constant 0 : index
    %23 = vector.load %arg9[%c0_13, %c0_14] : memref<1x32xf32, #tpu.memory_space<vmem>>, vector<1x32xf32>
    %24 = vector.broadcast %23 : vector<1x32xf32> to vector<512x32xf32>
    %25 = arith.addf %22, %24 : vector<512x32xf32>
    %26 = vector.shape_cast %25 : vector<512x32xf32> to vector<16x32x32xf32>
    %c0_15 = arith.constant 0 : index
    %c0_16 = arith.constant 0 : index
    %27 = vector.load %arg5[%c0_15, %c0_16] : memref<16x32xf32, #tpu.memory_space<vmem>>, vector<16x32xf32>
    %28 = vector.shape_cast %27 : vector<16x32xf32> to vector<16x32x1xf32>
    %29 = vector.broadcast %28 : vector<16x32x1xf32> to vector<16x32x32xf32>
    %30 = arith.mulf %26, %29 : vector<16x32x32xf32>
    %c0_17 = arith.constant 0 : index
    %c0_18 = arith.constant 0 : index
    %31 = vector.load %arg3[%c0_17, %c0_18] : memref<32x32xbf16, #tpu.memory_space<vmem>>, vector<32x32xbf16>
    %32 = arith.extf %31 : vector<32x32xbf16> to vector<32x32xf32>
    %c0_19 = arith.constant 0 : index
    %c0_20 = arith.constant 0 : index
    %33 = vector.load %arg15[%c0_19, %c0_20] : memref<16x32xf32, #tpu.memory_space<vmem>>, vector<16x32xf32>
    %34 = vector.shape_cast %32 : vector<32x32xf32> to vector<1x32x32xf32>
    %35 = vector.broadcast %34 : vector<1x32x32xf32> to vector<16x32x32xf32>
    %36 = arith.mulf %30, %35 : vector<16x32x32xf32>
    %cst_21 = arith.constant dense<0.000000e+00> : vector<16x32xf32>
    %37 = vector.multi_reduction <add>, %36, %cst_21 [1] : vector<16x32x32xf32> to vector<16x32xf32>
    %38 = arith.addf %33, %37 : vector<16x32xf32>
    %c0_22 = arith.constant 0 : index
    %c0_23 = arith.constant 0 : index
    %39 = vector.load %arg15[%c0_22, %c0_23] : memref<16x32xf32, #tpu.memory_space<vmem>>, vector<16x32xf32>
    tpu.vector_store %arg15[%c0_22, %c0_23], %38 {strides = array<i32>} : memref<16x32xf32, #tpu.memory_space<vmem>>, vector<16x32xf32>,
    %c0_i32_24 = arith.constant 0 : i32
    %40 = arith.cmpi eq, %arg1, %c0_i32_24 : i32
    %41 = arith.extui %40 : i1 to i32
    %c0_i32_25 = arith.constant 0 : i32
    %42 = arith.cmpi ne, %41, %c0_i32_25 : i32
    scf.if %42 {
      %c0_26 = arith.constant 0 : index
      %c0_27 = arith.constant 0 : index
      %43 = vector.load %arg15[%c0_26, %c0_27] : memref<16x32xf32, #tpu.memory_space<vmem>>, vector<16x32xf32>
      %c0_28 = arith.constant 0 : index
      %c0_29 = arith.constant 0 : index
      %44 = vector.load %arg10[%c0_28, %c0_29] : memref<32x32xf32, #tpu.memory_space<vmem>>, vector<32x32xf32>
      %cst_30 = arith.constant dense<0.000000e+00> : vector<16x32xf32>
      %45 = tpu.matmul %43, %44, %cst_30 {dimension_numbers = #tpu.dot_dimension_numbers<[1], [0], [0], [1], [0, 0, 1, 1], [], []>} : vector<16x32xf32>, vector<32x32xf32>, vector<16x32xf32> -> vector<16x32xf32>
      %c0_31 = arith.constant 0 : index
      %c0_32 = arith.constant 0 : index
      %46 = vector.load %arg11[%c0_31, %c0_32] : memref<1x32xf32, #tpu.memory_space<vmem>>, vector<1x32xf32>
      %47 = vector.broadcast %46 : vector<1x32xf32> to vector<16x32xf32>
      %48 = arith.addf %45, %47 : vector<16x32xf32>
      %cst_33 = arith.constant 0.000000e+00 : f32
      %49 = vector.broadcast %cst_33 : f32 to vector<16x32xf32>
      %50 = arith.maximumf %48, %49 : vector<16x32xf32>
      %51 = math.absf %48 : vector<16x32xf32>
      %cst_34 = arith.constant 0.000000e+00 : f32
      %52 = vector.broadcast %cst_34 : f32 to vector<16x32xf32>
      %53 = arith.subf %52, %51 : vector<16x32xf32>
      %54 = math.exp %53 : vector<16x32xf32>
      %55 = math.log1p %54 : vector<16x32xf32>
      %56 = arith.addf %50, %55 : vector<16x32xf32>
      %cst_35 = arith.constant 0.693147182 : f32
      %57 = vector.broadcast %cst_35 : f32 to vector<16x32xf32>
      %58 = arith.subf %56, %57 : vector<16x32xf32>
      %c0_36 = arith.constant 0 : index
      %c0_37 = arith.constant 0 : index
      %59 = vector.load %arg12[%c0_36, %c0_37] : memref<32x32xf32, #tpu.memory_space<vmem>>, vector<32x32xf32>
      %cst_38 = arith.constant dense<0.000000e+00> : vector<16x32xf32>
      %60 = tpu.matmul %58, %59, %cst_38 {dimension_numbers = #tpu.dot_dimension_numbers<[1], [0], [0], [1], [0, 0, 1, 1], [], []>} : vector<16x32xf32>, vector<32x32xf32>, vector<16x32xf32> -> vector<16x32xf32>
      %c0_39 = arith.constant 0 : index
      %c0_40 = arith.constant 0 : index
      %61 = vector.load %arg13[%c0_39, %c0_40] : memref<1x32xf32, #tpu.memory_space<vmem>>, vector<1x32xf32>
      %62 = vector.broadcast %61 : vector<1x32xf32> to vector<16x32xf32>
      %63 = arith.addf %60, %62 : vector<16x32xf32>
      %c0_41 = arith.constant 0 : index
      %c0_42 = arith.constant 0 : index
      %64 = vector.load %arg2[%c0_41, %c0_42] : memref<16x32xf32, #tpu.memory_space<vmem>>, vector<16x32xf32>
      %65 = arith.addf %64, %63 : vector<16x32xf32>
      %c0_43 = arith.constant 0 : index
      %c0_44 = arith.constant 0 : index
      %66 = vector.load %arg14[%c0_43, %c0_44] : memref<16x32xf32, #tpu.memory_space<vmem>>, vector<16x32xf32>
      tpu.vector_store %arg14[%c0_43, %c0_44], %65 {strides = array<i32>} : memref<16x32xf32, #tpu.memory_space<vmem>>, vector<16x32xf32>,
    } else {
    }
    return
  }
  func.func @transform_0(%arg0: i32, %arg1: i32) -> (i32, i32) {
    %c0_i32 = arith.constant 0 : i32
    %c0_i32_0 = arith.constant 0 : i32
    return %arg0, %c0_i32 : i32, i32
  }
  func.func @transform_1(%arg0: i32, %arg1: i32) -> (i32, i32) {
    %c0_i32 = arith.constant 0 : i32
    %c0_i32_0 = arith.constant 0 : i32
    return %arg1, %c0_i32 : i32, i32
  }
  func.func @transform_2(%arg0: i32, %arg1: i32) -> (i32, i32, i32) {
    %c0_i32 = arith.constant 0 : i32
    %c0_i32_0 = arith.constant 0 : i32
    return %arg0, %arg1, %c0_i32 : i32, i32, i32
  }
  func.func @transform_3(%arg0: i32, %arg1: i32) -> (i32, i32) {
    %c0_i32 = arith.constant 0 : i32
    return %arg0, %arg1 : i32, i32
  }
  func.func @transform_4(%arg0: i32, %arg1: i32) -> (i32, i32) {
    %c0_i32 = arith.constant 0 : i32
    %c0_i32_0 = arith.constant 0 : i32
    %c0_i32_1 = arith.constant 0 : i32
    return %c0_i32, %c0_i32_0 : i32, i32
  }
  func.func @transform_5(%arg0: i32, %arg1: i32) -> (i32, i32) {
    %c0_i32 = arith.constant 0 : i32
    %c0_i32_0 = arith.constant 0 : i32
    %c0_i32_1 = arith.constant 0 : i32
    return %c0_i32, %c0_i32_0 : i32, i32
  }
  func.func @transform_6(%arg0: i32, %arg1: i32) -> (i32, i32) {
    %c0_i32 = arith.constant 0 : i32
    %c0_i32_0 = arith.constant 0 : i32
    %c0_i32_1 = arith.constant 0 : i32
    return %c0_i32, %c0_i32_0 : i32, i32
  }
  func.func @transform_7(%arg0: i32, %arg1: i32) -> (i32, i32) {
    %c0_i32 = arith.constant 0 : i32
    %c0_i32_0 = arith.constant 0 : i32
    %c0_i32_1 = arith.constant 0 : i32
    return %c0_i32, %c0_i32_0 : i32, i32
  }
  func.func @transform_8(%arg0: i32, %arg1: i32) -> (i32, i32) {
    %c0_i32 = arith.constant 0 : i32
    %c0_i32_0 = arith.constant 0 : i32
    %c0_i32_1 = arith.constant 0 : i32
    return %c0_i32, %c0_i32_0 : i32, i32
  }
  func.func @transform_9(%arg0: i32, %arg1: i32) -> (i32, i32) {
    %c0_i32 = arith.constant 0 : i32
    %c0_i32_0 = arith.constant 0 : i32
    %c0_i32_1 = arith.constant 0 : i32
    return %c0_i32, %c0_i32_0 : i32, i32
  }
  func.func @transform_10(%arg0: i32, %arg1: i32) -> (i32, i32) {
    %c0_i32 = arith.constant 0 : i32
    %c0_i32_0 = arith.constant 0 : i32
    %c0_i32_1 = arith.constant 0 : i32
    return %c0_i32, %c0_i32_0 : i32, i32
  }
  func.func @transform_11(%arg0: i32, %arg1: i32) -> (i32, i32) {
    %c0_i32 = arith.constant 0 : i32
    %c0_i32_0 = arith.constant 0 : i32
    %c0_i32_1 = arith.constant 0 : i32
    return %c0_i32, %c0_i32_0 : i32, i32
  }
  func.func @transform_12(%arg0: i32, %arg1: i32) -> (i32, i32) {
    %c0_i32 = arith.constant 0 : i32
    %c0_i32_0 = arith.constant 0 : i32
    return %arg0, %c0_i32 : i32, i32
  }
}

module attributes {stable_mosaic.version = 11 : i64} {
  func.func @_head_kernel(%arg0: i32, %arg1: memref<2x32xf32, #tpu.memory_space<vmem>>, %arg2: memref<32x32xf32, #tpu.memory_space<vmem>>, %arg3: memref<32x32xf32, #tpu.memory_space<vmem>>, %arg4: memref<1x32xf32, #tpu.memory_space<vmem>>, %arg5: memref<1x32xf32, #tpu.memory_space<vmem>>, %arg6: memref<1x32xf32, #tpu.memory_space<vmem>>, %arg7: memref<32x32xf32, #tpu.memory_space<vmem>>, %arg8: memref<1x32xf32, #tpu.memory_space<vmem>>, %arg9: memref<1x32xf32, #tpu.memory_space<vmem>>, %arg10: memref<1x32xf32, #tpu.memory_space<vmem>>, %arg11: memref<32x32xf32, #tpu.memory_space<vmem>>, %arg12: memref<1x32xf32, #tpu.memory_space<vmem>>, %arg13: memref<1x32xf32, #tpu.memory_space<vmem>>, %arg14: memref<1x32xf32, #tpu.memory_space<vmem>>, %arg15: memref<32x1xf32, #tpu.memory_space<vmem>>, %arg16: memref<1x1xf32, #tpu.memory_space<vmem>>, %arg17: memref<2x32xf32, #tpu.memory_space<vmem>>, %arg18: memref<2x1xf32, #tpu.memory_space<vmem>>) attributes {dimension_semantics = [#tpu.dimension_semantics<arbitrary>], iteration_bounds = array<i64: 1>, scalar_prefetch = 0 : i64, scratch_operands = 0 : i64, tpu.core_type = #tpu.core_type<tc>, window_params = [{pipeline_mode = #tpu.pipeline_mode<synchronous>, transform_indices = @transform_0, window_bounds = array<i64: 2, 32>}, {pipeline_mode = #tpu.pipeline_mode<synchronous>, transform_indices = @transform_1, window_bounds = array<i64: 32, 32>}, {pipeline_mode = #tpu.pipeline_mode<synchronous>, transform_indices = @transform_2, window_bounds = array<i64: 32, 32>}, {pipeline_mode = #tpu.pipeline_mode<synchronous>, transform_indices = @transform_3, window_bounds = array<i64: 1, 32>}, {pipeline_mode = #tpu.pipeline_mode<synchronous>, transform_indices = @transform_4, window_bounds = array<i64: 1, 32>}, {pipeline_mode = #tpu.pipeline_mode<synchronous>, transform_indices = @transform_5, window_bounds = array<i64: 1, 32>}, {pipeline_mode = #tpu.pipeline_mode<synchronous>, transform_indices = @transform_6, window_bounds = array<i64: 32, 32>}, {pipeline_mode = #tpu.pipeline_mode<synchronous>, transform_indices = @transform_7, window_bounds = array<i64: 1, 32>}, {pipeline_mode = #tpu.pipeline_mode<synchronous>, transform_indices = @transform_8, window_bounds = array<i64: 1, 32>}, {pipeline_mode = #tpu.pipeline_mode<synchronous>, transform_indices = @transform_9, window_bounds = array<i64: 1, 32>}, {pipeline_mode = #tpu.pipeline_mode<synchronous>, transform_indices = @transform_10, window_bounds = array<i64: 32, 32>}, {pipeline_mode = #tpu.pipeline_mode<synchronous>, transform_indices = @transform_11, window_bounds = array<i64: 1, 32>}, {pipeline_mode = #tpu.pipeline_mode<synchronous>, transform_indices = @transform_12, window_bounds = array<i64: 1, 32>}, {pipeline_mode = #tpu.pipeline_mode<synchronous>, transform_indices = @transform_13, window_bounds = array<i64: 1, 32>}, {pipeline_mode = #tpu.pipeline_mode<synchronous>, transform_indices = @transform_14, window_bounds = array<i64: 32, 1>}, {pipeline_mode = #tpu.pipeline_mode<synchronous>, transform_indices = @transform_15, window_bounds = array<i64: 1, 1>}, {pipeline_mode = #tpu.pipeline_mode<synchronous>, transform_indices = @transform_16, window_bounds = array<i64: 2, 32>}, {pipeline_mode = #tpu.pipeline_mode<synchronous>, transform_indices = @transform_17, window_bounds = array<i64: 2, 1>}]} {
    %c0 = arith.constant 0 : index
    %c0_0 = arith.constant 0 : index
    %0 = vector.load %arg1[%c0, %c0_0] : memref<2x32xf32, #tpu.memory_space<vmem>>, vector<2x32xf32>
    %c0_1 = arith.constant 0 : index
    %c0_2 = arith.constant 0 : index
    %1 = vector.load %arg2[%c0_1, %c0_2] : memref<32x32xf32, #tpu.memory_space<vmem>>, vector<32x32xf32>
    %cst = arith.constant dense<0.000000e+00> : vector<2x32xf32>
    %2 = tpu.matmul %0, %1, %cst {dimension_numbers = #tpu.dot_dimension_numbers<[1], [0], [0], [1], [0, 0, 1, 1], [], []>} : vector<2x32xf32>, vector<32x32xf32>, vector<2x32xf32> -> vector<2x32xf32>
    %c0_3 = arith.constant 0 : index
    %c0_4 = arith.constant 0 : index
    %3 = vector.load %arg17[%c0_3, %c0_4] : memref<2x32xf32, #tpu.memory_space<vmem>>, vector<2x32xf32>
    tpu.vector_store %arg17[%c0_3, %c0_4], %2 {strides = array<i32>} : memref<2x32xf32, #tpu.memory_space<vmem>>, vector<2x32xf32>,
    %c0_5 = arith.constant 0 : index
    %c0_6 = arith.constant 0 : index
    %4 = vector.load %arg3[%c0_5, %c0_6] : memref<32x32xf32, #tpu.memory_space<vmem>>, vector<32x32xf32>
    %cst_7 = arith.constant dense<0.000000e+00> : vector<2x32xf32>
    %5 = tpu.matmul %2, %4, %cst_7 {dimension_numbers = #tpu.dot_dimension_numbers<[1], [0], [0], [1], [0, 0, 1, 1], [], []>} : vector<2x32xf32>, vector<32x32xf32>, vector<2x32xf32> -> vector<2x32xf32>
    %c0_8 = arith.constant 0 : index
    %c0_9 = arith.constant 0 : index
    %6 = vector.load %arg4[%c0_8, %c0_9] : memref<1x32xf32, #tpu.memory_space<vmem>>, vector<1x32xf32>
    %7 = vector.broadcast %6 : vector<1x32xf32> to vector<2x32xf32>
    %8 = arith.addf %5, %7 : vector<2x32xf32>
    %cst_10 = arith.constant 0.000000e+00 : f32
    %9 = vector.broadcast %cst_10 : f32 to vector<2x32xf32>
    %10 = arith.cmpf oge, %8, %9 : vector<2x32xf32>
    %cst_11 = arith.constant 0.00999999977 : f32
    %11 = vector.broadcast %cst_11 : f32 to vector<2x32xf32>
    %12 = arith.mulf %11, %8 : vector<2x32xf32>
    %13 = arith.select %10, %8, %12 : vector<2x32xi1>, vector<2x32xf32>
    %c0_12 = arith.constant 0 : index
    %c0_13 = arith.constant 0 : index
    %14 = vector.load %arg5[%c0_12, %c0_13] : memref<1x32xf32, #tpu.memory_space<vmem>>, vector<1x32xf32>
    %15 = vector.broadcast %14 : vector<1x32xf32> to vector<2x32xf32>
    %16 = arith.mulf %13, %15 : vector<2x32xf32>
    %c0_14 = arith.constant 0 : index
    %c0_15 = arith.constant 0 : index
    %17 = vector.load %arg6[%c0_14, %c0_15] : memref<1x32xf32, #tpu.memory_space<vmem>>, vector<1x32xf32>
    %18 = vector.broadcast %17 : vector<1x32xf32> to vector<2x32xf32>
    %19 = arith.addf %16, %18 : vector<2x32xf32>
    %c0_16 = arith.constant 0 : index
    %c0_17 = arith.constant 0 : index
    %20 = vector.load %arg7[%c0_16, %c0_17] : memref<32x32xf32, #tpu.memory_space<vmem>>, vector<32x32xf32>
    %cst_18 = arith.constant dense<0.000000e+00> : vector<2x32xf32>
    %21 = tpu.matmul %19, %20, %cst_18 {dimension_numbers = #tpu.dot_dimension_numbers<[1], [0], [0], [1], [0, 0, 1, 1], [], []>} : vector<2x32xf32>, vector<32x32xf32>, vector<2x32xf32> -> vector<2x32xf32>
    %c0_19 = arith.constant 0 : index
    %c0_20 = arith.constant 0 : index
    %22 = vector.load %arg8[%c0_19, %c0_20] : memref<1x32xf32, #tpu.memory_space<vmem>>, vector<1x32xf32>
    %23 = vector.broadcast %22 : vector<1x32xf32> to vector<2x32xf32>
    %24 = arith.addf %21, %23 : vector<2x32xf32>
    %cst_21 = arith.constant 0.000000e+00 : f32
    %25 = vector.broadcast %cst_21 : f32 to vector<2x32xf32>
    %26 = arith.cmpf oge, %24, %25 : vector<2x32xf32>
    %cst_22 = arith.constant 0.00999999977 : f32
    %27 = vector.broadcast %cst_22 : f32 to vector<2x32xf32>
    %28 = arith.mulf %27, %24 : vector<2x32xf32>
    %29 = arith.select %26, %24, %28 : vector<2x32xi1>, vector<2x32xf32>
    %c0_23 = arith.constant 0 : index
    %c0_24 = arith.constant 0 : index
    %30 = vector.load %arg9[%c0_23, %c0_24] : memref<1x32xf32, #tpu.memory_space<vmem>>, vector<1x32xf32>
    %31 = vector.broadcast %30 : vector<1x32xf32> to vector<2x32xf32>
    %32 = arith.mulf %29, %31 : vector<2x32xf32>
    %c0_25 = arith.constant 0 : index
    %c0_26 = arith.constant 0 : index
    %33 = vector.load %arg10[%c0_25, %c0_26] : memref<1x32xf32, #tpu.memory_space<vmem>>, vector<1x32xf32>
    %34 = vector.broadcast %33 : vector<1x32xf32> to vector<2x32xf32>
    %35 = arith.addf %32, %34 : vector<2x32xf32>
    %c0_27 = arith.constant 0 : index
    %c0_28 = arith.constant 0 : index
    %36 = vector.load %arg11[%c0_27, %c0_28] : memref<32x32xf32, #tpu.memory_space<vmem>>, vector<32x32xf32>
    %cst_29 = arith.constant dense<0.000000e+00> : vector<2x32xf32>
    %37 = tpu.matmul %35, %36, %cst_29 {dimension_numbers = #tpu.dot_dimension_numbers<[1], [0], [0], [1], [0, 0, 1, 1], [], []>} : vector<2x32xf32>, vector<32x32xf32>, vector<2x32xf32> -> vector<2x32xf32>
    %c0_30 = arith.constant 0 : index
    %c0_31 = arith.constant 0 : index
    %38 = vector.load %arg12[%c0_30, %c0_31] : memref<1x32xf32, #tpu.memory_space<vmem>>, vector<1x32xf32>
    %39 = vector.broadcast %38 : vector<1x32xf32> to vector<2x32xf32>
    %40 = arith.addf %37, %39 : vector<2x32xf32>
    %cst_32 = arith.constant 0.000000e+00 : f32
    %41 = vector.broadcast %cst_32 : f32 to vector<2x32xf32>
    %42 = arith.cmpf oge, %40, %41 : vector<2x32xf32>
    %cst_33 = arith.constant 0.00999999977 : f32
    %43 = vector.broadcast %cst_33 : f32 to vector<2x32xf32>
    %44 = arith.mulf %43, %40 : vector<2x32xf32>
    %45 = arith.select %42, %40, %44 : vector<2x32xi1>, vector<2x32xf32>
    %c0_34 = arith.constant 0 : index
    %c0_35 = arith.constant 0 : index
    %46 = vector.load %arg13[%c0_34, %c0_35] : memref<1x32xf32, #tpu.memory_space<vmem>>, vector<1x32xf32>
    %47 = vector.broadcast %46 : vector<1x32xf32> to vector<2x32xf32>
    %48 = arith.mulf %45, %47 : vector<2x32xf32>
    %c0_36 = arith.constant 0 : index
    %c0_37 = arith.constant 0 : index
    %49 = vector.load %arg14[%c0_36, %c0_37] : memref<1x32xf32, #tpu.memory_space<vmem>>, vector<1x32xf32>
    %50 = vector.broadcast %49 : vector<1x32xf32> to vector<2x32xf32>
    %51 = arith.addf %48, %50 : vector<2x32xf32>
    %c0_38 = arith.constant 0 : index
    %c0_39 = arith.constant 0 : index
    %52 = vector.load %arg15[%c0_38, %c0_39] : memref<32x1xf32, #tpu.memory_space<vmem>>, vector<32x1xf32>
    %cst_40 = arith.constant dense<0.000000e+00> : vector<2x1xf32>
    %53 = tpu.matmul %51, %52, %cst_40 {dimension_numbers = #tpu.dot_dimension_numbers<[1], [0], [0], [1], [0, 0, 1, 1], [], []>} : vector<2x32xf32>, vector<32x1xf32>, vector<2x1xf32> -> vector<2x1xf32>
    %c0_41 = arith.constant 0 : index
    %c0_42 = arith.constant 0 : index
    %54 = vector.load %arg16[%c0_41, %c0_42] : memref<1x1xf32, #tpu.memory_space<vmem>>, vector<1x1xf32>
    %55 = vector.broadcast %54 : vector<1x1xf32> to vector<2x1xf32>
    %56 = arith.addf %53, %55 : vector<2x1xf32>
    %c0_43 = arith.constant 0 : index
    %c0_44 = arith.constant 0 : index
    %57 = vector.load %arg18[%c0_43, %c0_44] : memref<2x1xf32, #tpu.memory_space<vmem>>, vector<2x1xf32>
    tpu.vector_store %arg18[%c0_43, %c0_44], %56 {strides = array<i32>} : memref<2x1xf32, #tpu.memory_space<vmem>>, vector<2x1xf32>,
    return
  }
  func.func @transform_0(%arg0: i32) -> (i32, i32) {
    %c0_i32 = arith.constant 0 : i32
    %c0_i32_0 = arith.constant 0 : i32
    %c0_i32_1 = arith.constant 0 : i32
    return %c0_i32, %c0_i32_0 : i32, i32
  }
  func.func @transform_1(%arg0: i32) -> (i32, i32) {
    %c0_i32 = arith.constant 0 : i32
    %c0_i32_0 = arith.constant 0 : i32
    %c0_i32_1 = arith.constant 0 : i32
    return %c0_i32, %c0_i32_0 : i32, i32
  }
  func.func @transform_2(%arg0: i32) -> (i32, i32) {
    %c0_i32 = arith.constant 0 : i32
    %c0_i32_0 = arith.constant 0 : i32
    %c0_i32_1 = arith.constant 0 : i32
    return %c0_i32, %c0_i32_0 : i32, i32
  }
  func.func @transform_3(%arg0: i32) -> (i32, i32) {
    %c0_i32 = arith.constant 0 : i32
    %c0_i32_0 = arith.constant 0 : i32
    %c0_i32_1 = arith.constant 0 : i32
    return %c0_i32, %c0_i32_0 : i32, i32
  }
  func.func @transform_4(%arg0: i32) -> (i32, i32) {
    %c0_i32 = arith.constant 0 : i32
    %c0_i32_0 = arith.constant 0 : i32
    %c0_i32_1 = arith.constant 0 : i32
    return %c0_i32, %c0_i32_0 : i32, i32
  }
  func.func @transform_5(%arg0: i32) -> (i32, i32) {
    %c0_i32 = arith.constant 0 : i32
    %c0_i32_0 = arith.constant 0 : i32
    %c0_i32_1 = arith.constant 0 : i32
    return %c0_i32, %c0_i32_0 : i32, i32
  }
  func.func @transform_6(%arg0: i32) -> (i32, i32) {
    %c0_i32 = arith.constant 0 : i32
    %c0_i32_0 = arith.constant 0 : i32
    %c0_i32_1 = arith.constant 0 : i32
    return %c0_i32, %c0_i32_0 : i32, i32
  }
  func.func @transform_7(%arg0: i32) -> (i32, i32) {
    %c0_i32 = arith.constant 0 : i32
    %c0_i32_0 = arith.constant 0 : i32
    %c0_i32_1 = arith.constant 0 : i32
    return %c0_i32, %c0_i32_0 : i32, i32
  }
  func.func @transform_8(%arg0: i32) -> (i32, i32) {
    %c0_i32 = arith.constant 0 : i32
    %c0_i32_0 = arith.constant 0 : i32
    %c0_i32_1 = arith.constant 0 : i32
    return %c0_i32, %c0_i32_0 : i32, i32
  }
  func.func @transform_9(%arg0: i32) -> (i32, i32) {
    %c0_i32 = arith.constant 0 : i32
    %c0_i32_0 = arith.constant 0 : i32
    %c0_i32_1 = arith.constant 0 : i32
    return %c0_i32, %c0_i32_0 : i32, i32
  }
  func.func @transform_10(%arg0: i32) -> (i32, i32) {
    %c0_i32 = arith.constant 0 : i32
    %c0_i32_0 = arith.constant 0 : i32
    %c0_i32_1 = arith.constant 0 : i32
    return %c0_i32, %c0_i32_0 : i32, i32
  }
  func.func @transform_11(%arg0: i32) -> (i32, i32) {
    %c0_i32 = arith.constant 0 : i32
    %c0_i32_0 = arith.constant 0 : i32
    %c0_i32_1 = arith.constant 0 : i32
    return %c0_i32, %c0_i32_0 : i32, i32
  }
  func.func @transform_12(%arg0: i32) -> (i32, i32) {
    %c0_i32 = arith.constant 0 : i32
    %c0_i32_0 = arith.constant 0 : i32
    %c0_i32_1 = arith.constant 0 : i32
    return %c0_i32, %c0_i32_0 : i32, i32
  }
  func.func @transform_13(%arg0: i32) -> (i32, i32) {
    %c0_i32 = arith.constant 0 : i32
    %c0_i32_0 = arith.constant 0 : i32
    %c0_i32_1 = arith.constant 0 : i32
    return %c0_i32, %c0_i32_0 : i32, i32
  }
  func.func @transform_14(%arg0: i32) -> (i32, i32) {
    %c0_i32 = arith.constant 0 : i32
    %c0_i32_0 = arith.constant 0 : i32
    %c0_i32_1 = arith.constant 0 : i32
    return %c0_i32, %c0_i32_0 : i32, i32
  }
  func.func @transform_15(%arg0: i32) -> (i32, i32) {
    %c0_i32 = arith.constant 0 : i32
    %c0_i32_0 = arith.constant 0 : i32
    %c0_i32_1 = arith.constant 0 : i32
    return %c0_i32, %c0_i32_0 : i32, i32
  }
  func.func @transform_16(%arg0: i32) -> (i32, i32) {
    %c0_i32 = arith.constant 0 : i32
    %c0_i32_0 = arith.constant 0 : i32
    %c0_i32_1 = arith.constant 0 : i32
    return %c0_i32, %c0_i32_0 : i32, i32
  }
  func.func @transform_17(%arg0: i32) -> (i32, i32) {
    %c0_i32 = arith.constant 0 : i32
    %c0_i32_0 = arith.constant 0 : i32
    %c0_i32_1 = arith.constant 0 : i32
    return %c0_i32, %c0_i32_0 : i32, i32
  }
}

</mosaic_0001>

<bundles_post_ra>
// kernel: schnet_forward.7
= control target key start
LH: loop header
LB: loop body
LE: loop exit
PB: predicated region body
PF: predicated region fallthrough
CT: control target
= control target key end

     0   :  { %s899_s0 = inlined_call_operand.vmem [shape: f32[2,32], index: 0, kind: input, shape index: {}]   ;;  %s900_s1 = inlined_call_operand.vmem [shape: f32[32,32], index: 1, kind: input, shape index: {}]   ;;  %s901_s2 = inlined_call_operand.vmem [shape: f32[32,32], index: 2, kind: input, shape index: {}]   ;;  %s902_s3 = inlined_call_operand.vmem [shape: f32[1,32], index: 3, kind: input, shape index: {}]   ;;  %s903_s4 = inlined_call_operand.vmem [shape: f32[1,32], index: 4, kind: input, shape index: {}]   ;;  %s904_s5 = inlined_call_operand.vmem [shape: f32[1,32], index: 5, kind: input, shape index: {}]   ;;  %s905_s6 = inlined_call_operand.vmem [shape: f32[32,32], index: 6, kind: input, shape index: {}]   ;;  %s906_s7 = inlined_call_operand.vmem [shape: f32[1,32], index: 7, kind: input, shape index: {}]   ;;  %s907_s8 = inlined_call_operand.vmem [shape: f32[1,32], index: 8, kind: input, shape index: {}]   ;;  %s908_s9 = inlined_call_operand.vmem [shape: f32[1,32], index: 9, kind: input, shape index: {}]   ;;  %s909_s10 = inlined_call_operand.vmem [shape: f32[32,32], index: 10, kind: input, shape index: {}]   ;;  %s910_s11 = inlined_call_operand.vmem [shape: f32[1,32], index: 11, kind: input, shape index: {}]   ;;  %s911_s12 = inlined_call_operand.vmem [shape: f32[1,32], index: 12, kind: input, shape index: {}]   ;;  %s912_s13 = inlined_call_operand.vmem [shape: f32[1,32], index: 13, kind: input, shape index: {}]   ;;  %s913_s14 = inlined_call_operand.vmem [shape: f32[32,1], index: 14, kind: input, shape index: {}]   ;;  %s914_s15 = inlined_call_operand.<no memory space> [shape: f32[1,1], index: 15, kind: input, shape index: {}]   ;;  %s915_s16 = inlined_call_operand.hbm [shape: f32[2,32], index: 16, kind: output, shape index: {0}]   ;;  %s916_s17 = inlined_call_operand.vmem [shape: f32[2,1], index: 17, kind: output, shape index: {1}]  }
   0x1   :  { %918 = sst [smem:[#allocation6_spill]] %s899_s0  ;;  %v23_v0 = vstv %s914_s15 }
   0x2   :  { %919 = sst [smem:[#allocation7_spill]] %s900_s1  ;;  %24 = vst [vmem:[#allocation2] sm:$0x1] %v23_v0 }
   0x3   :  { %s920_s28 = sld [smem:[#allocation7_spill]]  ;;  %v672_v2 = vmov 0.0   ;;  %vm673_vm0 = vmmov 0   ;;  %v142_v4 = vld [vmem:[%s901_s2 + $0x18] sm:$0xff]  ;;  %v141_v5 = vld [vmem:[%s901_s2 + $0x10] sm:$0xff] }
   0x4   :  { %592 = vmatprep.subr.mxu0 %v672_v2  ;;  %600 = vmatprep.mubr.msk.f32.mxu0 %vm673_vm0, %v672_v2 }
   0x5   :  { %603 = vmatprep.subr.mxu1 %v672_v2 }
   0x9   :  { %v62_v1 = vld [vmem:[%s920_s28 + $0x18] sm:$0xff]  ;;  %v61_v3 = vld [vmem:[%s920_s28 + $0x10] sm:$0xff] }
   0xa   :  { %593 = vmatpush3.msra.mxu0 %v62_v1 }
   0xb   :  { %25 = vsyncpa [#allocation4], 0  ;;  %594 = vmatprep.subr.mxu0 %v672_v2  ;;  %v60_v6 = vld [vmem:[%s920_s28 + $0x8] sm:$0xff]  ;;  %604 = vmatpush3.msra.mxu1 %v142_v4  ;;  %v59_v8 = vld [vmem:[%s920_s28] sm:$0xff]  ;;  %s921_s27 = sld [smem:[#allocation6_spill]]  ;;  %vm63_vm1 = vcmask 261120  }
   0xc   :  { %595 = vmatpush3.msra.mxu0 %v61_v3  ;;  %605 = vmatprep.subr.mxu1 %v672_v2  ;;  %v140_v7 = vld [vmem:[%s901_s2 + $0x8] sm:$0xff]  ;;  %v139_v10 = vld [vmem:[%s901_s2] sm:$0xff]  ;;  %vm137_vm2 = vcmask 254976   ;;  %v245_v13 = vld [vmem:[%s905_s6 + $0x18] sm:$0xff] }
   0xd   :  { %596 = vmatprep.subr.mxu0 %v672_v2  ;;  %606 = vmatpush3.msra.mxu1 %v141_v5  ;;  %v244_v14 = vld [vmem:[%s905_s6 + $0x10] sm:$0xff]  ;;  %v243_v15 = vld [vmem:[%s905_s6 + $0x8] sm:$0xff]  ;;  %v242_v16 = vld [vmem:[%s905_s6] sm:$0xff] }
   0xe   :  { %597 = vmatpush3.msra.mxu0 %v60_v6  ;;  %607 = vmatprep.subr.mxu1 %v672_v2  ;;  %v553_v17 = vld [vmem:[%s902_s3] ss:$0 sm:$0xff]  ;;  %v348_v27 = vld [vmem:[%s909_s10 + $0x18] sm:$0xff]  ;;  %v347_v28 = vld [vmem:[%s909_s10 + $0x10] sm:$0xff] }
   0xf   :  { %598 = vmatprep.subr.mxu0 %v672_v2  ;;  %608 = vmatpush3.msra.mxu1 %v140_v7  ;;  %v555_v22 = vld [vmem:[%s903_s4] ss:$0 sm:$0xff]  ;;  %v346_v29 = vld [vmem:[%s909_s10 + $0x8] sm:$0xff]  ;;  %v451_v41 = vld [vmem:[%s913_s14 + $0x18] sm:$0xff] }
  0x10   :  { %599 = vmatpush3.msra.mxu0 %v59_v8  ;;  %609 = vmatprep.subr.mxu1 %v672_v2  ;;  %v556_v24 = vld [vmem:[%s904_s5] ss:$0 sm:$0xff]  ;;  %v450_v42 = vld [vmem:[%s913_s14 + $0x10] sm:$0xff]  ;;  %v449_v43 = vld [vmem:[%s913_s14 + $0x8] sm:$0xff] }
  0x11   :  { %v58_v9 = vld [vmem:[%s921_s27] sm:$0x3]  ;;  %611 = vmatprep.mubr.msk.f32.mxu1 %vm673_vm0, %v672_v2  ;;  %614 = vmatprep.subr.mxu0 %v672_v2 }
  0x12   :  { %601 = vmatmul.mubr.msk.f32.vlgmr.msra.gmra.mxu0 %vm63_vm1, %v58_v9  ;;  %610 = vmatpush3.msra.mxu1 %v139_v10  ;;  %v345_v30 = vld [vmem:[%s909_s10] sm:$0xff] }
  0x13   :  { %622 = vmatprep.mubr.msk.f32.mxu0 %vm673_vm0, %v672_v2  ;;  %625 = vmatprep.subr.mxu1 %v672_v2  ;;  %v557_v31 = vld [vmem:[%s906_s7] ss:$0 sm:$0xff] }
  0x14   :  { %615 = vmatpush3.msra.mxu0 %v245_v13  ;;  %v559_v36 = vld [vmem:[%s907_s8] ss:$0 sm:$0xff] }
  0x15   :  { %616 = vmatprep.subr.mxu0 %v672_v2  ;;  %v560_v38 = vld [vmem:[%s908_s9] ss:$0 sm:$0xff] }
  0x16   :  { %617 = vmatpush3.msra.mxu0 %v244_v14  ;;  %v448_v44 = vld [vmem:[%s913_s14] sm:$0xff]  ;;  %s674_s14 = smov [#allocation3]  }
  0x17   :  { %618 = vmatprep.subr.mxu0 %v672_v2  ;;  %v561_v45 = vld [vmem:[%s910_s11] ss:$0 sm:$0xff]  ;;  %s540_s11 = sshll.u32 %s674_s14, 4  ;;  %s541_s11 = int_to_ptr.vmem [resolvable:$true] %s540_s11 }
  0x18   :  { %619 = vmatpush3.msra.mxu0 %v243_v15  ;;  %v563_v50 = vld [vmem:[%s911_s12] ss:$0 sm:$0xff]  ;;  %s650_s27 = scalar_lea.vmem %s541_s11, 32  ;;  %p655_p1 = scmp.lt.s32.totalorder %s541_s11, %s541_s11 }
  0x19   :  { %620 = vmatprep.subr.mxu0 %v672_v2  ;;  %v564_v52 = vld [vmem:[%s912_s13] ss:$0 sm:$0xff]  ;;  %p651_p0 = scmp.ne.s32.totalorder %s541_s11, %s650_s27  ;;  %p656_p2 = scmp.lt.s32.totalorder %s650_s27, %s650_s27 }
  0x1a   :  { %621 = vmatpush3.msra.mxu0 %v242_v16 }
  0x1b   :  { %636 = vmatprep.subr.mxu0 %v672_v2  ;;  %p657_p3 = por %p656_p2, %p655_p1 }
  0x1d   :  { %p658_p4 = pnand %p657_p3, %p651_p0 }
  0xd2   :  { %v133_v11 = vpop.f32.mrf.mxu0 }
  0xd3   :  { %612 = vmatmul.mubr.msk.f32.vlgmr.msra.gmra.mxu1 %vm63_vm1, %v133_v11  ;;  %138 = vst.msk [vmem:[#allocation3] sm:$0x3] %vm137_vm2, %v133_v11 }
  0xd4   :  { %v602_v12 = vpop.f32.mrf.mxu0  ;;  %633 = vmatprep.mubr.msk.f32.mxu1 %vm673_vm0, %v672_v2  ;;  %626 = vmatpush3.msra.mxu1 %v348_v27 }
  0xd5   :  { %627 = vmatprep.subr.mxu1 %v672_v2 }
  0xd6   :  { %628 = vmatpush3.msra.mxu1 %v347_v28 }
  0xd7   :  { %629 = vmatprep.subr.mxu1 %v672_v2 }
  0xd8   :  { %630 = vmatpush3.msra.mxu1 %v346_v29 }
  0xd9   :  { %631 = vmatprep.subr.mxu1 %v672_v2 }
  0xda   :  { %632 = vmatpush3.msra.mxu1 %v345_v30 }
 0x193   :  { %v219_v18 = vpop.f32.mrf.mxu1 }
 0x194   :  { %v220_v19 = vadd.f32 %v553_v17, %v219_v18 }
 0x195   :  { %v613_v20 = vpop.f32.mrf.mxu1 }
 0x196   :  { %vm223_vm3 = vcmp.ge.f32.partialorder %v220_v19, 0.0  ;;  %v224_v21 = vmul.f32 0.01, %v220_v19 }
 0x198   :  { %v225_v23 = vsel %vm223_vm3, %v220_v19, %v224_v21 }
 0x199   :  { %v233_v25 = vmul.f32 %v555_v22, %v225_v23 }
 0x19b   :  { %v241_v26 = vadd.f32 %v556_v24, %v233_v25 }
 0x19d   :  { %623 = vmatmul.mubr.msk.f32.vlgmr.msra.gmra.mxu0 %vm63_vm1, %v241_v26 }
 0x19e   :  { %644 = vmatprep.mubr.msk.f32.mxu0 %vm673_vm0, %v672_v2  ;;  %637 = vmatpush3.msra.mxu0 %v451_v41 }
 0x19f   :  { %638 = vmatprep.subr.mxu0 %v672_v2 }
 0x1a0   :  { %639 = vmatpush3.msra.mxu0 %v450_v42 }
 0x1a1   :  { %640 = vmatprep.subr.mxu0 %v672_v2 }
 0x1a2   :  { %641 = vmatpush3.msra.mxu0 %v449_v43 }
 0x1a3   :  { %642 = vmatprep.subr.mxu0 %v672_v2 }
 0x1a4   :  { %643 = vmatpush3.msra.mxu0 %v448_v44 }
 0x25d   :  { %v322_v32 = vpop.f32.mrf.mxu0 }
 0x25e   :  { %v323_v33 = vadd.f32 %v557_v31, %v322_v32 }
 0x25f   :  { %v624_v34 = vpop.f32.mrf.mxu0 }
 0x260   :  { %vm326_vm4 = vcmp.ge.f32.partialorder %v323_v33, 0.0  ;;  %v327_v35 = vmul.f32 0.01, %v323_v33 }
 0x262   :  { %v328_v37 = vsel %vm326_vm4, %v323_v33, %v327_v35 }
 0x263   :  { %v336_v39 = vmul.f32 %v559_v36, %v328_v37 }
 0x265   :  { %v344_v40 = vadd.f32 %v560_v38, %v336_v39 }
 0x267   :  { %634 = vmatmul.mubr.msk.f32.vlgmr.msra.gmra.mxu1 %vm63_vm1, %v344_v40 }
 0x327   :  { %v425_v46 = vpop.f32.mrf.mxu1 }
 0x328   :  { %v426_v47 = vadd.f32 %v561_v45, %v425_v46 }
 0x329   :  { %v635_v48 = vpop.f32.mrf.mxu1 }
 0x32a   :  { %vm429_vm5 = vcmp.ge.f32.partialorder %v426_v47, 0.0  ;;  %v430_v49 = vmul.f32 0.01, %v426_v47 }
 0x32c   :  { %v431_v51 = vsel %vm429_vm5, %v426_v47, %v430_v49 }
 0x32d   :  { %v439_v53 = vmul.f32 %v563_v50, %v431_v51 }
 0x32f   :  { %v447_v54 = vadd.f32 %v564_v52, %v439_v53 }
 0x331   :  { %645 = vmatmul.mubr.msk.f32.vlgmr.msra.gmra.mxu0 %vm63_vm1, %v447_v54 }
 0x332   :  { %661 = shalt.err (!%p658_p4)
}
 0x333   :  { %543 = dma.vmem_to_hbm [thread:$0]  %s541_s11, 32, %s915_s16, [#allocation4]   ;;  %v565_v55 = vld [vmem:[#allocation2] ss:$0 sm:$0xff]  ;;  %vm532_vm6 = vcmask 1024  }
 0x3f1   :  { %v528_v56 = vpop.f32.mrf.mxu0 }
 0x3f2   :  { %v529_v57 = vadd.f32 %v565_v55, %v528_v56 }
 0x3f3   :  { %v646_v58 = vpop.f32.mrf.mxu0 }
 0x3f4   :  { %533 = vst.msk [vmem:[%s916_s17] sm:$0x3] %vm532_vm6, %v529_v57 }
 0x3f5   :  { %670 = dma.done.wait [#allocation4], 32  }
 0x3f6   :  { %671 = vsyncadd [#allocation4], 4294967264 }
 0x3f7   :  { %551 = vsyncpa [#allocation4], 1 }

// kernel: schnet_forward.4
= control target key start
LH: loop header
LB: loop body
LE: loop exit
PB: predicated region body
PF: predicated region fallthrough
CT: control target
= control target key end

     0   :  { %s2333_s30 = smov 0   ;;  %s2849_s0 = inlined_call_operand.vmem [shape: f32[32,3], index: 0, kind: input, shape index: {}]   ;;  %s2850_s1 = inlined_call_operand.vmem [shape: f32[3,32], index: 1, kind: input, shape index: {}]   ;;  %s2851_s2 = inlined_call_operand.vmem [shape: s32[32,1], index: 2, kind: input, shape index: {}]   ;;  %s2852_s3 = inlined_call_operand.vmem [shape: s32[1,32], index: 3, kind: input, shape index: {}]   ;;  %s2853_s4 = inlined_call_operand.vmem [shape: f32[1,16], index: 4, kind: input, shape index: {}]   ;;  %s2854_s5 = inlined_call_operand.vmem [shape: f32[32,32], index: 5, kind: input, shape index: {}]   ;;  %s2855_s6 = inlined_call_operand.vmem [shape: bf16[32,32], index: 6, kind: input, shape index: {}]   ;;  %s2856_s7 = inlined_call_operand.vmem [shape: bf16[32,32,16], index: 7, kind: output, shape index: {0}]   ;;  %s2857_s8 = inlined_call_operand.vmem [shape: f32[32,32], index: 8, kind: output, shape index: {1}]   ;;  %s2858_s9 = inlined_call_operand.vmem [shape: bf16[32,32], index: 9, kind: output, shape index: {2}]  }
   0x1 LB: > { %s1908_s10 = sadd.s32 4294967295, %s2270_s30   ;;  %p1912_p0 = scmp.ge.s32.totalorder %s2270_s30, 1  ;;  %s2270_s30 = sphi %s2333_s30, %s20_s30  }
   0x2   : > { %p315_p1 = scmp.lt.s32.totalorder %s2270_s30, 3 }
   0x4   : > { %p316_p2 = pnand %p1912_p0, %p315_p1 }
   0x5   : > { %s1913_s11 = sshll.u32 (!%p316_p2), %s1908_s10, 1  ;;  %s2360_s19 = sshll.u32 (!%p316_p2), %s1908_s10, 4 }
   0x6   : > { %319 = sbr.rel (%p316_p2) target bundleno = 444 (0x1bc), region = 48  ;;  %p373_p3 = scmp.lt.s32.totalorder (!%p316_p2), %s1913_s11, 3 }
   0x7   : > { %p391_p4 = scmp.lt.s32.totalorder (!%p316_p2), %s2360_s19, 31 }
   0xb   : > { %v2272_v0 = vmov 0   ;;  %s2868_s11 = smov (!%p373_p3, %s1913_s11), 3  ;;  %v2273_v3 = vmov 1   ;;  %v2274_v4 = vmov 2   ;;  %v423_v7 = vlaneseq  ;;  %v2121_v14 = vld [vmem:[%s2855_s6 + $0x8] sm:$0xff]   ;;  %v2122_v16 = vld [vmem:[%s2855_s6] sm:$0xff]  }
   0xc   : > { %2115 = vset.pattern.permute.xlu1 %v2272_v0  ;;  %2113 = vset.pattern.permute.xlu0 %v2272_v0  ;;  %s2346_s12 = sshll.u32 %s2868_s11, 3  ;;  %v487_v9 = vstv %s2360_s19  ;;  %v2275_v15 = vmov 0.0   ;;  %vm2276_vm2 = vmmov 0   ;;  %vm729_vm3 = vcmask 261120   ;;  %v412_v22 = vld [vmem:[%s2850_s1] sm:$0x7] }
   0xd   : > { %s376_s15 = scalar_lea.vmem %s2849_s0, %s2346_s12  ;;  %s382_s18 = scalar_lea.vmem %s2851_s2, %s2346_s12  ;;  %v2356_v8 = vshrl.u32 %v423_v7, 7  ;;  %v2366_v11 = vand.u32 127, %v423_v7  ;;  %2078 = vmatprep.subr.bf16.mxu0 %v2275_v15  ;;  %2082 = vmatprep.mubr.msk.bf16.mxu0 %vm2276_vm2, %v2275_v15  ;;  %v1927_v52 = vld [vmem:[%s2852_s3] ss:$0 sm:$0xff] }
   0xe   : > { %v411_v1 = vld [vmem:[%s376_s15 + $0x8] sm:$0xff]  ;;  %v410_v2 = vld [vmem:[%s376_s15] sm:$0xff]  ;;  %2079 = vmatpush3.bf16.msra.mxu0 %v2121_v14  ;;  %s388_s26 = scalar_lea.vmem %s2854_s5, %s2346_s12  ;;  %s401_s15 = scalar_lea.vmem %s2857_s8, %s2346_s12 }
   0xf   : > { %420 = vperm.xlu1 %2115, %v411_v1   ;;  %415 = vperm.xlu0 %2113, %v410_v2   ;;  %v492_v5 = vld [vmem:[%s382_s18] sm:$0xff]  ;;  %v493_v6 = vld [vmem:[%s382_s18 + $0x8] sm:$0xff]  ;;  %v2364_v10 = vadd.s32 %v487_v9, %v2356_v8  ;;  %v485_v12 = vadd.s32 8, %v2356_v8  ;;  %v2387_v20 = vsub.s32 1, %v2356_v8  ;;  %v2390_v21 = vsub.s32 0, %v2356_v8  ;;  %s2870_s19 = smov (!%p391_p4, %s2360_s19), 31 }
  0x10   : > { %2080 = vmatprep.subr.bf16.mxu0 %v2275_v15  ;;  %v1684_v17 = vld [vmem:[%s388_s26] sm:$0xff]  ;;  %v1685_v18 = vld [vmem:[%s388_s26 + $0x8] sm:$0xff]  ;;  %v2398_v27 = vsub.s32 2, %v2356_v8  ;;  %v810_v14 = vsub.s32 4, %v2356_v8  ;;  %s2008_s17 = sshll.u32 %s2870_s19, 4  ;;  %s1925_s19 = sshll.u32 %s2868_s11, 2 }
  0x11   : > { %vm507_vm0 = vcmp.ne.s32.totalorder %v2364_v10, %v2366_v11  ;;  %v2371_v13 = vadd.s32 %v487_v9, %v485_v12  ;;  %v1686_v19 = vpack.c.bf16 %v1685_v18, %v1684_v17  ;;  %v440_v25 = vrot.slane %v412_v22, %v2387_v20  ;;  %s2659_s21 = scalar_lea.vmem %s2856_s7, %s2008_s17  ;;  %s407_s24 = scalar_lea.vmem %s2858_s9, %s1925_s19 }
  0x12   : > { %2081 = vmatpush3.bf16.msra.mxu0 %v2122_v16  ;;  %v426_v26 = vrot.slane %v412_v22, %v2390_v21  ;;  %v454_v34 = vrot.slane %v412_v22, %v2398_v27  ;;  %v829_v16 = vsub.s32 5, %v2356_v8  ;;  %v848_v17 = vsub.s32 6, %v2356_v8 }
  0x13   : > { %2116 = vset.pattern.permute.xlu1 %v2273_v3  ;;  %2114 = vset.pattern.permute.xlu0 %v2273_v3  ;;  %vm508_vm1 = vcmp.ne.s32.totalorder %v2371_v13, %v2366_v11  ;;  %v791_v13 = vsub.s32 3, %v2356_v8  ;;  %v867_v18 = vsub.s32 7, %v2356_v8 }
  0x14   : > { %434 = vperm.xlu1 %2116, %v411_v1   ;;  %430 = vperm.xlu0 %2114, %v410_v2  }
  0x15   : > { %2083 = vmatmul.mubr.msk.bf16.vlgmr.msra.gmra.mxu0 %vm729_vm3, %v1686_v19 }
  0x18   : > { %2117 = vset.pattern.permute.xlu1 %v2274_v4  ;;  %2118 = vset.pattern.permute.xlu0 %v2274_v4 }
  0x19   : > { %444 = vperm.xlu1 %2117, %v410_v2   ;;  %448 = vperm.xlu0 %2118, %v411_v1  }
  0x1d   : > { %2119 = vset.pattern.permute.xlu1 %v2272_v0  ;;  %2120 = vset.pattern.permute.xlu0 %v2272_v0 }
  0x1e   : > { %496 = vperm.xlu1 %2119, %v492_v5  }
  0x22   : > { %499 = vperm.xlu1 %2119, %v493_v6  }
  0x8a   : > { %v421_v23 = vpop.permute.xlu1 %420  ;;  %v416_v24 = vpop.permute.xlu0 %415 }
  0x8b   : > { %v428_v32 = vsub.f32 %v421_v23, %v426_v26  ;;  %v427_v33 = vsub.f32 %v416_v24, %v426_v26 }
  0x8d   : > { %v458_v39 = vmul.f32 %v428_v32, %v428_v32  ;;  %v457_v40 = vmul.f32 %v427_v33, %v427_v33 }
  0x8f   : > { %v435_v28 = vpop.permute.xlu1 %434  ;;  %v431_v29 = vpop.permute.xlu0 %430 }
  0x90   : > { %v442_v30 = vsub.f32 %v435_v28, %v440_v25  ;;  %v441_v31 = vsub.f32 %v431_v29, %v440_v25 }
  0x92   : > { %v460_v35 = vmul.f32 %v442_v30, %v442_v30  ;;  %v459_v36 = vmul.f32 %v441_v31, %v441_v31 }
  0x94   : > { %v445_v37 = vpop.permute.xlu1 %444  ;;  %v449_v38 = vpop.permute.xlu0 %448  ;;  %v462_v43 = vadd.f32 %v460_v35, %v458_v39  ;;  %v461_v44 = vadd.f32 %v459_v36, %v457_v40 }
  0x95   : > { %v455_v41 = vsub.f32 %v445_v37, %v454_v34  ;;  %v456_v42 = vsub.f32 %v449_v38, %v454_v34 }
  0x97   : > { %v463_v45 = vmul.f32 %v455_v41, %v455_v41  ;;  %v464_v46 = vmul.f32 %v456_v42, %v456_v42 }
  0x99   : > { %v465_v47 = vadd.f32 %v463_v45, %v461_v44  ;;  %v466_v48 = vadd.f32 %v464_v46, %v462_v43  ;;  %v497_v51 = vpop.permute.xlu1 %496  ;;  %v2277_v43 = vmov 683565275  }
  0x9a   : > { %vm505_vm4 = vcmp.eq.s32.totalorder %v497_v51, %v1927_v52  ;;  %v2280_v51 = vmov 2102212464  }
  0x9b   : > { %v467_v49 = vmax.f32 %v465_v47, 0.0  ;;  %v468_v50 = vmax.f32 %v466_v48, 0.0  ;;  %vm509_vm9 = vmand %vm505_vm4, %vm507_vm0  ;;  %v2278_v47 = vmov 2475754826  }
  0x9d   : > { %2123 = vrsqrt.f32 %v467_v49  ;;  %v500_v53 = vpop.permute.xlu1 %499  ;;  %vm471_vm6 = vcmp.eq.f32.partialorder %v467_v49, inf  ;;  %v474_v57 = vand.u32 2147483648, %v467_v49  ;;  %vm473_vm7 = vcmp.eq.f32.partialorder %v467_v49, 0.0 }
  0x9e   : > { %2125 = vrsqrt.f32 %v468_v50  ;;  %vm506_vm5 = vcmp.eq.s32.totalorder %v500_v53, %v1927_v52  ;;  %vm478_vm8 = vcmp.eq.f32.partialorder %v468_v50, inf  ;;  %v481_v60 = vand.u32 2147483648, %v468_v50 }
  0x9f   : > { %vm480_vm10 = vcmp.eq.f32.partialorder %v468_v50, 0.0  ;;  %vm510_vm11 = vmand %vm506_vm5, %vm508_vm1  ;;  %v2281_v53 = vmov 920167782  }
  0xaa   : > { %v2124_v54 = vpop.eup %2123 }
  0xab   : > { %v2126_v55 = vpop.eup %2125  ;;  %v470_v56 = vmul.f32 %v2124_v54, %v467_v49 }
  0xac   : > { %v477_v58 = vmul.f32 %v2126_v55, %v468_v50 }
  0xad   : > { %v472_v59 = vsel %vm471_vm6, %v467_v49, %v470_v56  ;;  %v2279_v49 = vmov 2131351028  }
  0xae   : > { %v2407_v61 = vsel %vm473_vm7, %v474_v57, %v472_v59  ;;  %v479_v62 = vsel %vm478_vm8, %v468_v50, %v477_v58 }
  0xaf   : > { %v2412_v63 = vsel %vm480_vm10, %v481_v60, %v479_v62  ;;  %vm511_vm12 = vcmp.le.f32.partialorder %v2407_v61, 10.0  ;;  %v2416_v0 = vmul.f32 0.31415927, %v2407_v61  ;;  %v735_v1 = vrot.slane %v2407_v61, %v2390_v21 }
  0xb0   : > { %vm2420_vm13 = vmand %vm509_vm9, %vm511_vm12  ;;  %vm512_vm14 = vcmp.le.f32.partialorder %v2412_v63, 10.0  ;;  %v2426_v3 = vmul.f32 0.31415927, %v2412_v63  ;;  %v754_v24 = vrot.slane %v2407_v61, %v2387_v20  ;;  %v2450_v28 = vrot.slane %v2412_v63, %v791_v13 }
  0xb1   : > { %v517_v4 = vand.u32 2147483647, %v2416_v0  ;;  %v520_v5 = vand.u32 2139095040, %v2416_v0  ;;  %vm2430_vm15 = vmand %vm510_vm11, %vm512_vm14  ;;  %741 = vbcast.lane.b32.xlu1 %v735_v1, 264  ;;  %737 = vbcast.lane.b32.xlu0 %v735_v1, 256  ;;  %v2453_v29 = vrot.slane %v2412_v63, %v810_v14  ;;  %v2458_v30 = vrot.slane %v2412_v63, %v829_v16 }
  0xb2   : > { %v623_v7 = vand.u32 2139095040, %v2426_v3  ;;  %v620_v10 = vand.u32 2147483647, %v2426_v3  ;;  %v2463_v31 = vrot.slane %v2412_v63, %v848_v17  ;;  %v2468_v32 = vrot.slane %v2412_v63, %v867_v18 }
  0xb3   : > { %v521_v9 = vshrl.u32 %v520_v5, 23  ;;  %v524_v11 = vand.u32 8388607, %v517_v4  ;;  %v773_v37 = vrot.slane %v2407_v61, %v2398_v27  ;;  %v2476_v40 = vrot.slane %v2407_v61, %v791_v13 }
  0xb4   : > { %v624_v12 = vshrl.u32 %v623_v7, 23  ;;  %v2445_v23 = vand.u32 8388607, %v620_v10  ;;  %v2479_v41 = vrot.slane %v2407_v61, %v810_v14  ;;  %v2282_v60 = vmov 1326507024  }
  0xb5   : > { %v1928_v15 = vadd.s32 4294967169, %v521_v9  ;;  %749 = vbcast.lane.b32.xlu1 %v735_v1, 280  ;;  %745 = vbcast.lane.b32.xlu0 %v735_v1, 272  ;;  %v525_v25 = vor.u32 8388608, %v524_v11 }
  0xb6   : > { %v1932_v19 = vadd.s32 4294967169, %v624_v12  ;;  %v628_v39 = vor.u32 8388608, %v2445_v23 }
  0xb7   : > { %v527_v22 = vadd.s32 1, %v1928_v15  ;;  %v2472_v38 = vshll.u32 %v525_v25, 8 }
  0xb8   : > { %v630_v26 = vadd.s32 1, %v1932_v19 }
  0xb9   : > { %vm528_vm0 = vcmp.gt.s32.totalorder %v527_v22, 0  ;;  %760 = vbcast.lane.b32.xlu1 %v754_v24, 264  ;;  %756 = vbcast.lane.b32.xlu0 %v754_v24, 256 }
  0xba   : > { %v529_v33 = vsel %vm528_vm0, %v527_v22, 0  ;;  %vm631_vm1 = vcmp.gt.s32.totalorder %v630_v26, 0 }
  0xbb   : > { %v530_v34 = vshrl.u32 %v529_v33, 5  ;;  %v531_v35 = vand.u32 31, %v529_v33  ;;  %v632_v36 = vsel %vm631_vm1, %v630_v26, 0  ;;  %vm519_vm1 = vcmp.lt.s32.totalorder %v2416_v0, 0 }
  0xbc   : > { %v2482_v45 = vshrl.u32 %v632_v36, 5  ;;  %v2484_v46 = vand.u32 31, %v632_v36 }
  0xbd   : > { %v532_v42 = vsub.s32 32, %v531_v35  ;;  %v534_v44 = vshll.u32 %v2277_v43, %v531_v35  ;;  %768 = vbcast.lane.b32.xlu1 %v754_v24, 280  ;;  %764 = vbcast.lane.b32.xlu0 %v754_v24, 272  ;;  %v537_v48 = vshll.u32 %v2278_v47, %v531_v35  ;;  %v540_v50 = vshll.u32 %v2279_v49, %v531_v35 }
  0xbe   : > { %v543_v52 = vshll.u32 %v2280_v51, %v531_v35  ;;  %v546_v54 = vshll.u32 %v2281_v53, %v531_v35  ;;  %vm549_vm2 = vcmp.lt.s32.totalorder %v530_v34, 1  ;;  %vm550_vm4 = vcmp.lt.s32.totalorder %v530_v34, 2 }
  0xbf   : > { %v535_v55 = vshrl.u32 %v2278_v47, %v532_v42  ;;  %v538_v56 = vshrl.u32 %v2279_v49, %v532_v42  ;;  %v541_v57 = vshrl.u32 %v2280_v51, %v532_v42  ;;  %v533_v58 = vshrl.u32 %v2277_v43, %v532_v42 }
  0xc0   : > { %v544_v59 = vshrl.u32 %v2281_v53, %v532_v42  ;;  %v547_v62 = vshrl.u32 %v2282_v60, %v532_v42  ;;  %v635_v9 = vsub.s32 32, %v2484_v46  ;;  %vm551_vm5 = vcmp.lt.s32.totalorder %v530_v34, 3 }
  0xc1   : > { %v536_v1 = vor.u32 %v535_v55, %v534_v44  ;;  %v539_v5 = vor.u32 %v538_v56, %v537_v48  ;;  %v542_v7 = vor.u32 %v541_v57, %v540_v50  ;;  %779 = vbcast.lane.b32.xlu1 %v773_v37, 264  ;;  %775 = vbcast.lane.b32.xlu0 %v773_v37, 256  ;;  %vm552_vm6 = vcmp.lt.s32.totalorder %v530_v34, 4 }
  0xc2   : > { %v545_v11 = vor.u32 %v544_v59, %v543_v52  ;;  %v548_v12 = vor.u32 %v547_v62, %v546_v54  ;;  %v637_v26 = vshll.u32 %v2277_v43, %v2484_v46  ;;  %v638_v36 = vshrl.u32 %v2278_v47, %v635_v9 }
  0xc3   : > { %v553_v13 = vsel %vm549_vm2, %v533_v58, %v536_v1  ;;  %v554_v14 = vsel %vm552_vm6, %v542_v7, 2102212464  ;;  %v557_v15 = vsel %vm549_vm2, %v536_v1, %v539_v5  ;;  %v561_v19 = vsel %vm549_vm2, %v539_v5, %v542_v7 }
  0xc4   : > { %v555_v22 = vsel %vm551_vm5, %v539_v5, %v554_v14  ;;  %v558_v24 = vsel %vm552_vm6, %v545_v11, 920167782  ;;  %v562_v25 = vsel %vm552_vm6, %v548_v12, 1326507024  ;;  %v640_v42 = vshll.u32 %v2278_v47, %v2484_v46 }
  0xc5   : > { %v559_v33 = vsel %vm551_vm5, %v542_v7, %v558_v24  ;;  %v563_v35 = vsel %vm551_vm5, %v545_v11, %v562_v25  ;;  %787 = vbcast.lane.b32.xlu1 %v773_v37, 280  ;;  %v556_v44 = vsel %vm550_vm4, %v553_v13, %v555_v22  ;;  %v641_v52 = vshrl.u32 %v2279_v49, %v635_v9 }
  0xc6   : > { %v560_v48 = vsel %vm550_vm4, %v557_v15, %v559_v33  ;;  %v564_v50 = vsel %vm550_vm4, %v561_v19, %v563_v35  ;;  %783 = vbcast.lane.b32.xlu0 %v773_v37, 272  ;;  %v639_v58 = vor.u32 %v638_v36, %v637_v26  ;;  %v643_v59 = vshll.u32 %v2279_v49, %v2484_v46 }
  0xc7   : > { %v2498_v54 = vmul.u32.u64.low %v2472_v38, %v564_v50  ;;  %v2499_v55 = vmul.u32.u64.high %v2472_v38, %v564_v50, %v2498_v54  ;;  %v2502_v56 = vmul.u32.u64.low %v2472_v38, %v560_v48  ;;  %v2503_v57 = vmul.u32.u64.high %v2472_v38, %v560_v48, %v2502_v56 }
  0xc8   : > { %v642_v47 = vor.u32 %v641_v52, %v640_v42  ;;  %v644_v62 = vshrl.u32 %v2280_v51, %v635_v9  ;;  %v646_v1 = vshll.u32 %v2280_v51, %v2484_v46  ;;  %v647_v34 = vshrl.u32 %v2281_v53, %v635_v9 }
  0xc9   : > { %v650_v5 = vshrl.u32 %v2282_v60, %v635_v9  ;;  %v668_v37 = vshll.u32 %v628_v39, 8  ;;  %798 = vbcast.lane.b32.xlu1 %v2476_v40, 264  ;;  %v572_v7 = vmul.u32 %v2472_v38, %v556_v44  ;;  %v636_v11 = vshrl.u32 %v2277_v43, %v635_v9 }
  0xca   : > { %v645_v12 = vor.u32 %v644_v62, %v643_v59  ;;  %v649_v13 = vshll.u32 %v2281_v53, %v2484_v46  ;;  %794 = vbcast.lane.b32.xlu0 %v2476_v40, 256  ;;  %vm574_vm7 = vc.u32 %v2499_v55, %v2502_v56  ;;  %v575_v49 = vadd.s32 1, %v2503_v57 }
  0xcb   : > { %v648_v51 = vor.u32 %v647_v34, %v646_v1  ;;  %vm652_vm8 = vcmp.lt.s32.totalorder %v2482_v45, 1  ;;  %vm654_vm9 = vcmp.lt.s32.totalorder %v2482_v45, 3  ;;  %vm655_vm10 = vcmp.lt.s32.totalorder %v2482_v45, 4 }
  0xcc   : > { %v651_v23 = vor.u32 %v650_v5, %v649_v13  ;;  %v660_v38 = vsel %vm652_vm8, %v639_v58, %v642_v47  ;;  %v576_v39 = vsel %vm574_vm7, %v575_v49, %v2503_v57  ;;  %v657_v43 = vsel %vm655_vm10, %v645_v12, 2102212464 }
  0xcd   : > { %v661_v46 = vsel %vm655_vm10, %v648_v51, 920167782  ;;  %v664_v53 = vsel %vm652_vm8, %v642_v47, %v645_v12  ;;  %806 = vbcast.lane.b32.xlu1 %v2476_v40, 280  ;;  %v577_v60 = vadd.s32 %v576_v39, %v572_v7  ;;  %vm653_vm11 = vcmp.lt.s32.totalorder %v2482_v45, 2 }
  0xce   : > { %v662_v9 = vsel %vm654_vm9, %v645_v12, %v661_v46  ;;  %v665_v14 = vsel %vm655_vm10, %v651_v23, 1326507024  ;;  %802 = vbcast.lane.b32.xlu0 %v2476_v40, 272  ;;  %v656_v15 = vsel %vm652_vm8, %v636_v11, %v639_v58  ;;  %v658_v19 = vsel %vm654_vm9, %v642_v47, %v657_v43 }
  0xcf   : > { %v663_v22 = vsel %vm653_vm11, %v660_v38, %v662_v9  ;;  %v666_v24 = vsel %vm654_vm9, %v648_v51, %v665_v14  ;;  %v578_v25 = vadd.s32 536870912, %v577_v60  ;;  %v659_v40 = vsel %vm653_vm11, %v656_v15, %v658_v19 }
  0xd0   : > { %v667_v26 = vsel %vm653_vm11, %v664_v53, %v666_v24  ;;  %v2531_v33 = vmul.u32.u64.low %v668_v37, %v663_v22  ;;  %v2532_v35 = vmul.u32.u64.high %v668_v37, %v663_v22, %v2531_v33  ;;  %v675_v50 = vmul.u32 %v668_v37, %v659_v40 }
  0xd1   : > { %v2534_v36 = vmul.u32.u64.low %v668_v37, %v667_v26  ;;  %v2535_v42 = vmul.u32.u64.high %v668_v37, %v667_v26, %v2534_v36  ;;  %817 = vbcast.lane.b32.xlu1 %v2479_v41, 264  ;;  %v2538_v44 = vshrl.u32 %v578_v25, 30  ;;  %v830_v58 = vrot.slane %v2407_v61, %v829_v16 }
  0xd2   : > { %813 = vbcast.lane.b32.xlu0 %v2479_v41, 256  ;;  %v678_v45 = vadd.s32 1, %v2532_v35  ;;  %v573_v12 = vadd.s32 %v2502_v56, %v2499_v55  ;;  %vm2567_vm2 = vcmp.le.f32.partialorder %v517_v4, 0.7853982  ;;  %vm622_vm4 = vcmp.lt.s32.totalorder %v2426_v3, 0 }
  0xd3   : > { %v580_v48 = vshll.u32 %v2538_v44, 30  ;;  %vm677_vm12 = vc.u32 %v2535_v42, %v2531_v33  ;;  %v676_v15 = vadd.s32 %v2531_v33, %v2535_v42  ;;  %vm2585_vm5 = vcmp.le.f32.partialorder %v620_v10, 0.7853982 }
  0xd4   : > { %v679_v54 = vsel %vm677_vm12, %v678_v45, %v2532_v35  ;;  %v603_v45 = vsub.s32 4, %v2538_v44  ;;  %vm609_vm9 = vweird.f32 %v2416_v0 }
  0xd5   : > { %825 = vbcast.lane.b32.xlu1 %v2479_v41, 280  ;;  %v581_v52 = vsub.s32 %v577_v60, %v580_v48  ;;  %v680_v57 = vadd.s32 %v679_v54, %v675_v50  ;;  %v868_v60 = vrot.slane %v2407_v61, %v867_v18  ;;  %v887_v18 = vrot.slane %v2412_v63, %v2390_v21 }
  0xd6   : > { %821 = vbcast.lane.b32.xlu0 %v2479_v41, 272  ;;  %v849_v41 = vrot.slane %v2407_v61, %v848_v17 }
  0xd7   : > { %v583_v47 = vsub.s32 0, %v581_v52  ;;  %v681_v59 = vadd.s32 536870912, %v680_v57 }
  0xd9   : > { %836 = vbcast.lane.b32.xlu1 %v830_v58, 264  ;;  %v1929_v62 = vmin.u32 %v583_v47, %v581_v52  ;;  %v2550_v1 = vshrl.u32 %v681_v59, 30 }
  0xda   : > { %832 = vbcast.lane.b32.xlu0 %v830_v58, 256 }
  0xdb   : > { %v585_v34 = vclz %v1929_v62  ;;  %v683_v5 = vshll.u32 %v2550_v1, 30 }
  0xdd   : > { %844 = vbcast.lane.b32.xlu1 %v830_v58, 280  ;;  %v1930_v37 = vadd.s32 4294967294, %v585_v34  ;;  %v684_v7 = vsub.s32 %v680_v57, %v683_v5  ;;  %v906_v57 = vrot.slane %v2412_v63, %v2387_v20  ;;  %v706_v20 = vsub.s32 4, %v2550_v1 }
  0xde   : > { %840 = vbcast.lane.b32.xlu0 %v830_v58, 272  ;;  %v925_v34 = vrot.slane %v2412_v63, %v2398_v27 }
  0xdf   : > { %vm1931_vm14 = vcmp.lt.s32.totalorder %v1930_v37, 0  ;;  %v686_v11 = vsub.s32 0, %v684_v7 }
  0xe0   : > { %v588_v16 = vsel %vm1931_vm14, 0, %v1930_v37  ;;  %vm712_vm14 = vweird.f32 %v2426_v3 }
  0xe1   : > { %855 = vbcast.lane.b32.xlu1 %v849_v41, 264  ;;  %v589_v13 = vsub.s32 32, %v588_v16  ;;  %v593_v49 = vsub.s32 4294967266, %v588_v16  ;;  %v1933_v51 = vmin.u32 %v686_v11, %v684_v7  ;;  %v590_v23 = vshll.u32 %v581_v52, %v588_v16 }
  0xe2   : > { %851 = vbcast.lane.b32.xlu0 %v849_v41, 256  ;;  %v604_v52 = vsel %vm519_vm1, %v603_v45, %v2538_v44 }
  0xe3   : > { %v591_v38 = vshrl.u32 %v573_v12, %v589_v13  ;;  %v594_v39 = vadd.s32 127, %v593_v49  ;;  %v688_v43 = vclz %v1933_v51  ;;  %v606_v59 = vsel %vm2567_vm2, 0, %v604_v52 }
  0xe4   : > { %v610_v10 = vand.u32 3, %v606_v59 }
  0xe5   : > { %863 = vbcast.lane.b32.xlu1 %v849_v41, 280  ;;  %v592_v46 = vor.u32 %v591_v38, %v590_v23  ;;  %v595_v53 = vshll.u32 %v594_v39, 23  ;;  %v1934_v17 = vadd.s32 4294967294, %v688_v43 }
  0xe6   : > { %859 = vbcast.lane.b32.xlu0 %v849_v41, 272  ;;  %vm615_vm6 = vcmp.eq.s32.totalorder %v610_v10, 2  ;;  %vm612_vm7 = vcmp.eq.s32.totalorder %v610_v10, 0  ;;  %vm611_vm8 = vcmp.lt.s32.totalorder %v610_v10, 2 }
  0xe7   : > { %v596_v9 = vor.u32 4788187, %v595_v53  ;;  %vm1935_vm0 = vcmp.lt.s32.totalorder %v1934_v17, 0  ;;  %v599_v56 = vcvt.s32.f32 %v592_v46 }
  0xe8   : > { %v691_v14 = vsel %vm1935_vm0, 0, %v1934_v17 }
  0xe9   : > { %874 = vbcast.lane.b32.xlu1 %v868_v60, 264  ;;  %v597_v55 = vand.u32 2147483647, %v596_v9  ;;  %v692_v19 = vsub.s32 32, %v691_v14  ;;  %v696_v22 = vsub.s32 4294967266, %v691_v14  ;;  %v693_v25 = vshll.u32 %v684_v7, %v691_v14 }
  0xea   : > { %870 = vbcast.lane.b32.xlu0 %v868_v60, 256  ;;  %v707_v7 = vsel %vm622_vm4, %v706_v20, %v2550_v1 }
  0xeb   : > { %v600_v24 = vmul.f32 %v599_v56, %v597_v55  ;;  %v694_v26 = vshrl.u32 %v676_v15, %v692_v19  ;;  %v697_v35 = vadd.s32 127, %v696_v22  ;;  %v709_v12 = vsel %vm2585_vm5, 0, %v707_v7 }
  0xec   : > { %v713_v49 = vand.u32 3, %v709_v12 }
  0xed   : > { %882 = vbcast.lane.b32.xlu1 %v868_v60, 280  ;;  %v601_v36 = vxor.u32 2147483648, %v600_v24  ;;  %v695_v8 = vor.u32 %v694_v26, %v693_v25  ;;  %v698_v61 = vshll.u32 %v697_v35, 23 }
  0xee   : > { %878 = vbcast.lane.b32.xlu0 %v868_v60, 272  ;;  %vm718_vm10 = vcmp.eq.s32.totalorder %v713_v49, 2  ;;  %vm715_vm11 = vcmp.eq.s32.totalorder %v713_v49, 0  ;;  %vm714_vm12 = vcmp.lt.s32.totalorder %v713_v49, 2 }
  0xef   : > { %v602_v42 = vsel %vm519_vm1, %v601_v36, %v600_v24  ;;  %v699_v48 = vor.u32 4788187, %v698_v61  ;;  %v702_v50 = vcvt.s32.f32 %v695_v8 }
  0xf0   : > { %v605_v40 = vsel %vm2567_vm2, %v2416_v0, %v602_v42 }
  0xf1   : > { %893 = vbcast.lane.b32.xlu1 %v887_v18, 264  ;;  %2127 = vcosq.f32 %v605_v40  ;;  %v700_v21 = vand.u32 2147483647, %v699_v48 }
  0xf2   : > { %889 = vbcast.lane.b32.xlu0 %v887_v18, 256  ;;  %2129 = vsinq.f32 %v605_v40 }
  0xf3   : > { %v703_v4 = vmul.f32 %v702_v50, %v700_v21 }
  0xf5   : > { %901 = vbcast.lane.b32.xlu1 %v887_v18, 280  ;;  %v704_v54 = vxor.u32 2147483648, %v703_v4 }
  0xf6   : > { %897 = vbcast.lane.b32.xlu0 %v887_v18, 272 }
  0xf7   : > { %v705_v47 = vsel %vm622_vm4, %v704_v54, %v703_v4 }
  0xf8   : > { %v708_v44 = vsel %vm2585_vm5, %v2426_v3, %v705_v47  ;;  %v2632_v3 = vld [vmem:[%s2853_s4] ss:$0 sm:$0xff] }
  0xf9   : > { %912 = vbcast.lane.b32.xlu1 %v906_v57, 264  ;;  %2131 = vcosq.f32 %v708_v44 }
  0xfa   : > { %908 = vbcast.lane.b32.xlu0 %v906_v57, 256  ;;  %2133 = vsinq.f32 %v708_v44 }
  0xfd   : > { %920 = vbcast.lane.b32.xlu1 %v906_v57, 280 }
  0xfe   : > { %916 = vbcast.lane.b32.xlu0 %v906_v57, 272  ;;  %v2128_v62 = vpop.eup %2127 }
  0xff   : > { %v2130_v5 = vpop.eup %2129  ;;  %v616_v37 = vxor.u32 2147483648, %v2128_v62 }
 0x100   : > { %v613_v41 = vxor.u32 2147483648, %v2130_v5 }
 0x101   : > { %931 = vbcast.lane.b32.xlu1 %v925_v34, 264  ;;  %v617_v16 = vsel %vm615_vm6, %v616_v37, %v2130_v5 }
 0x102   : > { %927 = vbcast.lane.b32.xlu0 %v925_v34, 256  ;;  %v614_v11 = vsel %vm612_vm7, %v2128_v62, %v613_v41 }
 0x103   : > { %v618_v27 = vsel %vm611_vm8, %v614_v11, %v617_v16 }
 0x104   : > { %v619_v63 = vsel %vm609_vm9, nan, %v618_v27 }
 0x105   : > { %939 = vbcast.lane.b32.xlu1 %v925_v34, 280  ;;  %v723_v13 = vadd.f32 1.0, %v619_v63 }
 0x106   : > { %935 = vbcast.lane.b32.xlu0 %v925_v34, 272  ;;  %v2132_v1 = vpop.eup %2131 }
 0x107   : > { %v725_v51 = vmul.f32 0.5, %v723_v13  ;;  %v2134_v23 = vpop.eup %2133  ;;  %v719_v38 = vxor.u32 2147483648, %v2132_v1 }
 0x108   : > { %v716_v0 = vxor.u32 2147483648, %v2134_v23 }
 0x109   : > { %950 = vbcast.lane.b32.xlu1 %v2450_v28, 264  ;;  %v727_v39 = vsel %vm2420_vm13, %v725_v51, 0.0  ;;  %v720_v43 = vsel %vm718_vm10, %v719_v38, %v2134_v23  ;;  %vm1755_vm13 = vcmask 257024  }
 0x10a   : > { %946 = vbcast.lane.b32.xlu0 %v2450_v28, 256  ;;  %730 = vst.msk [vmem:[%s401_s15] sm:$0xff] %vm729_vm3, %v727_v39  ;;  %v717_v46 = vsel %vm715_vm11, %v2132_v1, %v716_v0 }
 0x10b   : > { %v721_v53 = vsel %vm714_vm12, %v717_v46, %v720_v43  ;;  %v1740_v46 = vpop.f32.mrf.mxu0 }
 0x10c   : > { %v722_v17 = vsel %vm712_vm14, nan, %v721_v53 }
 0x10d   : > { %958 = vbcast.lane.b32.xlu1 %v2450_v28, 280  ;;  %v724_v2 = vadd.f32 1.0, %v722_v17 }
 0x10e   : > { %954 = vbcast.lane.b32.xlu0 %v2450_v28, 272 }
 0x10f   : > { %v726_v60 = vmul.f32 0.5, %v724_v2 }
 0x111   : > { %969 = vbcast.lane.b32.xlu1 %v2453_v29, 264  ;;  %v728_v9 = vsel %vm2430_vm15, %v726_v60, 0.0 }
 0x112   : > { %965 = vbcast.lane.b32.xlu0 %v2453_v29, 256  ;;  %731 = vst.msk [vmem:[%s401_s15 + $0x8] sm:$0xff] %vm729_vm3, %v728_v9  ;;  %vm1619_vm3 = vcmask 125952   ;;  %v2073_v9 = vpack.c.bf16 %v1740_v46, %v1740_v46 }
 0x114   : > { %1756 = vst.msk [vmem:[%s407_s24] sm:$0xf] %vm1755_vm13, %v2073_v9 }
 0x115   : > { %977 = vbcast.lane.b32.xlu1 %v2453_v29, 280 }
 0x116   : > { %973 = vbcast.lane.b32.xlu0 %v2453_v29, 272 }
 0x119   : > { %988 = vbcast.lane.b32.xlu1 %v2458_v30, 264 }
 0x11a   : > { %984 = vbcast.lane.b32.xlu0 %v2458_v30, 256 }
 0x11d   : > { %996 = vbcast.lane.b32.xlu1 %v2458_v30, 280 }
 0x11e   : > { %992 = vbcast.lane.b32.xlu0 %v2458_v30, 272 }
 0x121   : > { %1007 = vbcast.lane.b32.xlu1 %v2463_v31, 264 }
 0x122   : > { %1003 = vbcast.lane.b32.xlu0 %v2463_v31, 256 }
 0x123   : > { %v742_v6 = vpop.permute.xlu1 %741  ;;  %v738_v28 = vpop.permute.xlu0 %737 }
 0x124   : > { %v1044_v29 = vsub.f32 %v742_v6, %v2632_v3  ;;  %v1043_v55 = vsub.f32 %v738_v28, %v2632_v3 }
 0x125   : > { %1015 = vbcast.lane.b32.xlu1 %v2463_v31, 280 }
 0x126   : > { %v1108_v56 = vmul.f32 -1.125, %v1044_v29  ;;  %v1107_v14 = vmul.f32 -1.125, %v1043_v55  ;;  %1011 = vbcast.lane.b32.xlu0 %v2463_v31, 272 }
 0x127   : > { %v750_v30 = vpop.permute.xlu1 %749  ;;  %v746_v15 = vpop.permute.xlu0 %745 }
 0x128   : > { %v1172_v19 = vmul.f32 %v1108_v56, %v1044_v29  ;;  %v1171_v22 = vmul.f32 %v1107_v14, %v1043_v55  ;;  %v1046_v24 = vsub.f32 %v750_v30, %v2632_v3  ;;  %v1045_v25 = vsub.f32 %v746_v15, %v2632_v3  ;;  %v2084_v55 = vpop.f32.mrf.mxu0 }
 0x129   : > { %1026 = vbcast.lane.b32.xlu1 %v2468_v32, 264 }
 0x12a   : > { %v1237_v26 = vmul.f32 1.442695, %v1172_v19  ;;  %v1235_v35 = vmul.f32 1.442695, %v1171_v22  ;;  %v1110_v36 = vmul.f32 -1.125, %v1046_v24  ;;  %v1109_v8 = vmul.f32 -1.125, %v1045_v25 }
 0x12b   : > { %1022 = vbcast.lane.b32.xlu0 %v2468_v32, 256  ;;  %v761_v61 = vpop.permute.xlu1 %760  ;;  %v757_v18 = vpop.permute.xlu0 %756 }
 0x12c   : > { %2135 = vpow2.f32 %v1237_v26  ;;  %v1174_v31 = vmul.f32 %v1110_v36, %v1046_v24  ;;  %v1173_v33 = vmul.f32 %v1109_v8, %v1045_v25  ;;  %v1048_v42 = vsub.f32 %v761_v61, %v2632_v3  ;;  %v1743_v25 = vpop.f32.mrf.mxu0 }
 0x12d   : > { %2137 = vpow2.f32 %v1235_v35  ;;  %v1047_v40 = vsub.f32 %v757_v18, %v2632_v3  ;;  %1034 = vbcast.lane.b32.xlu1 %v2468_v32, 280  ;;  %v2074_v61 = vpack.c.bf16 %v1743_v25, %v1743_v25 }
 0x12e   : > { %v1241_v48 = vmul.f32 1.442695, %v1174_v31  ;;  %v1239_v45 = vmul.f32 1.442695, %v1173_v33  ;;  %v1112_v21 = vmul.f32 -1.125, %v1048_v42 }
 0x12f   : > { %v1111_v50 = vmul.f32 -1.125, %v1047_v40  ;;  %1030 = vbcast.lane.b32.xlu0 %v2468_v32, 272  ;;  %v769_v4 = vpop.permute.xlu1 %768  ;;  %v765_v52 = vpop.permute.xlu0 %764  ;;  %1757 = vst.msk [vmem:[%s407_s24 + $0x4] sm:$0xf] %vm1755_vm13, %v2074_v61 }
 0x130   : > { %2139 = vpow2.f32 %v1241_v48  ;;  %v1176_v54 = vmul.f32 %v1112_v21, %v1048_v42  ;;  %v1050_v57 = vsub.f32 %v769_v4, %v2632_v3  ;;  %v1049_v58 = vsub.f32 %v765_v52, %v2632_v3  ;;  %v2085_v42 = vpop.f32.mrf.mxu0 }
 0x131   : > { %2141 = vpow2.f32 %v1239_v45  ;;  %v1175_v47 = vmul.f32 %v1111_v50, %v1047_v40 }
 0x132   : > { %v1245_v59 = vmul.f32 1.442695, %v1176_v54  ;;  %v1114_v44 = vmul.f32 -1.125, %v1050_v57  ;;  %v1113_v20 = vmul.f32 -1.125, %v1049_v58 }
 0x133   : > { %v1243_v10 = vmul.f32 1.442695, %v1175_v47  ;;  %v780_v62 = vpop.permute.xlu1 %779  ;;  %v776_v34 = vpop.permute.xlu0 %775 }
 0x134   : > { %2143 = vpow2.f32 %v1245_v59  ;;  %v1178_v32 = vmul.f32 %v1114_v44, %v1050_v57  ;;  %v1177_v5 = vmul.f32 %v1113_v20, %v1049_v58  ;;  %v1052_v37 = vsub.f32 %v780_v62, %v2632_v3 }
 0x135   : > { %2145 = vpow2.f32 %v1243_v10  ;;  %v1051_v7 = vsub.f32 %v776_v34, %v2632_v3 }
 0x136   : > { %v1249_v41 = vmul.f32 1.442695, %v1178_v32  ;;  %v1247_v16 = vmul.f32 1.442695, %v1177_v5  ;;  %v1116_v11 = vmul.f32 -1.125, %v1052_v37 }
 0x137   : > { %v1115_v12 = vmul.f32 -1.125, %v1051_v7  ;;  %v788_v27 = vpop.permute.xlu1 %787 }
 0x138   : > { %2147 = vpow2.f32 %v1249_v41  ;;  %v1180_v63 = vmul.f32 %v1116_v11, %v1052_v37  ;;  %v1054_v13 = vsub.f32 %v788_v27, %v2632_v3  ;;  %v784_v49 = vpop.permute.xlu0 %783 }
 0x139   : > { %v2136_v1 = vpop.eup %2135  ;;  %2149 = vpow2.f32 %v1247_v16  ;;  %v1179_v51 = vmul.f32 %v1115_v12, %v1051_v7  ;;  %v1053_v23 = vsub.f32 %v784_v49, %v2632_v3 }
 0x13a   : > { %v2138_v38 = vpop.eup %2137  ;;  %v2010_v39 = vpack.c.bf16 %v2136_v1, %v2136_v1  ;;  %v1253_v0 = vmul.f32 1.442695, %v1180_v63  ;;  %v1118_v43 = vmul.f32 -1.125, %v1054_v13 }
 0x13b   : > { %v2009_v53 = vpack.c.bf16 %v2138_v38, %v2138_v38  ;;  %v1251_v17 = vmul.f32 1.442695, %v1179_v51  ;;  %v1117_v2 = vmul.f32 -1.125, %v1053_v23  ;;  %v799_v60 = vpop.permute.xlu1 %798 }
 0x13c   : > { %1621 = vst.msk [vmem:[%s2659_s21 + $0x4] sm:$0xf] %vm1619_vm3, %v2010_v39  ;;  %2151 = vpow2.f32 %v1253_v0  ;;  %v1182_v6 = vmul.f32 %v1118_v43, %v1054_v13  ;;  %v1056_v28 = vsub.f32 %v799_v60, %v2632_v3  ;;  %v795_v29 = vpop.permute.xlu0 %794 }
 0x13d   : > { %v2140_v56 = vpop.eup %2139  ;;  %1620 = vst.msk [vmem:[%s2659_s21] sm:$0xf] %vm1619_vm3, %v2009_v53  ;;  %2153 = vpow2.f32 %v1251_v17  ;;  %v1181_v14 = vmul.f32 %v1117_v2, %v1053_v23  ;;  %v1055_v30 = vsub.f32 %v795_v29, %v2632_v3 }
 0x13e   : > { %v2142_v15 = vpop.eup %2141  ;;  %v2012_v19 = vpack.c.bf16 %v2140_v56, %v2140_v56  ;;  %v1257_v22 = vmul.f32 1.442695, %v1182_v6  ;;  %v1120_v24 = vmul.f32 -1.125, %v1056_v28 }
 0x13f   : > { %v2011_v26 = vpack.c.bf16 %v2142_v15, %v2142_v15  ;;  %v1255_v35 = vmul.f32 1.442695, %v1181_v14  ;;  %v1119_v36 = vmul.f32 -1.125, %v1055_v30  ;;  %v807_v8 = vpop.permute.xlu1 %806 }
 0x140   : > { %1623 = vst.msk [vmem:[%s2659_s21 + $0xc] sm:$0xf] %vm1619_vm3, %v2012_v19  ;;  %2155 = vpow2.f32 %v1257_v22  ;;  %v1184_v18 = vmul.f32 %v1120_v24, %v1056_v28  ;;  %v1058_v31 = vsub.f32 %v807_v8, %v2632_v3  ;;  %v803_v33 = vpop.permute.xlu0 %802 }
 0x141   : > { %v2144_v40 = vpop.eup %2143  ;;  %1622 = vst.msk [vmem:[%s2659_s21 + $0x8] sm:$0xf] %vm1619_vm3, %v2011_v26  ;;  %2157 = vpow2.f32 %v1255_v35  ;;  %v1183_v48 = vmul.f32 %v1119_v36, %v1055_v30  ;;  %v1057_v45 = vsub.f32 %v803_v33, %v2632_v3 }
 0x142   : > { %v2146_v21 = vpop.eup %2145  ;;  %v2014_v50 = vpack.c.bf16 %v2144_v40, %v2144_v40  ;;  %v1261_v4 = vmul.f32 1.442695, %v1184_v18  ;;  %v1122_v52 = vmul.f32 -1.125, %v1058_v31 }
 0x143   : > { %v2013_v54 = vpack.c.bf16 %v2146_v21, %v2146_v21  ;;  %v1259_v57 = vmul.f32 1.442695, %v1183_v48  ;;  %v1121_v58 = vmul.f32 -1.125, %v1057_v45  ;;  %v818_v47 = vpop.permute.xlu1 %817 }
 0x144   : > { %1625 = vst.msk [vmem:[%s2659_s21 + $0x14] sm:$0xf] %vm1619_vm3, %v2014_v50  ;;  %2159 = vpow2.f32 %v1261_v4  ;;  %v1186_v59 = vmul.f32 %v1122_v52, %v1058_v31  ;;  %v1060_v44 = vsub.f32 %v818_v47, %v2632_v3  ;;  %v814_v20 = vpop.permute.xlu0 %813 }
 0x145   : > { %v2148_v10 = vpop.eup %2147  ;;  %1624 = vst.msk [vmem:[%s2659_s21 + $0x10] sm:$0xf] %vm1619_vm3, %v2013_v54  ;;  %2161 = vpow2.f32 %v1259_v57  ;;  %v1185_v62 = vmul.f32 %v1121_v58, %v1057_v45  ;;  %v1059_v34 = vsub.f32 %v814_v20, %v2632_v3 }
 0x146   : > { %v2150_v32 = vpop.eup %2149  ;;  %v2016_v5 = vpack.c.bf16 %v2148_v10, %v2148_v10  ;;  %v1265_v37 = vmul.f32 1.442695, %v1186_v59  ;;  %v1124_v7 = vmul.f32 -1.125, %v1060_v44 }
 0x147   : > { %v2015_v41 = vpack.c.bf16 %v2150_v32, %v2150_v32  ;;  %v1263_v16 = vmul.f32 1.442695, %v1185_v62  ;;  %v1123_v11 = vmul.f32 -1.125, %v1059_v34  ;;  %v826_v12 = vpop.permute.xlu1 %825 }
 0x148   : > { %1627 = vst.msk [vmem:[%s2659_s21 + $0x1c] sm:$0xf] %vm1619_vm3, %v2016_v5  ;;  %2163 = vpow2.f32 %v1265_v37  ;;  %v1188_v27 = vmul.f32 %v1124_v7, %v1060_v44  ;;  %v1062_v63 = vsub.f32 %v826_v12, %v2632_v3  ;;  %v822_v13 = vpop.permute.xlu0 %821 }
 0x149   : > { %v2152_v49 = vpop.eup %2151  ;;  %1626 = vst.msk [vmem:[%s2659_s21 + $0x18] sm:$0xf] %vm1619_vm3, %v2015_v41  ;;  %2165 = vpow2.f32 %v1263_v16  ;;  %v1187_v1 = vmul.f32 %v1123_v11, %v1059_v34  ;;  %v1061_v51 = vsub.f32 %v822_v13, %v2632_v3 }
 0x14a   : > { %v2154_v23 = vpop.eup %2153  ;;  %v2018_v38 = vpack.c.bf16 %v2152_v49, %v2152_v49  ;;  %v1269_v39 = vmul.f32 1.442695, %v1188_v27  ;;  %v1126_v0 = vmul.f32 -1.125, %v1062_v63 }
 0x14b   : > { %v2017_v43 = vpack.c.bf16 %v2154_v23, %v2154_v23  ;;  %v1267_v46 = vmul.f32 1.442695, %v1187_v1  ;;  %v1125_v53 = vmul.f32 -1.125, %v1061_v51  ;;  %v837_v17 = vpop.permute.xlu1 %836 }
 0x14c   : > { %1629 = vst.msk [vmem:[%s2659_s21 + $0x24] sm:$0xf] %vm1619_vm3, %v2018_v38  ;;  %2167 = vpow2.f32 %v1269_v39  ;;  %v1190_v2 = vmul.f32 %v1126_v0, %v1062_v63  ;;  %v1064_v60 = vsub.f32 %v837_v17, %v2632_v3  ;;  %v833_v9 = vpop.permute.xlu0 %832 }
 0x14d   : > { %v2156_v6 = vpop.eup %2155  ;;  %1628 = vst.msk [vmem:[%s2659_s21 + $0x20] sm:$0xf] %vm1619_vm3, %v2017_v43  ;;  %2169 = vpow2.f32 %v1267_v46  ;;  %v1189_v28 = vmul.f32 %v1125_v53, %v1061_v51  ;;  %v1063_v29 = vsub.f32 %v833_v9, %v2632_v3 }
 0x14e   : > { %v2158_v55 = vpop.eup %2157  ;;  %v2020_v56 = vpack.c.bf16 %v2156_v6, %v2156_v6  ;;  %v1273_v14 = vmul.f32 1.442695, %v1190_v2  ;;  %v1128_v30 = vmul.f32 -1.125, %v1064_v60 }
 0x14f   : > { %v2019_v15 = vpack.c.bf16 %v2158_v55, %v2158_v55  ;;  %v1271_v19 = vmul.f32 1.442695, %v1189_v28  ;;  %v1127_v22 = vmul.f32 -1.125, %v1063_v29  ;;  %v845_v24 = vpop.permute.xlu1 %844 }
 0x150   : > { %1631 = vst.msk [vmem:[%s2659_s21 + $0x2c] sm:$0xf] %vm1619_vm3, %v2020_v56  ;;  %2171 = vpow2.f32 %v1273_v14  ;;  %v1192_v25 = vmul.f32 %v1128_v30, %v1064_v60  ;;  %v1066_v26 = vsub.f32 %v845_v24, %v2632_v3  ;;  %v841_v35 = vpop.permute.xlu0 %840 }
 0x151   : > { %v2160_v36 = vpop.eup %2159  ;;  %1630 = vst.msk [vmem:[%s2659_s21 + $0x28] sm:$0xf] %vm1619_vm3, %v2019_v15  ;;  %2173 = vpow2.f32 %v1271_v19  ;;  %v1191_v8 = vmul.f32 %v1127_v22, %v1063_v29  ;;  %v1065_v61 = vsub.f32 %v841_v35, %v2632_v3 }
 0x152   : > { %v2162_v18 = vpop.eup %2161  ;;  %v2022_v31 = vpack.c.bf16 %v2160_v36, %v2160_v36  ;;  %v1277_v33 = vmul.f32 1.442695, %v1192_v25  ;;  %v1130_v42 = vmul.f32 -1.125, %v1066_v26 }
 0x153   : > { %v2021_v40 = vpack.c.bf16 %v2162_v18, %v2162_v18  ;;  %v1275_v48 = vmul.f32 1.442695, %v1191_v8  ;;  %v1129_v45 = vmul.f32 -1.125, %v1065_v61  ;;  %v856_v21 = vpop.permute.xlu1 %855 }
 0x154   : > { %1633 = vst.msk [vmem:[%s2659_s21 + $0x34] sm:$0xf] %vm1619_vm3, %v2022_v31  ;;  %2175 = vpow2.f32 %v1277_v33  ;;  %v1194_v50 = vmul.f32 %v1130_v42, %v1066_v26  ;;  %v1068_v4 = vsub.f32 %v856_v21, %v2632_v3  ;;  %v852_v52 = vpop.permute.xlu0 %851 }
 0x155   : > { %v2164_v54 = vpop.eup %2163  ;;  %1632 = vst.msk [vmem:[%s2659_s21 + $0x30] sm:$0xf] %vm1619_vm3, %v2021_v40  ;;  %2177 = vpow2.f32 %v1275_v48  ;;  %v1193_v57 = vmul.f32 %v1129_v45, %v1065_v61  ;;  %v1067_v58 = vsub.f32 %v852_v52, %v2632_v3 }
 0x156   : > { %v2166_v47 = vpop.eup %2165  ;;  %v2024_v59 = vpack.c.bf16 %v2164_v54, %v2164_v54  ;;  %v1281_v44 = vmul.f32 1.442695, %v1194_v50  ;;  %v1132_v20 = vmul.f32 -1.125, %v1068_v4 }
 0x157   : > { %v2023_v10 = vpack.c.bf16 %v2166_v47, %v2166_v47  ;;  %v1279_v62 = vmul.f32 1.442695, %v1193_v57  ;;  %v1131_v34 = vmul.f32 -1.125, %v1067_v58  ;;  %v864_v32 = vpop.permute.xlu1 %863 }
 0x158   : > { %1635 = vst.msk [vmem:[%s2659_s21 + $0x3c] sm:$0xf] %vm1619_vm3, %v2024_v59  ;;  %2179 = vpow2.f32 %v1281_v44  ;;  %v1196_v5 = vmul.f32 %v1132_v20, %v1068_v4  ;;  %v1070_v37 = vsub.f32 %v864_v32, %v2632_v3  ;;  %v860_v7 = vpop.permute.xlu0 %859 }
 0x159   : > { %v2168_v41 = vpop.eup %2167  ;;  %1634 = vst.msk [vmem:[%s2659_s21 + $0x38] sm:$0xf] %vm1619_vm3, %v2023_v10  ;;  %2181 = vpow2.f32 %v1279_v62  ;;  %v1195_v16 = vmul.f32 %v1131_v34, %v1067_v58  ;;  %v1069_v11 = vsub.f32 %v860_v7, %v2632_v3 }
 0x15a   : > { %v2170_v12 = vpop.eup %2169  ;;  %v2026_v27 = vpack.c.bf16 %v2168_v41, %v2168_v41  ;;  %v1285_v63 = vmul.f32 1.442695, %v1196_v5  ;;  %v1134_v13 = vmul.f32 -1.125, %v1070_v37 }
 0x15b   : > { %v2025_v49 = vpack.c.bf16 %v2170_v12, %v2170_v12  ;;  %v1283_v1 = vmul.f32 1.442695, %v1195_v16  ;;  %v1133_v51 = vmul.f32 -1.125, %v1069_v11  ;;  %v875_v23 = vpop.permute.xlu1 %874 }
 0x15c   : > { %1637 = vst.msk [vmem:[%s2659_s21 + $0x44] sm:$0xf] %vm1619_vm3, %v2026_v27  ;;  %2183 = vpow2.f32 %v1285_v63  ;;  %v1198_v38 = vmul.f32 %v1134_v13, %v1070_v37  ;;  %v1072_v39 = vsub.f32 %v875_v23, %v2632_v3  ;;  %v871_v0 = vpop.permute.xlu0 %870 }
 0x15d   : > { %v2172_v43 = vpop.eup %2171  ;;  %1636 = vst.msk [vmem:[%s2659_s21 + $0x40] sm:$0xf] %vm1619_vm3, %v2025_v49  ;;  %2185 = vpow2.f32 %v1283_v1  ;;  %v1197_v46 = vmul.f32 %v1133_v51, %v1069_v11  ;;  %v1071_v53 = vsub.f32 %v871_v0, %v2632_v3 }
 0x15e   : > { %v2174_v17 = vpop.eup %2173  ;;  %v2028_v2 = vpack.c.bf16 %v2172_v43, %v2172_v43  ;;  %v1289_v60 = vmul.f32 1.442695, %v1198_v38  ;;  %v1136_v9 = vmul.f32 -1.125, %v1072_v39 }
 0x15f   : > { %v2027_v6 = vpack.c.bf16 %v2174_v17, %v2174_v17  ;;  %v1287_v28 = vmul.f32 1.442695, %v1197_v46  ;;  %v1135_v29 = vmul.f32 -1.125, %v1071_v53  ;;  %v883_v55 = vpop.permute.xlu1 %882 }
 0x160   : > { %1639 = vst.msk [vmem:[%s2659_s21 + $0x4c] sm:$0xf] %vm1619_vm3, %v2028_v2  ;;  %2187 = vpow2.f32 %v1289_v60  ;;  %v1200_v56 = vmul.f32 %v1136_v9, %v1072_v39  ;;  %v1074_v14 = vsub.f32 %v883_v55, %v2632_v3  ;;  %v879_v30 = vpop.permute.xlu0 %878 }
 0x161   : > { %v2176_v15 = vpop.eup %2175  ;;  %1638 = vst.msk [vmem:[%s2659_s21 + $0x48] sm:$0xf] %vm1619_vm3, %v2027_v6  ;;  %2189 = vpow2.f32 %v1287_v28  ;;  %v1199_v19 = vmul.f32 %v1135_v29, %v1071_v53  ;;  %v1073_v22 = vsub.f32 %v879_v30, %v2632_v3 }
 0x162   : > { %v2178_v24 = vpop.eup %2177  ;;  %v2030_v25 = vpack.c.bf16 %v2176_v15, %v2176_v15  ;;  %v1293_v26 = vmul.f32 1.442695, %v1200_v56  ;;  %v1138_v35 = vmul.f32 -1.125, %v1074_v14 }
 0x163   : > { %v2029_v36 = vpack.c.bf16 %v2178_v24, %v2178_v24  ;;  %v1291_v8 = vmul.f32 1.442695, %v1199_v19  ;;  %v1137_v61 = vmul.f32 -1.125, %v1073_v22  ;;  %v894_v18 = vpop.permute.xlu1 %893 }
 0x164   : > { %1641 = vst.msk [vmem:[%s2659_s21 + $0x54] sm:$0xf] %vm1619_vm3, %v2030_v25  ;;  %2191 = vpow2.f32 %v1293_v26  ;;  %v1202_v31 = vmul.f32 %v1138_v35, %v1074_v14  ;;  %v1076_v33 = vsub.f32 %v894_v18, %v2632_v3  ;;  %v890_v42 = vpop.permute.xlu0 %889 }
 0x165   : > { %v2180_v40 = vpop.eup %2179  ;;  %1640 = vst.msk [vmem:[%s2659_s21 + $0x50] sm:$0xf] %vm1619_vm3, %v2029_v36  ;;  %2193 = vpow2.f32 %v1291_v8  ;;  %v1201_v48 = vmul.f32 %v1137_v61, %v1073_v22  ;;  %v1075_v45 = vsub.f32 %v890_v42, %v2632_v3 }
 0x166   : > { %v2182_v21 = vpop.eup %2181  ;;  %v2032_v50 = vpack.c.bf16 %v2180_v40, %v2180_v40  ;;  %v1297_v4 = vmul.f32 1.442695, %v1202_v31  ;;  %v1140_v52 = vmul.f32 -1.125, %v1076_v33 }
 0x167   : > { %v2031_v54 = vpack.c.bf16 %v2182_v21, %v2182_v21  ;;  %v1295_v57 = vmul.f32 1.442695, %v1201_v48  ;;  %v1139_v58 = vmul.f32 -1.125, %v1075_v45  ;;  %v902_v47 = vpop.permute.xlu1 %901 }
 0x168   : > { %1643 = vst.msk [vmem:[%s2659_s21 + $0x5c] sm:$0xf] %vm1619_vm3, %v2032_v50  ;;  %2195 = vpow2.f32 %v1297_v4  ;;  %v1204_v59 = vmul.f32 %v1140_v52, %v1076_v33  ;;  %v1078_v44 = vsub.f32 %v902_v47, %v2632_v3  ;;  %v898_v20 = vpop.permute.xlu0 %897 }
 0x169   : > { %v2184_v10 = vpop.eup %2183  ;;  %1642 = vst.msk [vmem:[%s2659_s21 + $0x58] sm:$0xf] %vm1619_vm3, %v2031_v54  ;;  %2197 = vpow2.f32 %v1295_v57  ;;  %v1203_v62 = vmul.f32 %v1139_v58, %v1075_v45  ;;  %v1077_v34 = vsub.f32 %v898_v20, %v2632_v3 }
 0x16a   : > { %v2186_v32 = vpop.eup %2185  ;;  %v2034_v5 = vpack.c.bf16 %v2184_v10, %v2184_v10  ;;  %v1301_v37 = vmul.f32 1.442695, %v1204_v59  ;;  %v1142_v7 = vmul.f32 -1.125, %v1078_v44 }
 0x16b   : > { %v2033_v41 = vpack.c.bf16 %v2186_v32, %v2186_v32  ;;  %v1299_v16 = vmul.f32 1.442695, %v1203_v62  ;;  %v1141_v11 = vmul.f32 -1.125, %v1077_v34  ;;  %v913_v12 = vpop.permute.xlu1 %912 }
 0x16c   : > { %1645 = vst.msk [vmem:[%s2659_s21 + $0x64] sm:$0xf] %vm1619_vm3, %v2034_v5  ;;  %2199 = vpow2.f32 %v1301_v37  ;;  %v1206_v27 = vmul.f32 %v1142_v7, %v1078_v44  ;;  %v1080_v63 = vsub.f32 %v913_v12, %v2632_v3  ;;  %v909_v13 = vpop.permute.xlu0 %908 }
 0x16d   : > { %v2188_v49 = vpop.eup %2187  ;;  %1644 = vst.msk [vmem:[%s2659_s21 + $0x60] sm:$0xf] %vm1619_vm3, %v2033_v41  ;;  %2201 = vpow2.f32 %v1299_v16  ;;  %v1205_v1 = vmul.f32 %v1141_v11, %v1077_v34  ;;  %v1079_v51 = vsub.f32 %v909_v13, %v2632_v3 }
 0x16e   : > { %v2190_v23 = vpop.eup %2189  ;;  %v2036_v38 = vpack.c.bf16 %v2188_v49, %v2188_v49  ;;  %v1305_v39 = vmul.f32 1.442695, %v1206_v27  ;;  %v1144_v0 = vmul.f32 -1.125, %v1080_v63 }
 0x16f   : > { %v2035_v43 = vpack.c.bf16 %v2190_v23, %v2190_v23  ;;  %v1303_v46 = vmul.f32 1.442695, %v1205_v1  ;;  %v1143_v53 = vmul.f32 -1.125, %v1079_v51  ;;  %v921_v17 = vpop.permute.xlu1 %920 }
 0x170   : > { %1647 = vst.msk [vmem:[%s2659_s21 + $0x6c] sm:$0xf] %vm1619_vm3, %v2036_v38  ;;  %2203 = vpow2.f32 %v1305_v39  ;;  %v1208_v2 = vmul.f32 %v1144_v0, %v1080_v63  ;;  %v1082_v60 = vsub.f32 %v921_v17, %v2632_v3  ;;  %v917_v9 = vpop.permute.xlu0 %916 }
 0x171   : > { %v2192_v6 = vpop.eup %2191  ;;  %1646 = vst.msk [vmem:[%s2659_s21 + $0x68] sm:$0xf] %vm1619_vm3, %v2035_v43  ;;  %2205 = vpow2.f32 %v1303_v46  ;;  %v1207_v28 = vmul.f32 %v1143_v53, %v1079_v51  ;;  %v1081_v29 = vsub.f32 %v917_v9, %v2632_v3 }
 0x172   : > { %v2194_v55 = vpop.eup %2193  ;;  %v2038_v56 = vpack.c.bf16 %v2192_v6, %v2192_v6  ;;  %v1309_v14 = vmul.f32 1.442695, %v1208_v2  ;;  %v1146_v30 = vmul.f32 -1.125, %v1082_v60 }
 0x173   : > { %v2037_v15 = vpack.c.bf16 %v2194_v55, %v2194_v55  ;;  %v1307_v19 = vmul.f32 1.442695, %v1207_v28  ;;  %v1145_v22 = vmul.f32 -1.125, %v1081_v29  ;;  %v932_v24 = vpop.permute.xlu1 %931 }
 0x174   : > { %1649 = vst.msk [vmem:[%s2659_s21 + $0x74] sm:$0xf] %vm1619_vm3, %v2038_v56  ;;  %2207 = vpow2.f32 %v1309_v14  ;;  %v1210_v25 = vmul.f32 %v1146_v30, %v1082_v60  ;;  %v1084_v26 = vsub.f32 %v932_v24, %v2632_v3  ;;  %v928_v35 = vpop.permute.xlu0 %927 }
 0x175   : > { %v2196_v36 = vpop.eup %2195  ;;  %1648 = vst.msk [vmem:[%s2659_s21 + $0x70] sm:$0xf] %vm1619_vm3, %v2037_v15  ;;  %2209 = vpow2.f32 %v1307_v19  ;;  %v1209_v8 = vmul.f32 %v1145_v22, %v1081_v29  ;;  %v1083_v61 = vsub.f32 %v928_v35, %v2632_v3 }
 0x176   : > { %v2198_v18 = vpop.eup %2197  ;;  %v2040_v31 = vpack.c.bf16 %v2196_v36, %v2196_v36  ;;  %v1313_v33 = vmul.f32 1.442695, %v1210_v25  ;;  %v1148_v42 = vmul.f32 -1.125, %v1084_v26 }
 0x177   : > { %v2039_v40 = vpack.c.bf16 %v2198_v18, %v2198_v18  ;;  %v1311_v48 = vmul.f32 1.442695, %v1209_v8  ;;  %v1147_v45 = vmul.f32 -1.125, %v1083_v61  ;;  %v940_v21 = vpop.permute.xlu1 %939 }
 0x178   : > { %1651 = vst.msk [vmem:[%s2659_s21 + $0x7c] sm:$0xf] %vm1619_vm3, %v2040_v31  ;;  %2211 = vpow2.f32 %v1313_v33  ;;  %v1212_v50 = vmul.f32 %v1148_v42, %v1084_v26  ;;  %v1086_v4 = vsub.f32 %v940_v21, %v2632_v3  ;;  %v936_v52 = vpop.permute.xlu0 %935 }
 0x179   : > { %v2200_v54 = vpop.eup %2199  ;;  %1650 = vst.msk [vmem:[%s2659_s21 + $0x78] sm:$0xf] %vm1619_vm3, %v2039_v40  ;;  %2213 = vpow2.f32 %v1311_v48  ;;  %v1211_v57 = vmul.f32 %v1147_v45, %v1083_v61  ;;  %v1085_v58 = vsub.f32 %v936_v52, %v2632_v3 }
 0x17a   : > { %v2202_v47 = vpop.eup %2201  ;;  %v2042_v59 = vpack.c.bf16 %v2200_v54, %v2200_v54  ;;  %v1317_v44 = vmul.f32 1.442695, %v1212_v50  ;;  %v1150_v20 = vmul.f32 -1.125, %v1086_v4 }
 0x17b   : > { %v2041_v10 = vpack.c.bf16 %v2202_v47, %v2202_v47  ;;  %v1315_v62 = vmul.f32 1.442695, %v1211_v57  ;;  %v1149_v34 = vmul.f32 -1.125, %v1085_v58  ;;  %v951_v32 = vpop.permute.xlu1 %950 }
 0x17c   : > { %1653 = vst.msk [vmem:[%s2659_s21 + $0x84] sm:$0xf] %vm1619_vm3, %v2042_v59  ;;  %2215 = vpow2.f32 %v1317_v44  ;;  %v1214_v5 = vmul.f32 %v1150_v20, %v1086_v4  ;;  %v1088_v37 = vsub.f32 %v951_v32, %v2632_v3  ;;  %v947_v7 = vpop.permute.xlu0 %946 }
 0x17d   : > { %v2204_v41 = vpop.eup %2203  ;;  %1652 = vst.msk [vmem:[%s2659_s21 + $0x80] sm:$0xf] %vm1619_vm3, %v2041_v10  ;;  %2217 = vpow2.f32 %v1315_v62  ;;  %v1213_v16 = vmul.f32 %v1149_v34, %v1085_v58  ;;  %v1087_v11 = vsub.f32 %v947_v7, %v2632_v3 }
 0x17e   : > { %v2206_v12 = vpop.eup %2205  ;;  %v2044_v27 = vpack.c.bf16 %v2204_v41, %v2204_v41  ;;  %v1321_v63 = vmul.f32 1.442695, %v1214_v5  ;;  %v1152_v13 = vmul.f32 -1.125, %v1088_v37 }
 0x17f   : > { %v2043_v49 = vpack.c.bf16 %v2206_v12, %v2206_v12  ;;  %v1319_v1 = vmul.f32 1.442695, %v1213_v16  ;;  %v1151_v51 = vmul.f32 -1.125, %v1087_v11  ;;  %v959_v23 = vpop.permute.xlu1 %958 }
 0x180   : > { %1655 = vst.msk [vmem:[%s2659_s21 + $0x8c] sm:$0xf] %vm1619_vm3, %v2044_v27  ;;  %2219 = vpow2.f32 %v1321_v63  ;;  %v1216_v38 = vmul.f32 %v1152_v13, %v1088_v37  ;;  %v1090_v39 = vsub.f32 %v959_v23, %v2632_v3  ;;  %v955_v0 = vpop.permute.xlu0 %954 }
 0x181   : > { %v2208_v43 = vpop.eup %2207  ;;  %1654 = vst.msk [vmem:[%s2659_s21 + $0x88] sm:$0xf] %vm1619_vm3, %v2043_v49  ;;  %2221 = vpow2.f32 %v1319_v1  ;;  %v1215_v46 = vmul.f32 %v1151_v51, %v1087_v11  ;;  %v1089_v53 = vsub.f32 %v955_v0, %v2632_v3 }
 0x182   : > { %v2210_v17 = vpop.eup %2209  ;;  %v2046_v2 = vpack.c.bf16 %v2208_v43, %v2208_v43  ;;  %v1325_v60 = vmul.f32 1.442695, %v1216_v38  ;;  %v1154_v9 = vmul.f32 -1.125, %v1090_v39 }
 0x183   : > { %v2045_v6 = vpack.c.bf16 %v2210_v17, %v2210_v17  ;;  %v1323_v28 = vmul.f32 1.442695, %v1215_v46  ;;  %v1153_v29 = vmul.f32 -1.125, %v1089_v53  ;;  %v970_v55 = vpop.permute.xlu1 %969 }
 0x184   : > { %1657 = vst.msk [vmem:[%s2659_s21 + $0x94] sm:$0xf] %vm1619_vm3, %v2046_v2  ;;  %2223 = vpow2.f32 %v1325_v60  ;;  %v1218_v56 = vmul.f32 %v1154_v9, %v1090_v39  ;;  %v1092_v14 = vsub.f32 %v970_v55, %v2632_v3  ;;  %v966_v30 = vpop.permute.xlu0 %965 }
 0x185   : > { %v2212_v15 = vpop.eup %2211  ;;  %1656 = vst.msk [vmem:[%s2659_s21 + $0x90] sm:$0xf] %vm1619_vm3, %v2045_v6  ;;  %2225 = vpow2.f32 %v1323_v28  ;;  %v1217_v19 = vmul.f32 %v1153_v29, %v1089_v53  ;;  %v1091_v22 = vsub.f32 %v966_v30, %v2632_v3 }
 0x186   : > { %v2214_v24 = vpop.eup %2213  ;;  %v2048_v25 = vpack.c.bf16 %v2212_v15, %v2212_v15  ;;  %v1329_v26 = vmul.f32 1.442695, %v1218_v56  ;;  %v1156_v35 = vmul.f32 -1.125, %v1092_v14 }
 0x187   : > { %v2047_v36 = vpack.c.bf16 %v2214_v24, %v2214_v24  ;;  %v1327_v8 = vmul.f32 1.442695, %v1217_v19  ;;  %v1155_v61 = vmul.f32 -1.125, %v1091_v22  ;;  %v978_v18 = vpop.permute.xlu1 %977 }
 0x188   : > { %1659 = vst.msk [vmem:[%s2659_s21 + $0x9c] sm:$0xf] %vm1619_vm3, %v2048_v25  ;;  %2227 = vpow2.f32 %v1329_v26  ;;  %v1220_v31 = vmul.f32 %v1156_v35, %v1092_v14  ;;  %v1094_v33 = vsub.f32 %v978_v18, %v2632_v3  ;;  %v974_v42 = vpop.permute.xlu0 %973 }
 0x189   : > { %v2216_v40 = vpop.eup %2215  ;;  %1658 = vst.msk [vmem:[%s2659_s21 + $0x98] sm:$0xf] %vm1619_vm3, %v2047_v36  ;;  %2229 = vpow2.f32 %v1327_v8  ;;  %v1219_v48 = vmul.f32 %v1155_v61, %v1091_v22  ;;  %v1093_v45 = vsub.f32 %v974_v42, %v2632_v3  ;;  %v2263_v61 = vld [vmem:[%s2853_s4] ss:$0 sm:$0xff] }
 0x18a   : > { %v2218_v21 = vpop.eup %2217  ;;  %v2050_v50 = vpack.c.bf16 %v2216_v40, %v2216_v40  ;;  %v1333_v4 = vmul.f32 1.442695, %v1220_v31  ;;  %v1158_v52 = vmul.f32 -1.125, %v1094_v33 }
 0x18b   : > { %v2049_v54 = vpack.c.bf16 %v2218_v21, %v2218_v21  ;;  %v1331_v57 = vmul.f32 1.442695, %v1219_v48  ;;  %v1157_v58 = vmul.f32 -1.125, %v1093_v45  ;;  %v989_v47 = vpop.permute.xlu1 %988 }
 0x18c   : > { %1661 = vst.msk [vmem:[%s2659_s21 + $0xa4] sm:$0xf] %vm1619_vm3, %v2050_v50  ;;  %2231 = vpow2.f32 %v1333_v4  ;;  %v1222_v59 = vmul.f32 %v1158_v52, %v1094_v33  ;;  %v1096_v44 = vsub.f32 %v989_v47, %v2632_v3  ;;  %v985_v20 = vpop.permute.xlu0 %984 }
 0x18d   : > { %v2220_v10 = vpop.eup %2219  ;;  %1660 = vst.msk [vmem:[%s2659_s21 + $0xa0] sm:$0xf] %vm1619_vm3, %v2049_v54  ;;  %2233 = vpow2.f32 %v1331_v57  ;;  %v1221_v62 = vmul.f32 %v1157_v58, %v1093_v45  ;;  %v1095_v34 = vsub.f32 %v985_v20, %v2632_v3 }
 0x18e   : > { %v2222_v32 = vpop.eup %2221  ;;  %v2052_v5 = vpack.c.bf16 %v2220_v10, %v2220_v10  ;;  %v1337_v37 = vmul.f32 1.442695, %v1222_v59  ;;  %v1160_v7 = vmul.f32 -1.125, %v1096_v44 }
 0x18f   : > { %v2051_v41 = vpack.c.bf16 %v2222_v32, %v2222_v32  ;;  %v1335_v16 = vmul.f32 1.442695, %v1221_v62  ;;  %v1159_v11 = vmul.f32 -1.125, %v1095_v34  ;;  %v997_v12 = vpop.permute.xlu1 %996 }
 0x190   : > { %1663 = vst.msk [vmem:[%s2659_s21 + $0xac] sm:$0xf] %vm1619_vm3, %v2052_v5  ;;  %2235 = vpow2.f32 %v1337_v37  ;;  %v1224_v27 = vmul.f32 %v1160_v7, %v1096_v44  ;;  %v1098_v63 = vsub.f32 %v997_v12, %v2632_v3  ;;  %v993_v13 = vpop.permute.xlu0 %992 }
 0x191   : > { %v2224_v49 = vpop.eup %2223  ;;  %1662 = vst.msk [vmem:[%s2659_s21 + $0xa8] sm:$0xf] %vm1619_vm3, %v2051_v41  ;;  %2237 = vpow2.f32 %v1335_v16  ;;  %v1223_v1 = vmul.f32 %v1159_v11, %v1095_v34  ;;  %v1097_v51 = vsub.f32 %v993_v13, %v2632_v3 }
 0x192   : > { %v2226_v23 = vpop.eup %2225  ;;  %v2054_v38 = vpack.c.bf16 %v2224_v49, %v2224_v49  ;;  %v1341_v39 = vmul.f32 1.442695, %v1224_v27  ;;  %v1162_v0 = vmul.f32 -1.125, %v1098_v63 }
 0x193   : > { %v2053_v43 = vpack.c.bf16 %v2226_v23, %v2226_v23  ;;  %v1339_v46 = vmul.f32 1.442695, %v1223_v1  ;;  %v1161_v53 = vmul.f32 -1.125, %v1097_v51  ;;  %v1008_v17 = vpop.permute.xlu1 %1007 }
 0x194   : > { %1665 = vst.msk [vmem:[%s2659_s21 + $0xb4] sm:$0xf] %vm1619_vm3, %v2054_v38  ;;  %2239 = vpow2.f32 %v1341_v39  ;;  %v1226_v2 = vmul.f32 %v1162_v0, %v1098_v63  ;;  %v1100_v60 = vsub.f32 %v1008_v17, %v2632_v3  ;;  %v1004_v9 = vpop.permute.xlu0 %1003 }
 0x195   : > { %v2228_v6 = vpop.eup %2227  ;;  %1664 = vst.msk [vmem:[%s2659_s21 + $0xb0] sm:$0xf] %vm1619_vm3, %v2053_v43  ;;  %2241 = vpow2.f32 %v1339_v46  ;;  %v1225_v28 = vmul.f32 %v1161_v53, %v1097_v51  ;;  %v1099_v29 = vsub.f32 %v1004_v9, %v2632_v3 }
 0x196   : > { %v2230_v55 = vpop.eup %2229  ;;  %v2056_v56 = vpack.c.bf16 %v2228_v6, %v2228_v6  ;;  %v1345_v14 = vmul.f32 1.442695, %v1226_v2  ;;  %v1164_v30 = vmul.f32 -1.125, %v1100_v60 }
 0x197   : > { %v2055_v15 = vpack.c.bf16 %v2230_v55, %v2230_v55  ;;  %v1343_v19 = vmul.f32 1.442695, %v1225_v28  ;;  %v1163_v22 = vmul.f32 -1.125, %v1099_v29  ;;  %v1016_v24 = vpop.permute.xlu1 %1015 }
 0x198   : > { %1667 = vst.msk [vmem:[%s2659_s21 + $0xbc] sm:$0xf] %vm1619_vm3, %v2056_v56  ;;  %2243 = vpow2.f32 %v1345_v14  ;;  %v1228_v25 = vmul.f32 %v1164_v30, %v1100_v60  ;;  %v1102_v26 = vsub.f32 %v1016_v24, %v2632_v3  ;;  %v1012_v35 = vpop.permute.xlu0 %1011 }
 0x199   : > { %v2232_v36 = vpop.eup %2231  ;;  %1666 = vst.msk [vmem:[%s2659_s21 + $0xb8] sm:$0xf] %vm1619_vm3, %v2055_v15  ;;  %2245 = vpow2.f32 %v1343_v19  ;;  %v1227_v8 = vmul.f32 %v1163_v22, %v1099_v29  ;;  %v1101_v18 = vsub.f32 %v1012_v35, %v2263_v61 }
 0x19a   : > { %v2234_v31 = vpop.eup %2233  ;;  %v2058_v33 = vpack.c.bf16 %v2232_v36, %v2232_v36  ;;  %v1349_v42 = vmul.f32 1.442695, %v1228_v25  ;;  %v1166_v40 = vmul.f32 -1.125, %v1102_v26 }
 0x19b   : > { %v2057_v48 = vpack.c.bf16 %v2234_v31, %v2234_v31  ;;  %v1347_v45 = vmul.f32 1.442695, %v1227_v8  ;;  %v1165_v3 = vmul.f32 -1.125, %v1101_v18  ;;  %v1027_v21 = vpop.permute.xlu1 %1026 }
 0x19c   : > { %1669 = vst.msk [vmem:[%s2659_s21 + $0xc4] sm:$0xf] %vm1619_vm3, %v2058_v33  ;;  %2247 = vpow2.f32 %v1349_v42  ;;  %v1230_v50 = vmul.f32 %v1166_v40, %v1102_v26  ;;  %v1104_v4 = vsub.f32 %v1027_v21, %v2263_v61 }
 0x19d   : > { %v2236_v52 = vpop.eup %2235  ;;  %1668 = vst.msk [vmem:[%s2659_s21 + $0xc0] sm:$0xf] %vm1619_vm3, %v2057_v48  ;;  %2249 = vpow2.f32 %v1347_v45  ;;  %v1229_v54 = vmul.f32 %v1165_v3, %v1101_v18  ;;  %v1023_v57 = vpop.permute.xlu0 %1022 }
 0x19e   : > { %v2238_v58 = vpop.eup %2237  ;;  %v2060_v47 = vpack.c.bf16 %v2236_v52, %v2236_v52  ;;  %v1353_v59 = vmul.f32 1.442695, %v1230_v50  ;;  %v1168_v44 = vmul.f32 -1.125, %v1104_v4  ;;  %v1103_v20 = vsub.f32 %v1023_v57, %v2263_v61 }
 0x19f   : > { %v2059_v10 = vpack.c.bf16 %v2238_v58, %v2238_v58  ;;  %v1351_v62 = vmul.f32 1.442695, %v1229_v54  ;;  %v1035_v34 = vpop.permute.xlu1 %1034 }
 0x1a0   : > { %1671 = vst.msk [vmem:[%s2659_s21 + $0xcc] sm:$0xf] %vm1619_vm3, %v2060_v47  ;;  %2251 = vpow2.f32 %v1353_v59  ;;  %v1232_v32 = vmul.f32 %v1168_v44, %v1104_v4  ;;  %v1167_v5 = vmul.f32 -1.125, %v1103_v20  ;;  %v1106_v37 = vsub.f32 %v1035_v34, %v2263_v61 }
 0x1a1   : > { %v2240_v7 = vpop.eup %2239  ;;  %1670 = vst.msk [vmem:[%s2659_s21 + $0xc8] sm:$0xf] %vm1619_vm3, %v2059_v10  ;;  %2253 = vpow2.f32 %v1351_v62  ;;  %v1031_v41 = vpop.permute.xlu0 %1030 }
 0x1a2   : > { %v2242_v16 = vpop.eup %2241  ;;  %v2062_v11 = vpack.c.bf16 %v2240_v7, %v2240_v7  ;;  %v1357_v12 = vmul.f32 1.442695, %v1232_v32  ;;  %v1231_v27 = vmul.f32 %v1167_v5, %v1103_v20  ;;  %v1170_v63 = vmul.f32 -1.125, %v1106_v37 }
 0x1a3   : > { %v2061_v13 = vpack.c.bf16 %v2242_v16, %v2242_v16  ;;  %v1105_v49 = vsub.f32 %v1031_v41, %v2263_v61 }
 0x1a4   : > { %1673 = vst.msk [vmem:[%s2659_s21 + $0xd4] sm:$0xf] %vm1619_vm3, %v2062_v11  ;;  %2255 = vpow2.f32 %v1357_v12  ;;  %v1355_v1 = vmul.f32 1.442695, %v1231_v27  ;;  %v1234_v51 = vmul.f32 %v1170_v63, %v1106_v37 }
 0x1a5   : > { %v2244_v23 = vpop.eup %2243  ;;  %1672 = vst.msk [vmem:[%s2659_s21 + $0xd0] sm:$0xf] %vm1619_vm3, %v2061_v13  ;;  %v1169_v38 = vmul.f32 -1.125, %v1105_v49 }
 0x1a6   : > { %v2246_v39 = vpop.eup %2245  ;;  %v2064_v0 = vpack.c.bf16 %v2244_v23, %v2244_v23  ;;  %2257 = vpow2.f32 %v1355_v1  ;;  %v1361_v43 = vmul.f32 1.442695, %v1234_v51 }
 0x1a7   : > { %v2063_v46 = vpack.c.bf16 %v2246_v39, %v2246_v39  ;;  %v1233_v53 = vmul.f32 %v1169_v38, %v1105_v49 }
 0x1a8   : > { %1675 = vst.msk [vmem:[%s2659_s21 + $0xdc] sm:$0xf] %vm1619_vm3, %v2064_v0  ;;  %2259 = vpow2.f32 %v1361_v43 }
 0x1a9   : > { %v2248_v17 = vpop.eup %2247  ;;  %1674 = vst.msk [vmem:[%s2659_s21 + $0xd8] sm:$0xf] %vm1619_vm3, %v2063_v46  ;;  %v1359_v2 = vmul.f32 1.442695, %v1233_v53 }
 0x1aa   : > { %v2250_v60 = vpop.eup %2249  ;;  %v2066_v9 = vpack.c.bf16 %v2248_v17, %v2248_v17 }
 0x1ab   : > { %v2065_v6 = vpack.c.bf16 %v2250_v60, %v2250_v60  ;;  %2261 = vpow2.f32 %v1359_v2 }
 0x1ac   : > { %1677 = vst.msk [vmem:[%s2659_s21 + $0xe4] sm:$0xf] %vm1619_vm3, %v2066_v9 }
 0x1ad   : > { %v2252_v28 = vpop.eup %2251  ;;  %1676 = vst.msk [vmem:[%s2659_s21 + $0xe0] sm:$0xf] %vm1619_vm3, %v2065_v6 }
 0x1ae   : > { %v2254_v29 = vpop.eup %2253  ;;  %v2068_v55 = vpack.c.bf16 %v2252_v28, %v2252_v28 }
 0x1af   : > { %v2067_v56 = vpack.c.bf16 %v2254_v29, %v2254_v29 }
 0x1b0   : > { %1679 = vst.msk [vmem:[%s2659_s21 + $0xec] sm:$0xf] %vm1619_vm3, %v2068_v55 }
 0x1b1   : > { %v2256_v14 = vpop.eup %2255  ;;  %1678 = vst.msk [vmem:[%s2659_s21 + $0xe8] sm:$0xf] %vm1619_vm3, %v2067_v56 }
 0x1b2   : > { %v2070_v30 = vpack.c.bf16 %v2256_v14, %v2256_v14 }
 0x1b3   : > { %v2258_v15 = vpop.eup %2257 }
 0x1b4   : > { %1681 = vst.msk [vmem:[%s2659_s21 + $0xf4] sm:$0xf] %vm1619_vm3, %v2070_v30  ;;  %v2069_v19 = vpack.c.bf16 %v2258_v15, %v2258_v15 }
 0x1b5   : > { %v2260_v22 = vpop.eup %2259 }
 0x1b6   : > { %1680 = vst.msk [vmem:[%s2659_s21 + $0xf0] sm:$0xf] %vm1619_vm3, %v2069_v19  ;;  %v2072_v24 = vpack.c.bf16 %v2260_v22, %v2260_v22 }
 0x1b8   : > { %v2262_v25 = vpop.eup %2261  ;;  %1683 = vst.msk [vmem:[%s2659_s21 + $0xfc] sm:$0xf] %vm1619_vm3, %v2072_v24 }
 0x1b9   : > { %v2071_v26 = vpack.c.bf16 %v2262_v25, %v2262_v25 }
 0x1bb   : > { %1682 = vst.msk [vmem:[%s2659_s21 + $0xf8] sm:$0xf] %vm1619_vm3, %v2071_v26 }
 0x1bc PF: > { %s20_s30 = sadd.s32 1, %s2270_s30  }
 0x1bd   : > { %p17_p5 = scmp.ge.s32.totalorder %s20_s30, 4  }
 0x1bf   :  { %19 = sbr.rel (!%p17_p5) target bundleno = 1 (0x1), region = 108 }

// kernel: schnet_forward.6
= control target key start
LH: loop header
LB: loop body
LE: loop exit
PB: predicated region body
PF: predicated region fallthrough
CT: control target
= control target key end

     0   :  { %s4512_s21 = smov 0   ;;  %s4514_s22 = smov 0   ;;  %s6689_s0 = inlined_call_operand.vmem [shape: f32[32,32], index: 0, kind: input, shape index: {}]   ;;  %s6690_s1 = inlined_call_operand.vmem [shape: bf16[32,32], index: 1, kind: input, shape index: {}]   ;;  %s6691_s2 = inlined_call_operand.vmem [shape: bf16[32,32,16], index: 2, kind: input, shape index: {}]   ;;  %s6692_s3 = inlined_call_operand.vmem [shape: f32[32,32], index: 3, kind: input, shape index: {}]   ;;  %s6693_s4 = inlined_call_operand.vmem [shape: bf16[16,32], index: 4, kind: input, shape index: {}]   ;;  %s6694_s5 = inlined_call_operand.vmem [shape: f32[1,32], index: 5, kind: input, shape index: {}]   ;;  %s6695_s6 = inlined_call_operand.vmem [shape: bf16[32,32], index: 6, kind: input, shape index: {}]   ;;  %s6696_s7 = inlined_call_operand.vmem [shape: f32[1,32], index: 7, kind: input, shape index: {}]   ;;  %s6697_s8 = inlined_call_operand.vmem [shape: f32[32,32], index: 8, kind: input, shape index: {}]   ;;  %s6698_s9 = inlined_call_operand.vmem [shape: f32[1,32], index: 9, kind: input, shape index: {}]   ;;  %s6699_s10 = inlined_call_operand.vmem [shape: f32[32,32], index: 10, kind: input, shape index: {}]   ;;  %s6700_s11 = inlined_call_operand.vmem [shape: f32[1,32], index: 11, kind: input, shape index: {}]   ;;  %s6701_s12 = inlined_call_operand.vmem [shape: f32[32,32], index: 12, kind: output, shape index: {}]  }
   0x1   :  { %s4516_s23 = smov 0  }
   0x2 LB: > { %s34_s24 = sadd.s32 1, %s4440_s22  ;;  %p3663_p0 = scmp.ge.s32.totalorder %s4444_s23, 1  ;;  %s4444_s23 = sphi %s4516_s23, %s22_s23   ;;  %s4440_s22 = sphi %s4514_s22, %s6893_s22   ;;  %s4436_s21 = sphi %s4512_s21, %s6892_s21  }
   0x3   : > { %p36_p1 = scmp.ge.s32.totalorder %s34_s24, 2  ;;  %p421_p2 = scmp.lt.s32.totalorder %s4444_s23, 3 }
   0x5   : > { %s6895_s24 = smov (%p36_p1, %s34_s24), 0  ;;  %p422_p3 = pnand %p3663_p0, %p421_p2 }
   0x7   : > { %425 = sbr.rel (%p422_p3) target bundleno = 1200 (0x4b0), region = 68 }
   0xc   : > { %v4118_v0 = vld [vmem:[%s6693_s4] sm:$0xff]   ;;  %s3666_s27 = sshll.u32 %s4436_s21, 4  ;;  %vm772_vm0 = vcmask 130048   ;;  %v4151_v33 = vld [vmem:[%s6695_s6 + $0x8] sm:$0xff]   ;;  %s3664_s26 = sshll.u32 %s4436_s21, 1 }
   0xd   : > { %p500_p4 = scmp.lt.s32.totalorder %s3666_s27, 31  ;;  %3937 = vmatprep.subr.bf16.mxu0 %v4118_v0  ;;  %4003 = vmatprep.subr.bf16.mxu1 %v4151_v33  ;;  %v4152_v34 = vld [vmem:[%s6695_s6] sm:$0xff]   ;;  %p5227_p5 = scmp.lt.s32.totalorder %s3664_s26, 3 }
   0xe   : > { %3938 = vmatpush3.bf16.msra.mxu0 %v4118_v0  ;;  %4004 = vmatpush3.bf16.msra.mxu1 %v4151_v33  ;;  %v4614_v35 = vld [vmem:[%s6694_s5] ss:$0 sm:$0xff] }
   0xf   : > { %s6897_s27 = smov (!%p500_p4, %s3666_s27), 31  ;;  %4005 = vmatprep.subr.bf16.mxu1 %v4152_v34  ;;  %s6899_s26 = smov (!%p5227_p5, %s3664_s26), 3 }
  0x10   : > { %s3848_s28 = sshll.u32 %s6897_s27, 4  ;;  %s5269_s21 = sshll.u32 %s6899_s26, 3 }
  0x11   : > { %s4539_s13 = scalar_lea.vmem %s6691_s2, %s3848_s28  ;;  %s5297_s30 = scalar_lea.vmem %s6692_s3, %s5269_s21 }
  0x12   : > { %v4119_v1 = vld [vmem:[%s4539_s13] sm:$0xff]   ;;  %v4120_v2 = vld [vmem:[%s4539_s13 + $0x8] sm:$0xff]   ;;  %v4121_v3 = vld [vmem:[%s4539_s13 + $0x10] sm:$0xff]   ;;  %4006 = vmatpush3.bf16.msra.mxu1 %v4152_v34  ;;  %s490_s17 = scalar_lea.vmem %s6689_s0, %s5269_s21  ;;  %s523_s20 = scalar_lea.vmem %s6701_s12, %s5269_s21 }
  0x13   : > { %3939 = vmatprep.mubr.msk.bf16.mxu0 %vm772_vm0, %v4119_v1  ;;  %v4122_v4 = vld [vmem:[%s4539_s13 + $0x18] sm:$0xff]   ;;  %v4123_v5 = vld [vmem:[%s4539_s13 + $0x20] sm:$0xff]   ;;  %v4124_v6 = vld [vmem:[%s4539_s13 + $0x28] sm:$0xff]  }
  0x14   : > { %3940 = vmatmul.mubr.msk.bf16.vlgmr.msra.gmra.mxu0 %vm772_vm0, %v4120_v2  ;;  %v4125_v7 = vld [vmem:[%s4539_s13 + $0x30] sm:$0xff]   ;;  %v4126_v8 = vld [vmem:[%s4539_s13 + $0x38] sm:$0xff]   ;;  %v4127_v9 = vld [vmem:[%s4539_s13 + $0x40] sm:$0xff]  }
  0x15   : > { %3943 = vmatprep.mubr.msk.bf16.mxu0 %vm772_vm0, %v4121_v3  ;;  %v4128_v10 = vld [vmem:[%s4539_s13 + $0x48] sm:$0xff]   ;;  %v4129_v11 = vld [vmem:[%s4539_s13 + $0x50] sm:$0xff]   ;;  %v4130_v12 = vld [vmem:[%s4539_s13 + $0x58] sm:$0xff]  }
  0x16   : > { %v4131_v13 = vld [vmem:[%s4539_s13 + $0x60] sm:$0xff]   ;;  %v4132_v14 = vld [vmem:[%s4539_s13 + $0x68] sm:$0xff]   ;;  %v4133_v15 = vld [vmem:[%s4539_s13 + $0x70] sm:$0xff]  }
  0x17   : > { %v4134_v16 = vld [vmem:[%s4539_s13 + $0x78] sm:$0xff]   ;;  %v4135_v17 = vld [vmem:[%s4539_s13 + $0x80] sm:$0xff]   ;;  %v4136_v18 = vld [vmem:[%s4539_s13 + $0x88] sm:$0xff]  }
  0x18   : > { %v4137_v19 = vld [vmem:[%s4539_s13 + $0x90] sm:$0xff]   ;;  %v4138_v20 = vld [vmem:[%s4539_s13 + $0x98] sm:$0xff]   ;;  %v4139_v21 = vld [vmem:[%s4539_s13 + $0xa0] sm:$0xff]  }
  0x19   : > { %v4140_v22 = vld [vmem:[%s4539_s13 + $0xa8] sm:$0xff]   ;;  %v4141_v23 = vld [vmem:[%s4539_s13 + $0xb0] sm:$0xff]   ;;  %v4142_v24 = vld [vmem:[%s4539_s13 + $0xb8] sm:$0xff]  }
  0x1a   : > { %v4143_v25 = vld [vmem:[%s4539_s13 + $0xc0] sm:$0xff]   ;;  %v4144_v26 = vld [vmem:[%s4539_s13 + $0xc8] sm:$0xff]   ;;  %v4145_v27 = vld [vmem:[%s4539_s13 + $0xd0] sm:$0xff]  }
  0x1b   : > { %v4146_v28 = vld [vmem:[%s4539_s13 + $0xd8] sm:$0xff]   ;;  %v4147_v29 = vld [vmem:[%s4539_s13 + $0xe0] sm:$0xff]   ;;  %v4148_v30 = vld [vmem:[%s4539_s13 + $0xe8] sm:$0xff]  }
  0x1c   : > { %3944 = vmatmul.mubr.msk.bf16.gmra.mxu0 %vm772_vm0, %v4122_v4  ;;  %v4149_v31 = vld [vmem:[%s4539_s13 + $0xf0] sm:$0xff]   ;;  %v4150_v32 = vld [vmem:[%s4539_s13 + $0xf8] sm:$0xff]  }
  0x1d   : > { %3947 = vmatprep.mubr.msk.bf16.mxu0 %vm772_vm0, %v4123_v5 }
  0x24   : > { %3948 = vmatmul.mubr.msk.bf16.gmra.mxu0 %vm772_vm0, %v4124_v6 }
  0x25   : > { %3951 = vmatprep.mubr.msk.bf16.mxu0 %vm772_vm0, %v4125_v7 }
  0x2c   : > { %3952 = vmatmul.mubr.msk.bf16.gmra.mxu0 %vm772_vm0, %v4126_v8 }
  0x2d   : > { %3955 = vmatprep.mubr.msk.bf16.mxu0 %vm772_vm0, %v4127_v9 }
  0x34   : > { %3956 = vmatmul.mubr.msk.bf16.gmra.mxu0 %vm772_vm0, %v4128_v10 }
  0x35   : > { %3959 = vmatprep.mubr.msk.bf16.mxu0 %vm772_vm0, %v4129_v11 }
  0x3c   : > { %3960 = vmatmul.mubr.msk.bf16.gmra.mxu0 %vm772_vm0, %v4130_v12 }
  0x3d   : > { %3963 = vmatprep.mubr.msk.bf16.mxu0 %vm772_vm0, %v4131_v13 }
  0x44   : > { %3964 = vmatmul.mubr.msk.bf16.gmra.mxu0 %vm772_vm0, %v4132_v14 }
  0x45   : > { %3967 = vmatprep.mubr.msk.bf16.mxu0 %vm772_vm0, %v4133_v15 }
  0x4c   : > { %3968 = vmatmul.mubr.msk.bf16.gmra.mxu0 %vm772_vm0, %v4134_v16 }
  0x4d   : > { %3971 = vmatprep.mubr.msk.bf16.mxu0 %vm772_vm0, %v4135_v17 }
  0x54   : > { %3972 = vmatmul.mubr.msk.bf16.gmra.mxu0 %vm772_vm0, %v4136_v18 }
  0x55   : > { %3975 = vmatprep.mubr.msk.bf16.mxu0 %vm772_vm0, %v4137_v19 }
  0x5c   : > { %3976 = vmatmul.mubr.msk.bf16.gmra.mxu0 %vm772_vm0, %v4138_v20 }
  0x5d   : > { %3979 = vmatprep.mubr.msk.bf16.mxu0 %vm772_vm0, %v4139_v21 }
  0x64   : > { %3980 = vmatmul.mubr.msk.bf16.gmra.mxu0 %vm772_vm0, %v4140_v22 }
  0x65   : > { %3983 = vmatprep.mubr.msk.bf16.mxu0 %vm772_vm0, %v4141_v23 }
  0x6c   : > { %3984 = vmatmul.mubr.msk.bf16.gmra.mxu0 %vm772_vm0, %v4142_v24 }
  0x6d   : > { %3987 = vmatprep.mubr.msk.bf16.mxu0 %vm772_vm0, %v4143_v25 }
  0x74   : > { %3988 = vmatmul.mubr.msk.bf16.gmra.mxu0 %vm772_vm0, %v4144_v26 }
  0x75   : > { %3991 = vmatprep.mubr.msk.bf16.mxu0 %vm772_vm0, %v4145_v27 }
  0x7c   : > { %3992 = vmatmul.mubr.msk.bf16.gmra.mxu0 %vm772_vm0, %v4146_v28 }
  0x7d   : > { %3995 = vmatprep.mubr.msk.bf16.mxu0 %vm772_vm0, %v4147_v29 }
  0x84   : > { %3996 = vmatmul.mubr.msk.bf16.gmra.mxu0 %vm772_vm0, %v4148_v30 }
  0x85   : > { %3999 = vmatprep.mubr.msk.bf16.mxu0 %vm772_vm0, %v4149_v31 }
  0x8c   : > { %4000 = vmatmul.mubr.msk.bf16.gmra.mxu0 %vm772_vm0, %v4150_v32 }
  0xd4   : > { %v3941_v36 = vpop.f32.mrf.mxu0 }
  0xd5   : > { %v4617_v37 = vadd.f32 %v3941_v36, %v4614_v35 }
  0xd6   : > { %v903_v38 = vpop.f32.mrf.mxu0 }
  0xd7   : > { %v1224_v39 = vand.u32 2147483647, %v4617_v37  ;;  %v4644_v4 = vadd.f32 %v4614_v35, %v903_v38 }
  0xd8   : > { %v3942_v40 = vpop.f32.mrf.mxu0 }
  0xd9   : > { %v1288_v41 = vsub.f32 0.0, %v1224_v39  ;;  %v4621_v42 = vadd.f32 %v3942_v40, %v4614_v35  ;;  %v1222_v16 = vand.u32 2147483647, %v4644_v4 }
  0xda   : > { %v906_v43 = vpop.f32.mrf.mxu0 }
  0xdb   : > { %v1354_v44 = vmul.f32 1.442695, %v1288_v41  ;;  %v1225_v45 = vand.u32 2147483647, %v4621_v42  ;;  %v4658_v17 = vadd.f32 %v4614_v35, %v906_v43  ;;  %v1286_v27 = vsub.f32 0.0, %v1222_v16 }
  0xdc   : > { %v3945_v46 = vpop.f32.mrf.mxu0 }
  0xdd   : > { %4153 = vpow2.f32 %v1354_v44  ;;  %v1289_v47 = vsub.f32 0.0, %v1225_v45  ;;  %v4625_v48 = vadd.f32 %v3945_v46, %v4614_v35  ;;  %v1223_v29 = vand.u32 2147483647, %v4658_v17 }
  0xde   : > { %v919_v49 = vpop.f32.mrf.mxu0  ;;  %v1350_v39 = vmul.f32 1.442695, %v1286_v27 }
  0xdf   : > { %v1356_v50 = vmul.f32 1.442695, %v1289_v47  ;;  %v1228_v51 = vand.u32 2147483647, %v4625_v48  ;;  %v4629_v52 = vadd.f32 %v4614_v35, %v919_v49  ;;  %v1287_v41 = vsub.f32 0.0, %v1223_v29 }
  0xe0   : > { %v3946_v53 = vpop.f32.mrf.mxu0 }
  0xe1   : > { %4155 = vpow2.f32 %v1356_v50  ;;  %v1292_v54 = vsub.f32 0.0, %v1228_v51  ;;  %v4632_v55 = vadd.f32 %v3946_v53, %v4614_v35  ;;  %v1226_v56 = vand.u32 2147483647, %v4629_v52 }
  0xe2   : > { %v922_v57 = vpop.f32.mrf.mxu0  ;;  %v1160_v50 = vmax.f32 %v4617_v37, 0.0 }
  0xe3   : > { %v1362_v58 = vmul.f32 1.442695, %v1292_v54  ;;  %v1229_v59 = vand.u32 2147483647, %v4632_v55  ;;  %v4637_v60 = vadd.f32 %v4614_v35, %v922_v57  ;;  %v1290_v61 = vsub.f32 0.0, %v1226_v56 }
  0xe4   : > { %v3949_v62 = vpop.f32.mrf.mxu0  ;;  %v1352_v56 = vmul.f32 1.442695, %v1287_v41 }
  0xe5   : > { %4157 = vpow2.f32 %v1362_v58  ;;  %v1293_v63 = vsub.f32 0.0, %v1229_v59  ;;  %v1227_v0 = vand.u32 2147483647, %v4637_v60  ;;  %v1358_v1 = vmul.f32 1.442695, %v1290_v61 }
  0xe6   : > { %v4641_v2 = vadd.f32 %v3949_v62, %v4614_v35  ;;  %v935_v3 = vpop.f32.mrf.mxu0  ;;  %v1161_v61 = vmax.f32 %v4621_v42, 0.0  ;;  %v1163_v16 = vmax.f32 %v4637_v60, 0.0 }
  0xe7   : > { %v1364_v5 = vmul.f32 1.442695, %v1293_v63  ;;  %v1291_v6 = vsub.f32 0.0, %v1227_v0  ;;  %v4647_v7 = vadd.f32 %v4614_v35, %v935_v3  ;;  %4159 = vpow2.f32 %v1358_v1 }
  0xe8   : > { %v1232_v8 = vand.u32 2147483647, %v4641_v2  ;;  %v3950_v9 = vpop.f32.mrf.mxu0  ;;  %v1164_v63 = vmax.f32 %v4625_v48, 0.0  ;;  %v1162_v1 = vmax.f32 %v4629_v52, 0.0 }
  0xe9   : > { %v1360_v10 = vmul.f32 1.442695, %v1291_v6  ;;  %v1230_v11 = vand.u32 2147483647, %v4647_v7  ;;  %4161 = vpow2.f32 %v1364_v5  ;;  %v4654_v14 = vadd.f32 %v3950_v9, %v4614_v35 }
  0xea   : > { %v4651_v12 = vpop.eup %4153  ;;  %v1296_v13 = vsub.f32 0.0, %v1232_v8  ;;  %v938_v15 = vpop.f32.mrf.mxu0 }
  0xeb   : > { %4163 = vpow2.f32 %v1360_v10  ;;  %v1294_v18 = vsub.f32 0.0, %v1230_v11  ;;  %v1233_v19 = vand.u32 2147483647, %v4654_v14  ;;  %v1496_v21 = vadd.f32 1.0, %v4651_v12 }
  0xec   : > { %v3953_v20 = vpop.f32.mrf.mxu0  ;;  %v4663_v22 = vadd.f32 %v4614_v35, %v938_v15  ;;  %v1370_v24 = vmul.f32 1.442695, %v1296_v13  ;;  %v1499_v51 = vmul.f32 -0.5, %v4651_v12  ;;  %v1502_v6 = vand.u32 2147483647, %v4651_v12 }
  0xed   : > { %v1297_v25 = vsub.f32 0.0, %v1233_v19  ;;  %v4668_v26 = vadd.f32 %v3953_v20, %v4614_v35  ;;  %v1366_v30 = vmul.f32 1.442695, %v1294_v18  ;;  %4165 = vlog2.f32 %v1496_v21 }
  0xee   : > { %v4665_v23 = vpop.eup %4155  ;;  %v1231_v31 = vand.u32 2147483647, %v4663_v22  ;;  %v951_v32 = vpop.f32.mrf.mxu0  ;;  %4167 = vpow2.f32 %v1370_v24  ;;  %v1500_v5 = vadd.f32 1.0, %v1499_v51  ;;  %v1165_v10 = vmax.f32 %v4632_v55, 0.0 }
  0xef   : > { %v1505_v28 = vadd.f32 1.0, %v4665_v23  ;;  %v1372_v33 = vmul.f32 1.442695, %v1297_v25  ;;  %v1236_v38 = vand.u32 2147483647, %v4668_v26  ;;  %v4677_v40 = vadd.f32 %v4614_v35, %v951_v32 }
  0xf0   : > { %v1295_v36 = vsub.f32 0.0, %v1231_v31  ;;  %v3954_v58 = vpop.f32.mrf.mxu0  ;;  %v1508_v0 = vmul.f32 -0.5, %v4665_v23  ;;  %v1511_v15 = vand.u32 2147483647, %v4665_v23  ;;  %v1168_v18 = vmax.f32 %v4641_v2, 0.0 }
  0xf1   : > { %4169 = vlog2.f32 %v1505_v28  ;;  %v1300_v44 = vsub.f32 0.0, %v1236_v38  ;;  %v1234_v53 = vand.u32 2147483647, %v4677_v40  ;;  %v1166_v19 = vmax.f32 %v4647_v7, 0.0 }
  0xf2   : > { %v4673_v34 = vpop.eup %4157  ;;  %4171 = vpow2.f32 %v1366_v30  ;;  %v1368_v46 = vmul.f32 1.442695, %v1295_v36  ;;  %v4701_v13 = vpop.f32.mrf.mxu0  ;;  %v1509_v21 = vadd.f32 1.0, %v1508_v0  ;;  %v1169_v25 = vmax.f32 %v4654_v14, 0.0 }
  0xf3   : > { %v1532_v43 = vadd.f32 1.0, %v4673_v34  ;;  %4173 = vpow2.f32 %v1372_v33  ;;  %v1378_v57 = vmul.f32 1.442695, %v1300_v44  ;;  %v1298_v8 = vsub.f32 0.0, %v1234_v53 }
  0xf4   : > { %v4680_v45 = vpop.eup %4159  ;;  %4175 = vpow2.f32 %v1350_v39  ;;  %v1535_v9 = vmul.f32 -0.5, %v4673_v34  ;;  %v1501_v28 = vmul.f32 %v4651_v12, %v1500_v5  ;;  %vm4712_vm1 = vcmp.lt.f32.partialorder %v1502_v6, 0.0004427343  ;;  %v4719_v39 = vpop.f32.mrf.mxu0 }
  0xf5   : > { %v1514_v47 = vadd.f32 1.0, %v4680_v45  ;;  %4177 = vlog2.f32 %v1532_v43  ;;  %v1517_v24 = vmul.f32 -0.5, %v4680_v45  ;;  %v1374_v31 = vmul.f32 1.442695, %v1298_v8 }
  0xf6   : > { %v4683_v49 = vpop.eup %4161  ;;  %4179 = vpow2.f32 %v1368_v46  ;;  %v1536_v33 = vadd.f32 1.0, %v1535_v9  ;;  %v1538_v36 = vand.u32 2147483647, %v4673_v34  ;;  %vm4723_vm2 = vcmp.lt.f32.partialorder %v1511_v15, 0.0004427343 }
  0xf7   : > { %4181 = vlog2.f32 %v1514_v47  ;;  %v1541_v3 = vadd.f32 1.0, %v4683_v49  ;;  %v1544_v30 = vmul.f32 -0.5, %v4683_v49  ;;  %v4729_v46 = vadd.f32 %v3954_v58, %v4614_v35 }
  0xf8   : > { %v4689_v59 = vpop.eup %4163  ;;  %4183 = vpow2.f32 %v1378_v57  ;;  %v1510_v51 = vmul.f32 %v4665_v23, %v1509_v21  ;;  %v1518_v53 = vadd.f32 1.0, %v1517_v24  ;;  %v1537_v8 = vmul.f32 %v4673_v34, %v1536_v33 }
  0xf9   : > { %4185 = vpow2.f32 %v1352_v56  ;;  %v1523_v11 = vadd.f32 1.0, %v4689_v59  ;;  %v1520_v56 = vand.u32 2147483647, %v4680_v45  ;;  %v1526_v57 = vmul.f32 -0.5, %v4689_v59 }
  0xfa   : > { %v4166_v20 = vpop.eup %4165  ;;  %4187 = vlog2.f32 %v1541_v3  ;;  %v1545_v3 = vadd.f32 1.0, %v1544_v30  ;;  %vm4740_vm3 = vcmp.lt.f32.partialorder %v1538_v36, 0.0004427343  ;;  %v1547_v21 = vand.u32 2147483647, %v4683_v49 }
  0xfb   : > { %v4709_v27 = vpop.eup %4167  ;;  %4189 = vlog2.f32 %v1523_v11  ;;  %v1498_v43 = vmul.f32 0.6931472, %v4166_v20  ;;  %v4746_v11 = vpop.f32.mrf.mxu0  ;;  %v1237_v34 = vand.u32 2147483647, %v4729_v46  ;;  %vm4756_vm4 = vcmp.lt.f32.partialorder %v1520_v56, 0.0004427343 }
  0xfc   : > { %v1568_v5 = vadd.f32 1.0, %v4709_v27  ;;  %4191 = vpow2.f32 %v1374_v31  ;;  %v1519_v31 = vmul.f32 %v4680_v45, %v1518_v53  ;;  %v1527_v33 = vadd.f32 1.0, %v1526_v57 }
  0xfd   : > { %v1504_v20 = vsel %vm4712_vm1, %v1501_v28, %v1498_v43  ;;  %v1529_v36 = vand.u32 2147483647, %v4689_v59  ;;  %v4764_v29 = vmul.f32 %v4683_v49, %v1545_v3  ;;  %v1301_v43 = vsub.f32 0.0, %v1237_v34  ;;  %v4772_v57 = vpop.f32.mrf.mxu0 }
  0xfe   : > { %v4170_v32 = vpop.eup %4169  ;;  %4193 = vlog2.f32 %v1568_v5  ;;  %v2056_v45 = vadd.f32 %v1504_v20, %v1160_v50  ;;  %v1571_v53 = vmul.f32 -0.5, %v4709_v27  ;;  %vm4776_vm5 = vcmp.lt.f32.partialorder %v1547_v21, 0.0004427343 }
  0xff   : > { %v4721_v41 = vpop.eup %4171  ;;  %v1507_v0 = vmul.f32 0.6931472, %v4170_v32  ;;  %vm4789_vm6 = vcmp.lt.f32.partialorder %v1529_v36, 0.0004427343  ;;  %v4796_v42 = vadd.f32 %v4614_v35, %v4701_v13  ;;  %v4807_v13 = vadd.f32 %v4719_v39, %v4614_v35 }
 0x100   : > { %v4731_v47 = vpop.eup %4173  ;;  %v1550_v23 = vadd.f32 1.0, %v4721_v41  ;;  %v1553_v56 = vmul.f32 -0.5, %v4721_v41 }
 0x101   : > { %v4737_v6 = vpop.eup %4175  ;;  %v1577_v24 = vadd.f32 1.0, %v4731_v47  ;;  %v1513_v28 = vsel %vm4723_vm2, %v1510_v51, %v1507_v0  ;;  %v1574_v51 = vand.u32 2147483647, %v4709_v27  ;;  %v1580_v37 = vmul.f32 -0.5, %v4731_v47 }
 0x102   : > { %v4178_v15 = vpop.eup %4177  ;;  %4195 = vlog2.f32 %v1550_v23  ;;  %v2057_v50 = vadd.f32 %v1513_v28, %v1161_v61  ;;  %v4785_v0 = vmul.f32 %v4689_v59, %v1527_v33  ;;  %v4798_v61 = vadd.f32 -0.6931472, %v2056_v45  ;;  %v970_v28 = vpop.f32.mrf.mxu0 }
 0x103   : > { %v4753_v30 = vpop.eup %4179  ;;  %v1534_v12 = vmul.f32 0.6931472, %v4178_v15  ;;  %4197 = vlog2.f32 %v1577_v24  ;;  %v1380_v24 = vmul.f32 1.442695, %v1301_v43  ;;  %v1572_v59 = vadd.f32 1.0, %v1571_v53 }
 0x104   : > { %v4182_v62 = vpop.eup %4181  ;;  %v1559_v3 = vadd.f32 1.0, %v4753_v30  ;;  %v1554_v34 = vadd.f32 1.0, %v1553_v56  ;;  %v1556_v33 = vand.u32 2147483647, %v4721_v41  ;;  %v1581_v36 = vadd.f32 1.0, %v1580_v37 }
 0x105   : > { %v4766_v54 = vpop.eup %4183  ;;  %v1516_v15 = vmul.f32 0.6931472, %v4182_v62  ;;  %v1540_v62 = vsel %vm4740_vm3, %v1537_v8, %v1534_v12  ;;  %4199 = vpow2.f32 %v1380_v24  ;;  %v1235_v44 = vand.u32 2147483647, %v4796_v42 }
 0x106   : > { %v4774_v9 = vpop.eup %4185  ;;  %v1604_v21 = vadd.f32 1.0, %v4766_v54  ;;  %v1583_v38 = vand.u32 2147483647, %v4731_v47  ;;  %4201 = vlog2.f32 %v1559_v3  ;;  %v4809_v45 = vadd.f32 -0.6931472, %v2057_v50 }
 0x107   : > { %v4188_v23 = vpop.eup %4187  ;;  %v1522_v53 = vsel %vm4756_vm4, %v1519_v31, %v1516_v15  ;;  %v1299_v58 = vsub.f32 0.0, %v1235_v44  ;;  %v2060_v56 = vadd.f32 %v1540_v62, %v1164_v63  ;;  %v1562_v37 = vmul.f32 -0.5, %v4753_v30 }
 0x108   : > { %v4190_v5 = vpop.eup %4189  ;;  %v1543_v43 = vmul.f32 0.6931472, %v4188_v23  ;;  %4203 = vlog2.f32 %v1604_v21  ;;  %v1240_v3 = vand.u32 2147483647, %v4807_v13  ;;  %v3961_v23 = vpop.f32.mrf.mxu0  ;;  %v4820_v39 = vmul.f32 %v4709_v27, %v1572_v59 }
 0x109   : > { %v4813_v8 = vpop.eup %4191  ;;  %v1525_v12 = vmul.f32 0.6931472, %v4190_v5  ;;  %v4823_v50 = vmul.f32 %v4721_v41, %v1554_v34  ;;  %v4826_v31 = vmul.f32 %v4731_v47, %v1581_v36  ;;  %v1607_v44 = vmul.f32 -0.5, %v4766_v54 }
 0x10a   : > { %v2058_v48 = vadd.f32 %v1522_v53, %v1162_v1  ;;  %v1549_v63 = vsel %vm4776_vm5, %v4764_v29, %v1543_v43  ;;  %vm4834_vm7 = vcmp.lt.f32.partialorder %v1574_v51, 0.0004427343  ;;  %v1376_v27 = vmul.f32 1.442695, %v1299_v58  ;;  %v983_v24 = vpop.f32.mrf.mxu0 }
 0x10b   : > { %v4840_v41 = vadd.f32 %v4614_v35, %v4746_v11  ;;  %vm4844_vm8 = vcmp.lt.f32.partialorder %v1556_v33, 0.0004427343  ;;  %v1565_v52 = vand.u32 2147483647, %v4753_v30  ;;  %v1586_v1 = vadd.f32 1.0, %v4813_v8  ;;  %v4194_v49 = vpop.eup %4193 }
 0x10c   : > { %v1304_v29 = vsub.f32 0.0, %v1240_v3  ;;  %v4850_v51 = vadd.f32 -0.6931472, %v2060_v56  ;;  %v1531_v11 = vsel %vm4789_vm6, %v4785_v0, %v1525_v12  ;;  %vm4855_vm9 = vcmp.lt.f32.partialorder %v1583_v38, 0.0004427343  ;;  %v3962_v3 = vpop.f32.mrf.mxu0 }
 0x10d   : > { %v1563_v21 = vadd.f32 1.0, %v1562_v37  ;;  %4205 = vpow2.f32 %v1376_v27  ;;  %v2061_v34 = vadd.f32 %v1549_v63, %v1165_v10  ;;  %v1608_v33 = vadd.f32 1.0, %v1607_v44 }
 0x10e   : > { %v1610_v62 = vand.u32 2147483647, %v4766_v54  ;;  %v1386_v36 = vmul.f32 1.442695, %v1304_v29  ;;  %v4862_v53 = vadd.f32 -0.6931472, %v2058_v48  ;;  %v4867_v38 = vadd.f32 %v4772_v57, %v4614_v35 }
 0x10f   : > { %v4196_v59 = vpop.eup %4195  ;;  %v1238_v0 = vand.u32 2147483647, %v4840_v41  ;;  %v4870_v20 = vadd.f32 %v4614_v35, %v970_v28  ;;  %v2059_v55 = vadd.f32 %v1531_v11, %v1163_v16  ;;  %v1570_v10 = vmul.f32 0.6931472, %v4194_v49 }
 0x110   : > { %v4198_v43 = vpop.eup %4197  ;;  %4207 = vlog2.f32 %v1586_v1  ;;  %v4875_v58 = vadd.f32 %v3961_v23, %v4614_v35  ;;  %v1552_v56 = vmul.f32 0.6931472, %v4196_v59  ;;  %v1241_v37 = vand.u32 2147483647, %v4867_v38 }
 0x111   : > { %4209 = vpow2.f32 %v1386_v36  ;;  %v1302_v12 = vsub.f32 0.0, %v1238_v0  ;;  %v4878_v44 = vadd.f32 -0.6931472, %v2061_v34  ;;  %v1579_v57 = vmul.f32 0.6931472, %v4198_v43 }
 0x112   : > { %v1564_v28 = vmul.f32 %v4753_v30, %v1563_v21  ;;  %vm4881_vm10 = vcmp.lt.f32.partialorder %v1565_v52, 0.0004427343  ;;  %v1239_v60 = vand.u32 2147483647, %v4870_v20  ;;  %v4886_v16 = vpop.eup %4199  ;;  %v1609_v23 = vmul.f32 %v4766_v54, %v1608_v33 }
 0x113   : > { %vm4889_vm11 = vcmp.lt.f32.partialorder %v1610_v62, 0.0004427343  ;;  %v1382_v27 = vmul.f32 1.442695, %v1302_v12  ;;  %v1305_v1 = vsub.f32 0.0, %v1241_v37  ;;  %v4202_v49 = vpop.eup %4201  ;;  %v1576_v52 = vsel %vm4834_vm7, %v4820_v39, %v1570_v10  ;;  %v986_v62 = vpop.f32.mrf.mxu0 }
 0x114   : > { %v1244_v29 = vand.u32 2147483647, %v4875_v58  ;;  %v4894_v30 = vadd.f32 -0.6931472, %v2059_v55  ;;  %v1613_v11 = vadd.f32 1.0, %v4886_v16  ;;  %v1558_v59 = vsel %vm4844_vm8, %v4823_v50, %v1552_v56 }
 0x115   : > { %v4204_v54 = vpop.eup %4203  ;;  %4211 = vpow2.f32 %v1382_v27  ;;  %v1388_v34 = vmul.f32 1.442695, %v1305_v1  ;;  %v1303_v33 = vsub.f32 0.0, %v1239_v60  ;;  %v1585_v36 = vsel %vm4855_vm9, %v4826_v31, %v1579_v57  ;;  %v3965_v1 = vpop.f32.mrf.mxu0 }
 0x116   : > { %v1589_v32 = vmul.f32 -0.5, %v4813_v8  ;;  %4213 = vlog2.f32 %v1613_v11  ;;  %v1308_v39 = vsub.f32 0.0, %v1244_v29  ;;  %v1561_v43 = vmul.f32 0.6931472, %v4202_v49 }
 0x117   : > { %4215 = vpow2.f32 %v1388_v34  ;;  %v1384_v0 = vmul.f32 1.442695, %v1303_v33  ;;  %v4909_v55 = vadd.f32 %v4614_v35, %v983_v24  ;;  %v1606_v5 = vmul.f32 0.6931472, %v4204_v54 }
 0x118   : > { %v1394_v50 = vmul.f32 1.442695, %v1308_v39  ;;  %v4912_v10 = vadd.f32 %v3962_v3, %v4614_v35  ;;  %v4915_v56 = vadd.f32 %v4614_v35, %v986_v62  ;;  %v2064_v31 = vadd.f32 %v1576_v52, %v1168_v18 }
 0x119   : > { %v2062_v15 = vadd.f32 %v1558_v59, %v1166_v19  ;;  %4217 = vpow2.f32 %v1384_v0  ;;  %v1242_v12 = vand.u32 2147483647, %v4909_v55  ;;  %v2065_v24 = vadd.f32 %v1585_v36, %v1169_v25 }
 0x11a   : > { %v4922_v37 = vpop.eup %4205  ;;  %v1592_v3 = vand.u32 2147483647, %v4813_v8  ;;  %4219 = vpow2.f32 %v1394_v50  ;;  %v1245_v57 = vand.u32 2147483647, %v4912_v10  ;;  %v1567_v7 = vsel %vm4881_vm10, %v1564_v28, %v1561_v43 }
 0x11b   : > { %v1595_v18 = vadd.f32 1.0, %v4922_v37  ;;  %v1306_v19 = vsub.f32 0.0, %v1242_v12  ;;  %v1612_v60 = vsel %vm4889_vm11, %v1609_v23, %v1606_v5  ;;  %v1590_v27 = vadd.f32 1.0, %v1589_v32 }
 0x11c   : > { %v1309_v14 = vsub.f32 0.0, %v1245_v57  ;;  %v1243_v25 = vand.u32 2147483647, %v4915_v56  ;;  %v4938_v52 = vadd.f32 -0.6931472, %v2064_v31  ;;  %v6738_v23 = vmax.f32 %v4663_v22, 0.0 }
 0x11d   : > { %v4208_v29 = vpop.eup %4207  ;;  %v4940_v11 = vadd.f32 -0.6931472, %v2062_v15  ;;  %v4945_v54 = vadd.f32 -0.6931472, %v2065_v24  ;;  %vm4949_vm12 = vcmp.lt.f32.partialorder %v1592_v3, 0.0004427343  ;;  %4221 = vlog2.f32 %v1595_v18  ;;  %v999_v24 = vpop.f32.mrf.mxu0 }
 0x11e   : > { %6737 = vst [vmem:[#allocation3_spill] sm:$0xff] %v4938_v52  ;;  %v4943_v48 = vpop.eup %4209  ;;  %v2063_v63 = vadd.f32 %v1567_v7, %v6738_v23  ;;  %v1390_v34 = vmul.f32 1.442695, %v1306_v19  ;;  %v6741_v33 = vmax.f32 %v4668_v26, 0.0  ;;  %v1396_v36 = vmul.f32 1.442695, %v1309_v14 }
 0x11f   : > { %v4956_v32 = vadd.f32 %v3965_v1, %v4614_v35  ;;  %v1591_v39 = vmul.f32 %v4813_v8, %v1590_v27  ;;  %v1616_v43 = vmul.f32 -0.5, %v4886_v16  ;;  %v1619_v22 = vand.u32 2147483647, %v4886_v16 }
 0x120   : > { %v2068_v62 = vadd.f32 %v1612_v60, %v6741_v33  ;;  %v1307_v0 = vsub.f32 0.0, %v1243_v25  ;;  %v1588_v5 = vmul.f32 0.6931472, %v4208_v29  ;;  %v1640_v50 = vadd.f32 1.0, %v4943_v48 }
 0x121   : > { %4223 = vpow2.f32 %v1390_v34  ;;  %v4967_v12 = vadd.f32 -0.6931472, %v2063_v63  ;;  %v1248_v19 = vand.u32 2147483647, %v4956_v32  ;;  %v1617_v27 = vadd.f32 1.0, %v1616_v43  ;;  %v3966_v43 = vpop.f32.mrf.mxu0 }
 0x122   : > { %v4963_v26 = vpop.eup %4211  ;;  %4225 = vpow2.f32 %v1396_v36  ;;  %v4970_v57 = vadd.f32 -0.6931472, %v2068_v62  ;;  %vm4977_vm13 = vcmp.lt.f32.partialorder %v1619_v22, 0.0004427343  ;;  %v1392_v1 = vmul.f32 1.442695, %v1307_v0 }
 0x123   : > { %v4214_v3 = vpop.eup %4213  ;;  %v1622_v7 = vadd.f32 1.0, %v4963_v26  ;;  %v1594_v29 = vsel %vm4949_vm12, %v1591_v39, %v1588_v5  ;;  %v1598_v23 = vmul.f32 -0.5, %v4922_v37  ;;  %4227 = vlog2.f32 %v1640_v50 }
 0x124   : > { %v4975_v60 = vpop.eup %4215  ;;  %v1615_v33 = vmul.f32 0.6931472, %v4214_v3  ;;  %v1601_v62 = vand.u32 2147483647, %v4922_v37  ;;  %v1643_v36 = vmul.f32 -0.5, %v4943_v48  ;;  %v1312_v39 = vsub.f32 0.0, %v1248_v19 }
 0x125   : > { %v1649_v63 = vadd.f32 1.0, %v4975_v60  ;;  %4229 = vlog2.f32 %v1622_v7  ;;  %v4994_v0 = vadd.f32 %v4614_v35, %v999_v24  ;;  %v6744_v5 = vmax.f32 %v4677_v40, 0.0 }
 0x126   : > { %v4986_v34 = vpop.eup %4217  ;;  %v1618_v3 = vmul.f32 %v4886_v16, %v1617_v27  ;;  %v1599_v2 = vadd.f32 1.0, %v1598_v23  ;;  %v1644_v24 = vadd.f32 1.0, %v1643_v36  ;;  %vm5010_vm14 = vcmp.lt.f32.partialorder %v1601_v62, 0.0004427343 }
 0x127   : > { %v4990_v22 = vpop.eup %4219  ;;  %4231 = vlog2.f32 %v1649_v63  ;;  %v1631_v59 = vadd.f32 1.0, %v4986_v34  ;;  %v2066_v50 = vadd.f32 %v1594_v29, %v6744_v5  ;;  %v5002_v63 = vadd.f32 %v3966_v43, %v4614_v35 }
 0x128   : > { %4233 = vpow2.f32 %v1392_v1  ;;  %v1676_v7 = vadd.f32 1.0, %v4990_v22  ;;  %v1621_v19 = vsel %vm4977_vm13, %v1618_v3, %v1615_v33  ;;  %v1402_v1 = vmul.f32 1.442695, %v1312_v39 }
 0x129   : > { %4235 = vlog2.f32 %v1631_v59  ;;  %v1246_v29 = vand.u32 2147483647, %v4994_v0  ;;  %v5015_v43 = vadd.f32 -0.6931472, %v2066_v50  ;;  %v1646_v14 = vand.u32 2147483647, %v4943_v48 }
 0x12a   : > { %v4222_v23 = vpop.eup %4221  ;;  %v1625_v33 = vmul.f32 -0.5, %v4963_v26  ;;  %4237 = vlog2.f32 %v1676_v7  ;;  %v6747_v36 = vmax.f32 %v4729_v46, 0.0  ;;  %v1600_v5 = vmul.f32 %v4922_v37, %v1599_v2 }
 0x12b   : > { %v1652_v62 = vmul.f32 -0.5, %v4975_v60  ;;  %v1249_v3 = vand.u32 2147483647, %v5002_v63  ;;  %v5027_v16 = vmul.f32 %v4943_v48, %v1644_v24  ;;  %v1634_v50 = vmul.f32 -0.5, %v4986_v34 }
 0x12c   : > { %v2069_v59 = vadd.f32 %v1621_v19, %v6747_v36  ;;  %v1679_v47 = vmul.f32 -0.5, %v4990_v22  ;;  %v1597_v46 = vmul.f32 0.6931472, %v4222_v23  ;;  %4239 = vpow2.f32 %v1402_v1  ;;  %v1002_v19 = vpop.f32.mrf.mxu0 }
 0x12d   : > { %v1310_v2 = vsub.f32 0.0, %v1246_v29  ;;  %v1626_v36 = vadd.f32 1.0, %v1625_v33  ;;  %v1628_v49 = vand.u32 2147483647, %v4963_v26  ;;  %v1655_v48 = vand.u32 2147483647, %v4975_v60 }
 0x12e   : > { %v5024_v39 = vpop.eup %4223  ;;  %v5038_v15 = vadd.f32 -0.6931472, %v2069_v59  ;;  %vm5040_vm15 = vcmp.lt.f32.partialorder %v1646_v14, 0.0004427343  ;;  %v1653_v7 = vadd.f32 1.0, %v1652_v62  ;;  %v1313_v18 = vsub.f32 0.0, %v1249_v3 }
 0x12f   : > { %v5032_v40 = vpop.eup %4225  ;;  %v1658_v37 = vadd.f32 1.0, %v5024_v39  ;;  %v1637_v23 = vand.u32 2147483647, %v4986_v34  ;;  %v1635_v29 = vadd.f32 1.0, %v1634_v50  ;;  %v1680_v31 = vadd.f32 1.0, %v1679_v47 }
 0x130   : > { %v1685_v24 = vadd.f32 1.0, %v5032_v40  ;;  %v4228_v1 = vpop.eup %4227  ;;  %v5046_v33 = vadd.f32 %v4614_v35, %v1002_v19  ;;  %v1603_v59 = vsel %vm5010_vm14, %v1600_v5, %v1597_v46  ;;  %v1682_v14 = vand.u32 2147483647, %v4990_v22 }
 0x131   : > { %4241 = vlog2.f32 %v1658_v37  ;;  %v1398_v21 = vmul.f32 1.442695, %v1310_v2  ;;  %v1627_v52 = vmul.f32 %v4963_v26, %v1626_v36  ;;  %vm5053_vm0 = vcmp.lt.f32.partialorder %v1628_v49, 0.0004427343  ;;  %v5070_v26 = vpop.f32.mrf.mxu0 }
 0x132   : > { %v4230_v8 = vpop.eup %4229  ;;  %vm5057_vm1 = vcmp.lt.f32.partialorder %v1655_v48, 0.0004427343  ;;  %4243 = vlog2.f32 %v1685_v24  ;;  %v1654_v5 = vmul.f32 %v4975_v60, %v1653_v7  ;;  %vm5066_vm2 = vcmp.lt.f32.partialorder %v1637_v23, 0.0004427343 }
 0x133   : > { %v1404_v49 = vmul.f32 1.442695, %v1313_v18  ;;  %v6756_v2 = vmax.f32 %v4796_v42, 0.0  ;;  %v1642_v36 = vmul.f32 0.6931472, %v4228_v1  ;;  %v1636_v48 = vmul.f32 %v4986_v34, %v1635_v29  ;;  %v1015_v29 = vpop.f32.mrf.mxu0 }
 0x134   : > { %v4232_v62 = vpop.eup %4231  ;;  %v1681_v24 = vmul.f32 %v4990_v22, %v1680_v31  ;;  %v1624_v28 = vmul.f32 0.6931472, %v4230_v8  ;;  %vm5076_vm3 = vcmp.lt.f32.partialorder %v1682_v14, 0.0004427343  ;;  %4245 = vpow2.f32 %v1398_v21 }
 0x135   : > { %v5061_v50 = vpop.eup %4233  ;;  %v2067_v19 = vadd.f32 %v1603_v59, %v6756_v2  ;;  %v1651_v27 = vmul.f32 0.6931472, %v4232_v62  ;;  %v1247_v18 = vand.u32 2147483647, %v5046_v33  ;;  %4247 = vpow2.f32 %v1404_v49 }
 0x136   : > { %v4236_v37 = vpop.eup %4235  ;;  %v1667_v23 = vadd.f32 1.0, %v5061_v50  ;;  %v1478_v42 = vadd.f32 1.0, %v4737_v6  ;;  %v1661_v34 = vmul.f32 -0.5, %v5024_v39  ;;  %v1648_v21 = vsel %vm5040_vm15, %v5027_v16, %v1642_v36 }
 0x137   : > { %v1633_v7 = vmul.f32 0.6931472, %v4236_v37  ;;  %v4238_v1 = vpop.eup %4237  ;;  %v1311_v22 = vsub.f32 0.0, %v1247_v18  ;;  %v5086_v59 = vadd.f32 -0.6931472, %v2067_v19  ;;  %v1688_v62 = vmul.f32 -0.5, %v5032_v40 }
 0x138   : > { %v1664_v14 = vand.u32 2147483647, %v5024_v39  ;;  %v1657_v49 = vsel %vm5057_vm1, %v1654_v5, %v1651_v27  ;;  %v1670_v37 = vmul.f32 -0.5, %v5061_v50  ;;  %4249 = vlog2.f32 %v1478_v42  ;;  %v5105_v27 = vpop.f32.mrf.mxu0 }
 0x139   : > { %v1400_v2 = vmul.f32 1.442695, %v1311_v22  ;;  %v5096_v8 = vpop.eup %4239  ;;  %v1630_v19 = vsel %vm5053_vm0, %v1627_v52, %v1624_v28  ;;  %v1639_v25 = vsel %vm5066_vm2, %v1636_v48, %v1633_v7  ;;  %v1678_v16 = vmul.f32 0.6931472, %v4238_v1 }
 0x13a   : > { %4251 = vlog2.f32 %v1667_v23  ;;  %v6759_v36 = vmax.f32 %v4807_v13, 0.0  ;;  %v1662_v31 = vadd.f32 1.0, %v1661_v34  ;;  %v1691_v47 = vand.u32 2147483647, %v5032_v40 }
 0x13b   : > { %4253 = vpow2.f32 %v1400_v2  ;;  %v6760_v5 = vmax.f32 %v4867_v38, 0.0  ;;  %vm5109_vm4 = vcmp.lt.f32.partialorder %v1664_v14, 0.0004427343  ;;  %v1689_v52 = vadd.f32 1.0, %v1688_v62  ;;  %v5132_v2 = vpop.f32.mrf.mxu0 }
 0x13c   : > { %v2072_v18 = vadd.f32 %v1648_v21, %v6759_v36  ;;  %v1487_v28 = vadd.f32 1.0, %v4774_v9  ;;  %v2188_v13 = vpack.c.bf16 %v5086_v59, %v5015_v43  ;;  %v6763_v48 = vmax.f32 %v4840_v41, 0.0 }
 0x13d   : > { %v2073_v42 = vadd.f32 %v1657_v49, %v6760_v5  ;;  %v6764_v23 = vmax.f32 %v4870_v20, 0.0  ;;  %v1715_v38 = vmul.f32 -0.5, %v5096_v8  ;;  %v1684_v34 = vsel %vm5076_vm3, %v1681_v24, %v1678_v16 }
 0x13e   : > { %v4242_v46 = vpop.eup %4241  ;;  %v2070_v7 = vadd.f32 %v1630_v19, %v6763_v48  ;;  %v1671_v22 = vadd.f32 1.0, %v1670_v37  ;;  %v1481_v21 = vmul.f32 -0.5, %v4737_v6  ;;  %4255 = vlog2.f32 %v1487_v28  ;;  %v3973_v48 = vpop.f32.mrf.mxu0 }
 0x13f   : > { %v2071_v1 = vadd.f32 %v1639_v25, %v6764_v23  ;;  %v4244_v14 = vpop.eup %4243  ;;  %v5124_v62 = vadd.f32 -0.6931472, %v2072_v18  ;;  %v1663_v49 = vmul.f32 %v5024_v39, %v1662_v31  ;;  %vm5127_vm5 = vcmp.lt.f32.partialorder %v1691_v47, 0.0004427343 }
 0x140   : > { %v1712_v20 = vadd.f32 1.0, %v5096_v8  ;;  %v5134_v19 = vadd.f32 -0.6931472, %v2073_v42  ;;  %v1660_v24 = vmul.f32 0.6931472, %v4242_v46  ;;  %v1690_v60 = vmul.f32 %v5032_v40, %v1689_v52  ;;  %v1031_v41 = vpop.f32.mrf.mxu0 }
 0x141   : > { %v1673_v37 = vand.u32 2147483647, %v5061_v50  ;;  %v5138_v25 = vadd.f32 -0.6931472, %v2070_v7  ;;  %v5140_v16 = vadd.f32 -0.6931472, %v2071_v1  ;;  %v5144_v18 = vpop.eup %4245  ;;  %v5147_v5 = vmul.f32 %v5061_v50, %v1671_v22 }
 0x142   : > { %v6767_v39 = vmax.f32 %v4875_v58, 0.0  ;;  %v1716_v36 = vadd.f32 1.0, %v1715_v38  ;;  %v1687_v47 = vmul.f32 0.6931472, %v4244_v14  ;;  %v1482_v42 = vadd.f32 1.0, %v1481_v21  ;;  %v5153_v52 = vpop.eup %4247 }
 0x143   : > { %v5151_v40 = vadd.f32 %v5070_v26, %v4614_v35  ;;  %4257 = vlog2.f32 %v1712_v20  ;;  %v1718_v28 = vand.u32 2147483647, %v5096_v8  ;;  %v1490_v58 = vmul.f32 -0.5, %v4774_v9 }
 0x144   : > { %v2076_v31 = vadd.f32 %v1684_v34, %v6767_v39  ;;  %v5158_v46 = vadd.f32 %v4614_v35, %v1015_v29  ;;  %v1666_v7 = vsel %vm5109_vm4, %v1663_v49, %v1660_v24  ;;  %v1484_v26 = vand.u32 2147483647, %v4737_v6 }
 0x145   : > { %v1493_v23 = vand.u32 2147483647, %v4774_v9  ;;  %v5171_v34 = vmul.f32 %v5096_v8, %v1716_v36  ;;  %v1694_v35 = vadd.f32 1.0, %v5144_v18  ;;  %v4250_v29 = vpop.eup %4249  ;;  %v1693_v22 = vsel %vm5127_vm5, %v1690_v60, %v1687_v47 }
 0x146   : > { %v5168_v38 = vadd.f32 -0.6931472, %v2076_v31  ;;  %v1721_v3 = vadd.f32 1.0, %v5153_v52  ;;  %v1483_v21 = vmul.f32 %v4737_v6, %v1482_v42  ;;  %v1252_v14 = vand.u32 2147483647, %v5151_v40 }
 0x147   : > { %v4252_v49 = vpop.eup %4251  ;;  %v6768_v20 = vmax.f32 %v4909_v55, 0.0  ;;  %vm5181_vm6 = vcmp.lt.f32.partialorder %v1673_v37, 0.0004427343  ;;  %v1480_v8 = vmul.f32 0.6931472, %v4250_v29  ;;  %v1491_v31 = vadd.f32 1.0, %v1490_v58 }
 0x148   : > { %v1250_v36 = vand.u32 2147483647, %v5158_v46  ;;  %v5186_v60 = vpop.eup %4253  ;;  %vm5188_vm7 = vcmp.lt.f32.partialorder %v1484_v26, 0.0004427343  ;;  %vm5192_vm8 = vcmp.lt.f32.partialorder %v1493_v23, 0.0004427343  ;;  %4259 = vlog2.f32 %v1694_v35  ;;  %v3974_v35 = vpop.f32.mrf.mxu0 }
 0x149   : > { %v2074_v24 = vadd.f32 %v1666_v7, %v6768_v20  ;;  %v1316_v55 = vsub.f32 0.0, %v1252_v14  ;;  %v5199_v37 = vld [vmem:[%s6694_s5] ss:$0 sm:$0xff]  ;;  %v6775_v58 = vmax.f32 %v4912_v10, 0.0  ;;  %v1703_v26 = vadd.f32 1.0, %v5186_v60 }
 0x14a   : > { %v5203_v42 = vadd.f32 %v5199_v37, %v5105_v27  ;;  %v1486_v23 = vsel %vm5188_vm7, %v1483_v21, %v1480_v8  ;;  %v1669_v29 = vmul.f32 0.6931472, %v4252_v49  ;;  %4261 = vlog2.f32 %v1721_v3 }
 0x14b   : > { %v2077_v7 = vadd.f32 %v1693_v22, %v6775_v58  ;;  %vm530_vm9 = vcmask 261120   ;;  %v1410_v14 = vmul.f32 1.442695, %v1316_v55  ;;  %v1314_v20 = vsub.f32 0.0, %v1250_v36  ;;  %v4256_v50 = vpop.eup %4255 }
 0x14c   : > { %v5211_v1 = vadd.f32 -0.6931472, %v2074_v24  ;;  %4263 = vlog2.f32 %v1703_v26  ;;  %v1492_v10 = vmul.f32 %v4774_v9, %v1491_v31  ;;  %v1489_v22 = vmul.f32 0.6931472, %v4256_v50  ;;  %v1034_v26 = vpop.f32.mrf.mxu0 }
 0x14d   : > { %v6776_v6 = vmax.f32 %v4644_v4, 0.0  ;;  %4265 = vpow2.f32 %v1410_v14  ;;  %v1406_v3 = vmul.f32 1.442695, %v1314_v20  ;;  %v5217_v49 = vadd.f32 -0.6931472, %v2077_v7 }
 0x14e   : > { %v1697_v8 = vmul.f32 -0.5, %v5144_v18  ;;  %v1253_v36 = vand.u32 2147483647, %v5203_v42  ;;  %v5223_v24 = vadd.f32 %v5199_v37, %v5132_v2  ;;  %vm5231_vm10 = vcmp.lt.f32.partialorder %v1718_v28, 0.0004427343 }
 0x14f   : > { %v2054_v21 = vadd.f32 %v1486_v23, %v6776_v6  ;;  %v1495_v9 = vsel %vm5192_vm8, %v1492_v10, %v1489_v22  ;;  %4267 = vpow2.f32 %v1406_v3  ;;  %v5238_v50 = vadd.f32 %v5199_v37, %v3973_v48 }
 0x150   : > { %v5241_v2 = vadd.f32 %v5199_v37, %v1031_v41  ;;  %v1724_v31 = vmul.f32 -0.5, %v5153_v52  ;;  %v6780_v55 = vmax.f32 %v4658_v17, 0.0  ;;  %v1317_v58 = vsub.f32 0.0, %v1253_v36  ;;  %v4258_v47 = vpop.eup %4257 }
 0x151   : > { %v1251_v7 = vand.u32 2147483647, %v5223_v24  ;;  %v1675_v48 = vsel %vm5181_vm6, %v5147_v5, %v1669_v29  ;;  %v3739_v23 = vadd.f32 -0.6931472, %v2054_v21  ;;  %v1256_v14 = vand.u32 2147483647, %v5238_v50 }
 0x152   : > { %v2055_v28 = vadd.f32 %v1495_v9, %v6780_v55  ;;  %v1254_v41 = vand.u32 2147483647, %v5241_v2  ;;  %v1412_v10 = vmul.f32 1.442695, %v1317_v58  ;;  %v5253_v17 = vadd.f32 %v5199_v37, %v3974_v35 }
 0x153   : > { %v1315_v22 = vsub.f32 0.0, %v1251_v7  ;;  %v1700_v6 = vand.u32 2147483647, %v5144_v18  ;;  %v1320_v3 = vsub.f32 0.0, %v1256_v14  ;;  %v5261_v5 = vadd.f32 %v5199_v37, %v1034_v26 }
 0x154   : > { %v3740_v20 = vadd.f32 -0.6931472, %v2055_v28  ;;  %v1318_v36 = vsub.f32 0.0, %v1254_v41  ;;  %v1714_v39 = vmul.f32 0.6931472, %v4258_v47  ;;  %4269 = vpow2.f32 %v1412_v10 }
 0x155   : > { %v1408_v21 = vmul.f32 1.442695, %v1315_v22  ;;  %v6781_v9 = vmax.f32 %v4915_v56, 0.0  ;;  %v1698_v28 = vadd.f32 1.0, %v1697_v8  ;;  %v1418_v35 = vmul.f32 1.442695, %v1320_v3  ;;  %v4260_v47 = vpop.eup %4259 }
 0x156   : > { %v2182_v29 = vpack.c.bf16 %v3740_v20, %v3739_v23  ;;  %v1414_v58 = vmul.f32 1.442695, %v1318_v36  ;;  %v1725_v27 = vadd.f32 1.0, %v1724_v31  ;;  %v1257_v26 = vand.u32 2147483647, %v5253_v17 }
 0x157   : > { %v2075_v55 = vadd.f32 %v1675_v48, %v6781_v9  ;;  %4271 = vpow2.f32 %v1408_v21  ;;  %vm5271_vm11 = vcmp.lt.f32.partialorder %v1700_v6, 0.0004427343  ;;  %v1727_v56 = vand.u32 2147483647, %v5153_v52  ;;  %v4262_v14 = vpop.eup %4261 }
 0x158   : > { %4007 = vmatprep.mubr.msk.bf16.mxu1 %vm530_vm9, %v2182_v29  ;;  %v1706_v8 = vmul.f32 -0.5, %v5186_v60  ;;  %v6784_v48 = vpack.c.bf16 %v4809_v45, %v4798_v61  ;;  %4273 = vpow2.f32 %v1418_v35  ;;  %v1255_v31 = vand.u32 2147483647, %v5261_v5  ;;  %v3977_v61 = vpop.f32.mrf.mxu0 }
 0x159   : > { %v1720_v41 = vsel %vm5231_vm10, %v5171_v34, %v1714_v39  ;;  %v6785_v20 = vpack.c.bf16 %v4894_v30, %v4862_v53  ;;  %4275 = vpow2.f32 %v1414_v58  ;;  %v1321_v10 = vsub.f32 0.0, %v1257_v26  ;;  %v4264_v45 = vpop.eup %4263 }
 0x15a   : > { %4008 = vmatmul.mubr.msk.bf16.vlgmr.msra.gmra.mxu1 %vm530_vm9, %v6784_v48  ;;  %v2625_v22 = vlaneseq  ;;  %v5289_v6 = vadd.f32 -0.6931472, %v2075_v55  ;;  %v1699_v3 = vmul.f32 %v5144_v18, %v1698_v28  ;;  %v1319_v29 = vsub.f32 0.0, %v1255_v31  ;;  %v5299_v53 = vpop.eup %4265  ;;  %v1047_v48 = vpop.f32.mrf.mxu0 }
 0x15b   : > { %4011 = vmatprep.mubr.msk.bf16.mxu1 %vm530_vm9, %v6785_v20  ;;  %v1726_v30 = vmul.f32 %v5153_v52, %v1725_v27  ;;  %v1709_v34 = vand.u32 2147483647, %v5186_v60  ;;  %v1420_v4 = vmul.f32 1.442695, %v1321_v10  ;;  %v6786_v18 = vmax.f32 %v4956_v32, 0.0  ;;  %v5315_v27 = vld [vmem:[%s5297_s30] sm:$0xff] }
 0x15c   : > { %v5303_v39 = vshrl.u32 %v2625_v22, 7  ;;  %vm5307_vm12 = vcmp.lt.f32.partialorder %v1727_v56, 0.0004427343  ;;  %v1707_v55 = vadd.f32 1.0, %v1706_v8  ;;  %v1748_v28 = vadd.f32 1.0, %v5299_v53  ;;  %v5312_v35 = vpop.eup %4267  ;;  %6789 = vst [vmem:[#allocation4_spill] sm:$0xff] %v5315_v27 }
 0x15d   : > { %v2080_v21 = vadd.f32 %v1720_v41, %v6786_v18  ;;  %v1696_v58 = vmul.f32 0.6931472, %v4260_v47  ;;  %4277 = vpow2.f32 %v1420_v4  ;;  %v1416_v52 = vmul.f32 1.442695, %v1319_v29 }
 0x15e   : > { %v6705_v26 = vsub.s32 0, %v5303_v39  ;;  %v1723_v56 = vmul.f32 0.6931472, %v4262_v14  ;;  %v1705_v31 = vmul.f32 0.6931472, %v4264_v45  ;;  %v5321_v41 = vadd.f32 %v5199_v37, %v3977_v61 }
 0x15f   : > { %vm5323_vm13 = vcmp.lt.f32.partialorder %v1709_v34, 0.0004427343  ;;  %v1730_v47 = vadd.f32 1.0, %v5312_v35  ;;  %4279 = vpow2.f32 %v1416_v52  ;;  %v1708_v10 = vmul.f32 %v5186_v60, %v1707_v55 }
 0x160   : > { %6790 = vst [vmem:[#allocation5_spill] sm:$0xff] %v5321_v41  ;;  %4281 = vlog2.f32 %v1748_v28  ;;  %v6793_v22 = vpack.c.bf16 %v4878_v44, %v4850_v51  ;;  %v5337_v14 = vrot.slane %v5315_v27, %v6705_v26  ;;  %v5340_v61 = vadd.f32 %v5199_v37, %v1047_v48 }
 0x161   : > { %v5342_v45 = vadd.f32 -0.6931472, %v2080_v21  ;;  %v1702_v29 = vsel %vm5271_vm11, %v1699_v3, %v1696_v58  ;;  %v6795_v51 = vpack.c.bf16 %v4967_v12, %v4940_v11  ;;  %v5352_v44 = vpop.eup %4269  ;;  %v1729_v4 = vsel %vm5307_vm12, %v1726_v30, %v1723_v56 }
 0x162   : > { %4012 = vmatmul.mubr.msk.bf16.gmra.mxu1 %vm530_vm9, %v6793_v22  ;;  %6794 = vst [vmem:[#allocation6_spill] sm:$0xff] %v5340_v61  ;;  %v1711_v18 = vsel %vm5323_vm13, %v1708_v10, %v1705_v31  ;;  %2630 = vbcast.lane.b32.xlu0 %v5337_v14, 256  ;;  %v1260_v23 = vand.u32 2147483647, %v5321_v41  ;;  %v6703_v3 = vsub.s32 1, %v5303_v39  ;;  %v1751_v21 = vmul.f32 -0.5, %v5299_v53  ;;  %v3978_v22 = vpop.f32.mrf.mxu0 }
 0x163   : > { %4015 = vmatprep.mubr.msk.bf16.mxu1 %vm530_vm9, %v6795_v51  ;;  %4283 = vlog2.f32 %v1730_v47  ;;  %v1757_v11 = vadd.f32 1.0, %v5352_v44  ;;  %v6796_v30 = vmax.f32 %v4994_v0, 0.0  ;;  %v1258_v58 = vand.u32 2147483647, %v5340_v61 }
 0x164   : > { %v5364_v55 = vpop.eup %4271  ;;  %v5373_v52 = vrot.slane %v5315_v27, %v6703_v3  ;;  %v6798_v56 = vmax.f32 %v5002_v63, 0.0  ;;  %v6799_v8 = vmax.f32 %v5046_v33, 0.0  ;;  %v1754_v0 = vand.u32 2147483647, %v5299_v53 }
 0x165   : > { %v2078_v9 = vadd.f32 %v1702_v29, %v6796_v30  ;;  %v5375_v48 = vpop.eup %4273  ;;  %v1739_v10 = vadd.f32 1.0, %v5364_v55  ;;  %v1733_v51 = vmul.f32 -0.5, %v5312_v35  ;;  %4285 = vlog2.f32 %v1757_v11 }
 0x166   : > { %6797 = vst [vmem:[#allocation7_spill] sm:$0xff] %v5373_v52  ;;  %v2081_v31 = vadd.f32 %v1729_v4, %v6798_v56  ;;  %v2079_v47 = vadd.f32 %v1711_v18, %v6799_v8  ;;  %v5383_v29 = vpop.eup %4275  ;;  %v1784_v30 = vadd.f32 1.0, %v5375_v48  ;;  %v1324_v3 = vsub.f32 0.0, %v1260_v23  ;;  %2649 = vbcast.lane.b32.xlu1 %v5373_v52, 256  ;;  %2634 = vbcast.lane.b32.xlu0 %v5337_v14, 264  ;;  %v6800_v56 = vld [vmem:[#allocation3_spill] sm:$0xff] }
 0x167   : > { %v1752_v63 = vadd.f32 1.0, %v1751_v21  ;;  %v1760_v4 = vmul.f32 -0.5, %v5352_v44  ;;  %4287 = vlog2.f32 %v1739_v10  ;;  %v1766_v33 = vadd.f32 1.0, %v5383_v29 }
 0x168   : > { %v5391_v18 = vadd.f32 -0.6931472, %v2078_v9  ;;  %4289 = vlog2.f32 %v1784_v30  ;;  %v6801_v8 = vpack.c.bf16 %v4945_v54, %v6800_v56  ;;  %v1322_v11 = vsub.f32 0.0, %v1258_v58 }
 0x169   : > { %v5398_v23 = vadd.f32 %v5199_v37, %v3978_v22  ;;  %v5400_v21 = vadd.f32 -0.6931472, %v2081_v31  ;;  %v5402_v28 = vadd.f32 -0.6931472, %v2079_v47  ;;  %v1736_v10 = vand.u32 2147483647, %v5312_v35  ;;  %v1050_v31 = vpop.f32.mrf.mxu0 }
 0x16a   : > { %4016 = vmatmul.mubr.msk.bf16.gmra.mxu1 %vm530_vm9, %v6801_v8  ;;  %4291 = vlog2.f32 %v1766_v33  ;;  %v5409_v9 = vpop.eup %4277  ;;  %v1734_v54 = vadd.f32 1.0, %v1733_v51  ;;  %v1742_v58 = vmul.f32 -0.5, %v5364_v55  ;;  %v1426_v30 = vmul.f32 1.442695, %v1324_v3  ;;  %2653 = vbcast.lane.b32.xlu1 %v5373_v52, 264 }
 0x16b   : > { %6802 = vst [vmem:[#allocation3_spill] sm:$0xff] %v5398_v23  ;;  %4019 = vmatprep.mubr.msk.bf16.mxu1 %vm530_vm9, %v2188_v13  ;;  %v5415_v47 = vmul.f32 %v5299_v53, %v1752_v63  ;;  %vm5417_vm14 = vcmp.lt.f32.partialorder %v1754_v0, 0.0004427343  ;;  %v1761_v43 = vadd.f32 1.0, %v1760_v4  ;;  %v1745_v59 = vand.u32 2147483647, %v5364_v55  ;;  %v3981_v34 = vpop.f32.mrf.mxu0 }
 0x16c   : > { %v1793_v13 = vadd.f32 1.0, %v5409_v9  ;;  %v5423_v51 = vpop.eup %4279  ;;  %v1787_v56 = vmul.f32 -0.5, %v5375_v48  ;;  %v1422_v8 = vmul.f32 1.442695, %v1322_v11  ;;  %v1261_v22 = vand.u32 2147483647, %v5398_v23 }
 0x16d   : > { %v4282_v53 = vpop.eup %4281  ;;  %v1775_v63 = vadd.f32 1.0, %v5423_v51  ;;  %v5433_v7 = vmul.f32 %v5312_v35, %v1734_v54  ;;  %vm5435_vm15 = vcmp.lt.f32.partialorder %v1736_v10, 0.0004427343  ;;  %v1763_v11 = vand.u32 2147483647, %v5352_v44 }
 0x16e   : > { %4293 = vlog2.f32 %v1793_v13  ;;  %v1743_v3 = vadd.f32 1.0, %v1742_v58  ;;  %v5441_v20 = vmul.f32 %v5352_v44, %v1761_v43  ;;  %v1790_v13 = vand.u32 2147483647, %v5375_v48 }
 0x16f   : > { %4295 = vpow2.f32 %v1426_v30  ;;  %v1750_v35 = vmul.f32 0.6931472, %v4282_v53  ;;  %vm5445_vm0 = vcmp.lt.f32.partialorder %v1745_v59, 0.0004427343  ;;  %v1788_v54 = vadd.f32 1.0, %v1787_v56  ;;  %v1063_v53 = vpop.f32.mrf.mxu0 }
 0x170   : > { %4297 = vlog2.f32 %v1775_v63  ;;  %v4284_v0 = vpop.eup %4283  ;;  %v1325_v60 = vsub.f32 0.0, %v1261_v22  ;;  %v6809_v58 = vpack.c.bf16 %v5038_v15, %v4970_v57  ;;  %v1769_v44 = vmul.f32 -0.5, %v5383_v29 }
 0x171   : > { %4299 = vpow2.f32 %v1422_v8  ;;  %v1772_v30 = vand.u32 2147483647, %v5383_v29  ;;  %v5456_v43 = vadd.f32 %v5199_v37, %v1050_v31  ;;  %v6704_v59 = vsub.s32 2, %v5303_v39 }
 0x172   : > { %4020 = vmatmul.mubr.msk.bf16.gmra.mxu1 %vm530_vm9, %v6809_v58  ;;  %v6810_v56 = vpack.c.bf16 %v5140_v16, %v5138_v25  ;;  %v1744_v22 = vmul.f32 %v5364_v55, %v1743_v3  ;;  %v1796_v15 = vmul.f32 -0.5, %v5409_v9  ;;  %v1428_v57 = vmul.f32 1.442695, %v1325_v60  ;;  %v4286_v63 = vpop.eup %4285 }
 0x173   : > { %v5466_v8 = vadd.f32 %v5199_v37, %v3981_v34  ;;  %v1732_v58 = vmul.f32 0.6931472, %v4284_v0  ;;  %vm5468_vm1 = vcmp.lt.f32.partialorder %v1763_v11, 0.0004427343  ;;  %vm5472_vm2 = vcmp.lt.f32.partialorder %v1790_v13, 0.0004427343 }
 0x174   : > { %4023 = vmatprep.mubr.msk.bf16.mxu1 %vm530_vm9, %v6810_v56  ;;  %v1778_v25 = vmul.f32 -0.5, %v5423_v51  ;;  %v1259_v16 = vand.u32 2147483647, %v5456_v43  ;;  %v5481_v60 = vrot.slane %v5315_v27, %v6704_v59  ;;  %v5484_v34 = vld [vmem:[%s5297_s30 + $0x8] sm:$0xff]  ;;  %v4288_v55 = vpop.eup %4287  ;;  %v1756_v3 = vsel %vm5417_vm14, %v5415_v47, %v1750_v35 }
 0x175   : > { %v1799_v0 = vand.u32 2147483647, %v5409_v9  ;;  %4301 = vpow2.f32 %v1428_v57  ;;  %v1264_v11 = vand.u32 2147483647, %v5466_v8  ;;  %v4290_v13 = vpop.eup %4289  ;;  %v1741_v56 = vmul.f32 0.6931472, %v4288_v55 }
 0x176   : > { %6815 = vst [vmem:[#allocation8_spill] sm:$0xff] %v5481_v60  ;;  %v1770_v32 = vadd.f32 1.0, %v1769_v44  ;;  %v1323_v36 = vsub.f32 0.0, %v1259_v16  ;;  %2668 = vbcast.lane.b32.xlu0 %v5481_v60, 256  ;;  %v5493_v59 = vadd.f32 %v5199_v37, %v1063_v53  ;;  %2672 = vbcast.lane.b32.xlu1 %v5481_v60, 264  ;;  %v1797_v41 = vadd.f32 1.0, %v1796_v15  ;;  %v3982_v60 = vpop.f32.mrf.mxu0 }
 0x177   : > { %v4292_v26 = vpop.eup %4291  ;;  %v1781_v47 = vand.u32 2147483647, %v5423_v51  ;;  %v1328_v33 = vsub.f32 0.0, %v1264_v11  ;;  %v6816_v35 = vsub.s32 0, %v5303_v39  ;;  %v6817_v44 = vmax.f32 %v5151_v40, 0.0 }
 0x178   : > { %v1738_v53 = vsel %vm5435_vm15, %v5433_v7, %v1732_v58  ;;  %v1779_v55 = vadd.f32 1.0, %v1778_v25  ;;  %v1424_v23 = vmul.f32 1.442695, %v1323_v36  ;;  %v1759_v27 = vmul.f32 0.6931472, %v4286_v63 }
 0x179   : > { %v5500_v57 = vrot.slane %v5484_v34, %v6816_v35  ;;  %v2084_v16 = vadd.f32 %v1756_v3, %v6817_v44  ;;  %v1786_v15 = vmul.f32 0.6931472, %v4290_v13  ;;  %v1789_v61 = vmul.f32 %v5375_v48, %v1788_v54 }
 0x17a   : > { %v1434_v11 = vmul.f32 1.442695, %v1328_v33  ;;  %v6818_v52 = vpack.c.bf16 %v5134_v19, %v5124_v62  ;;  %v1747_v40 = vsel %vm5445_vm0, %v1744_v22, %v1741_v56  ;;  %v1768_v3 = vmul.f32 0.6931472, %v4292_v26 }
 0x17b   : > { %4303 = vpow2.f32 %v1424_v23  ;;  %v1262_v7 = vand.u32 2147483647, %v5493_v59  ;;  %2782 = vbcast.lane.b32.xlu0 %v5500_v57, 256  ;;  %2786 = vbcast.lane.b32.xlu1 %v5500_v57, 264  ;;  %v4294_v36 = vpop.eup %4293  ;;  %v6819_v12 = vmax.f32 %v5158_v46, 0.0  ;;  %v1771_v54 = vmul.f32 %v5383_v29, %v1770_v32  ;;  %v1066_v29 = vpop.f32.mrf.mxu0 }
 0x17c   : > { %4024 = vmatmul.mubr.msk.bf16.gmra.mxu1 %vm530_vm9, %v6818_v52  ;;  %vm5520_vm3 = vcmp.lt.f32.partialorder %v1772_v30, 0.0004427343  ;;  %vm5524_vm4 = vcmp.lt.f32.partialorder %v1799_v0, 0.0004427343  ;;  %v6824_v26 = vpack.c.bf16 %v5289_v6, %v5211_v1  ;;  %v5532_v52 = vpop.eup %4295  ;;  %v5534_v23 = vadd.f32 -0.6931472, %v2084_v16 }
 0x17d   : > { %v2082_v48 = vadd.f32 %v1738_v53, %v6819_v12  ;;  %v1798_v46 = vmul.f32 %v5409_v9, %v1797_v41  ;;  %vm5537_vm5 = vcmp.lt.f32.partialorder %v1781_v47, 0.0004427343  ;;  %4305 = vpow2.f32 %v1434_v11  ;;  %v4298_v10 = vpop.eup %4297  ;;  %v3985_v33 = vpop.f32.mrf.mxu0 }
 0x17e   : > { %4027 = vmatprep.mubr.msk.bf16.mxu1 %vm530_vm9, %v6824_v26  ;;  %v1765_v30 = vsel %vm5468_vm1, %v5441_v20, %v1759_v27  ;;  %v6827_v1 = vmax.f32 %v5223_v24, 0.0  ;;  %v1792_v22 = vsel %vm5472_vm2, %v1789_v61, %v1786_v15  ;;  %v1780_v63 = vmul.f32 %v5423_v51, %v1779_v55  ;;  %v5549_v41 = vpop.eup %4299 }
 0x17f   : > { %v1774_v9 = vsel %vm5520_vm3, %v1771_v54, %v1768_v3  ;;  %v1795_v58 = vmul.f32 0.6931472, %v4294_v36  ;;  %v1195_v25 = vmax.f32 %v5456_v43, 0.0  ;;  %v1326_v0 = vsub.f32 0.0, %v1262_v7 }
 0x180   : > { %v2083_v6 = vadd.f32 %v1747_v40, %v6827_v1  ;;  %v3767_v13 = vadd.f32 -0.6931472, %v2082_v48  ;;  %v1777_v31 = vmul.f32 0.6931472, %v4298_v10  ;;  %v1820_v27 = vadd.f32 1.0, %v5532_v52 }
 0x181   : > { %v1802_v24 = vadd.f32 1.0, %v5549_v41  ;;  %v6828_v20 = vmax.f32 %v5203_v42, 0.0  ;;  %v6829_v51 = vmax.f32 %v5238_v50, 0.0  ;;  %v1200_v56 = vmax.f32 %v5466_v8, 0.0 }
 0x182   : > { %v1430_v47 = vmul.f32 1.442695, %v1326_v0  ;;  %v3768_v35 = vadd.f32 -0.6931472, %v2083_v6  ;;  %v6830_v44 = vmax.f32 %v5241_v2, 0.0  ;;  %v1198_v53 = vmax.f32 %v5493_v59, 0.0  ;;  %v5568_v42 = vpop.eup %4301 }
 0x183   : > { %v2085_v61 = vadd.f32 %v1765_v30, %v6828_v20  ;;  %v2088_v4 = vadd.f32 %v1792_v22, %v6829_v51  ;;  %4307 = vlog2.f32 %v1802_v24  ;;  %v6831_v55 = vpack.c.bf16 %v5217_v49, %v5168_v38 }
 0x184   : > { %v2086_v16 = vadd.f32 %v1774_v9, %v6830_v44  ;;  %v1801_v50 = vsel %vm5524_vm4, %v1798_v46, %v1795_v58  ;;  %4309 = vpow2.f32 %v1430_v47  ;;  %v5573_v15 = vadd.f32 %v5199_v37, %v3982_v60 }
 0x185   : > { %4028 = vmatmul.mubr.msk.bf16.gmra.mxu1 %vm530_vm9, %v6831_v55  ;;  %v5576_v2 = vadd.f32 %v5199_v37, %v1066_v29  ;;  %v6832_v11 = vpack.c.bf16 %v5402_v28, %v5391_v18  ;;  %v1783_v38 = vsel %vm5537_vm5, %v1780_v63, %v1777_v31  ;;  %4311 = vlog2.f32 %v1820_v27  ;;  %v1079_v28 = vpop.f32.mrf.mxu0 }
 0x186   : > { %v1823_v49 = vmul.f32 -0.5, %v5532_v52  ;;  %v1829_v40 = vadd.f32 1.0, %v5568_v42  ;;  %v2195_v60 = vpack.c.bf16 %v5400_v21, %v5342_v45  ;;  %v5588_v3 = vadd.f32 -0.6931472, %v2085_v61 }
 0x187   : > { %4031 = vmatprep.mubr.msk.bf16.mxu1 %vm530_vm9, %v6832_v11  ;;  %v5590_v7 = vadd.f32 -0.6931472, %v2088_v4  ;;  %v1265_v36 = vand.u32 2147483647, %v5573_v15  ;;  %v2196_v18 = vpack.c.bf16 %v3768_v35, %v3767_v13  ;;  %v6833_v12 = vmax.f32 %v5253_v17, 0.0  ;;  %v3986_v63 = vpop.f32.mrf.mxu0  ;;  %v6836_v35 = vld [vmem:[#allocation7_spill] sm:$0xff] }
 0x188   : > { %4313 = vlog2.f32 %v1829_v40  ;;  %v1263_v54 = vand.u32 2147483647, %v5576_v2  ;;  %v5596_v62 = vadd.f32 -0.6931472, %v2086_v16  ;;  %v6834_v19 = vmax.f32 %v5261_v5, 0.0  ;;  %v5605_v32 = vpop.eup %4303 }
 0x189   : > { %v2089_v48 = vadd.f32 %v1801_v50, %v6833_v12  ;;  %v1329_v45 = vsub.f32 0.0, %v1265_v36  ;;  %v6835_v21 = vsub.s32 1, %v5303_v39  ;;  %v1824_v29 = vadd.f32 1.0, %v1823_v49 }
 0x18a   : > { %v2087_v26 = vadd.f32 %v1783_v38, %v6834_v19  ;;  %v1826_v17 = vand.u32 2147483647, %v5532_v52  ;;  %v1805_v10 = vmul.f32 -0.5, %v5549_v41  ;;  %v1327_v30 = vsub.f32 0.0, %v1263_v54  ;;  %v5619_v9 = vpop.eup %4305 }
 0x18b   : > { %v5603_v46 = vrot.slane %v5484_v34, %v6835_v21  ;;  %v1808_v1 = vand.u32 2147483647, %v5549_v41  ;;  %v1811_v6 = vadd.f32 1.0, %v5605_v32  ;;  %v5613_v5 = vadd.f32 %v5199_v37, %v3985_v33 }
 0x18c   : > { %v5616_v22 = vadd.f32 %v5199_v37, %v1079_v28  ;;  %v5621_v58 = vadd.f32 -0.6931472, %v2089_v48  ;;  %v1436_v0 = vmul.f32 1.442695, %v1329_v45  ;;  %v1432_v13 = vmul.f32 1.442695, %v1327_v30 }
 0x18d   : > { %2801 = vbcast.lane.b32.xlu0 %v5603_v46, 256  ;;  %2805 = vbcast.lane.b32.xlu1 %v5603_v46, 264  ;;  %v3772_v31 = vadd.f32 -0.6931472, %v2087_v26  ;;  %v1832_v27 = vmul.f32 -0.5, %v5568_v42  ;;  %4315 = vlog2.f32 %v1811_v6  ;;  %v1856_v24 = vadd.f32 1.0, %v5619_v9 }
 0x18e   : > { %4032 = vmatmul.mubr.msk.bf16.gmra.mxu1 %vm530_vm9, %v2195_v60  ;;  %v1806_v20 = vadd.f32 1.0, %v1805_v10  ;;  %v1835_v61 = vand.u32 2147483647, %v5568_v42  ;;  %4317 = vpow2.f32 %v1436_v0  ;;  %v5629_v51 = vadd.f32 %v5199_v37, %v3986_v63 }
 0x18f   : > { %4035 = vmatprep.mubr.msk.bf16.mxu1 %vm530_vm9, %v2196_v18  ;;  %v2197_v4 = vpack.c.bf16 %v5588_v3, %v5534_v23  ;;  %4319 = vlog2.f32 %v1856_v24  ;;  %v1268_v47 = vand.u32 2147483647, %v5613_v5  ;;  %v1266_v33 = vand.u32 2147483647, %v5616_v22  ;;  %v1082_v23 = vpop.f32.mrf.mxu0 }
 0x190   : > { %v2199_v44 = vpack.c.bf16 %v5621_v58, %v5590_v7  ;;  %v5640_v16 = vmul.f32 %v5532_v52, %v1824_v29  ;;  %vm5642_vm6 = vcmp.lt.f32.partialorder %v1808_v1, 0.0004427343  ;;  %4321 = vpow2.f32 %v1432_v13  ;;  %v4308_v50 = vpop.eup %4307 }
 0x191   : > { %2638 = vbcast.lane.b32.xlu0 %v5337_v14, 272  ;;  %2657 = vbcast.lane.b32.xlu1 %v6836_v35, 272  ;;  %v2198_v11 = vpack.c.bf16 %v3772_v31, %v5596_v62  ;;  %vm5647_vm7 = vcmp.lt.f32.partialorder %v1826_v17, 0.0004427343  ;;  %v1833_v49 = vadd.f32 1.0, %v1832_v27  ;;  %v1332_v40 = vsub.f32 0.0, %v1268_v47  ;;  %v5651_v3 = vpop.eup %4309  ;;  %v3989_v1 = vpop.f32.mrf.mxu0 }
 0x192   : > { %v1330_v60 = vsub.f32 0.0, %v1266_v33  ;;  %v1807_v52 = vmul.f32 %v5549_v41, %v1806_v20  ;;  %vm5654_vm8 = vcmp.lt.f32.partialorder %v1835_v61, 0.0004427343  ;;  %v1201_v28 = vmax.f32 %v5573_v15, 0.0  ;;  %v4312_v12 = vpop.eup %4311 }
 0x193   : > { %v1269_v18 = vand.u32 2147483647, %v5629_v51  ;;  %v1804_v48 = vmul.f32 0.6931472, %v4308_v50  ;;  %v1814_v54 = vmul.f32 -0.5, %v5605_v32  ;;  %v1838_v62 = vadd.f32 1.0, %v5651_v3  ;;  %v1095_v36 = vpop.f32.mrf.mxu0 }
 0x194   : > { %v5663_v19 = vadd.f32 %v5199_v37, %v1082_v23  ;;  %v1199_v26 = vmax.f32 %v5576_v2, 0.0  ;;  %v1442_v41 = vmul.f32 1.442695, %v1332_v40  ;;  %v1438_v45 = vmul.f32 1.442695, %v1330_v60  ;;  %v6845_v50 = vld [vmem:[#allocation6_spill] sm:$0xff] }
 0x195   : > { %v1333_v21 = vsub.f32 0.0, %v1269_v18  ;;  %v4314_v29 = vpop.eup %4313  ;;  %v1834_v17 = vmul.f32 %v5568_v42, %v1833_v49  ;;  %v1817_v10 = vand.u32 2147483647, %v5605_v32  ;;  %4323 = vlog2.f32 %v1838_v62  ;;  %v6847_v40 = vld [vmem:[#allocation4_spill] sm:$0xff]  ;;  %v3990_v58 = vpop.f32.mrf.mxu0  ;;  %v5827_v2 = vld [vmem:[%s6694_s5] ss:$0 sm:$0xff] }
 0x196   : > { %4036 = vmatmul.mubr.msk.bf16.gmra.mxu1 %vm530_vm9, %v2197_v4  ;;  %v1204_v30 = vmax.f32 %v5613_v5, 0.0  ;;  %v1822_v6 = vmul.f32 0.6931472, %v4312_v12  ;;  %v1831_v63 = vmul.f32 0.6931472, %v4314_v29  ;;  %4325 = vpow2.f32 %v1442_v41  ;;  %v6848_v12 = vld [vmem:[#allocation3_spill] sm:$0xff] }
 0x197   : > { %4039 = vmatprep.mubr.msk.bf16.mxu1 %vm530_vm9, %v2198_v11  ;;  %v1444_v0 = vmul.f32 1.442695, %v1333_v21  ;;  %v1810_v13 = vsel %vm5642_vm6, %v1807_v52, %v1804_v48  ;;  %v1815_v31 = vadd.f32 1.0, %v1814_v54  ;;  %4327 = vpow2.f32 %v1438_v45 }
 0x198   : > { %v1267_v27 = vand.u32 2147483647, %v5663_v19  ;;  %v1837_v42 = vsel %vm5654_vm8, %v1834_v17, %v1831_v63  ;;  %v2684_v24 = vsub.s32 3, %v5303_v39  ;;  %v5678_v20 = vadd.f32 %v5199_v37, %v3989_v1  ;;  %v6851_v1 = vld [vmem:[#allocation5_spill] sm:$0xff] }
 0x199   : > { %4329 = vpow2.f32 %v1444_v0  ;;  %vm5680_vm10 = vcmp.lt.f32.partialorder %v1817_v10, 0.0004427343  ;;  %v1859_v4 = vmul.f32 -0.5, %v5619_v9  ;;  %v1202_v47 = vmax.f32 %v5616_v22, 0.0 }
 0x19a   : > { %v1331_v33 = vsub.f32 0.0, %v1267_v27  ;;  %v4316_v55 = vpop.eup %4315  ;;  %v1828_v23 = vsel %vm5647_vm7, %v5640_v16, %v1822_v6  ;;  %v6846_v11 = vmax.f32 %v6845_v50, 0.0  ;;  %v5694_v60 = vrot.slane %v6847_v40, %v2684_v24 }
 0x19b   : > { %v1272_v52 = vand.u32 2147483647, %v5678_v20  ;;  %v5697_v18 = vpop.eup %4317  ;;  %v6849_v48 = vmax.f32 %v6848_v12, 0.0  ;;  %v1813_v62 = vmul.f32 0.6931472, %v4316_v55  ;;  %v1816_v38 = vmul.f32 %v5605_v32, %v1815_v31 }
 0x19c   : > { %v2090_v49 = vadd.f32 %v1810_v13, %v6846_v11  ;;  %v1440_v16 = vmul.f32 1.442695, %v1331_v33  ;;  %v4320_v41 = vpop.eup %4319  ;;  %v1862_v45 = vand.u32 2147483647, %v5619_v9  ;;  %v1865_v21 = vadd.f32 1.0, %v5697_v18  ;;  %2687 = vbcast.lane.b32.xlu0 %v5694_v60, 256 }
 0x19d   : > { %v2093_v54 = vadd.f32 %v1837_v42, %v6849_v48  ;;  %v1336_v29 = vsub.f32 0.0, %v1272_v52  ;;  %v6850_v17 = vsub.s32 2, %v5303_v39  ;;  %v5714_v32 = vpop.eup %4321  ;;  %v6852_v6 = vmax.f32 %v6851_v1, 0.0  ;;  %2691 = vbcast.lane.b32.xlu1 %v5694_v60, 264 }
 0x19e   : > { %4040 = vmatmul.mubr.msk.bf16.gmra.mxu1 %vm530_vm9, %v2199_v44  ;;  %v1819_v0 = vsel %vm5680_vm10, %v1816_v38, %v1813_v62  ;;  %v1860_v13 = vadd.f32 1.0, %v1859_v4  ;;  %4331 = vpow2.f32 %v1440_v16  ;;  %v3775_v31 = vadd.f32 -0.6931472, %v2090_v49  ;;  %v1098_v16 = vpop.f32.mrf.mxu0 }
 0x19f   : > { %v5708_v10 = vrot.slane %v5484_v34, %v6850_v17  ;;  %v2092_v63 = vadd.f32 %v1828_v23, %v6852_v6  ;;  %v2091_v27 = vadd.f32 %v1819_v0, %v1195_v25  ;;  %4333 = vlog2.f32 %v1865_v21  ;;  %v6855_v17 = vld [vmem:[#allocation8_spill] sm:$0xff] }
 0x1a0   : > { %v5724_v7 = vadd.f32 %v5199_v37, %v1095_v36  ;;  %v3778_v44 = vadd.f32 -0.6931472, %v2093_v54  ;;  %v1858_v42 = vmul.f32 0.6931472, %v4320_v41  ;;  %v1841_v33 = vmul.f32 -0.5, %v5651_v3 }
 0x1a1   : > { %v1847_v61 = vadd.f32 1.0, %v5714_v32  ;;  %v3776_v55 = vadd.f32 -0.6931472, %v2091_v27  ;;  %v1868_v4 = vmul.f32 -0.5, %v5697_v18  ;;  %v1450_v23 = vmul.f32 1.442695, %v1336_v29 }
 0x1a2   : > { %2820 = vbcast.lane.b32.xlu0 %v5708_v10, 256  ;;  %v3777_v50 = vadd.f32 -0.6931472, %v2092_v63  ;;  %vm5730_vm11 = vcmp.lt.f32.partialorder %v1862_v45, 0.0004427343  ;;  %v5735_v25 = vadd.f32 %v5199_v37, %v3990_v58  ;;  %2824 = vbcast.lane.b32.xlu1 %v5708_v10, 264  ;;  %v4324_v11 = vpop.eup %4323  ;;  %v1861_v52 = vmul.f32 %v5619_v9, %v1860_v13 }
 0x1a3   : > { %4335 = vlog2.f32 %v1847_v61  ;;  %v2200_v49 = vpack.c.bf16 %v3776_v55, %v3775_v31  ;;  %v1270_v36 = vand.u32 2147483647, %v5724_v7  ;;  %v5740_v12 = vpop.eup %4325  ;;  %v1842_v54 = vadd.f32 1.0, %v1841_v33 }
 0x1a4   : > { %4337 = vpow2.f32 %v1450_v23  ;;  %v2201_v48 = vpack.c.bf16 %v3778_v44, %v3777_v50  ;;  %v1844_v62 = vand.u32 2147483647, %v5651_v3  ;;  %v1205_v38 = vmax.f32 %v5629_v51, 0.0  ;;  %v5744_v41 = vpop.eup %4327  ;;  %v3993_v50 = vpop.f32.mrf.mxu0 }
 0x1a5   : > { %v1864_v45 = vsel %vm5730_vm11, %v1861_v52, %v1858_v42  ;;  %v1869_v21 = vadd.f32 1.0, %v1868_v4  ;;  %v1871_v9 = vand.u32 2147483647, %v5697_v18  ;;  %v1892_v29 = vadd.f32 1.0, %v5740_v12  ;;  %4043 = vmatprep.mubr.msk.bf16.mxu1 %vm530_vm9, %v2200_v49 }
 0x1a6   : > { %2676 = vbcast.lane.b32.xlu0 %v6855_v17, 272  ;;  %v5752_v1 = vpop.eup %4329  ;;  %v1850_v6 = vmul.f32 -0.5, %v5714_v32  ;;  %v1874_v63 = vadd.f32 1.0, %v5744_v41  ;;  %v1334_v0 = vsub.f32 0.0, %v1270_v36  ;;  %v1273_v13 = vand.u32 2147483647, %v5735_v25  ;;  %4044 = vmatmul.mubr.msk.bf16.gmra.mxu1 %vm530_vm9, %v2201_v48 }
 0x1a7   : > { %v1840_v31 = vmul.f32 0.6931472, %v4324_v11  ;;  %v1853_v27 = vand.u32 2147483647, %v5714_v32  ;;  %4339 = vlog2.f32 %v1892_v29  ;;  %v5760_v58 = vadd.f32 %v5199_v37, %v1098_v16  ;;  %v1111_v29 = vpop.f32.mrf.mxu0 }
 0x1a8   : > { %v2096_v44 = vadd.f32 %v1864_v45, %v1200_v56  ;;  %vm5764_vm12 = vcmp.lt.f32.partialorder %v1844_v62, 0.0004427343  ;;  %4341 = vlog2.f32 %v1874_v63  ;;  %v1901_v33 = vadd.f32 1.0, %v5752_v1 }
 0x1a9   : > { %v1843_v61 = vmul.f32 %v5651_v3, %v1842_v54  ;;  %v1870_v55 = vmul.f32 %v5697_v18, %v1869_v21  ;;  %vm5771_vm13 = vcmp.lt.f32.partialorder %v1871_v9, 0.0004427343  ;;  %v1203_v23 = vmax.f32 %v5663_v19, 0.0 }
 0x1aa   : > { %v1851_v8 = vadd.f32 1.0, %v1850_v6  ;;  %4343 = vlog2.f32 %v1901_v33  ;;  %v1446_v56 = vmul.f32 1.442695, %v1334_v0  ;;  %v1337_v43 = vsub.f32 0.0, %v1273_v13 }
 0x1ab   : > { %v5776_v11 = vpop.eup %4331  ;;  %v1846_v49 = vsel %vm5764_vm12, %v1843_v61, %v1840_v31  ;;  %vm5780_vm14 = vcmp.lt.f32.partialorder %v1853_v27, 0.0004427343  ;;  %v1877_v18 = vmul.f32 -0.5, %v5744_v41  ;;  %v1271_v52 = vand.u32 2147483647, %v5760_v58 }
 0x1ac   : > { %v4334_v36 = vpop.eup %4333  ;;  %v5786_v48 = vadd.f32 -0.6931472, %v2096_v44  ;;  %v1880_v54 = vand.u32 2147483647, %v5744_v41  ;;  %v1883_v62 = vadd.f32 1.0, %v5776_v11  ;;  %4345 = vpow2.f32 %v1446_v56 }
 0x1ad   : > { %v1867_v16 = vmul.f32 0.6931472, %v4334_v36  ;;  %v1895_v45 = vmul.f32 -0.5, %v5740_v12  ;;  %v1452_v21 = vmul.f32 1.442695, %v1337_v43  ;;  %v1335_v9 = vsub.f32 0.0, %v1271_v52 }
 0x1ae   : > { %v2094_v6 = vadd.f32 %v1846_v49, %v1198_v53  ;;  %v1852_v63 = vmul.f32 %v5714_v32, %v1851_v8  ;;  %4347 = vlog2.f32 %v1883_v62  ;;  %v5795_v0 = vadd.f32 %v5199_v37, %v3993_v50 }
 0x1af   : > { %v1873_v31 = vsel %vm5771_vm13, %v1870_v55, %v1867_v16  ;;  %v1878_v27 = vadd.f32 1.0, %v1877_v18  ;;  %4349 = vpow2.f32 %v1452_v21  ;;  %v1448_v44 = vmul.f32 1.442695, %v1335_v9  ;;  %v3994_v55 = vpop.f32.mrf.mxu0 }
 0x1b0   : > { %v4336_v13 = vpop.eup %4335  ;;  %v2097_v33 = vadd.f32 %v1873_v31, %v1201_v28  ;;  %v1904_v53 = vmul.f32 -0.5, %v5752_v1  ;;  %v5805_v32 = vadd.f32 %v5199_v37, %v1111_v29  ;;  %v1896_v61 = vadd.f32 1.0, %v1895_v45 }
 0x1b1   : > { %v5799_v42 = vpop.eup %4337  ;;  %v1849_v59 = vmul.f32 0.6931472, %v4336_v13  ;;  %v1898_v50 = vand.u32 2147483647, %v5740_v12  ;;  %vm5808_vm15 = vcmp.lt.f32.partialorder %v1880_v54, 0.0004427343  ;;  %4351 = vpow2.f32 %v1448_v44 }
 0x1b2   : > { %v3779_v8 = vadd.f32 -0.6931472, %v2094_v6  ;;  %v1928_v28 = vadd.f32 1.0, %v5799_v42  ;;  %v1276_v56 = vand.u32 2147483647, %v5795_v0  ;;  %v1879_v43 = vmul.f32 %v5744_v41, %v1878_v27  ;;  %v1114_v41 = vpop.f32.mrf.mxu0 }
 0x1b3   : > { %v1855_v15 = vsel %vm5780_vm14, %v1852_v63, %v1849_v59  ;;  %v1907_v49 = vand.u32 2147483647, %v5752_v1  ;;  %v1886_v18 = vmul.f32 -0.5, %v5776_v11  ;;  %v3782_v36 = vadd.f32 -0.6931472, %v2097_v33 }
 0x1b4   : > { %v2095_v37 = vadd.f32 %v1855_v15, %v1199_v26  ;;  %v4340_v52 = vpop.eup %4339  ;;  %v1905_v54 = vadd.f32 1.0, %v1904_v53  ;;  %v1274_v62 = vand.u32 2147483647, %v5805_v32  ;;  %v2703_v3 = vsub.s32 4, %v5303_v39 }
 0x1b5   : > { %v4342_v16 = vpop.eup %4341  ;;  %v1889_v21 = vand.u32 2147483647, %v5776_v11  ;;  %v1340_v9 = vsub.f32 0.0, %v1276_v56  ;;  %v5830_v26 = vadd.f32 %v5827_v2, %v3994_v55  ;;  %4353 = vlog2.f32 %v1928_v28 }
 0x1b6   : > { %v3780_v45 = vadd.f32 -0.6931472, %v2095_v37  ;;  %v1876_v29 = vmul.f32 0.6931472, %v4342_v16  ;;  %v1338_v6 = vsub.f32 0.0, %v1274_v62  ;;  %v5835_v63 = vrot.slane %v6847_v40, %v2703_v3 }
 0x1b7   : > { %v4344_v13 = vpop.eup %4343  ;;  %v1894_v27 = vmul.f32 0.6931472, %v4340_v52  ;;  %v1887_v44 = vadd.f32 1.0, %v1886_v18  ;;  %v1277_v33 = vand.u32 2147483647, %v5830_v26  ;;  %v2203_v59 = vpack.c.bf16 %v3782_v36, %v5786_v48  ;;  %v3997_v18 = vpop.f32.mrf.mxu0 }
 0x1b8   : > { %v2202_v31 = vpack.c.bf16 %v3780_v45, %v3779_v8  ;;  %v1903_v53 = vmul.f32 0.6931472, %v4344_v13  ;;  %v1906_v55 = vmul.f32 %v5752_v1, %v1905_v54  ;;  %vm5840_vm0 = vcmp.lt.f32.partialorder %v1907_v49, 0.0004427343  ;;  %2706 = vbcast.lane.b32.xlu1 %v5835_v63, 256  ;;  %2710 = vbcast.lane.b32.xlu0 %v5835_v63, 264 }
 0x1b9   : > { %v5846_v40 = vpop.eup %4345  ;;  %v1897_v8 = vmul.f32 %v5740_v12, %v1896_v61  ;;  %v1458_v28 = vmul.f32 1.442695, %v1340_v9  ;;  %v1454_v56 = vmul.f32 1.442695, %v1338_v6  ;;  %v1341_v37 = vsub.f32 0.0, %v1277_v33 }
 0x1ba   : > { %4047 = vmatprep.mubr.msk.bf16.mxu1 %vm530_vm9, %v2202_v31  ;;  %vm5850_vm1 = vcmp.lt.f32.partialorder %v1898_v50, 0.0004427343  ;;  %v1882_v48 = vsel %vm5808_vm15, %v1879_v43, %v1876_v29  ;;  %v1909_v49 = vsel %vm5840_vm0, %v1906_v55, %v1903_v53  ;;  %v1910_v52 = vadd.f32 1.0, %v5846_v40 }
 0x1bb   : > { %4048 = vmatmul.mubr.msk.bf16.gmra.mxu1 %vm530_vm9, %v2203_v59  ;;  %v4348_v12 = vpop.eup %4347  ;;  %v1900_v61 = vsel %vm5850_vm1, %v1897_v8, %v1894_v27  ;;  %v1888_v36 = vmul.f32 %v5776_v11, %v1887_v44  ;;  %vm5863_vm2 = vcmp.lt.f32.partialorder %v1889_v21, 0.0004427343  ;;  %4355 = vpow2.f32 %v1454_v56  ;;  %v1127_v21 = vpop.f32.mrf.mxu0 }
 0x1bc   : > { %v5867_v4 = vpop.eup %4349  ;;  %v2101_v43 = vadd.f32 %v1909_v49, %v1205_v38  ;;  %v1885_v54 = vmul.f32 0.6931472, %v4348_v12  ;;  %4357 = vlog2.f32 %v1910_v52  ;;  %v1460_v62 = vmul.f32 1.442695, %v1341_v37  ;;  %2790 = vbcast.lane.b32.xlu1 %v5500_v57, 272  ;;  %2809 = vbcast.lane.b32.xlu0 %v5603_v46, 272 }
 0x1bd   : > { %v2098_v16 = vadd.f32 %v1882_v48, %v1202_v47  ;;  %v1931_v11 = vmul.f32 -0.5, %v5799_v42  ;;  %v1937_v45 = vadd.f32 1.0, %v5867_v4  ;;  %4359 = vpow2.f32 %v1458_v28  ;;  %v3998_v27 = vpop.f32.mrf.mxu0 }
 0x1be   : > { %v5876_v9 = vpop.eup %4351  ;;  %v2100_v51 = vadd.f32 %v1900_v61, %v1204_v30  ;;  %v1891_v38 = vsel %vm5863_vm2, %v1888_v36, %v1885_v54  ;;  %4361 = vpow2.f32 %v1460_v62  ;;  %v5883_v29 = vadd.f32 %v5827_v2, %v1114_v41 }
 0x1bf   : > { %v2099_v22 = vadd.f32 %v1891_v38, %v1203_v23  ;;  %4363 = vlog2.f32 %v1937_v45  ;;  %v3786_v47 = vadd.f32 -0.6931472, %v2101_v43  ;;  %v1934_v6 = vand.u32 2147483647, %v5799_v42  ;;  %v1130_v49 = vpop.f32.mrf.mxu0 }
 0x1c0   : > { %v1919_v13 = vadd.f32 1.0, %v5876_v9  ;;  %v3783_v5 = vadd.f32 -0.6931472, %v2098_v16  ;;  %v1913_v31 = vmul.f32 -0.5, %v5846_v40  ;;  %v3785_v44 = vadd.f32 -0.6931472, %v2100_v51 }
 0x1c1   : > { %v3784_v30 = vadd.f32 -0.6931472, %v2099_v22  ;;  %v1932_v33 = vadd.f32 1.0, %v1931_v11  ;;  %v1275_v41 = vand.u32 2147483647, %v5883_v29  ;;  %v5894_v23 = vadd.f32 %v5827_v2, %v3997_v18 }
 0x1c2   : > { %4365 = vlog2.f32 %v1919_v13  ;;  %v4354_v59 = vpop.eup %4353  ;;  %v1916_v19 = vand.u32 2147483647, %v5846_v40  ;;  %v5897_v55 = vadd.f32 %v5827_v2, %v1127_v21  ;;  %v2205_v15 = vpack.c.bf16 %v3786_v47, %v3785_v44  ;;  %v4001_v21 = vpop.f32.mrf.mxu0 }
 0x1c3   : > { %v2204_v53 = vpack.c.bf16 %v3784_v30, %v3783_v5  ;;  %v1940_v8 = vmul.f32 -0.5, %v5867_v4  ;;  %v1339_v28 = vsub.f32 0.0, %v1275_v41  ;;  %v5903_v56 = vrot.slane %v5484_v34, %v2684_v24 }
 0x1c4   : > { %v1208_v37 = vmax.f32 %v5678_v20, 0.0  ;;  %v1914_v1 = vadd.f32 1.0, %v1913_v31  ;;  %v1280_v48 = vand.u32 2147483647, %v5894_v23  ;;  %v1278_v18 = vand.u32 2147483647, %v5897_v55 }
 0x1c5   : > { %4051 = vmatprep.mubr.msk.bf16.mxu1 %vm530_vm9, %v2204_v53  ;;  %v1930_v52 = vmul.f32 0.6931472, %v4354_v59  ;;  %v1206_v12 = vmax.f32 %v5724_v7, 0.0  ;;  %v1209_v61 = vmax.f32 %v5735_v25, 0.0  ;;  %v1922_v36 = vmul.f32 -0.5, %v5876_v9  ;;  %2839 = vbcast.lane.b32.xlu1 %v5903_v56, 256 }
 0x1c6   : > { %4052 = vmatmul.mubr.msk.bf16.gmra.mxu1 %vm530_vm9, %v2205_v15  ;;  %v1456_v34 = vmul.f32 1.442695, %v1339_v28  ;;  %v1344_v24 = vsub.f32 0.0, %v1280_v48  ;;  %v1342_v20 = vsub.f32 0.0, %v1278_v18  ;;  %2843 = vbcast.lane.b32.xlu0 %v5903_v56, 264  ;;  %v1933_v43 = vmul.f32 %v5799_v42, %v1932_v33 }
 0x1c7   : > { %vm5918_vm3 = vcmp.lt.f32.partialorder %v1934_v6, 0.0004427343  ;;  %v1941_v7 = vadd.f32 1.0, %v1940_v8  ;;  %v1943_v25 = vand.u32 2147483647, %v5867_v4  ;;  %v1915_v16 = vmul.f32 %v5846_v40, %v1914_v1 }
 0x1c8   : > { %v5915_v50 = vpop.eup %4355  ;;  %vm5924_vm4 = vcmp.lt.f32.partialorder %v1916_v19, 0.0004427343  ;;  %v1925_v45 = vand.u32 2147483647, %v5876_v9  ;;  %4367 = vpow2.f32 %v1456_v34  ;;  %v1466_v22 = vmul.f32 1.442695, %v1344_v24 }
 0x1c9   : > { %v4358_v62 = vpop.eup %4357  ;;  %v1946_v38 = vadd.f32 1.0, %v5915_v50  ;;  %v5933_v47 = vadd.f32 %v5827_v2, %v3998_v27  ;;  %v1936_v40 = vsel %vm5918_vm3, %v1933_v43, %v1930_v52  ;;  %v1207_v13 = vmax.f32 %v5760_v58, 0.0  ;;  %2642 = vbcast.lane.b32.xlu1 %v5337_v14, 280 }
 0x1ca   : > { %v5929_v51 = vpop.eup %4359  ;;  %v1912_v42 = vmul.f32 0.6931472, %v4358_v62  ;;  %v1923_v5 = vadd.f32 1.0, %v1922_v36  ;;  %v1462_v30 = vmul.f32 1.442695, %v1342_v20  ;;  %2661 = vbcast.lane.b32.xlu0 %v6836_v35, 280  ;;  %v1942_v27 = vmul.f32 %v5867_v4, %v1941_v7  ;;  %v1143_v35 = vpop.f32.mrf.mxu0 }
 0x1cb   : > { %v5935_v6 = vpop.eup %4361  ;;  %vm5945_vm5 = vcmp.lt.f32.partialorder %v1943_v25, 0.0004427343  ;;  %vm5950_vm6 = vcmp.lt.f32.partialorder %v1925_v45, 0.0004427343  ;;  %4369 = vpow2.f32 %v1466_v22  ;;  %v5955_v14 = vadd.f32 %v5827_v2, %v1130_v49 }
 0x1cc   : > { %v4364_v31 = vpop.eup %4363  ;;  %v1918_v44 = vsel %vm5924_vm4, %v1915_v16, %v1912_v42  ;;  %v1973_v41 = vadd.f32 1.0, %v5935_v6  ;;  %v2104_v53 = vadd.f32 %v1936_v40, %v1208_v37  ;;  %v1964_v19 = vadd.f32 1.0, %v5929_v51  ;;  %v4002_v34 = vpop.f32.mrf.mxu0  ;;  %v5979_v42 = vld [vmem:[%s5297_s30] sm:$0xff] }
 0x1cd   : > { %v1939_v59 = vmul.f32 0.6931472, %v4364_v31  ;;  %4371 = vlog2.f32 %v1946_v38  ;;  %v1281_v4 = vand.u32 2147483647, %v5933_v47  ;;  %v2102_v8 = vadd.f32 %v1918_v44, %v1206_v12  ;;  %2695 = vbcast.lane.b32.xlu1 %v5694_v60, 272 }
 0x1ce   : > { %v1924_v1 = vmul.f32 %v5876_v9, %v1923_v5  ;;  %4373 = vpow2.f32 %v1462_v30  ;;  %v1279_v37 = vand.u32 2147483647, %v5955_v14  ;;  %v5965_v52 = vadd.f32 %v5827_v2, %v4001_v21 }
 0x1cf   : > { %v4366_v15 = vpop.eup %4365  ;;  %v1945_v28 = vsel %vm5945_vm5, %v1942_v27, %v1939_v59  ;;  %4375 = vlog2.f32 %v1973_v41  ;;  %v1345_v49 = vsub.f32 0.0, %v1281_v4  ;;  %v5968_v36 = vadd.f32 %v5827_v2, %v1143_v35  ;;  %v1146_v59 = vpop.f32.mrf.mxu0 }
 0x1d0   : > { %v2105_v48 = vadd.f32 %v1945_v28, %v1209_v61  ;;  %v1921_v18 = vmul.f32 0.6931472, %v4366_v15  ;;  %v2722_v12 = vsub.s32 5, %v5303_v39  ;;  %v3789_v9 = vadd.f32 -0.6931472, %v2104_v53 }
 0x1d1   : > { %4377 = vlog2.f32 %v1964_v19  ;;  %v1468_v61 = vmul.f32 1.442695, %v1345_v49  ;;  %v1343_v54 = vsub.f32 0.0, %v1279_v37  ;;  %v1284_v7 = vand.u32 2147483647, %v5965_v52 }
 0x1d2   : > { %v1927_v24 = vsel %vm5950_vm6, %v1924_v1, %v1921_v18  ;;  %v3790_v20 = vadd.f32 -0.6931472, %v2105_v48  ;;  %v3787_v25 = vadd.f32 -0.6931472, %v2102_v8  ;;  %v1282_v62 = vand.u32 2147483647, %v5968_v36 }
 0x1d3   : > { %v2103_v43 = vadd.f32 %v1927_v24, %v1207_v13  ;;  %4379 = vpow2.f32 %v1468_v61  ;;  %v5976_v16 = vadd.f32 %v5827_v2, %v4002_v34  ;;  %v1464_v45 = vmul.f32 1.442695, %v1343_v54 }
 0x1d4   : > { %v1348_v21 = vsub.f32 0.0, %v1284_v7  ;;  %v5984_v38 = vrot.slane %v5979_v42, %v2722_v12  ;;  %v1967_v40 = vmul.f32 -0.5, %v5929_v51  ;;  %v2207_v13 = vpack.c.bf16 %v3790_v20, %v3789_v9 }
 0x1d5   : > { %v3788_v11 = vadd.f32 -0.6931472, %v2103_v43  ;;  %v5986_v22 = vpop.eup %4367  ;;  %v1976_v30 = vmul.f32 -0.5, %v5935_v6  ;;  %4381 = vpow2.f32 %v1464_v45  ;;  %v1346_v27 = vsub.f32 0.0, %v1282_v62 }
 0x1d6   : > { %v1955_v31 = vadd.f32 1.0, %v5986_v22  ;;  %2725 = vbcast.lane.b32.xlu0 %v5984_v38, 256  ;;  %2729 = vbcast.lane.b32.xlu1 %v5984_v38, 264  ;;  %v1474_v44 = vmul.f32 1.442695, %v1348_v21  ;;  %v1968_v35 = vadd.f32 1.0, %v1967_v40  ;;  %v6005_v18 = vadd.f32 %v5827_v2, %v1146_v59 }
 0x1d7   : > { %v2206_v5 = vpack.c.bf16 %v3788_v11, %v3787_v25  ;;  %v1285_v33 = vand.u32 2147483647, %v5976_v16  ;;  %v1949_v53 = vmul.f32 -0.5, %v5915_v50  ;;  %v1977_v4 = vadd.f32 1.0, %v1976_v30  ;;  %v6018_v11 = vld [vmem:[%s5297_s30 + $0x8] sm:$0xff] }
 0x1d8   : > { %4383 = vlog2.f32 %v1955_v31  ;;  %v5995_v41 = vpop.eup %4369  ;;  %v1470_v15 = vmul.f32 1.442695, %v1346_v27  ;;  %v1212_v49 = vmax.f32 %v5795_v0, 0.0  ;;  %v1970_v37 = vand.u32 2147483647, %v5929_v51 }
 0x1d9   : > { %4055 = vmatprep.mubr.msk.bf16.mxu1 %vm530_vm9, %v2206_v5  ;;  %4385 = vpow2.f32 %v1474_v44  ;;  %v1349_v8 = vsub.f32 0.0, %v1285_v33  ;;  %v2000_v1 = vadd.f32 1.0, %v5995_v41  ;;  %v1952_v34 = vand.u32 2147483647, %v5915_v50 }
 0x1da   : > { %4056 = vmatmul.mubr.msk.bf16.gmra.mxu1 %vm530_vm9, %v2207_v13  ;;  %v4372_v58 = vpop.eup %4371  ;;  %2828 = vbcast.lane.b32.xlu0 %v5708_v10, 272  ;;  %v1958_v9 = vmul.f32 -0.5, %v5986_v22  ;;  %v1969_v61 = vmul.f32 %v5929_v51, %v1968_v35  ;;  %v1950_v20 = vadd.f32 1.0, %v1949_v53  ;;  %v1979_v43 = vand.u32 2147483647, %v5935_v6 }
 0x1db   : > { %v6000_v19 = vpop.eup %4373  ;;  %v1978_v2 = vmul.f32 %v5935_v6, %v1977_v4  ;;  %v1476_v7 = vmul.f32 1.442695, %v1349_v8  ;;  %v1948_v25 = vmul.f32 0.6931472, %v4372_v58  ;;  %v1283_v62 = vand.u32 2147483647, %v6005_v18 }
 0x1dc   : > { %v4376_v28 = vpop.eup %4375  ;;  %v1982_v48 = vadd.f32 1.0, %v6000_v19  ;;  %v6023_v51 = vrot.slane %v6018_v11, %v2703_v3  ;;  %v1959_v21 = vadd.f32 1.0, %v1958_v9  ;;  %v1951_v6 = vmul.f32 %v5915_v50, %v1950_v20 }
 0x1dd   : > { %v1975_v54 = vmul.f32 0.6931472, %v4376_v28  ;;  %vm6027_vm7 = vcmp.lt.f32.partialorder %v1979_v43, 0.0004427343  ;;  %v1347_v5 = vsub.f32 0.0, %v1283_v62  ;;  %v2741_v30 = vsub.s32 6, %v5303_v39 }
 0x1de   : > { %v4378_v24 = vpop.eup %4377  ;;  %4387 = vlog2.f32 %v1982_v48  ;;  %2858 = vbcast.lane.b32.xlu1 %v6023_v51, 256  ;;  %2862 = vbcast.lane.b32.xlu0 %v6023_v51, 264  ;;  %vm6034_vm8 = vcmp.lt.f32.partialorder %v1952_v34, 0.0004427343  ;;  %v1961_v50 = vand.u32 2147483647, %v5986_v22 }
 0x1df   : > { %4389 = vpow2.f32 %v1470_v15  ;;  %v1966_v45 = vmul.f32 0.6931472, %v4378_v24  ;;  %v1981_v31 = vsel %vm6027_vm7, %v1978_v2, %v1975_v54  ;;  %vm6043_vm10 = vcmp.lt.f32.partialorder %v1970_v37, 0.0004427343 }
 0x1e0   : > { %v6014_v0 = vpop.eup %4379  ;;  %4391 = vlog2.f32 %v2000_v1  ;;  %v1954_v33 = vsel %vm6034_vm8, %v1951_v6, %v1948_v25  ;;  %v1213_v59 = vmax.f32 %v5830_v26, 0.0  ;;  %v1472_v58 = vmul.f32 1.442695, %v1347_v5 }
 0x1e1   : > { %v2009_v40 = vadd.f32 1.0, %v6014_v0  ;;  %4393 = vpow2.f32 %v1476_v7  ;;  %v1972_v53 = vsel %vm6043_vm10, %v1969_v61, %v1966_v45  ;;  %v1210_v4 = vmax.f32 %v5805_v32, 0.0 }
 0x1e2   : > { %v6041_v44 = vpop.eup %4381  ;;  %v1960_v15 = vmul.f32 %v5986_v22, %v1959_v21  ;;  %v2109_v28 = vadd.f32 %v1981_v31, %v1213_v59  ;;  %2680 = vbcast.lane.b32.xlu1 %v6855_v17, 280  ;;  %2714 = vbcast.lane.b32.xlu0 %v5835_v63, 272  ;;  %v6060_v26 = vrot.slane %v5979_v42, %v2741_v30  ;;  %v1211_v32 = vmax.f32 %v5883_v29, 0.0 }
 0x1e3   : > { %4395 = vlog2.f32 %v2009_v40  ;;  %v1991_v8 = vadd.f32 1.0, %v6041_v44  ;;  %v2106_v37 = vadd.f32 %v1954_v33, %v1210_v4  ;;  %vm1962_vm11 = vcmp.lt.f32.partialorder %v1961_v50, 0.0004427343 }
 0x1e4   : > { %4397 = vpow2.f32 %v1472_v58  ;;  %v2108_v22 = vadd.f32 %v1972_v53, %v1212_v49  ;;  %v1985_v9 = vmul.f32 -0.5, %v6000_v19  ;;  %v2012_v17 = vmul.f32 -0.5, %v6014_v0 }
 0x1e5   : > { %v4384_v35 = vpop.eup %4383  ;;  %4399 = vlog2.f32 %v1991_v8  ;;  %v3794_v61 = vadd.f32 -0.6931472, %v2109_v28  ;;  %v2003_v20 = vmul.f32 -0.5, %v5995_v41  ;;  %v3791_v2 = vadd.f32 -0.6931472, %v2106_v37 }
 0x1e6   : > { %v1957_v1 = vmul.f32 0.6931472, %v4384_v35  ;;  %v6062_v48 = vpop.eup %4385  ;;  %2744 = vbcast.lane.b32.xlu1 %v6060_v26, 256  ;;  %2748 = vbcast.lane.b32.xlu0 %v6060_v26, 264  ;;  %v3793_v49 = vadd.f32 -0.6931472, %v2108_v22  ;;  %v6085_v59 = vrot.slane %v6018_v11, %v2722_v12 }
 0x1e7   : > { %v2036_v43 = vadd.f32 1.0, %v6062_v48  ;;  %v1986_v25 = vadd.f32 1.0, %v1985_v9  ;;  %v1988_v62 = vand.u32 2147483647, %v6000_v19  ;;  %v2013_v40 = vadd.f32 1.0, %v2012_v17 }
 0x1e8   : > { %v1963_v34 = vsel %vm1962_vm11, %v1960_v15, %v1957_v1  ;;  %v1994_v6 = vmul.f32 -0.5, %v6041_v44  ;;  %v2209_v3 = vpack.c.bf16 %v3794_v61, %v3793_v49  ;;  %v2004_v31 = vadd.f32 1.0, %v2003_v20 }
 0x1e9   : > { %v2107_v24 = vadd.f32 %v1963_v34, %v1211_v32  ;;  %v2015_v50 = vand.u32 2147483647, %v6014_v0  ;;  %4401 = vlog2.f32 %v2036_v43  ;;  %v2006_v27 = vand.u32 2147483647, %v5995_v41 }
 0x1ea   : > { %2794 = vbcast.lane.b32.xlu1 %v5500_v57, 280  ;;  %2813 = vbcast.lane.b32.xlu0 %v5603_v46, 280  ;;  %vm6088_vm12 = vcmp.lt.f32.partialorder %v1988_v62, 0.0004427343  ;;  %v1217_v57 = vmax.f32 %v5933_v47, 0.0  ;;  %v1987_v46 = vmul.f32 %v6000_v19, %v1986_v25  ;;  %v2014_v12 = vmul.f32 %v6014_v0, %v2013_v40 }
 0x1eb   : > { %v4388_v54 = vpop.eup %4387  ;;  %v3792_v7 = vadd.f32 -0.6931472, %v2107_v24  ;;  %v1995_v8 = vadd.f32 1.0, %v1994_v6  ;;  %v2005_v28 = vmul.f32 %v5995_v41, %v2004_v31  ;;  %vm2016_vm13 = vcmp.lt.f32.partialorder %v2015_v50, 0.0004427343 }
 0x1ec   : > { %v6071_v29 = vpop.eup %4389  ;;  %v1984_v33 = vmul.f32 0.6931472, %v4388_v54  ;;  %v1997_v1 = vand.u32 2147483647, %v6041_v44  ;;  %vm6102_vm14 = vcmp.lt.f32.partialorder %v2006_v27, 0.0004427343 }
 0x1ed   : > { %v4392_v45 = vpop.eup %4391  ;;  %v2208_v21 = vpack.c.bf16 %v3792_v7, %v3791_v2  ;;  %v2018_v13 = vadd.f32 1.0, %v6071_v29  ;;  %v2760_v41 = vsub.s32 7, %v5303_v39  ;;  %v1214_v34 = vmax.f32 %v5897_v55, 0.0  ;;  %v6118_v2 = vpop.permute.xlu0 %2630 }
 0x1ee   : > { %v6076_v5 = vpop.eup %4393  ;;  %v2002_v35 = vmul.f32 0.6931472, %v4392_v45  ;;  %2847 = vbcast.lane.b32.xlu1 %v5903_v56, 272  ;;  %v1990_v19 = vsel %vm6088_vm12, %v1987_v46, %v1984_v33  ;;  %2877 = vbcast.lane.b32.xlu0 %v6085_v59, 256  ;;  %v1216_v24 = vmax.f32 %v5894_v23, 0.0  ;;  %v1996_v20 = vmul.f32 %v6041_v44, %v1995_v8 }
 0x1ef   : > { %4403 = vlog2.f32 %v2018_v13  ;;  %4059 = vmatprep.mubr.msk.bf16.mxu1 %vm530_vm9, %v2208_v21  ;;  %v2045_v4 = vadd.f32 1.0, %v6076_v5  ;;  %v2110_v43 = vadd.f32 %v1990_v19, %v1214_v34  ;;  %v1215_v54 = vmax.f32 %v5955_v14, 0.0 }
 0x1f0   : > { %v4396_v58 = vpop.eup %4395  ;;  %4060 = vmatmul.mubr.msk.bf16.gmra.mxu1 %vm530_vm9, %v2209_v3  ;;  %v2008_v22 = vsel %vm6102_vm14, %v2005_v28, %v2002_v35  ;;  %vm1998_vm15 = vcmp.lt.f32.partialorder %v1997_v1, 0.0004427343  ;;  %v6124_v23 = vrot.slane %v5979_v42, %v2760_v41  ;;  %v2021_v44 = vmul.f32 -0.5, %v6071_v29  ;;  %v3326_v42 = vld [vmem:[%s6697_s8 + $0x18] sm:$0xff] }
 0x1f1   : > { %v2011_v15 = vmul.f32 0.6931472, %v4396_v58  ;;  %4405 = vlog2.f32 %v2045_v4  ;;  %v6100_v37 = vpop.eup %4397  ;;  %v2112_v7 = vadd.f32 %v2008_v22, %v1216_v24  ;;  %v2048_v14 = vmul.f32 -0.5, %v6076_v5  ;;  %v6137_v33 = vpop.permute.xlu0 %2634  ;;  %4071 = vmatprep.subr.mxu0 %v3326_v42 }
 0x1f2   : > { %v4400_v0 = vpop.eup %4399  ;;  %v2027_v9 = vadd.f32 1.0, %v6100_v37  ;;  %2881 = vbcast.lane.b32.xlu1 %v6085_v59, 264  ;;  %2699 = vbcast.lane.b32.xlu0 %v5694_v60, 280  ;;  %v2039_v62 = vmul.f32 -0.5, %v6062_v48  ;;  %v3795_v45 = vadd.f32 -0.6931472, %v2110_v43  ;;  %v6131_v60 = vpop.permute.xlu1 %2649  ;;  %v6148_v8 = vrot.slane %v6018_v11, %v2741_v30 }
 0x1f3   : > { %v2017_v32 = vsel %vm2016_vm13, %v2014_v12, %v2011_v15  ;;  %v1993_v61 = vmul.f32 0.6931472, %v4400_v0  ;;  %v3797_v6 = vadd.f32 -0.6931472, %v2112_v7  ;;  %v2022_v31 = vadd.f32 1.0, %v2021_v44  ;;  %4072 = vmatpush3.msra.mxu0 %v3326_v42 }
 0x1f4   : > { %v2113_v17 = vadd.f32 %v2017_v32, %v1217_v57  ;;  %4407 = vlog2.f32 %v2027_v9  ;;  %v2049_v50 = vadd.f32 1.0, %v2048_v14  ;;  %v2030_v27 = vmul.f32 -0.5, %v6100_v37 }
 0x1f5   : > { %v1999_v49 = vsel %vm1998_vm15, %v1996_v20, %v1993_v61  ;;  %v2040_v35 = vadd.f32 1.0, %v2039_v62  ;;  %v2024_v53 = vand.u32 2147483647, %v6071_v29  ;;  %v2051_v57 = vand.u32 2147483647, %v6076_v5 }
 0x1f6   : > { %v2111_v55 = vadd.f32 %v1999_v49, %v1215_v54  ;;  %v3798_v25 = vadd.f32 -0.6931472, %v2113_v17  ;;  %2733 = vbcast.lane.b32.xlu1 %v5984_v38, 272  ;;  %v4402_v40 = vpop.eup %4401  ;;  %2763 = vbcast.lane.b32.xlu0 %v6124_v23, 256  ;;  %v2042_v4 = vand.u32 2147483647, %v6062_v48  ;;  %v2023_v28 = vmul.f32 %v6071_v29, %v2022_v31  ;;  %v6159_v22 = vpop.permute.xlu1 %2653 }
 0x1f7   : > { %v2038_v12 = vmul.f32 0.6931472, %v4402_v40  ;;  %v2050_v47 = vmul.f32 %v6076_v5, %v2049_v50  ;;  %v2031_v19 = vadd.f32 1.0, %v2030_v27  ;;  %v2041_v32 = vmul.f32 %v6062_v48, %v2040_v35  ;;  %v6169_v48 = vpop.permute.xlu0 %2668  ;;  %v6225_v50 = vld [vmem:[%s6690_s1 + $0x8] sm:$0xff]  }
 0x1f8   : > { %v3796_v21 = vadd.f32 -0.6931472, %v2111_v55  ;;  %v2211_v58 = vpack.c.bf16 %v3798_v25, %v3797_v6  ;;  %vm6154_vm0 = vcmp.lt.f32.partialorder %v2024_v53, 0.0004427343  ;;  %vm2052_vm1 = vcmp.lt.f32.partialorder %v2051_v57, 0.0004427343 }
 0x1f9   : > { %vm6161_vm2 = vcmp.lt.f32.partialorder %v2042_v4, 0.0004427343  ;;  %v1221_v5 = vmax.f32 %v5976_v16, 0.0  ;;  %v1218_v17 = vmax.f32 %v5968_v36, 0.0  ;;  %v1220_v61 = vmax.f32 %v5965_v52, 0.0 }
 0x1fa   : > { %v2210_v3 = vpack.c.bf16 %v3796_v21, %v3795_v45  ;;  %2767 = vbcast.lane.b32.xlu1 %v6124_v23, 264  ;;  %2832 = vbcast.lane.b32.xlu0 %v5708_v10, 280  ;;  %v2033_v10 = vand.u32 2147483647, %v6100_v37  ;;  %v2044_v24 = vsel %vm6161_vm2, %v2041_v32, %v2038_v12  ;;  %v2032_v54 = vmul.f32 %v6100_v37, %v2031_v19  ;;  %v6180_v36 = vpop.permute.xlu1 %2672 }
 0x1fb   : > { %v1219_v7 = vmax.f32 %v6005_v18, 0.0  ;;  %v2116_v49 = vadd.f32 %v2044_v24, %v1220_v61  ;;  %v6182_v25 = vpop.permute.xlu0 %2782  ;;  %v2913_v18 = vrot.slane %v6018_v11, %v2760_v41  ;;  %v4446_v53 = vmov 0.0   ;;  %v3324_v24 = vld [vmem:[%s6697_s8 + $0x8] sm:$0xff] }
 0x1fc   : > { %v4404_v13 = vpop.eup %4403  ;;  %4063 = vmatprep.mubr.msk.bf16.mxu1 %vm530_vm9, %v2210_v3  ;;  %vm2034_vm3 = vcmp.lt.f32.partialorder %v2033_v10, 0.0004427343  ;;  %531 = vst.msk [vmem:[#allocation2] sm:$0xff] %vm530_vm9, %v4446_v53  ;;  %532 = vst.msk [vmem:[#allocation2 + $0x8] sm:$0xff] %vm530_vm9, %v4446_v53  ;;  %v6234_v4 = vunpack.c.l.bf16 %v6225_v50  ;;  %v6293_v53 = vunpack.c.h.bf16 %v6225_v50  ;;  %vm3291_vm4 = vcmask 1041409  }
 0x1fd   : > { %v2020_v46 = vmul.f32 0.6931472, %v4404_v13  ;;  %4064 = vmatmul.mubr.msk.bf16.gmra.mxu1 %vm530_vm9, %v2211_v58  ;;  %v3801_v45 = vadd.f32 -0.6931472, %v2116_v49  ;;  %vm3293_vm5 = vcmask 1042434   ;;  %vm3295_vm6 = vcmask 1043459  }
 0x1fe   : > { %v4406_v15 = vpop.eup %4405  ;;  %2866 = vbcast.lane.b32.xlu1 %v6023_v51, 272  ;;  %2896 = vbcast.lane.b32.xlu0 %v6148_v8, 256  ;;  %vm3297_vm7 = vcmask 1044484   ;;  %vm3299_vm8 = vcmask 1045509   ;;  %vm3301_vm10 = vcmask 1046534   ;;  %vm3303_vm11 = vcmask 1047559  }
 0x1ff   : > { %v2047_v1 = vmul.f32 0.6931472, %v4406_v15  ;;  %v2026_v29 = vsel %vm6154_vm0, %v2023_v28, %v2020_v46  ;;  %v6194_v40 = vpop.permute.xlu0 %2801 }
 0x200   : > { %v2114_v16 = vadd.f32 %v2026_v29, %v1218_v17 }
 0x201   : > { %v2053_v34 = vsel %vm2052_vm1, %v2050_v47, %v2047_v1  ;;  %v4408_v9 = vpop.eup %4407 }
 0x202   : > { %v2117_v20 = vadd.f32 %v2053_v34, %v1221_v5  ;;  %v2029_v43 = vmul.f32 0.6931472, %v4408_v9  ;;  %2900 = vbcast.lane.b32.xlu1 %v6148_v8, 264  ;;  %2718 = vbcast.lane.b32.xlu0 %v5835_v63, 280  ;;  %v3799_v52 = vadd.f32 -0.6931472, %v2114_v16  ;;  %v6190_v63 = vpop.permute.xlu1 %2786 }
 0x203   : > { %v2639_v39 = vpop.permute.xlu0 %2638  ;;  %v3325_v9 = vld [vmem:[%s6697_s8 + $0x10] sm:$0xff] }
 0x204   : > { %v2035_v55 = vsel %vm2034_vm3, %v2032_v54, %v2029_v43  ;;  %v3802_v14 = vadd.f32 -0.6931472, %v2117_v20  ;;  %4073 = vmatprep.subr.mxu0 %v3325_v9 }
 0x205   : > { %v2115_v44 = vadd.f32 %v2035_v55, %v1219_v7  ;;  %4074 = vmatpush3.msra.mxu0 %v3325_v9 }
 0x206   : > { %2752 = vbcast.lane.b32.xlu1 %v6060_v26, 272  ;;  %2851 = vbcast.lane.b32.xlu0 %v5903_v56, 280  ;;  %v2213_v21 = vpack.c.bf16 %v3802_v14, %v3801_v45  ;;  %v6197_v56 = vpop.permute.xlu1 %2805 }
 0x207   : > { %v3800_v62 = vadd.f32 -0.6931472, %v2115_v44  ;;  %4075 = vmatprep.subr.mxu0 %v3324_v24 }
 0x208   : > { %4076 = vmatpush3.msra.mxu0 %v3324_v24 }
 0x209   : > { %v2212_v37 = vpack.c.bf16 %v3800_v62, %v3799_v52 }
 0x20a   : > { %2885 = vbcast.lane.b32.xlu1 %v6085_v59, 272  ;;  %2915 = vbcast.lane.b32.xlu0 %v2913_v18, 256  ;;  %v6201_v11 = vpop.permute.xlu1 %2657 }
 0x20b   : > { %4067 = vmatprep.mubr.msk.bf16.mxu1 %vm530_vm9, %v2212_v37 }
 0x20c   : > { %4068 = vmatmul.mubr.msk.bf16.gmra.mxu1 %vm530_vm9, %v2213_v21 }
 0x20e   : > { %2919 = vbcast.lane.b32.xlu1 %v2913_v18, 264  ;;  %2737 = vbcast.lane.b32.xlu0 %v5984_v38, 280  ;;  %v6204_v41 = vpop.permute.xlu0 %2687  ;;  %v6210_v38 = vld [vmem:[%s6696_s7] ss:$0 sm:$0xff] }
 0x20f   : > { %v6216_v13 = vpop.permute.xlu1 %2691 }
 0x212   : > { %2771 = vbcast.lane.b32.xlu1 %v6124_v23, 272  ;;  %2870 = vbcast.lane.b32.xlu0 %v6023_v51, 280  ;;  %v3850_v51 = vld [vmem:[%s6690_s1] sm:$0xff]  }
 0x213   : > { %v6228_v58 = vunpack.c.l.bf16 %v3850_v51  ;;  %v6238_v15 = vunpack.c.h.bf16 %v3850_v51 }
 0x214   : > { %v6220_v31 = vpop.permute.xlu0 %2820  ;;  %v6240_v12 = vpop.permute.xlu1 %2824 }
 0x216   : > { %2904 = vbcast.lane.b32.xlu1 %v6148_v8, 272  ;;  %2756 = vbcast.lane.b32.xlu0 %v6060_v26, 280 }
 0x218   : > { %v6244_v1 = vpop.permute.xlu0 %2676 }
 0x21a   : > { %v4009_v6 = vpop.f32.mrf.mxu1  ;;  %2889 = vbcast.lane.b32.xlu1 %v6085_v59, 280  ;;  %2923 = vbcast.lane.b32.xlu0 %v2913_v18, 272 }
 0x21b   : > { %v2377_v3 = vadd.f32 %v4009_v6, %v6210_v38 }
 0x21c   : > { %v2368_v42 = vpop.f32.mrf.mxu1 }
 0x21d   : > { %v2369_v26 = vadd.f32 %v6210_v38, %v2368_v42  ;;  %v2931_v57 = vmul.f32 %v2639_v39, %v2377_v3 }
 0x21e   : > { %v4010_v59 = vpop.f32.mrf.mxu1  ;;  %2775 = vbcast.lane.b32.xlu1 %v6124_v23, 280  ;;  %2908 = vbcast.lane.b32.xlu0 %v6148_v8, 280 }
 0x21f   : > { %v2929_v27 = vmul.f32 %v6118_v2, %v2369_v26  ;;  %v3005_v19 = vmul.f32 %v6234_v4, %v2931_v57 }
 0x220   : > { %v2371_v35 = vpop.f32.mrf.mxu1 }
 0x221   : > { %v2372_v46 = vadd.f32 %v6210_v38, %v2371_v35  ;;  %v3003_v23 = vmul.f32 %v6228_v58, %v2929_v27  ;;  %v3070_v34 = vsel %vm530_vm9, %v3005_v19, 0.0 }
 0x222   : > { %v4013_v2 = vpop.f32.mrf.mxu1  ;;  %2927 = vbcast.lane.b32.xlu1 %v2913_v18, 280 }
 0x223   : > { %v2930_v28 = vmul.f32 %v6137_v33, %v2372_v46  ;;  %v3067_v0 = vsel %vm530_vm9, %v3003_v23, 0.0  ;;  %v2393_v55 = vadd.f32 %v4013_v2, %v6210_v38 }
 0x224   : > { %v2384_v47 = vpop.f32.mrf.mxu1 }
 0x225   : > { %v3004_v32 = vmul.f32 %v6238_v15, %v2930_v28  ;;  %v2385_v43 = vadd.f32 %v6210_v38, %v2384_v47  ;;  %v2935_v37 = vmul.f32 %v6201_v11, %v2393_v55 }
 0x226   : > { %v4014_v8 = vpop.f32.mrf.mxu1 }
 0x227   : > { %v3068_v10 = vsel %vm530_vm9, %v3004_v32, 0.0  ;;  %v2933_v44 = vmul.f32 %v6131_v60, %v2385_v43  ;;  %v2380_v60 = vadd.f32 %v4010_v59, %v6210_v38  ;;  %v3009_v51 = vmul.f32 %v6234_v4, %v2935_v37 }
 0x228   : > { %v3069_v30 = vadd.f32 %v3068_v10, %v3067_v0  ;;  %v2387_v29 = vpop.f32.mrf.mxu1  ;;  %v2396_v26 = vadd.f32 %v4014_v8, %v6210_v38 }
 0x229   : > { %v2388_v33 = vadd.f32 %v6210_v38, %v2387_v29  ;;  %v3007_v18 = vmul.f32 %v6228_v58, %v2933_v44  ;;  %v3083_v28 = vsel %vm530_vm9, %v3009_v51, 0.0 }
 0x22a   : > { %v6250_v5 = vpop.permute.xlu1 %2706  ;;  %v6260_v17 = vpop.permute.xlu0 %2710  ;;  %v3071_v61 = vadd.f32 %v3070_v34, %v3069_v30 }
 0x22b   : > { %v6262_v20 = vpop.f32.mrf.mxu1  ;;  %v2934_v16 = vmul.f32 %v6159_v22, %v2388_v33  ;;  %v3080_v3 = vsel %vm530_vm9, %v3007_v18, 0.0 }
 0x22d   : > { %v6265_v54 = vpop.f32.mrf.mxu1  ;;  %v3008_v62 = vmul.f32 %v6238_v15, %v2934_v16 }
 0x22e   : > { %v6270_v49 = vpop.permute.xlu1 %2790  ;;  %v6274_v14 = vpop.permute.xlu0 %2809 }
 0x22f   : > { %v6268_v7 = vpop.f32.mrf.mxu1  ;;  %v3081_v21 = vsel %vm530_vm9, %v3008_v62, 0.0 }
 0x230   : > { %v3082_v27 = vadd.f32 %v3081_v21, %v3080_v3 }
 0x231   : > { %v2403_v52 = vpop.f32.mrf.mxu1 }
 0x232   : > { %v3084_v8 = vadd.f32 %v3083_v28, %v3082_v27  ;;  %v2401_v28 = vadd.f32 %v6210_v38, %v6265_v54  ;;  %v2409_v54 = vadd.f32 %v6262_v20, %v6210_v38 }
 0x233   : > { %v4021_v45 = vpop.f32.mrf.mxu1 }
 0x234   : > { %v2425_v19 = vadd.f32 %v4021_v45, %v6210_v38 }
 0x235   : > { %v2416_v22 = vpop.f32.mrf.mxu1 }
 0x236   : > { %v2417_v39 = vadd.f32 %v6210_v38, %v2416_v22 }
 0x237   : > { %v6281_v6 = vpop.permute.xlu1 %2839  ;;  %v6289_v11 = vpop.f32.mrf.mxu1 }
 0x238   : > { %v6283_v42 = vpop.permute.xlu0 %2843  ;;  %v2941_v35 = vmul.f32 %v6204_v41, %v2417_v39 }
 0x239   : > { %v2419_v57 = vpop.f32.mrf.mxu1 }
 0x23a   : > { %v2420_v23 = vadd.f32 %v6210_v38, %v2419_v57  ;;  %v3015_v0 = vmul.f32 %v6228_v58, %v2941_v35  ;;  %v2404_v35 = vadd.f32 %v6210_v38, %v2403_v52 }
 0x23b   : > { %v2643_v46 = vpop.permute.xlu1 %2642 }
 0x23c   : > { %v2662_v2 = vpop.permute.xlu0 %2661  ;;  %v2932_v59 = vmul.f32 %v2643_v46, %v2380_v60  ;;  %v6298_v32 = vpop.f32.mrf.mxu1  ;;  %v2942_v41 = vmul.f32 %v6216_v13, %v2420_v23  ;;  %v3106_v13 = vsel %vm530_vm9, %v3015_v0, 0.0  ;;  %v2938_v52 = vmul.f32 %v6180_v36, %v2404_v35 }
 0x23d   : > { %v2936_v47 = vmul.f32 %v2662_v2, %v2396_v26 }
 0x23e   : > { %v3006_v50 = vmul.f32 %v6293_v53, %v2932_v59  ;;  %v2432_v30 = vpop.f32.mrf.mxu1  ;;  %v3016_v34 = vmul.f32 %v6238_v15, %v2942_v41 }
 0x23f   : > { %v3010_v10 = vmul.f32 %v6293_v53, %v2936_v47  ;;  %v2696_v29 = vpop.permute.xlu1 %2695  ;;  %v2433_v33 = vadd.f32 %v6210_v38, %v2432_v30 }
 0x240   : > { %v3072_v9 = vsel %vm530_vm9, %v3006_v50, 0.0  ;;  %v2943_v43 = vmul.f32 %v2696_v29, %v2425_v19  ;;  %v6308_v16 = vpop.f32.mrf.mxu1  ;;  %v3107_v62 = vsel %vm530_vm9, %v3016_v34, 0.0  ;;  %v2937_v34 = vmul.f32 %v6169_v48, %v2401_v28 }
 0x241   : > { %v3085_v24 = vsel %vm530_vm9, %v3010_v10, 0.0  ;;  %v3073_v55 = vadd.f32 %v3072_v9, %v3071_v61  ;;  %v3108_v37 = vadd.f32 %v3107_v62, %v3106_v13  ;;  %v2945_v18 = vmul.f32 %v6250_v5, %v2433_v33 }
 0x242   : > { %v3086_v44 = vadd.f32 %v3085_v24, %v3084_v8  ;;  %v3017_v45 = vmul.f32 %v6234_v4, %v2943_v43  ;;  %v2435_v22 = vpop.f32.mrf.mxu1  ;;  %v2939_v62 = vmul.f32 %v6244_v1, %v2409_v54  ;;  %v3011_v20 = vmul.f32 %v6228_v58, %v2937_v34 }
 0x243   : > { %v3074_v21 = vrot.slane %v3073_v55, 4  ;;  %v2436_v60 = vadd.f32 %v6210_v38, %v2435_v22  ;;  %v3019_v57 = vmul.f32 %v6228_v58, %v2945_v18 }
 0x244   : > { %v3087_v39 = vrot.slane %v3086_v44, 4  ;;  %v3109_v51 = vsel %vm530_vm9, %v3017_v45, 0.0 }
 0x245   : > { %v6316_v3 = vpop.f32.mrf.mxu1  ;;  %v3075_v61 = vadd.f32 %v3074_v21, %v3073_v55  ;;  %v6318_v27 = vadd.f32 %v3109_v51, %v3108_v37  ;;  %v2946_v46 = vmul.f32 %v6260_v17, %v2436_v60  ;;  %v3119_v41 = vsel %vm530_vm9, %v3019_v57, 0.0 }
 0x246   : > { %v3088_v26 = vadd.f32 %v3087_v39, %v3086_v44  ;;  %v3012_v55 = vmul.f32 %v6238_v15, %v2938_v52  ;;  %v3013_v21 = vmul.f32 %v6234_v4, %v2939_v62  ;;  %v3093_v39 = vsel %vm530_vm9, %v3011_v20, 0.0 }
 0x247   : > { %v6323_v5 = vpop.f32.mrf.mxu1  ;;  %v3076_v23 = vrot.slane %v3075_v61, 2  ;;  %v3020_v47 = vmul.f32 %v6238_v15, %v2946_v46  ;;  %v2412_v60 = vadd.f32 %v6268_v7, %v6210_v38 }
 0x248   : > { %v6325_v2 = vpop.permute.xlu0 %2725  ;;  %v3089_v59 = vrot.slane %v3088_v26, 2  ;;  %v6344_v9 = vpop.permute.xlu1 %2729  ;;  %v3094_v45 = vsel %vm530_vm9, %v3012_v55, 0.0  ;;  %v3096_v57 = vsel %vm530_vm9, %v3013_v21, 0.0 }
 0x249   : > { %v6330_v19 = vpop.f32.mrf.mxu1  ;;  %v3077_v8 = vadd.f32 %v3076_v23, %v3075_v61  ;;  %v3120_v17 = vsel %vm530_vm9, %v3020_v47, 0.0  ;;  %v3095_v51 = vadd.f32 %v3094_v45, %v3093_v39 }
 0x24a   : > { %v3090_v0 = vadd.f32 %v3089_v59, %v3088_v26  ;;  %v6337_v29 = vadd.f32 %v3120_v17, %v3119_v41 }
 0x24b   : > { %v6335_v50 = vpop.f32.mrf.mxu1  ;;  %v3078_v10 = vrot.slane %v3077_v8, 1  ;;  %v3097_v59 = vadd.f32 %v3096_v57, %v3095_v51 }
 0x24c   : > { %v3091_v30 = vrot.slane %v3090_v0, 1  ;;  %v6346_v36 = vpop.permute.xlu0 %2828 }
 0x24d   : > { %v3079_v24 = vadd.f32 %v3078_v10, %v3077_v8 }
 0x24e   : > { %v6342_v33 = vpop.f32.mrf.mxu1  ;;  %v3092_v43 = vadd.f32 %v3091_v30, %v3090_v0 }
 0x250   : > { %v6349_v44 = vpop.f32.mrf.mxu1  ;;  %v6352_v13 = vsel %vm3291_vm4, %v3092_v43, %v3079_v24  ;;  %v6361_v18 = vpop.permute.xlu1 %2858 }
 0x251   : > { %v6363_v22 = vpop.permute.xlu0 %2862 }
 0x252   : > { %v6356_v48 = vpop.f32.mrf.mxu1 }
 0x254   : > { %v6359_v37 = vpop.f32.mrf.mxu1  ;;  %v2681_v26 = vpop.permute.xlu1 %2680 }
 0x255   : > { %v6373_v35 = vpop.permute.xlu0 %2714  ;;  %v2940_v46 = vmul.f32 %v2681_v26, %v2412_v60 }
 0x256   : > { %v6369_v1 = vpop.f32.mrf.mxu1 }
 0x257   : > { %v3014_v28 = vmul.f32 %v6293_v53, %v2940_v46 }
 0x258   : > { %v6371_v61 = vpop.f32.mrf.mxu1  ;;  %v6381_v8 = vpop.permute.xlu1 %2744 }
 0x259   : > { %v6383_v7 = vpop.permute.xlu0 %2748  ;;  %v3098_v0 = vsel %vm530_vm9, %v3014_v28, 0.0  ;;  %v2428_v28 = vadd.f32 %v6289_v11, %v6210_v38  ;;  %v2441_v11 = vadd.f32 %v6298_v32, %v6210_v38 }
 0x25a   : > { %v6376_v23 = vpop.f32.mrf.mxu1  ;;  %v3099_v41 = vadd.f32 %v3098_v0, %v3097_v59 }
 0x25c   : > { %v6379_v47 = vpop.f32.mrf.mxu1  ;;  %v2795_v30 = vpop.permute.xlu1 %2794  ;;  %v3100_v54 = vrot.slane %v3099_v41, 4 }
 0x25d   : > { %v2814_v24 = vpop.permute.xlu0 %2813 }
 0x25e   : > { %v4041_v52 = vpop.f32.mrf.mxu1  ;;  %v3101_v55 = vadd.f32 %v3100_v54, %v3099_v41 }
 0x25f   : > { %v2505_v17 = vadd.f32 %v4041_v52, %v6210_v38 }
 0x260   : > { %v2496_v10 = vpop.f32.mrf.mxu1  ;;  %v6391_v39 = vpop.permute.xlu1 %2847  ;;  %v3102_v60 = vrot.slane %v3101_v55, 2 }
 0x261   : > { %v2497_v34 = vadd.f32 %v6210_v38, %v2496_v10  ;;  %v2963_v20 = vmul.f32 %v6270_v49, %v2505_v17  ;;  %v6394_v26 = vpop.permute.xlu0 %2877 }
 0x262   : > { %v4042_v43 = vpop.f32.mrf.mxu1  ;;  %v3103_v59 = vadd.f32 %v3102_v60, %v3101_v55 }
 0x263   : > { %v2961_v62 = vmul.f32 %v6182_v25, %v2497_v34  ;;  %v2508_v45 = vadd.f32 %v4042_v43, %v6210_v38  ;;  %v3037_v0 = vmul.f32 %v6234_v4, %v2963_v20 }
 0x264   : > { %v2499_v21 = vpop.f32.mrf.mxu1  ;;  %v6401_v41 = vpop.permute.xlu1 %2881  ;;  %v3104_v17 = vrot.slane %v3103_v59, 1 }
 0x265   : > { %v2500_v51 = vadd.f32 %v6210_v38, %v2499_v21  ;;  %v2964_v57 = vmul.f32 %v2795_v30, %v2508_v45  ;;  %v3035_v25 = vmul.f32 %v6228_v58, %v2961_v62  ;;  %v2700_v34 = vpop.permute.xlu0 %2699  ;;  %v3174_v21 = vsel %vm530_vm9, %v3037_v0, 0.0 }
 0x266   : > { %v4045_v46 = vpop.f32.mrf.mxu1  ;;  %v3105_v55 = vadd.f32 %v3104_v17, %v3103_v59  ;;  %v2944_v62 = vmul.f32 %v2700_v34, %v2428_v28  ;;  %v2452_v0 = vadd.f32 %v6210_v38, %v6335_v50 }
 0x267   : > { %v2962_v49 = vmul.f32 %v6190_v63, %v2500_v51  ;;  %v2521_v54 = vadd.f32 %v4045_v46, %v6210_v38  ;;  %v3038_v43 = vmul.f32 %v6293_v53, %v2964_v57  ;;  %v3171_v20 = vsel %vm530_vm9, %v3035_v25, 0.0 }
 0x268   : > { %v2512_v52 = vpop.f32.mrf.mxu1  ;;  %v6416_v32 = vsel %vm3293_vm5, %v3105_v55, %v6352_v13  ;;  %v6418_v57 = vpop.permute.xlu1 %2733  ;;  %v3018_v59 = vmul.f32 %v6293_v53, %v2944_v62 }
 0x269   : > { %v3036_v10 = vmul.f32 %v6238_v15, %v2962_v49  ;;  %v2513_v30 = vadd.f32 %v6210_v38, %v2512_v52  ;;  %v2967_v28 = vmul.f32 %v6274_v14, %v2521_v54  ;;  %v6423_v52 = vpop.permute.xlu0 %2763  ;;  %v3176_v17 = vsel %vm530_vm9, %v3038_v43, 0.0 }
 0x26a   : > { %v4046_v63 = vpop.f32.mrf.mxu1 }
 0x26b   : > { %v3172_v45 = vsel %vm530_vm9, %v3036_v10, 0.0  ;;  %v2965_v51 = vmul.f32 %v6194_v40, %v2513_v30  ;;  %v2524_v46 = vadd.f32 %v4046_v63, %v6210_v38  ;;  %v2449_v40 = vadd.f32 %v6210_v38, %v6323_v5 }
 0x26c   : > { %v3173_v60 = vadd.f32 %v3172_v45, %v3171_v20  ;;  %v2515_v49 = vpop.f32.mrf.mxu1  ;;  %v3111_v10 = vsel %vm530_vm9, %v3018_v59, 0.0  ;;  %v6434_v55 = vpop.permute.xlu1 %2767  ;;  %v3041_v5 = vmul.f32 %v6234_v4, %v2967_v28  ;;  %v2947_v20 = vmul.f32 %v6373_v35, %v2441_v11 }
 0x26d   : > { %v2516_v25 = vadd.f32 %v6210_v38, %v2515_v49  ;;  %v3039_v30 = vmul.f32 %v6228_v58, %v2965_v51  ;;  %v2968_v34 = vmul.f32 %v2814_v24, %v2524_v46  ;;  %v3112_v54 = vadd.f32 %v3111_v10, %v6318_v27  ;;  %v6438_v50 = vpop.permute.xlu0 %2832 }
 0x26e   : > { %v3175_v13 = vadd.f32 %v3174_v21, %v3173_v60  ;;  %v2949_v45 = vmul.f32 %v6325_v2, %v2449_v40  ;;  %v2950_v27 = vmul.f32 %v6344_v9, %v2452_v0  ;;  %v3187_v2 = vsel %vm530_vm9, %v3041_v5, 0.0 }
 0x26f   : > { %v2966_v14 = vmul.f32 %v6197_v56, %v2516_v25  ;;  %v3113_v43 = vrot.slane %v3112_v54, 4  ;;  %v3323_v56 = vld [vmem:[%s6697_s8] sm:$0xff]  ;;  %v3184_v24 = vsel %vm530_vm9, %v3039_v30, 0.0  ;;  %v3042_v60 = vmul.f32 %v6293_v53, %v2968_v34 }
 0x270   : > { %v3177_v63 = vadd.f32 %v3176_v17, %v3175_v13  ;;  %4077 = vmatprep.subr.mxu0 %v3323_v56  ;;  %v6449_v35 = vpop.permute.xlu1 %2866  ;;  %v3021_v9 = vmul.f32 %v6234_v4, %v2947_v20  ;;  %v3023_v25 = vmul.f32 %v6228_v58, %v2949_v45  ;;  %v2444_v0 = vadd.f32 %v6308_v16, %v6210_v38 }
 0x271   : > { %v3040_v62 = vmul.f32 %v6238_v15, %v2966_v14  ;;  %v3114_v46 = vadd.f32 %v3113_v43, %v3112_v54  ;;  %4078 = vmatpush3.msra.mxu0 %v3323_v56  ;;  %v6452_v28 = vpop.permute.xlu0 %2896  ;;  %v3024_v17 = vmul.f32 %v6238_v15, %v2950_v27  ;;  %v2465_v13 = vadd.f32 %v6210_v38, %v6349_v44 }
 0x272   : > { %v3178_v21 = vrot.slane %v3177_v63, 4  ;;  %v3189_v10 = vsel %vm530_vm9, %v3042_v60, 0.0  ;;  %v2468_v34 = vadd.f32 %v6210_v38, %v6359_v37  ;;  %v2457_v5 = vadd.f32 %v6316_v3, %v6210_v38  ;;  %v3449_v3 = vld [vmem:[%s6699_s10 + $0x10] sm:$0xff] }
 0x273   : > { %v3185_v51 = vsel %vm530_vm9, %v3040_v62, 0.0  ;;  %v3115_v11 = vrot.slane %v3114_v46, 2  ;;  %v6470_v16 = vadd.f32 %v6330_v19, %v6210_v38  ;;  %v3122_v44 = vsel %vm530_vm9, %v3021_v9, 0.0 }
 0x274   : > { %v3179_v49 = vadd.f32 %v3178_v21, %v3177_v63  ;;  %v3186_v59 = vadd.f32 %v3185_v51, %v3184_v24  ;;  %v6464_v63 = vpop.permute.xlu1 %2900  ;;  %v3132_v20 = vsel %vm530_vm9, %v3023_v25, 0.0  ;;  %v3450_v21 = vld [vmem:[%s6699_s10 + $0x18] sm:$0xff]  ;;  %v3123_v19 = vadd.f32 %v3122_v44, %v6337_v29 }
 0x275   : > { %v3116_v30 = vadd.f32 %v3115_v11, %v3114_v46  ;;  %v2719_v43 = vpop.permute.xlu0 %2718  ;;  %v3133_v27 = vsel %vm530_vm9, %v3024_v17, 0.0  ;;  %v2953_v24 = vmul.f32 %v6381_v8, %v2465_v13  ;;  %4082 = vmatprep.subr.mxu1 %v3450_v21  ;;  %v2954_v51 = vmul.f32 %v6383_v7, %v2468_v34  ;;  %v3448_v11 = vld [vmem:[%s6699_s10 + $0x8] sm:$0xff] }
 0x276   : > { %v3188_v40 = vadd.f32 %v3187_v2, %v3186_v59  ;;  %v3180_v14 = vrot.slane %v3179_v49, 2  ;;  %v2948_v56 = vmul.f32 %v2719_v43, %v2444_v0  ;;  %4083 = vmatpush3.msra.mxu1 %v3450_v21  ;;  %v2951_v29 = vmul.f32 %v6418_v57, %v2457_v5 }
 0x277   : > { %v3117_v62 = vrot.slane %v3116_v30, 1  ;;  %4084 = vmatprep.subr.mxu1 %v3449_v3  ;;  %v6501_v17 = vadd.f32 %v6356_v48, %v6210_v38  ;;  %v3028_v43 = vmul.f32 %v6238_v15, %v2954_v51  ;;  %v2489_v21 = vadd.f32 %v6369_v1, %v6210_v38 }
 0x278   : > { %v3190_v54 = vadd.f32 %v3189_v10, %v3188_v40  ;;  %v3181_v46 = vadd.f32 %v3180_v14, %v3179_v49  ;;  %v3022_v9 = vmul.f32 %v6293_v53, %v2948_v56  ;;  %v2753_v25 = vpop.permute.xlu1 %2752  ;;  %v2473_v49 = vadd.f32 %v6342_v33, %v6210_v38  ;;  %4085 = vmatpush3.msra.mxu1 %v3449_v3 }
 0x279   : > { %v3118_v60 = vadd.f32 %v3117_v62, %v3116_v30  ;;  %v6491_v0 = vpop.permute.xlu0 %2851  ;;  %v3134_v30 = vadd.f32 %v3133_v27, %v3132_v20  ;;  %4086 = vmatprep.subr.mxu1 %v3448_v11  ;;  %v3025_v48 = vmul.f32 %v6234_v4, %v2951_v29  ;;  %v2484_v3 = vadd.f32 %v6210_v38, %v6379_v47 }
 0x27a   : > { %v3191_v45 = vrot.slane %v3190_v54, 4  ;;  %v3124_v10 = vsel %vm530_vm9, %v3022_v9, 0.0  ;;  %v3182_v5 = vrot.slane %v3181_v46, 1  ;;  %4087 = vmatpush3.msra.mxu1 %v3448_v11  ;;  %v3146_v47 = vsel %vm530_vm9, %v3028_v43, 0.0 }
 0x27b   : > { %v4049_v37 = vpop.f32.mrf.mxu1  ;;  %v6495_v7 = vsel %vm3295_vm6, %v3118_v60, %v6416_v32  ;;  %v3125_v32 = vadd.f32 %v3124_v10, %v3123_v19  ;;  %v2481_v19 = vadd.f32 %v6210_v38, %v6371_v61  ;;  %v3135_v1 = vsel %vm530_vm9, %v3025_v48, 0.0 }
 0x27c   : > { %v3192_v59 = vadd.f32 %v3191_v45, %v3190_v54  ;;  %v2537_v40 = vadd.f32 %v4049_v37, %v6210_v38  ;;  %v3027_v54 = vmul.f32 %v6228_v58, %v2953_v24  ;;  %v6508_v44 = vpop.permute.xlu1 %2885 }
 0x27d   : > { %v2528_v2 = vpop.f32.mrf.mxu1  ;;  %v3126_v45 = vrot.slane %v3125_v32, 4  ;;  %v6513_v37 = vpop.permute.xlu0 %2915 }
 0x27e   : > { %v2529_v8 = vadd.f32 %v6210_v38, %v2528_v2  ;;  %v3193_v13 = vrot.slane %v3192_v59, 2  ;;  %v2971_v20 = vmul.f32 %v6346_v36, %v2537_v40  ;;  %v3145_v51 = vsel %vm530_vm9, %v3027_v54, 0.0 }
 0x27f   : > { %v4050_v57 = vpop.f32.mrf.mxu1  ;;  %v3127_v60 = vadd.f32 %v3126_v45, %v3125_v32  ;;  %v3136_v32 = vadd.f32 %v3135_v1, %v3134_v30  ;;  %v2957_v54 = vmul.f32 %v6423_v52, %v2481_v19 }
 0x280   : > { %v2969_v34 = vmul.f32 %v6220_v31, %v2529_v8  ;;  %v2540_v14 = vadd.f32 %v4050_v57, %v6210_v38  ;;  %v3194_v33 = vadd.f32 %v3193_v13, %v3192_v59  ;;  %v3183_v59 = vadd.f32 %v3182_v5, %v3181_v46  ;;  %v6526_v11 = vpop.permute.xlu1 %2919 }
 0x281   : > { %v2531_v62 = vpop.f32.mrf.mxu1  ;;  %v3045_v9 = vmul.f32 %v6234_v4, %v2971_v20  ;;  %v3128_v29 = vrot.slane %v3127_v60, 2  ;;  %v2738_v40 = vpop.permute.xlu0 %2737  ;;  %v3147_v20 = vadd.f32 %v3146_v47, %v3145_v51  ;;  %v3031_v51 = vmul.f32 %v6228_v58, %v2957_v54 }
 0x282   : > { %v2532_v31 = vadd.f32 %v6210_v38, %v2531_v62  ;;  %v3195_v56 = vrot.slane %v3194_v33, 1  ;;  %v3043_v27 = vmul.f32 %v6228_v58, %v2969_v34  ;;  %v2972_v36 = vmul.f32 %v6438_v50, %v2540_v14 }
 0x283   : > { %v2955_v50 = vmul.f32 %v2753_v25, %v2473_v49  ;;  %v2952_v13 = vmul.f32 %v2738_v40, %v6470_v16  ;;  %v3129_v14 = vadd.f32 %v3128_v29, %v3127_v60 }
 0x284   : > { %v2970_v24 = vmul.f32 %v6240_v12, %v2532_v31  ;;  %v3196_v2 = vadd.f32 %v3195_v56, %v3194_v33  ;;  %v2958_v12 = vmul.f32 %v6434_v55, %v2484_v3  ;;  %v3197_v57 = vsel %vm530_vm9, %v3043_v27, 0.0  ;;  %v2772_v49 = vpop.permute.xlu1 %2771 }
 0x285   : > { %v3046_v10 = vmul.f32 %v6293_v53, %v2972_v36  ;;  %v3026_v55 = vmul.f32 %v6293_v53, %v2952_v13  ;;  %v3200_v33 = vsel %vm530_vm9, %v3045_v9, 0.0  ;;  %v3130_v48 = vrot.slane %v3129_v14, 1  ;;  %v6544_v43 = vpop.permute.xlu0 %2870 }
 0x286   : > { %v3044_v61 = vmul.f32 %v6238_v15, %v2970_v24  ;;  %v6533_v8 = vsel %vm3291_vm4, %v3196_v2, %v3183_v59  ;;  %v4053_v46 = vpop.f32.mrf.mxu1  ;;  %v3032_v31 = vmul.f32 %v6238_v15, %v2958_v12  ;;  %v3029_v3 = vmul.f32 %v6234_v4, %v2955_v50 }
 0x287   : > { %v2553_v62 = vadd.f32 %v4053_v46, %v6210_v38  ;;  %v3137_v52 = vsel %vm530_vm9, %v3026_v55, 0.0  ;;  %v3202_v56 = vsel %vm530_vm9, %v3046_v10, 0.0  ;;  %v3131_v27 = vadd.f32 %v3130_v48, %v3129_v14 }
 0x288   : > { %v3198_v34 = vsel %vm530_vm9, %v3044_v61, 0.0  ;;  %v2544_v25 = vpop.f32.mrf.mxu1  ;;  %v3138_v36 = vadd.f32 %v3137_v52, %v3136_v32  ;;  %v6552_v2 = vpop.permute.xlu1 %2904  ;;  %v3159_v29 = vsel %vm530_vm9, %v3032_v31, 0.0  ;;  %v3148_v12 = vsel %vm530_vm9, %v3029_v3, 0.0 }
 0x289   : > { %v3199_v5 = vadd.f32 %v3198_v34, %v3197_v57  ;;  %v2545_v16 = vadd.f32 %v6210_v38, %v2544_v25  ;;  %v2975_v1 = vmul.f32 %v6391_v39, %v2553_v62  ;;  %v6559_v9 = vsel %vm3297_vm7, %v3131_v27, %v6495_v7  ;;  %v2757_v61 = vpop.permute.xlu0 %2756 }
 0x28a   : > { %v4054_v45 = vpop.f32.mrf.mxu1  ;;  %v3139_v50 = vrot.slane %v3138_v36, 4  ;;  %v2956_v46 = vmul.f32 %v2757_v61, %v6501_v17  ;;  %v3149_v57 = vadd.f32 %v3148_v12, %v3147_v20  ;;  %v3158_v17 = vsel %vm530_vm9, %v3031_v51, 0.0 }
 0x28b   : > { %v3201_v30 = vadd.f32 %v3200_v33, %v3199_v5  ;;  %v2973_v19 = vmul.f32 %v6281_v6, %v2545_v16  ;;  %v2556_v60 = vadd.f32 %v4054_v45, %v6210_v38  ;;  %v2959_v6 = vmul.f32 %v2772_v49, %v2489_v21 }
 0x28c   : > { %v2547_v59 = vpop.f32.mrf.mxu1  ;;  %v3030_v7 = vmul.f32 %v6293_v53, %v2956_v46  ;;  %v6568_v14 = vpop.permute.xlu1 %2889  ;;  %v2492_v21 = vadd.f32 %v6376_v23, %v6210_v38  ;;  %v3049_v32 = vmul.f32 %v6234_v4, %v2975_v1  ;;  %v3140_v55 = vadd.f32 %v3139_v50, %v3138_v36 }
 0x28d   : > { %v3203_v24 = vadd.f32 %v3202_v56, %v3201_v30  ;;  %v2548_v47 = vadd.f32 %v6210_v38, %v2547_v59  ;;  %v3047_v13 = vmul.f32 %v6228_v58, %v2973_v19  ;;  %v2976_v10 = vmul.f32 %v6491_v0, %v2556_v60 }
 0x28e   : > { %v3033_v54 = vmul.f32 %v6234_v4, %v2959_v6  ;;  %v3150_v0 = vsel %vm530_vm9, %v3030_v7, 0.0  ;;  %v3213_v20 = vsel %vm530_vm9, %v3049_v32, 0.0  ;;  %v3141_v56 = vrot.slane %v3140_v55, 2 }
 0x28f   : > { %v3204_v40 = vrot.slane %v3203_v24, 4  ;;  %v2974_v34 = vmul.f32 %v6283_v42, %v2548_v47  ;;  %v3160_v42 = vadd.f32 %v3159_v29, %v3158_v17  ;;  %v3210_v49 = vsel %vm530_vm9, %v3047_v13, 0.0 }
 0x290   : > { %v3151_v33 = vadd.f32 %v3150_v0, %v3149_v57  ;;  %v3050_v16 = vmul.f32 %v6293_v53, %v2976_v10  ;;  %v2776_v48 = vpop.permute.xlu1 %2775  ;;  %v3161_v45 = vsel %vm530_vm9, %v3033_v54, 0.0  ;;  %v3142_v29 = vadd.f32 %v3141_v56, %v3140_v55 }
 0x291   : > { %v3205_v39 = vadd.f32 %v3204_v40, %v3203_v24  ;;  %v3048_v25 = vmul.f32 %v6238_v15, %v2974_v34  ;;  %v2960_v52 = vmul.f32 %v2776_v48, %v2492_v21  ;;  %v3162_v19 = vadd.f32 %v3161_v45, %v3160_v42 }
 0x292   : > { %v3152_v30 = vrot.slane %v3151_v33, 4  ;;  %v3215_v59 = vsel %vm530_vm9, %v3050_v16, 0.0  ;;  %v3143_v7 = vrot.slane %v3142_v29, 1 }
 0x293   : > { %v3206_v5 = vrot.slane %v3205_v39, 2  ;;  %v3211_v23 = vsel %vm530_vm9, %v3048_v25, 0.0  ;;  %v3034_v24 = vmul.f32 %v6293_v53, %v2960_v52  ;;  %v3001_v52 = vld [vmem:[#allocation2] sm:$0xff] }
 0x294   : > { %v3212_v31 = vadd.f32 %v3211_v23, %v3210_v49  ;;  %v3153_v36 = vadd.f32 %v3152_v30, %v3151_v33  ;;  %v3144_v49 = vadd.f32 %v3143_v7, %v3142_v29 }
 0x295   : > { %v3207_v62 = vadd.f32 %v3206_v5, %v3205_v39  ;;  %v3163_v47 = vsel %vm530_vm9, %v3034_v24, 0.0 }
 0x296   : > { %v3214_v27 = vadd.f32 %v3213_v20, %v3212_v31  ;;  %v3154_v1 = vrot.slane %v3153_v36, 2  ;;  %v3164_v40 = vadd.f32 %v3163_v47, %v3162_v19  ;;  %v3300_v45 = vsel %vm3299_vm8, %v3144_v49, %v6559_v9 }
 0x297   : > { %v3208_v3 = vrot.slane %v3207_v62, 1 }
 0x298   : > { %v3216_v51 = vadd.f32 %v3215_v59, %v3214_v27  ;;  %v3155_v12 = vadd.f32 %v3154_v1, %v3153_v36  ;;  %v3165_v13 = vrot.slane %v3164_v40, 4 }
 0x299   : > { %v3209_v60 = vadd.f32 %v3208_v3, %v3207_v62 }
 0x29a   : > { %v4057_v6 = vpop.f32.mrf.mxu1  ;;  %v3217_v50 = vrot.slane %v3216_v51, 4  ;;  %v3166_v21 = vadd.f32 %v3165_v13, %v3164_v40  ;;  %v3156_v54 = vrot.slane %v3155_v12, 1 }
 0x29b   : > { %v3306_v61 = vsel %vm3293_vm5, %v3209_v60, %v6533_v8  ;;  %v2569_v10 = vadd.f32 %v4057_v6, %v6210_v38 }
 0x29c   : > { %v2560_v46 = vpop.f32.mrf.mxu1  ;;  %v3218_v57 = vadd.f32 %v3217_v50, %v3216_v51  ;;  %v3167_v25 = vrot.slane %v3166_v21, 2  ;;  %v3157_v16 = vadd.f32 %v3156_v54, %v3155_v12 }
 0x29d   : > { %v2561_v39 = vadd.f32 %v6210_v38, %v2560_v46  ;;  %v2979_v0 = vmul.f32 %v6449_v35, %v2569_v10 }
 0x29e   : > { %v4058_v34 = vpop.f32.mrf.mxu1  ;;  %v3219_v32 = vrot.slane %v3218_v57, 2  ;;  %v3168_v33 = vadd.f32 %v3167_v25, %v3166_v21  ;;  %v3302_v19 = vsel %vm3301_vm10, %v3157_v16, %v3300_v45  ;;  %v2924_v16 = vpop.permute.xlu0 %2923 }
 0x29f   : > { %v2977_v17 = vmul.f32 %v6361_v18, %v2561_v39  ;;  %v2572_v8 = vadd.f32 %v4058_v34, %v6210_v38  ;;  %v3053_v30 = vmul.f32 %v6234_v4, %v2979_v0 }
 0x2a0   : > { %v2563_v5 = vpop.f32.mrf.mxu1  ;;  %v3220_v55 = vadd.f32 %v3219_v32, %v3218_v57  ;;  %v3169_v20 = vrot.slane %v3168_v33, 1 }
 0x2a1   : > { %v2564_v42 = vadd.f32 %v6210_v38, %v2563_v5  ;;  %v3051_v23 = vmul.f32 %v6228_v58, %v2977_v17  ;;  %v2980_v48 = vmul.f32 %v6544_v43, %v2572_v8  ;;  %v3226_v59 = vsel %vm530_vm9, %v3053_v30, 0.0 }
 0x2a2   : > { %v3221_v62 = vrot.slane %v3220_v55, 1  ;;  %v3170_v3 = vadd.f32 %v3169_v20, %v3168_v33 }
 0x2a3   : > { %v2978_v18 = vmul.f32 %v6363_v22, %v2564_v42  ;;  %v3223_v43 = vsel %vm530_vm9, %v3051_v23, 0.0  ;;  %v3054_v22 = vmul.f32 %v6293_v53, %v2980_v48 }
 0x2a4   : > { %v3222_v31 = vadd.f32 %v3221_v62, %v3220_v55  ;;  %v3304_v36 = vsel %vm3303_vm11, %v3170_v3, %v3302_v19  ;;  %v2909_v3 = vpop.permute.xlu0 %2908 }
 0x2a5   : > { %v3052_v35 = vmul.f32 %v6238_v15, %v2978_v18  ;;  %v3314_v60 = vadd.f32 %v3304_v36, %v3001_v52  ;;  %v3228_v9 = vsel %vm530_vm9, %v3054_v22, 0.0 }
 0x2a6   : > { %v3307_v56 = vsel %vm3295_vm6, %v3222_v31, %v3306_v61 }
 0x2a7   : > { %v3224_v27 = vsel %vm530_vm9, %v3052_v35, 0.0  ;;  %3316 = vst.msk [vmem:[#allocation2] sm:$0xff] %vm530_vm9, %v3314_v60 }
 0x2a8   : > { %v3225_v24 = vadd.f32 %v3224_v27, %v3223_v43  ;;  %v4421_v43 = vld [vmem:[%s6696_s7] ss:$0 sm:$0xff] }
 0x2aa   : > { %v3227_v51 = vadd.f32 %v3226_v59, %v3225_v24 }
 0x2ac   : > { %v3229_v1 = vadd.f32 %v3228_v9, %v3227_v51 }
 0x2ae   : > { %v3230_v47 = vrot.slane %v3229_v1, 4  ;;  %v3321_v29 = vld [vmem:[#allocation2] sm:$0xff] }
 0x2af   : > { %4079 = vmatprep.mubr.msk.f32.mxu0 %vm530_vm9, %v3321_v29 }
 0x2b0   : > { %v3231_v61 = vadd.f32 %v3230_v47, %v3229_v1  ;;  %v4061_v6 = vpop.f32.mrf.mxu1 }
 0x2b1   : > { %v2585_v12 = vadd.f32 %v4061_v6, %v6210_v38 }
 0x2b2   : > { %v3232_v40 = vrot.slane %v3231_v61, 2  ;;  %v2576_v50 = vpop.f32.mrf.mxu1 }
 0x2b3   : > { %v2577_v46 = vadd.f32 %v6210_v38, %v2576_v50  ;;  %v2983_v21 = vmul.f32 %v6508_v44, %v2585_v12 }
 0x2b4   : > { %v3233_v13 = vadd.f32 %v3232_v40, %v3231_v61  ;;  %v4062_v57 = vpop.f32.mrf.mxu1 }
 0x2b5   : > { %v2981_v39 = vmul.f32 %v6394_v26, %v2577_v46  ;;  %v2588_v10 = vadd.f32 %v4062_v57, %v6210_v38  ;;  %v3057_v55 = vmul.f32 %v6234_v4, %v2983_v21 }
 0x2b6   : > { %v3234_v34 = vrot.slane %v3233_v13, 1  ;;  %v2579_v7 = vpop.f32.mrf.mxu1 }
 0x2b7   : > { %v2580_v32 = vadd.f32 %v6210_v38, %v2579_v7  ;;  %v3055_v17 = vmul.f32 %v6228_v58, %v2981_v39  ;;  %v2984_v8 = vmul.f32 %v6568_v14, %v2588_v10  ;;  %v3239_v33 = vsel %vm530_vm9, %v3057_v55, 0.0 }
 0x2b8   : > { %v3235_v54 = vadd.f32 %v3234_v34, %v3233_v13 }
 0x2b9   : > { %v2982_v5 = vmul.f32 %v6401_v41, %v2580_v32  ;;  %v3236_v0 = vsel %vm530_vm9, %v3055_v17, 0.0  ;;  %v3058_v42 = vmul.f32 %v6293_v53, %v2984_v8  ;;  %v2928_v32 = vpop.permute.xlu1 %2927 }
 0x2ba   : > { %v3308_v25 = vsel %vm3297_vm7, %v3235_v54, %v3307_v56 }
 0x2bb   : > { %v3056_v26 = vmul.f32 %v6238_v15, %v2982_v5  ;;  %v3241_v41 = vsel %vm530_vm9, %v3058_v42, 0.0 }
 0x2bd   : > { %v3237_v44 = vsel %vm530_vm9, %v3056_v26, 0.0  ;;  %v4065_v62 = vpop.f32.mrf.mxu1 }
 0x2be   : > { %v3238_v49 = vadd.f32 %v3237_v44, %v3236_v0  ;;  %v2601_v18 = vadd.f32 %v4065_v62, %v6210_v38 }
 0x2bf   : > { %v2592_v23 = vpop.f32.mrf.mxu1 }
 0x2c0   : > { %v3240_v14 = vadd.f32 %v3239_v33, %v3238_v49  ;;  %v2593_v20 = vadd.f32 %v6210_v38, %v2592_v23  ;;  %v2987_v19 = vmul.f32 %v6552_v2, %v2601_v18 }
 0x2c1   : > { %v4066_v31 = vpop.f32.mrf.mxu1 }
 0x2c2   : > { %v3242_v48 = vadd.f32 %v3241_v41, %v3240_v14  ;;  %v2985_v35 = vmul.f32 %v6452_v28, %v2593_v20  ;;  %v2604_v45 = vadd.f32 %v4066_v31, %v6210_v38  ;;  %v3061_v28 = vmul.f32 %v6234_v4, %v2987_v19 }
 0x2c3   : > { %v2595_v52 = vpop.f32.mrf.mxu1 }
 0x2c4   : > { %v3243_v30 = vrot.slane %v3242_v48, 4  ;;  %v2596_v22 = vadd.f32 %v4421_v43, %v2595_v52  ;;  %v3059_v36 = vmul.f32 %v6228_v58, %v2985_v35  ;;  %v2988_v60 = vmul.f32 %v2909_v3, %v2604_v45  ;;  %v3447_v3 = vld [vmem:[%s6699_s10] sm:$0xff] }
 0x2c5   : > { %v3252_v6 = vsel %vm530_vm9, %v3061_v28, 0.0  ;;  %4088 = vmatprep.subr.mxu1 %v3447_v3 }
 0x2c6   : > { %v3244_v56 = vadd.f32 %v3243_v30, %v3242_v48  ;;  %v2986_v24 = vmul.f32 %v6464_v63, %v2596_v22  ;;  %v3249_v9 = vsel %vm530_vm9, %v3059_v36, 0.0  ;;  %v3062_v1 = vmul.f32 %v6293_v53, %v2988_v60  ;;  %v3002_v30 = vld [vmem:[#allocation2 + $0x8] sm:$0xff]  ;;  %4089 = vmatpush3.msra.mxu1 %v3447_v3 }
 0x2c8   : > { %v3245_v27 = vrot.slane %v3244_v56, 2  ;;  %v3060_v38 = vmul.f32 %v6238_v15, %v2986_v24  ;;  %v3254_v50 = vsel %vm530_vm9, %v3062_v1, 0.0 }
 0x2ca   : > { %v3246_v59 = vadd.f32 %v3245_v27, %v3244_v56  ;;  %v3250_v2 = vsel %vm530_vm9, %v3060_v38, 0.0  ;;  %v3838_v56 = vld [vmem:[%s6698_s9] ss:$0 sm:$0xff] }
 0x2cb   : > { %v3251_v47 = vadd.f32 %v3250_v2, %v3249_v9 }
 0x2cc   : > { %v3247_v51 = vrot.slane %v3246_v59, 1  ;;  %v4069_v29 = vpop.f32.mrf.mxu1 }
 0x2cd   : > { %v3253_v40 = vadd.f32 %v3252_v6, %v3251_v47  ;;  %v2617_v13 = vadd.f32 %v4421_v43, %v4069_v29 }
 0x2ce   : > { %v3248_v61 = vadd.f32 %v3247_v51, %v3246_v59  ;;  %v2608_v12 = vpop.f32.mrf.mxu1 }
 0x2cf   : > { %v3255_v46 = vadd.f32 %v3254_v50, %v3253_v40  ;;  %v2609_v57 = vadd.f32 %v4421_v43, %v2608_v12  ;;  %v2991_v17 = vmul.f32 %v2924_v16, %v2617_v13 }
 0x2d0   : > { %v3309_v63 = vsel %vm3299_vm8, %v3248_v61, %v3308_v25  ;;  %v4070_v39 = vpop.f32.mrf.mxu1 }
 0x2d1   : > { %v3256_v10 = vrot.slane %v3255_v46, 4  ;;  %v2989_v34 = vmul.f32 %v6513_v37, %v2609_v57  ;;  %v2620_v7 = vadd.f32 %v4421_v43, %v4070_v39  ;;  %v3065_v42 = vmul.f32 %v6234_v4, %v2991_v17 }
 0x2d2   : > { %v2611_v21 = vpop.f32.mrf.mxu1 }
 0x2d3   : > { %v3257_v54 = vadd.f32 %v3256_v10, %v3255_v46  ;;  %v2612_v8 = vadd.f32 %v4421_v43, %v2611_v21  ;;  %v3063_v55 = vmul.f32 %v6228_v58, %v2989_v34  ;;  %v2992_v26 = vmul.f32 %v2928_v32, %v2620_v7 }
 0x2d4   : > { %v3265_v41 = vsel %vm530_vm9, %v3065_v42, 0.0  ;;  %v3540_v42 = vld [vmem:[%s490_s17 + $0x8] sm:$0xff] }
 0x2d5   : > { %v3258_v5 = vrot.slane %v3257_v54, 2  ;;  %v2990_v25 = vmul.f32 %v6526_v11, %v2612_v8  ;;  %v3262_v37 = vsel %vm530_vm9, %v3063_v55, 0.0  ;;  %v3066_v62 = vmul.f32 %v6293_v53, %v2992_v26 }
 0x2d7   : > { %v3259_v0 = vadd.f32 %v3258_v5, %v3257_v54  ;;  %v3064_v44 = vmul.f32 %v6238_v15, %v2990_v25  ;;  %v3267_v23 = vsel %vm530_vm9, %v3066_v62, 0.0  ;;  %v3843_v5 = vld [vmem:[%s6700_s11] ss:$0 sm:$0xff] }
 0x2d9   : > { %v3260_v49 = vrot.slane %v3259_v0, 1  ;;  %v3263_v33 = vsel %vm530_vm9, %v3064_v44, 0.0 }
 0x2da   : > { %v3264_v16 = vadd.f32 %v3263_v33, %v3262_v37 }
 0x2db   : > { %v3261_v14 = vadd.f32 %v3260_v49, %v3259_v0  ;;  %v3539_v0 = vld [vmem:[%s490_s17] sm:$0xff] }
 0x2dc   : > { %v3266_v58 = vadd.f32 %v3265_v41, %v3264_v16 }
 0x2dd   : > { %v3310_v11 = vsel %vm3301_vm10, %v3261_v14, %v3309_v63 }
 0x2de   : > { %v3268_v48 = vadd.f32 %v3267_v23, %v3266_v58 }
 0x2e0   : > { %v3269_v4 = vrot.slane %v3268_v48, 4 }
 0x2e2   : > { %v3270_v18 = vadd.f32 %v3269_v4, %v3268_v48 }
 0x2e4   : > { %v3271_v15 = vrot.slane %v3270_v18, 2 }
 0x2e6   : > { %v3272_v20 = vadd.f32 %v3271_v15, %v3270_v18 }
 0x2e8   : > { %v3273_v31 = vrot.slane %v3272_v20, 1 }
 0x2ea   : > { %v3274_v35 = vadd.f32 %v3273_v31, %v3272_v20 }
 0x2ec   : > { %v3311_v45 = vsel %vm3303_vm11, %v3274_v35, %v3310_v11 }
 0x2ed   : > { %v3315_v53 = vadd.f32 %v3311_v45, %v3002_v30 }
 0x2ef   : > { %3317 = vst.msk [vmem:[#allocation2 + $0x8] sm:$0xff] %vm530_vm9, %v3315_v53 }
 0x2f6   : > { %v3322_v52 = vld [vmem:[#allocation2 + $0x8] sm:$0xff] }
 0x2f7   : > { %4080 = vmatmul.mubr.msk.f32.vlgmr.msra.gmra.mxu0 %vm530_vm9, %v3322_v52 }
 0x3b7   : > { %v4081_v19 = vpop.f32.mrf.mxu0 }
 0x3b8   : > { %v3412_v43 = vadd.f32 %v4081_v19, %v3838_v56 }
 0x3b9   : > { %v3406_v22 = vpop.f32.mrf.mxu0 }
 0x3ba   : > { %v3418_v27 = vand.u32 2147483647, %v3412_v43  ;;  %v3407_v36 = vadd.f32 %v3838_v56, %v3406_v22  ;;  %v3416_v57 = vmax.f32 %v3412_v43, 0.0 }
 0x3bc   : > { %v3420_v24 = vsub.f32 0.0, %v3418_v27  ;;  %v3417_v60 = vand.u32 2147483647, %v3407_v36  ;;  %v3415_v7 = vmax.f32 %v3407_v36, 0.0 }
 0x3be   : > { %v3423_v59 = vmul.f32 1.442695, %v3420_v24  ;;  %v3419_v28 = vsub.f32 0.0, %v3417_v60 }
 0x3c0   : > { %4409 = vpow2.f32 %v3423_v59  ;;  %v3421_v38 = vmul.f32 1.442695, %v3419_v28 }
 0x3c2   : > { %4411 = vpow2.f32 %v3421_v38 }
 0x3cd   : > { %v4410_v51 = vpop.eup %4409 }
 0x3ce   : > { %v3434_v9 = vadd.f32 1.0, %v4410_v51  ;;  %v3437_v47 = vmul.f32 -0.5, %v4410_v51  ;;  %v3440_v29 = vand.u32 2147483647, %v4410_v51 }
 0x3cf   : > { %v4412_v2 = vpop.eup %4411 }
 0x3d0   : > { %4413 = vlog2.f32 %v3434_v9  ;;  %v3425_v1 = vadd.f32 1.0, %v4412_v2  ;;  %v3428_v61 = vmul.f32 -0.5, %v4412_v2  ;;  %v3438_v6 = vadd.f32 1.0, %v3437_v47 }
 0x3d1   : > { %v3431_v50 = vand.u32 2147483647, %v4412_v2  ;;  %vm3441_vm12 = vcmp.lt.f32.partialorder %v3440_v29, 0.0004427343 }
 0x3d2   : > { %4415 = vlog2.f32 %v3425_v1  ;;  %v3429_v40 = vadd.f32 1.0, %v3428_v61  ;;  %v3439_v46 = vmul.f32 %v4410_v51, %v3438_v6 }
 0x3d3   : > { %vm3432_vm13 = vcmp.lt.f32.partialorder %v3431_v50, 0.0004427343 }
 0x3d4   : > { %v3430_v34 = vmul.f32 %v4412_v2, %v3429_v40 }
 0x3dd   : > { %v4414_v63 = vpop.eup %4413 }
 0x3de   : > { %v3436_v12 = vmul.f32 0.6931472, %v4414_v63 }
 0x3df   : > { %v4416_v13 = vpop.eup %4415 }
 0x3e0   : > { %v3442_v39 = vsel %vm3441_vm12, %v3439_v46, %v3436_v12  ;;  %v3427_v10 = vmul.f32 0.6931472, %v4416_v13 }
 0x3e1   : > { %v3444_v21 = vadd.f32 %v3442_v39, %v3416_v57 }
 0x3e2   : > { %v3433_v32 = vsel %vm3432_vm13, %v3430_v34, %v3427_v10 }
 0x3e3   : > { %v3443_v54 = vadd.f32 %v3433_v32, %v3415_v7  ;;  %v3842_v8 = vadd.f32 -0.6931472, %v3444_v21 }
 0x3e5   : > { %v3841_v17 = vadd.f32 -0.6931472, %v3443_v54 }
 0x3e7   : > { %4090 = vmatprep.mubr.msk.f32.mxu1 %vm530_vm9, %v3841_v17 }
 0x3e8   : > { %4091 = vmatmul.mubr.msk.f32.vlgmr.msra.gmra.mxu1 %vm530_vm9, %v3842_v8 }
 0x4a8   : > { %v4092_v55 = vpop.f32.mrf.mxu1 }
 0x4a9   : > { %v3536_v25 = vadd.f32 %v4092_v55, %v3843_v5 }
 0x4aa   : > { %v3530_v26 = vpop.f32.mrf.mxu1 }
 0x4ab   : > { %v3531_v44 = vadd.f32 %v3843_v5, %v3530_v26  ;;  %v3542_v37 = vadd.f32 %v3540_v42, %v3536_v25 }
 0x4ad   : > { %v3541_v49 = vadd.f32 %v3539_v0, %v3531_v44  ;;  %3544 = vst.msk [vmem:[%s523_s20 + $0x8] sm:$0xff] %vm530_vm9, %v3542_v37 }
 0x4af   : > { %3543 = vst.msk [vmem:[%s523_s20] sm:$0xff] %vm530_vm9, %v3541_v49 }
 0x4b0 PF: > { %s22_s23 = sadd.s32 1, %s4444_s23   ;;  %s6892_s21 = smov %s4440_s22 }
 0x4b1   : > { %p19_p6 = scmp.ge.s32.totalorder %s22_s23, 4   ;;  %s6893_s22 = smov %s6895_s24 }
 0x4b3   :  { %21 = sbr.rel (!%p19_p6) target bundleno = 2 (0x2), region = 115 }

// kernel: schnet_forward.5
= control target key start
LH: loop header
LB: loop body
LE: loop exit
PB: predicated region body
PF: predicated region fallthrough
CT: control target
= control target key end

     0   :  { %s4720_s29 = smov 0   ;;  %s4722_s30 = smov 0   ;;  %s6915_s0 = inlined_call_operand.vmem [shape: f32[32,32], index: 0, kind: input, shape index: {}]   ;;  %s6916_s1 = inlined_call_operand.vmem [shape: bf16[32,32], index: 1, kind: input, shape index: {}]   ;;  %s6917_s2 = inlined_call_operand.vmem [shape: bf16[32,32,16], index: 2, kind: input, shape index: {}]   ;;  %s6918_s3 = inlined_call_operand.vmem [shape: f32[32,32], index: 3, kind: input, shape index: {}]   ;;  %s6919_s4 = inlined_call_operand.vmem [shape: bf16[16,32], index: 4, kind: input, shape index: {}]   ;;  %s6920_s5 = inlined_call_operand.vmem [shape: f32[1,32], index: 5, kind: input, shape index: {}]   ;;  %s6921_s6 = inlined_call_operand.vmem [shape: bf16[32,32], index: 6, kind: input, shape index: {}]   ;;  %s6922_s7 = inlined_call_operand.vmem [shape: f32[1,32], index: 7, kind: input, shape index: {}]   ;;  %s6923_s8 = inlined_call_operand.vmem [shape: f32[32,32], index: 8, kind: input, shape index: {}]   ;;  %s6924_s9 = inlined_call_operand.vmem [shape: f32[1,32], index: 9, kind: input, shape index: {}]   ;;  %s6925_s10 = inlined_call_operand.vmem [shape: f32[32,32], index: 10, kind: input, shape index: {}]   ;;  %s6926_s11 = inlined_call_operand.vmem [shape: f32[1,32], index: 11, kind: input, shape index: {}]   ;;  %s6927_s12 = inlined_call_operand.vmem [shape: bf16[32,32], index: 12, kind: input, shape index: {}]   ;;  %s6928_s13 = inlined_call_operand.vmem [shape: f32[32,32], index: 13, kind: output, shape index: {0}]   ;;  %s6929_s14 = inlined_call_operand.vmem [shape: bf16[32,32], index: 14, kind: output, shape index: {1}]  }
   0x1   :  { %s4724_s15 = smov 0  }
   0x2 LB: > { %s37_s16 = sadd.s32 1, %s4637_s30  ;;  %p3837_p0 = scmp.ge.s32.totalorder %s4641_s15, 1  ;;  %s4641_s15 = sphi %s4724_s15, %s25_s15   ;;  %s4637_s30 = sphi %s4722_s30, %s7121_s30   ;;  %s4633_s29 = sphi %s4720_s29, %s7120_s29  }
   0x3   : > { %p39_p1 = scmp.ge.s32.totalorder %s37_s16, 2  ;;  %p474_p2 = scmp.lt.s32.totalorder %s4641_s15, 3 }
   0x5   : > { %s7123_s16 = smov (%p39_p1, %s37_s16), 0  ;;  %p475_p3 = pnand %p3837_p0, %p474_p2 }
   0x7   : > { %478 = sbr.rel (%p475_p3) target bundleno = 1401 (0x579), region = 72 }
   0xc   : > { %v4313_v0 = vld [vmem:[%s6919_s4] sm:$0xff]   ;;  %s3840_s19 = sshll.u32 %s4633_s29, 4  ;;  %vm840_vm0 = vcmask 130048   ;;  %v4346_v33 = vld [vmem:[%s6921_s6 + $0x8] sm:$0xff]  }
   0xd   : > { %p562_p4 = scmp.lt.s32.totalorder %s3840_s19, 31  ;;  %4123 = vmatprep.subr.bf16.mxu0 %v4313_v0  ;;  %4189 = vmatprep.subr.bf16.mxu1 %v4346_v33  ;;  %v4347_v34 = vld [vmem:[%s6921_s6] sm:$0xff]  }
   0xe   : > { %4124 = vmatpush3.bf16.msra.mxu0 %v4313_v0  ;;  %4190 = vmatpush3.bf16.msra.mxu1 %v4346_v33  ;;  %v4822_v35 = vld [vmem:[%s6920_s5] ss:$0 sm:$0xff] }
   0xf   : > { %s7125_s19 = smov (!%p562_p4, %s3840_s19), 31  ;;  %4191 = vmatprep.subr.bf16.mxu1 %v4347_v34 }
  0x10   : > { %s4029_s20 = sshll.u32 %s7125_s19, 4 }
  0x11   : > { %s4747_s23 = scalar_lea.vmem %s6917_s2, %s4029_s20  ;;  %s3838_s20 = sshll.u32 %s4633_s29, 1 }
  0x12   : > { %v4314_v1 = vld [vmem:[%s4747_s23] sm:$0xff]   ;;  %v4315_v2 = vld [vmem:[%s4747_s23 + $0x8] sm:$0xff]   ;;  %v4316_v3 = vld [vmem:[%s4747_s23 + $0x10] sm:$0xff]   ;;  %4192 = vmatpush3.bf16.msra.mxu1 %v4347_v34  ;;  %p5435_p5 = scmp.lt.s32.totalorder %s3838_s20, 3 }
  0x13   : > { %4125 = vmatprep.mubr.msk.bf16.mxu0 %vm840_vm0, %v4314_v1  ;;  %v4317_v4 = vld [vmem:[%s4747_s23 + $0x18] sm:$0xff]   ;;  %v4318_v5 = vld [vmem:[%s4747_s23 + $0x20] sm:$0xff]   ;;  %v4319_v6 = vld [vmem:[%s4747_s23 + $0x28] sm:$0xff]  }
  0x14   : > { %4126 = vmatmul.mubr.msk.bf16.vlgmr.msra.gmra.mxu0 %vm840_vm0, %v4315_v2  ;;  %v4320_v7 = vld [vmem:[%s4747_s23 + $0x30] sm:$0xff]   ;;  %v4321_v8 = vld [vmem:[%s4747_s23 + $0x38] sm:$0xff]   ;;  %v4322_v9 = vld [vmem:[%s4747_s23 + $0x40] sm:$0xff]   ;;  %s7127_s20 = smov (!%p5435_p5, %s3838_s20), 3 }
  0x15   : > { %4129 = vmatprep.mubr.msk.bf16.mxu0 %vm840_vm0, %v4316_v3  ;;  %v4323_v10 = vld [vmem:[%s4747_s23 + $0x48] sm:$0xff]   ;;  %v4324_v11 = vld [vmem:[%s4747_s23 + $0x50] sm:$0xff]   ;;  %v4325_v12 = vld [vmem:[%s4747_s23 + $0x58] sm:$0xff]   ;;  %s5480_s29 = sshll.u32 %s7127_s20, 3  ;;  %s3848_s21 = sshll.u32 %s7127_s20, 2 }
  0x16   : > { %v4326_v13 = vld [vmem:[%s4747_s23 + $0x60] sm:$0xff]   ;;  %v4327_v14 = vld [vmem:[%s4747_s23 + $0x68] sm:$0xff]   ;;  %v4328_v15 = vld [vmem:[%s4747_s23 + $0x70] sm:$0xff]   ;;  %s5508_s24 = scalar_lea.vmem %s6918_s3, %s5480_s29  ;;  %s552_s28 = scalar_lea.vmem %s6915_s0, %s5480_s29 }
  0x17   : > { %v4329_v16 = vld [vmem:[%s4747_s23 + $0x78] sm:$0xff]   ;;  %v4330_v17 = vld [vmem:[%s4747_s23 + $0x80] sm:$0xff]   ;;  %v4331_v18 = vld [vmem:[%s4747_s23 + $0x88] sm:$0xff]   ;;  %s585_s19 = scalar_lea.vmem %s6928_s13, %s5480_s29 }
  0x18   : > { %v4332_v19 = vld [vmem:[%s4747_s23 + $0x90] sm:$0xff]   ;;  %v4333_v20 = vld [vmem:[%s4747_s23 + $0x98] sm:$0xff]   ;;  %v4334_v21 = vld [vmem:[%s4747_s23 + $0xa0] sm:$0xff]  }
  0x19   : > { %v4335_v22 = vld [vmem:[%s4747_s23 + $0xa8] sm:$0xff]   ;;  %v4336_v23 = vld [vmem:[%s4747_s23 + $0xb0] sm:$0xff]   ;;  %v4337_v24 = vld [vmem:[%s4747_s23 + $0xb8] sm:$0xff]  }
  0x1a   : > { %v4338_v25 = vld [vmem:[%s4747_s23 + $0xc0] sm:$0xff]   ;;  %v4339_v26 = vld [vmem:[%s4747_s23 + $0xc8] sm:$0xff]   ;;  %v4340_v27 = vld [vmem:[%s4747_s23 + $0xd0] sm:$0xff]  }
  0x1b   : > { %v4341_v28 = vld [vmem:[%s4747_s23 + $0xd8] sm:$0xff]   ;;  %v4342_v29 = vld [vmem:[%s4747_s23 + $0xe0] sm:$0xff]   ;;  %v4343_v30 = vld [vmem:[%s4747_s23 + $0xe8] sm:$0xff]  }
  0x1c   : > { %4130 = vmatmul.mubr.msk.bf16.gmra.mxu0 %vm840_vm0, %v4317_v4  ;;  %v4344_v31 = vld [vmem:[%s4747_s23 + $0xf0] sm:$0xff]   ;;  %v4345_v32 = vld [vmem:[%s4747_s23 + $0xf8] sm:$0xff]  }
  0x1d   : > { %4133 = vmatprep.mubr.msk.bf16.mxu0 %vm840_vm0, %v4318_v5 }
  0x24   : > { %4134 = vmatmul.mubr.msk.bf16.gmra.mxu0 %vm840_vm0, %v4319_v6 }
  0x25   : > { %4137 = vmatprep.mubr.msk.bf16.mxu0 %vm840_vm0, %v4320_v7 }
  0x2c   : > { %4138 = vmatmul.mubr.msk.bf16.gmra.mxu0 %vm840_vm0, %v4321_v8 }
  0x2d   : > { %4141 = vmatprep.mubr.msk.bf16.mxu0 %vm840_vm0, %v4322_v9 }
  0x34   : > { %4142 = vmatmul.mubr.msk.bf16.gmra.mxu0 %vm840_vm0, %v4323_v10 }
  0x35   : > { %4145 = vmatprep.mubr.msk.bf16.mxu0 %vm840_vm0, %v4324_v11 }
  0x3c   : > { %4146 = vmatmul.mubr.msk.bf16.gmra.mxu0 %vm840_vm0, %v4325_v12 }
  0x3d   : > { %4149 = vmatprep.mubr.msk.bf16.mxu0 %vm840_vm0, %v4326_v13 }
  0x44   : > { %4150 = vmatmul.mubr.msk.bf16.gmra.mxu0 %vm840_vm0, %v4327_v14 }
  0x45   : > { %4153 = vmatprep.mubr.msk.bf16.mxu0 %vm840_vm0, %v4328_v15 }
  0x4c   : > { %4154 = vmatmul.mubr.msk.bf16.gmra.mxu0 %vm840_vm0, %v4329_v16 }
  0x4d   : > { %4157 = vmatprep.mubr.msk.bf16.mxu0 %vm840_vm0, %v4330_v17 }
  0x54   : > { %4158 = vmatmul.mubr.msk.bf16.gmra.mxu0 %vm840_vm0, %v4331_v18 }
  0x55   : > { %4161 = vmatprep.mubr.msk.bf16.mxu0 %vm840_vm0, %v4332_v19 }
  0x5c   : > { %4162 = vmatmul.mubr.msk.bf16.gmra.mxu0 %vm840_vm0, %v4333_v20 }
  0x5d   : > { %4165 = vmatprep.mubr.msk.bf16.mxu0 %vm840_vm0, %v4334_v21 }
  0x64   : > { %4166 = vmatmul.mubr.msk.bf16.gmra.mxu0 %vm840_vm0, %v4335_v22 }
  0x65   : > { %4169 = vmatprep.mubr.msk.bf16.mxu0 %vm840_vm0, %v4336_v23 }
  0x6c   : > { %4170 = vmatmul.mubr.msk.bf16.gmra.mxu0 %vm840_vm0, %v4337_v24 }
  0x6d   : > { %4173 = vmatprep.mubr.msk.bf16.mxu0 %vm840_vm0, %v4338_v25 }
  0x74   : > { %4174 = vmatmul.mubr.msk.bf16.gmra.mxu0 %vm840_vm0, %v4339_v26 }
  0x75   : > { %4177 = vmatprep.mubr.msk.bf16.mxu0 %vm840_vm0, %v4340_v27 }
  0x7c   : > { %4178 = vmatmul.mubr.msk.bf16.gmra.mxu0 %vm840_vm0, %v4341_v28 }
  0x7d   : > { %4181 = vmatprep.mubr.msk.bf16.mxu0 %vm840_vm0, %v4342_v29 }
  0x84   : > { %4182 = vmatmul.mubr.msk.bf16.gmra.mxu0 %vm840_vm0, %v4343_v30 }
  0x85   : > { %4185 = vmatprep.mubr.msk.bf16.mxu0 %vm840_vm0, %v4344_v31 }
  0x8c   : > { %4186 = vmatmul.mubr.msk.bf16.gmra.mxu0 %vm840_vm0, %v4345_v32 }
  0xd4   : > { %v4127_v36 = vpop.f32.mrf.mxu0 }
  0xd5   : > { %v4825_v37 = vadd.f32 %v4127_v36, %v4822_v35 }
  0xd6   : > { %v971_v38 = vpop.f32.mrf.mxu0 }
  0xd7   : > { %v1292_v39 = vand.u32 2147483647, %v4825_v37  ;;  %v4852_v4 = vadd.f32 %v4822_v35, %v971_v38 }
  0xd8   : > { %v4128_v40 = vpop.f32.mrf.mxu0 }
  0xd9   : > { %v1356_v41 = vsub.f32 0.0, %v1292_v39  ;;  %v4829_v42 = vadd.f32 %v4128_v40, %v4822_v35  ;;  %v1290_v16 = vand.u32 2147483647, %v4852_v4 }
  0xda   : > { %v974_v43 = vpop.f32.mrf.mxu0 }
  0xdb   : > { %v1422_v44 = vmul.f32 1.442695, %v1356_v41  ;;  %v1293_v45 = vand.u32 2147483647, %v4829_v42  ;;  %v4866_v17 = vadd.f32 %v4822_v35, %v974_v43  ;;  %v1354_v27 = vsub.f32 0.0, %v1290_v16 }
  0xdc   : > { %v4131_v46 = vpop.f32.mrf.mxu0 }
  0xdd   : > { %4350 = vpow2.f32 %v1422_v44  ;;  %v1357_v47 = vsub.f32 0.0, %v1293_v45  ;;  %v4833_v48 = vadd.f32 %v4131_v46, %v4822_v35  ;;  %v1291_v29 = vand.u32 2147483647, %v4866_v17 }
  0xde   : > { %v987_v49 = vpop.f32.mrf.mxu0  ;;  %v1418_v39 = vmul.f32 1.442695, %v1354_v27 }
  0xdf   : > { %v1424_v50 = vmul.f32 1.442695, %v1357_v47  ;;  %v1296_v51 = vand.u32 2147483647, %v4833_v48  ;;  %v4837_v52 = vadd.f32 %v4822_v35, %v987_v49  ;;  %v1355_v41 = vsub.f32 0.0, %v1291_v29 }
  0xe0   : > { %v4132_v53 = vpop.f32.mrf.mxu0 }
  0xe1   : > { %4352 = vpow2.f32 %v1424_v50  ;;  %v1360_v54 = vsub.f32 0.0, %v1296_v51  ;;  %v4840_v55 = vadd.f32 %v4132_v53, %v4822_v35  ;;  %v1294_v56 = vand.u32 2147483647, %v4837_v52 }
  0xe2   : > { %v990_v57 = vpop.f32.mrf.mxu0  ;;  %v1228_v50 = vmax.f32 %v4825_v37, 0.0 }
  0xe3   : > { %v1430_v58 = vmul.f32 1.442695, %v1360_v54  ;;  %v1297_v59 = vand.u32 2147483647, %v4840_v55  ;;  %v4845_v60 = vadd.f32 %v4822_v35, %v990_v57  ;;  %v1358_v61 = vsub.f32 0.0, %v1294_v56 }
  0xe4   : > { %v4135_v62 = vpop.f32.mrf.mxu0  ;;  %v1420_v56 = vmul.f32 1.442695, %v1355_v41 }
  0xe5   : > { %4354 = vpow2.f32 %v1430_v58  ;;  %v1361_v63 = vsub.f32 0.0, %v1297_v59  ;;  %v1295_v0 = vand.u32 2147483647, %v4845_v60  ;;  %v1426_v1 = vmul.f32 1.442695, %v1358_v61 }
  0xe6   : > { %v4849_v2 = vadd.f32 %v4135_v62, %v4822_v35  ;;  %v1003_v3 = vpop.f32.mrf.mxu0  ;;  %v1229_v61 = vmax.f32 %v4829_v42, 0.0  ;;  %v1231_v16 = vmax.f32 %v4845_v60, 0.0 }
  0xe7   : > { %v1432_v5 = vmul.f32 1.442695, %v1361_v63  ;;  %v1359_v6 = vsub.f32 0.0, %v1295_v0  ;;  %v4855_v7 = vadd.f32 %v4822_v35, %v1003_v3  ;;  %4356 = vpow2.f32 %v1426_v1 }
  0xe8   : > { %v1300_v8 = vand.u32 2147483647, %v4849_v2  ;;  %v4136_v9 = vpop.f32.mrf.mxu0  ;;  %v1232_v63 = vmax.f32 %v4833_v48, 0.0  ;;  %v1230_v1 = vmax.f32 %v4837_v52, 0.0 }
  0xe9   : > { %v1428_v10 = vmul.f32 1.442695, %v1359_v6  ;;  %v1298_v11 = vand.u32 2147483647, %v4855_v7  ;;  %4358 = vpow2.f32 %v1432_v5  ;;  %v4862_v14 = vadd.f32 %v4136_v9, %v4822_v35 }
  0xea   : > { %v4859_v12 = vpop.eup %4350  ;;  %v1364_v13 = vsub.f32 0.0, %v1300_v8  ;;  %v1006_v15 = vpop.f32.mrf.mxu0 }
  0xeb   : > { %4360 = vpow2.f32 %v1428_v10  ;;  %v1362_v18 = vsub.f32 0.0, %v1298_v11  ;;  %v1301_v19 = vand.u32 2147483647, %v4862_v14  ;;  %v1564_v21 = vadd.f32 1.0, %v4859_v12 }
  0xec   : > { %v4139_v20 = vpop.f32.mrf.mxu0  ;;  %v4871_v22 = vadd.f32 %v4822_v35, %v1006_v15  ;;  %v1438_v24 = vmul.f32 1.442695, %v1364_v13  ;;  %v1567_v51 = vmul.f32 -0.5, %v4859_v12  ;;  %v1570_v6 = vand.u32 2147483647, %v4859_v12 }
  0xed   : > { %v1365_v25 = vsub.f32 0.0, %v1301_v19  ;;  %v4876_v26 = vadd.f32 %v4139_v20, %v4822_v35  ;;  %v1434_v30 = vmul.f32 1.442695, %v1362_v18  ;;  %4362 = vlog2.f32 %v1564_v21 }
  0xee   : > { %v4873_v23 = vpop.eup %4352  ;;  %v1299_v31 = vand.u32 2147483647, %v4871_v22  ;;  %v1019_v32 = vpop.f32.mrf.mxu0  ;;  %4364 = vpow2.f32 %v1438_v24  ;;  %v1568_v5 = vadd.f32 1.0, %v1567_v51  ;;  %v1233_v10 = vmax.f32 %v4840_v55, 0.0 }
  0xef   : > { %v1573_v28 = vadd.f32 1.0, %v4873_v23  ;;  %v1440_v33 = vmul.f32 1.442695, %v1365_v25  ;;  %v1304_v38 = vand.u32 2147483647, %v4876_v26  ;;  %v4885_v40 = vadd.f32 %v4822_v35, %v1019_v32 }
  0xf0   : > { %v1363_v36 = vsub.f32 0.0, %v1299_v31  ;;  %v4140_v58 = vpop.f32.mrf.mxu0  ;;  %v1576_v0 = vmul.f32 -0.5, %v4873_v23  ;;  %v1579_v15 = vand.u32 2147483647, %v4873_v23  ;;  %v1236_v18 = vmax.f32 %v4849_v2, 0.0 }
  0xf1   : > { %4366 = vlog2.f32 %v1573_v28  ;;  %v1368_v44 = vsub.f32 0.0, %v1304_v38  ;;  %v1302_v53 = vand.u32 2147483647, %v4885_v40  ;;  %v1234_v19 = vmax.f32 %v4855_v7, 0.0 }
  0xf2   : > { %v4881_v34 = vpop.eup %4354  ;;  %4368 = vpow2.f32 %v1434_v30  ;;  %v1436_v46 = vmul.f32 1.442695, %v1363_v36  ;;  %v4909_v13 = vpop.f32.mrf.mxu0  ;;  %v1577_v21 = vadd.f32 1.0, %v1576_v0  ;;  %v1237_v25 = vmax.f32 %v4862_v14, 0.0 }
  0xf3   : > { %v1600_v43 = vadd.f32 1.0, %v4881_v34  ;;  %4370 = vpow2.f32 %v1440_v33  ;;  %v1446_v57 = vmul.f32 1.442695, %v1368_v44  ;;  %v1366_v8 = vsub.f32 0.0, %v1302_v53 }
  0xf4   : > { %v4888_v45 = vpop.eup %4356  ;;  %4372 = vpow2.f32 %v1418_v39  ;;  %v1603_v9 = vmul.f32 -0.5, %v4881_v34  ;;  %v1569_v28 = vmul.f32 %v4859_v12, %v1568_v5  ;;  %vm4920_vm1 = vcmp.lt.f32.partialorder %v1570_v6, 0.0004427343  ;;  %v4927_v39 = vpop.f32.mrf.mxu0 }
  0xf5   : > { %v1582_v47 = vadd.f32 1.0, %v4888_v45  ;;  %4374 = vlog2.f32 %v1600_v43  ;;  %v1585_v24 = vmul.f32 -0.5, %v4888_v45  ;;  %v1442_v31 = vmul.f32 1.442695, %v1366_v8 }
  0xf6   : > { %v4891_v49 = vpop.eup %4358  ;;  %4376 = vpow2.f32 %v1436_v46  ;;  %v1604_v33 = vadd.f32 1.0, %v1603_v9  ;;  %v1606_v36 = vand.u32 2147483647, %v4881_v34  ;;  %vm4931_vm2 = vcmp.lt.f32.partialorder %v1579_v15, 0.0004427343 }
  0xf7   : > { %4378 = vlog2.f32 %v1582_v47  ;;  %v1609_v3 = vadd.f32 1.0, %v4891_v49  ;;  %v1612_v30 = vmul.f32 -0.5, %v4891_v49  ;;  %v4937_v46 = vadd.f32 %v4140_v58, %v4822_v35 }
  0xf8   : > { %v4897_v59 = vpop.eup %4360  ;;  %4380 = vpow2.f32 %v1446_v57  ;;  %v1578_v51 = vmul.f32 %v4873_v23, %v1577_v21  ;;  %v1586_v53 = vadd.f32 1.0, %v1585_v24  ;;  %v1605_v8 = vmul.f32 %v4881_v34, %v1604_v33 }
  0xf9   : > { %4382 = vpow2.f32 %v1420_v56  ;;  %v1591_v11 = vadd.f32 1.0, %v4897_v59  ;;  %v1588_v56 = vand.u32 2147483647, %v4888_v45  ;;  %v1594_v57 = vmul.f32 -0.5, %v4897_v59 }
  0xfa   : > { %v4363_v20 = vpop.eup %4362  ;;  %4384 = vlog2.f32 %v1609_v3  ;;  %v1613_v3 = vadd.f32 1.0, %v1612_v30  ;;  %vm4948_vm3 = vcmp.lt.f32.partialorder %v1606_v36, 0.0004427343  ;;  %v1615_v21 = vand.u32 2147483647, %v4891_v49 }
  0xfb   : > { %v4917_v27 = vpop.eup %4364  ;;  %4386 = vlog2.f32 %v1591_v11  ;;  %v1566_v43 = vmul.f32 0.6931472, %v4363_v20  ;;  %v4954_v11 = vpop.f32.mrf.mxu0  ;;  %v1305_v34 = vand.u32 2147483647, %v4937_v46  ;;  %vm4964_vm4 = vcmp.lt.f32.partialorder %v1588_v56, 0.0004427343 }
  0xfc   : > { %v1636_v5 = vadd.f32 1.0, %v4917_v27  ;;  %4388 = vpow2.f32 %v1442_v31  ;;  %v1587_v31 = vmul.f32 %v4888_v45, %v1586_v53  ;;  %v1595_v33 = vadd.f32 1.0, %v1594_v57 }
  0xfd   : > { %v1572_v20 = vsel %vm4920_vm1, %v1569_v28, %v1566_v43  ;;  %v1597_v36 = vand.u32 2147483647, %v4897_v59  ;;  %v4972_v29 = vmul.f32 %v4891_v49, %v1613_v3  ;;  %v1369_v43 = vsub.f32 0.0, %v1305_v34  ;;  %v4980_v57 = vpop.f32.mrf.mxu0 }
  0xfe   : > { %v4367_v32 = vpop.eup %4366  ;;  %4390 = vlog2.f32 %v1636_v5  ;;  %v2124_v45 = vadd.f32 %v1572_v20, %v1228_v50  ;;  %v1639_v53 = vmul.f32 -0.5, %v4917_v27  ;;  %vm4984_vm5 = vcmp.lt.f32.partialorder %v1615_v21, 0.0004427343 }
  0xff   : > { %v4929_v41 = vpop.eup %4368  ;;  %v1575_v0 = vmul.f32 0.6931472, %v4367_v32  ;;  %vm4997_vm6 = vcmp.lt.f32.partialorder %v1597_v36, 0.0004427343  ;;  %v5004_v42 = vadd.f32 %v4822_v35, %v4909_v13  ;;  %v5015_v13 = vadd.f32 %v4927_v39, %v4822_v35 }
 0x100   : > { %v4939_v47 = vpop.eup %4370  ;;  %v1618_v23 = vadd.f32 1.0, %v4929_v41  ;;  %v1621_v56 = vmul.f32 -0.5, %v4929_v41 }
 0x101   : > { %v4945_v6 = vpop.eup %4372  ;;  %v1645_v24 = vadd.f32 1.0, %v4939_v47  ;;  %v1581_v28 = vsel %vm4931_vm2, %v1578_v51, %v1575_v0  ;;  %v1642_v51 = vand.u32 2147483647, %v4917_v27  ;;  %v1648_v37 = vmul.f32 -0.5, %v4939_v47 }
 0x102   : > { %v4375_v15 = vpop.eup %4374  ;;  %4392 = vlog2.f32 %v1618_v23  ;;  %v2125_v50 = vadd.f32 %v1581_v28, %v1229_v61  ;;  %v4993_v0 = vmul.f32 %v4897_v59, %v1595_v33  ;;  %v5006_v61 = vadd.f32 -0.6931472, %v2124_v45  ;;  %v1038_v28 = vpop.f32.mrf.mxu0 }
 0x103   : > { %v4961_v30 = vpop.eup %4376  ;;  %v1602_v12 = vmul.f32 0.6931472, %v4375_v15  ;;  %4394 = vlog2.f32 %v1645_v24  ;;  %v1448_v24 = vmul.f32 1.442695, %v1369_v43  ;;  %v1640_v59 = vadd.f32 1.0, %v1639_v53 }
 0x104   : > { %v4379_v62 = vpop.eup %4378  ;;  %v1627_v3 = vadd.f32 1.0, %v4961_v30  ;;  %v1622_v34 = vadd.f32 1.0, %v1621_v56  ;;  %v1624_v33 = vand.u32 2147483647, %v4929_v41  ;;  %v1649_v36 = vadd.f32 1.0, %v1648_v37 }
 0x105   : > { %v4974_v54 = vpop.eup %4380  ;;  %v1584_v15 = vmul.f32 0.6931472, %v4379_v62  ;;  %v1608_v62 = vsel %vm4948_vm3, %v1605_v8, %v1602_v12  ;;  %4396 = vpow2.f32 %v1448_v24  ;;  %v1303_v44 = vand.u32 2147483647, %v5004_v42 }
 0x106   : > { %v4982_v9 = vpop.eup %4382  ;;  %v1672_v21 = vadd.f32 1.0, %v4974_v54  ;;  %v1651_v38 = vand.u32 2147483647, %v4939_v47  ;;  %4398 = vlog2.f32 %v1627_v3  ;;  %v5017_v45 = vadd.f32 -0.6931472, %v2125_v50 }
 0x107   : > { %v4385_v23 = vpop.eup %4384  ;;  %v1590_v53 = vsel %vm4964_vm4, %v1587_v31, %v1584_v15  ;;  %v1367_v58 = vsub.f32 0.0, %v1303_v44  ;;  %v2128_v56 = vadd.f32 %v1608_v62, %v1232_v63  ;;  %v1630_v37 = vmul.f32 -0.5, %v4961_v30 }
 0x108   : > { %v4387_v5 = vpop.eup %4386  ;;  %v1611_v43 = vmul.f32 0.6931472, %v4385_v23  ;;  %4400 = vlog2.f32 %v1672_v21  ;;  %v1308_v3 = vand.u32 2147483647, %v5015_v13  ;;  %v4147_v23 = vpop.f32.mrf.mxu0  ;;  %v5028_v39 = vmul.f32 %v4917_v27, %v1640_v59 }
 0x109   : > { %v5021_v8 = vpop.eup %4388  ;;  %v1593_v12 = vmul.f32 0.6931472, %v4387_v5  ;;  %v5031_v50 = vmul.f32 %v4929_v41, %v1622_v34  ;;  %v5034_v31 = vmul.f32 %v4939_v47, %v1649_v36  ;;  %v1675_v44 = vmul.f32 -0.5, %v4974_v54 }
 0x10a   : > { %v2126_v48 = vadd.f32 %v1590_v53, %v1230_v1  ;;  %v1617_v63 = vsel %vm4984_vm5, %v4972_v29, %v1611_v43  ;;  %vm5042_vm7 = vcmp.lt.f32.partialorder %v1642_v51, 0.0004427343  ;;  %v1444_v27 = vmul.f32 1.442695, %v1367_v58  ;;  %v1051_v24 = vpop.f32.mrf.mxu0 }
 0x10b   : > { %v5048_v41 = vadd.f32 %v4822_v35, %v4954_v11  ;;  %vm5052_vm8 = vcmp.lt.f32.partialorder %v1624_v33, 0.0004427343  ;;  %v1633_v52 = vand.u32 2147483647, %v4961_v30  ;;  %v1654_v1 = vadd.f32 1.0, %v5021_v8  ;;  %v4391_v49 = vpop.eup %4390 }
 0x10c   : > { %v1372_v29 = vsub.f32 0.0, %v1308_v3  ;;  %v5058_v51 = vadd.f32 -0.6931472, %v2128_v56  ;;  %v1599_v11 = vsel %vm4997_vm6, %v4993_v0, %v1593_v12  ;;  %vm5063_vm9 = vcmp.lt.f32.partialorder %v1651_v38, 0.0004427343  ;;  %v4148_v3 = vpop.f32.mrf.mxu0 }
 0x10d   : > { %v1631_v21 = vadd.f32 1.0, %v1630_v37  ;;  %4402 = vpow2.f32 %v1444_v27  ;;  %v2129_v34 = vadd.f32 %v1617_v63, %v1233_v10  ;;  %v1676_v33 = vadd.f32 1.0, %v1675_v44 }
 0x10e   : > { %v1678_v62 = vand.u32 2147483647, %v4974_v54  ;;  %v1454_v36 = vmul.f32 1.442695, %v1372_v29  ;;  %v5070_v53 = vadd.f32 -0.6931472, %v2126_v48  ;;  %v5075_v38 = vadd.f32 %v4980_v57, %v4822_v35 }
 0x10f   : > { %v4393_v59 = vpop.eup %4392  ;;  %v1306_v0 = vand.u32 2147483647, %v5048_v41  ;;  %v5078_v20 = vadd.f32 %v4822_v35, %v1038_v28  ;;  %v2127_v55 = vadd.f32 %v1599_v11, %v1231_v16  ;;  %v1638_v10 = vmul.f32 0.6931472, %v4391_v49 }
 0x110   : > { %v4395_v43 = vpop.eup %4394  ;;  %4404 = vlog2.f32 %v1654_v1  ;;  %v5083_v58 = vadd.f32 %v4147_v23, %v4822_v35  ;;  %v1620_v56 = vmul.f32 0.6931472, %v4393_v59  ;;  %v1309_v37 = vand.u32 2147483647, %v5075_v38 }
 0x111   : > { %4406 = vpow2.f32 %v1454_v36  ;;  %v1370_v12 = vsub.f32 0.0, %v1306_v0  ;;  %v5086_v44 = vadd.f32 -0.6931472, %v2129_v34  ;;  %v1647_v57 = vmul.f32 0.6931472, %v4395_v43 }
 0x112   : > { %v1632_v28 = vmul.f32 %v4961_v30, %v1631_v21  ;;  %vm5089_vm10 = vcmp.lt.f32.partialorder %v1633_v52, 0.0004427343  ;;  %v1307_v60 = vand.u32 2147483647, %v5078_v20  ;;  %v5094_v16 = vpop.eup %4396  ;;  %v1677_v23 = vmul.f32 %v4974_v54, %v1676_v33 }
 0x113   : > { %vm5097_vm11 = vcmp.lt.f32.partialorder %v1678_v62, 0.0004427343  ;;  %v1450_v27 = vmul.f32 1.442695, %v1370_v12  ;;  %v1373_v1 = vsub.f32 0.0, %v1309_v37  ;;  %v4399_v49 = vpop.eup %4398  ;;  %v1644_v52 = vsel %vm5042_vm7, %v5028_v39, %v1638_v10  ;;  %v1054_v62 = vpop.f32.mrf.mxu0 }
 0x114   : > { %v1312_v29 = vand.u32 2147483647, %v5083_v58  ;;  %v5102_v30 = vadd.f32 -0.6931472, %v2127_v55  ;;  %v1681_v11 = vadd.f32 1.0, %v5094_v16  ;;  %v1626_v59 = vsel %vm5052_vm8, %v5031_v50, %v1620_v56 }
 0x115   : > { %v4401_v54 = vpop.eup %4400  ;;  %4408 = vpow2.f32 %v1450_v27  ;;  %v1456_v34 = vmul.f32 1.442695, %v1373_v1  ;;  %v1371_v33 = vsub.f32 0.0, %v1307_v60  ;;  %v1653_v36 = vsel %vm5063_vm9, %v5034_v31, %v1647_v57  ;;  %v4151_v1 = vpop.f32.mrf.mxu0 }
 0x116   : > { %v1657_v32 = vmul.f32 -0.5, %v5021_v8  ;;  %4410 = vlog2.f32 %v1681_v11  ;;  %v1376_v39 = vsub.f32 0.0, %v1312_v29  ;;  %v1629_v43 = vmul.f32 0.6931472, %v4399_v49 }
 0x117   : > { %4412 = vpow2.f32 %v1456_v34  ;;  %v1452_v0 = vmul.f32 1.442695, %v1371_v33  ;;  %v5117_v55 = vadd.f32 %v4822_v35, %v1051_v24  ;;  %v1674_v5 = vmul.f32 0.6931472, %v4401_v54 }
 0x118   : > { %v1462_v50 = vmul.f32 1.442695, %v1376_v39  ;;  %v5120_v10 = vadd.f32 %v4148_v3, %v4822_v35  ;;  %v5123_v56 = vadd.f32 %v4822_v35, %v1054_v62  ;;  %v2132_v31 = vadd.f32 %v1644_v52, %v1236_v18 }
 0x119   : > { %v2130_v15 = vadd.f32 %v1626_v59, %v1234_v19  ;;  %4414 = vpow2.f32 %v1452_v0  ;;  %v1310_v12 = vand.u32 2147483647, %v5117_v55  ;;  %v2133_v24 = vadd.f32 %v1653_v36, %v1237_v25 }
 0x11a   : > { %v5130_v37 = vpop.eup %4402  ;;  %v1660_v3 = vand.u32 2147483647, %v5021_v8  ;;  %4416 = vpow2.f32 %v1462_v50  ;;  %v1313_v57 = vand.u32 2147483647, %v5120_v10  ;;  %v1635_v7 = vsel %vm5089_vm10, %v1632_v28, %v1629_v43 }
 0x11b   : > { %v1663_v18 = vadd.f32 1.0, %v5130_v37  ;;  %v1374_v19 = vsub.f32 0.0, %v1310_v12  ;;  %v1680_v60 = vsel %vm5097_vm11, %v1677_v23, %v1674_v5  ;;  %v1658_v27 = vadd.f32 1.0, %v1657_v32 }
 0x11c   : > { %v1377_v14 = vsub.f32 0.0, %v1313_v57  ;;  %v1311_v25 = vand.u32 2147483647, %v5123_v56  ;;  %v5146_v52 = vadd.f32 -0.6931472, %v2132_v31  ;;  %v6966_v23 = vmax.f32 %v4871_v22, 0.0 }
 0x11d   : > { %v4405_v29 = vpop.eup %4404  ;;  %v5148_v11 = vadd.f32 -0.6931472, %v2130_v15  ;;  %v5153_v54 = vadd.f32 -0.6931472, %v2133_v24  ;;  %vm5157_vm12 = vcmp.lt.f32.partialorder %v1660_v3, 0.0004427343  ;;  %4418 = vlog2.f32 %v1663_v18  ;;  %v1067_v24 = vpop.f32.mrf.mxu0 }
 0x11e   : > { %6965 = vst [vmem:[#allocation3_spill] sm:$0xff] %v5146_v52  ;;  %v5151_v48 = vpop.eup %4406  ;;  %v2131_v63 = vadd.f32 %v1635_v7, %v6966_v23  ;;  %v1458_v34 = vmul.f32 1.442695, %v1374_v19  ;;  %v6969_v33 = vmax.f32 %v4876_v26, 0.0  ;;  %v1464_v36 = vmul.f32 1.442695, %v1377_v14 }
 0x11f   : > { %v5164_v32 = vadd.f32 %v4151_v1, %v4822_v35  ;;  %v1659_v39 = vmul.f32 %v5021_v8, %v1658_v27  ;;  %v1684_v43 = vmul.f32 -0.5, %v5094_v16  ;;  %v1687_v22 = vand.u32 2147483647, %v5094_v16 }
 0x120   : > { %v2136_v62 = vadd.f32 %v1680_v60, %v6969_v33  ;;  %v1375_v0 = vsub.f32 0.0, %v1311_v25  ;;  %v1656_v5 = vmul.f32 0.6931472, %v4405_v29  ;;  %v1708_v50 = vadd.f32 1.0, %v5151_v48 }
 0x121   : > { %4420 = vpow2.f32 %v1458_v34  ;;  %v5175_v12 = vadd.f32 -0.6931472, %v2131_v63  ;;  %v1316_v19 = vand.u32 2147483647, %v5164_v32  ;;  %v1685_v27 = vadd.f32 1.0, %v1684_v43  ;;  %v4152_v43 = vpop.f32.mrf.mxu0 }
 0x122   : > { %v5171_v26 = vpop.eup %4408  ;;  %4422 = vpow2.f32 %v1464_v36  ;;  %v5178_v57 = vadd.f32 -0.6931472, %v2136_v62  ;;  %vm5185_vm13 = vcmp.lt.f32.partialorder %v1687_v22, 0.0004427343  ;;  %v1460_v1 = vmul.f32 1.442695, %v1375_v0 }
 0x123   : > { %v4411_v3 = vpop.eup %4410  ;;  %v1690_v7 = vadd.f32 1.0, %v5171_v26  ;;  %v1662_v29 = vsel %vm5157_vm12, %v1659_v39, %v1656_v5  ;;  %v1666_v23 = vmul.f32 -0.5, %v5130_v37  ;;  %4424 = vlog2.f32 %v1708_v50 }
 0x124   : > { %v5183_v60 = vpop.eup %4412  ;;  %v1683_v33 = vmul.f32 0.6931472, %v4411_v3  ;;  %v1669_v62 = vand.u32 2147483647, %v5130_v37  ;;  %v1711_v36 = vmul.f32 -0.5, %v5151_v48  ;;  %v1380_v39 = vsub.f32 0.0, %v1316_v19 }
 0x125   : > { %v1717_v63 = vadd.f32 1.0, %v5183_v60  ;;  %4426 = vlog2.f32 %v1690_v7  ;;  %v5202_v0 = vadd.f32 %v4822_v35, %v1067_v24  ;;  %v6972_v5 = vmax.f32 %v4885_v40, 0.0 }
 0x126   : > { %v5194_v34 = vpop.eup %4414  ;;  %v1686_v3 = vmul.f32 %v5094_v16, %v1685_v27  ;;  %v1667_v2 = vadd.f32 1.0, %v1666_v23  ;;  %v1712_v24 = vadd.f32 1.0, %v1711_v36  ;;  %vm5218_vm14 = vcmp.lt.f32.partialorder %v1669_v62, 0.0004427343 }
 0x127   : > { %v5198_v22 = vpop.eup %4416  ;;  %4428 = vlog2.f32 %v1717_v63  ;;  %v1699_v59 = vadd.f32 1.0, %v5194_v34  ;;  %v2134_v50 = vadd.f32 %v1662_v29, %v6972_v5  ;;  %v5210_v63 = vadd.f32 %v4152_v43, %v4822_v35 }
 0x128   : > { %4430 = vpow2.f32 %v1460_v1  ;;  %v1744_v7 = vadd.f32 1.0, %v5198_v22  ;;  %v1689_v19 = vsel %vm5185_vm13, %v1686_v3, %v1683_v33  ;;  %v1470_v1 = vmul.f32 1.442695, %v1380_v39 }
 0x129   : > { %4432 = vlog2.f32 %v1699_v59  ;;  %v1314_v29 = vand.u32 2147483647, %v5202_v0  ;;  %v5223_v43 = vadd.f32 -0.6931472, %v2134_v50  ;;  %v1714_v14 = vand.u32 2147483647, %v5151_v48 }
 0x12a   : > { %v4419_v23 = vpop.eup %4418  ;;  %v1693_v33 = vmul.f32 -0.5, %v5171_v26  ;;  %4434 = vlog2.f32 %v1744_v7  ;;  %v6975_v36 = vmax.f32 %v4937_v46, 0.0  ;;  %v1668_v5 = vmul.f32 %v5130_v37, %v1667_v2 }
 0x12b   : > { %v1720_v62 = vmul.f32 -0.5, %v5183_v60  ;;  %v1317_v3 = vand.u32 2147483647, %v5210_v63  ;;  %v5235_v16 = vmul.f32 %v5151_v48, %v1712_v24  ;;  %v1702_v50 = vmul.f32 -0.5, %v5194_v34 }
 0x12c   : > { %v2137_v59 = vadd.f32 %v1689_v19, %v6975_v36  ;;  %v1747_v47 = vmul.f32 -0.5, %v5198_v22  ;;  %v1665_v46 = vmul.f32 0.6931472, %v4419_v23  ;;  %4436 = vpow2.f32 %v1470_v1  ;;  %v1070_v19 = vpop.f32.mrf.mxu0 }
 0x12d   : > { %v1378_v2 = vsub.f32 0.0, %v1314_v29  ;;  %v1694_v36 = vadd.f32 1.0, %v1693_v33  ;;  %v1696_v49 = vand.u32 2147483647, %v5171_v26  ;;  %v1723_v48 = vand.u32 2147483647, %v5183_v60 }
 0x12e   : > { %v5232_v39 = vpop.eup %4420  ;;  %v5246_v15 = vadd.f32 -0.6931472, %v2137_v59  ;;  %vm5248_vm15 = vcmp.lt.f32.partialorder %v1714_v14, 0.0004427343  ;;  %v1721_v7 = vadd.f32 1.0, %v1720_v62  ;;  %v1381_v18 = vsub.f32 0.0, %v1317_v3 }
 0x12f   : > { %v5240_v40 = vpop.eup %4422  ;;  %v1726_v37 = vadd.f32 1.0, %v5232_v39  ;;  %v1705_v23 = vand.u32 2147483647, %v5194_v34  ;;  %v1703_v29 = vadd.f32 1.0, %v1702_v50  ;;  %v1748_v31 = vadd.f32 1.0, %v1747_v47 }
 0x130   : > { %v1753_v24 = vadd.f32 1.0, %v5240_v40  ;;  %v4425_v1 = vpop.eup %4424  ;;  %v5254_v33 = vadd.f32 %v4822_v35, %v1070_v19  ;;  %v1671_v59 = vsel %vm5218_vm14, %v1668_v5, %v1665_v46  ;;  %v1750_v14 = vand.u32 2147483647, %v5198_v22 }
 0x131   : > { %4438 = vlog2.f32 %v1726_v37  ;;  %v1466_v21 = vmul.f32 1.442695, %v1378_v2  ;;  %v1695_v52 = vmul.f32 %v5171_v26, %v1694_v36  ;;  %vm5261_vm0 = vcmp.lt.f32.partialorder %v1696_v49, 0.0004427343  ;;  %v5278_v26 = vpop.f32.mrf.mxu0 }
 0x132   : > { %v4427_v8 = vpop.eup %4426  ;;  %vm5265_vm1 = vcmp.lt.f32.partialorder %v1723_v48, 0.0004427343  ;;  %4440 = vlog2.f32 %v1753_v24  ;;  %v1722_v5 = vmul.f32 %v5183_v60, %v1721_v7  ;;  %vm5274_vm2 = vcmp.lt.f32.partialorder %v1705_v23, 0.0004427343 }
 0x133   : > { %v1472_v49 = vmul.f32 1.442695, %v1381_v18  ;;  %v6984_v2 = vmax.f32 %v5004_v42, 0.0  ;;  %v1710_v36 = vmul.f32 0.6931472, %v4425_v1  ;;  %v1704_v48 = vmul.f32 %v5194_v34, %v1703_v29  ;;  %v1083_v29 = vpop.f32.mrf.mxu0 }
 0x134   : > { %v4429_v62 = vpop.eup %4428  ;;  %v1749_v24 = vmul.f32 %v5198_v22, %v1748_v31  ;;  %v1692_v28 = vmul.f32 0.6931472, %v4427_v8  ;;  %vm5284_vm3 = vcmp.lt.f32.partialorder %v1750_v14, 0.0004427343  ;;  %4442 = vpow2.f32 %v1466_v21 }
 0x135   : > { %v5269_v50 = vpop.eup %4430  ;;  %v2135_v19 = vadd.f32 %v1671_v59, %v6984_v2  ;;  %v1719_v27 = vmul.f32 0.6931472, %v4429_v62  ;;  %v1315_v18 = vand.u32 2147483647, %v5254_v33  ;;  %4444 = vpow2.f32 %v1472_v49 }
 0x136   : > { %v4433_v37 = vpop.eup %4432  ;;  %v1735_v23 = vadd.f32 1.0, %v5269_v50  ;;  %v1546_v42 = vadd.f32 1.0, %v4945_v6  ;;  %v1729_v34 = vmul.f32 -0.5, %v5232_v39  ;;  %v1716_v21 = vsel %vm5248_vm15, %v5235_v16, %v1710_v36 }
 0x137   : > { %v1701_v7 = vmul.f32 0.6931472, %v4433_v37  ;;  %v4435_v1 = vpop.eup %4434  ;;  %v1379_v22 = vsub.f32 0.0, %v1315_v18  ;;  %v5294_v59 = vadd.f32 -0.6931472, %v2135_v19  ;;  %v1756_v62 = vmul.f32 -0.5, %v5240_v40 }
 0x138   : > { %v1732_v14 = vand.u32 2147483647, %v5232_v39  ;;  %v1725_v49 = vsel %vm5265_vm1, %v1722_v5, %v1719_v27  ;;  %v1738_v37 = vmul.f32 -0.5, %v5269_v50  ;;  %4446 = vlog2.f32 %v1546_v42  ;;  %v5313_v27 = vpop.f32.mrf.mxu0 }
 0x139   : > { %v1468_v2 = vmul.f32 1.442695, %v1379_v22  ;;  %v5304_v8 = vpop.eup %4436  ;;  %v1698_v19 = vsel %vm5261_vm0, %v1695_v52, %v1692_v28  ;;  %v1707_v25 = vsel %vm5274_vm2, %v1704_v48, %v1701_v7  ;;  %v1746_v16 = vmul.f32 0.6931472, %v4435_v1 }
 0x13a   : > { %4448 = vlog2.f32 %v1735_v23  ;;  %v6987_v36 = vmax.f32 %v5015_v13, 0.0  ;;  %v1730_v31 = vadd.f32 1.0, %v1729_v34  ;;  %v1759_v47 = vand.u32 2147483647, %v5240_v40 }
 0x13b   : > { %4450 = vpow2.f32 %v1468_v2  ;;  %v6988_v5 = vmax.f32 %v5075_v38, 0.0  ;;  %vm5317_vm4 = vcmp.lt.f32.partialorder %v1732_v14, 0.0004427343  ;;  %v1757_v52 = vadd.f32 1.0, %v1756_v62  ;;  %v5340_v2 = vpop.f32.mrf.mxu0 }
 0x13c   : > { %v2140_v18 = vadd.f32 %v1716_v21, %v6987_v36  ;;  %v1555_v28 = vadd.f32 1.0, %v4982_v9  ;;  %v2256_v13 = vpack.c.bf16 %v5294_v59, %v5223_v43  ;;  %v6991_v48 = vmax.f32 %v5048_v41, 0.0 }
 0x13d   : > { %v2141_v42 = vadd.f32 %v1725_v49, %v6988_v5  ;;  %v6992_v23 = vmax.f32 %v5078_v20, 0.0  ;;  %v1783_v38 = vmul.f32 -0.5, %v5304_v8  ;;  %v1752_v34 = vsel %vm5284_vm3, %v1749_v24, %v1746_v16 }
 0x13e   : > { %v4439_v46 = vpop.eup %4438  ;;  %v2138_v7 = vadd.f32 %v1698_v19, %v6991_v48  ;;  %v1739_v22 = vadd.f32 1.0, %v1738_v37  ;;  %v1549_v21 = vmul.f32 -0.5, %v4945_v6  ;;  %4452 = vlog2.f32 %v1555_v28  ;;  %v4159_v48 = vpop.f32.mrf.mxu0 }
 0x13f   : > { %v2139_v1 = vadd.f32 %v1707_v25, %v6992_v23  ;;  %v4441_v14 = vpop.eup %4440  ;;  %v5332_v62 = vadd.f32 -0.6931472, %v2140_v18  ;;  %v1731_v49 = vmul.f32 %v5232_v39, %v1730_v31  ;;  %vm5335_vm5 = vcmp.lt.f32.partialorder %v1759_v47, 0.0004427343 }
 0x140   : > { %v1780_v20 = vadd.f32 1.0, %v5304_v8  ;;  %v5342_v19 = vadd.f32 -0.6931472, %v2141_v42  ;;  %v1728_v24 = vmul.f32 0.6931472, %v4439_v46  ;;  %v1758_v60 = vmul.f32 %v5240_v40, %v1757_v52  ;;  %v1099_v41 = vpop.f32.mrf.mxu0 }
 0x141   : > { %v1741_v37 = vand.u32 2147483647, %v5269_v50  ;;  %v5346_v25 = vadd.f32 -0.6931472, %v2138_v7  ;;  %v5348_v16 = vadd.f32 -0.6931472, %v2139_v1  ;;  %v5352_v18 = vpop.eup %4442  ;;  %v5355_v5 = vmul.f32 %v5269_v50, %v1739_v22 }
 0x142   : > { %v6995_v39 = vmax.f32 %v5083_v58, 0.0  ;;  %v1784_v36 = vadd.f32 1.0, %v1783_v38  ;;  %v1755_v47 = vmul.f32 0.6931472, %v4441_v14  ;;  %v1550_v42 = vadd.f32 1.0, %v1549_v21  ;;  %v5361_v52 = vpop.eup %4444 }
 0x143   : > { %v5359_v40 = vadd.f32 %v5278_v26, %v4822_v35  ;;  %4454 = vlog2.f32 %v1780_v20  ;;  %v1786_v28 = vand.u32 2147483647, %v5304_v8  ;;  %v1558_v58 = vmul.f32 -0.5, %v4982_v9 }
 0x144   : > { %v2144_v31 = vadd.f32 %v1752_v34, %v6995_v39  ;;  %v5366_v46 = vadd.f32 %v4822_v35, %v1083_v29  ;;  %v1734_v7 = vsel %vm5317_vm4, %v1731_v49, %v1728_v24  ;;  %v1552_v26 = vand.u32 2147483647, %v4945_v6 }
 0x145   : > { %v1561_v23 = vand.u32 2147483647, %v4982_v9  ;;  %v5379_v34 = vmul.f32 %v5304_v8, %v1784_v36  ;;  %v1762_v35 = vadd.f32 1.0, %v5352_v18  ;;  %v4447_v29 = vpop.eup %4446  ;;  %v1761_v22 = vsel %vm5335_vm5, %v1758_v60, %v1755_v47 }
 0x146   : > { %v5376_v38 = vadd.f32 -0.6931472, %v2144_v31  ;;  %v1789_v3 = vadd.f32 1.0, %v5361_v52  ;;  %v1551_v21 = vmul.f32 %v4945_v6, %v1550_v42  ;;  %v1320_v14 = vand.u32 2147483647, %v5359_v40 }
 0x147   : > { %v4449_v49 = vpop.eup %4448  ;;  %v6996_v20 = vmax.f32 %v5117_v55, 0.0  ;;  %vm5389_vm6 = vcmp.lt.f32.partialorder %v1741_v37, 0.0004427343  ;;  %v1548_v8 = vmul.f32 0.6931472, %v4447_v29  ;;  %v1559_v31 = vadd.f32 1.0, %v1558_v58 }
 0x148   : > { %v1318_v36 = vand.u32 2147483647, %v5366_v46  ;;  %v5394_v60 = vpop.eup %4450  ;;  %vm5396_vm7 = vcmp.lt.f32.partialorder %v1552_v26, 0.0004427343  ;;  %vm5400_vm8 = vcmp.lt.f32.partialorder %v1561_v23, 0.0004427343  ;;  %4456 = vlog2.f32 %v1762_v35  ;;  %v4160_v35 = vpop.f32.mrf.mxu0 }
 0x149   : > { %v2142_v24 = vadd.f32 %v1734_v7, %v6996_v20  ;;  %v1384_v55 = vsub.f32 0.0, %v1320_v14  ;;  %v5407_v37 = vld [vmem:[%s6920_s5] ss:$0 sm:$0xff]  ;;  %v7003_v58 = vmax.f32 %v5120_v10, 0.0  ;;  %v1771_v26 = vadd.f32 1.0, %v5394_v60 }
 0x14a   : > { %v5411_v42 = vadd.f32 %v5407_v37, %v5313_v27  ;;  %v1554_v23 = vsel %vm5396_vm7, %v1551_v21, %v1548_v8  ;;  %v1737_v29 = vmul.f32 0.6931472, %v4449_v49  ;;  %4458 = vlog2.f32 %v1789_v3 }
 0x14b   : > { %v2145_v7 = vadd.f32 %v1761_v22, %v7003_v58  ;;  %vm598_vm9 = vcmask 261120   ;;  %v1478_v14 = vmul.f32 1.442695, %v1384_v55  ;;  %v1382_v20 = vsub.f32 0.0, %v1318_v36  ;;  %v4453_v50 = vpop.eup %4452 }
 0x14c   : > { %v5419_v1 = vadd.f32 -0.6931472, %v2142_v24  ;;  %4460 = vlog2.f32 %v1771_v26  ;;  %v1560_v10 = vmul.f32 %v4982_v9, %v1559_v31  ;;  %v1557_v22 = vmul.f32 0.6931472, %v4453_v50  ;;  %v1102_v26 = vpop.f32.mrf.mxu0 }
 0x14d   : > { %v7004_v6 = vmax.f32 %v4852_v4, 0.0  ;;  %4462 = vpow2.f32 %v1478_v14  ;;  %v1474_v3 = vmul.f32 1.442695, %v1382_v20  ;;  %v5425_v49 = vadd.f32 -0.6931472, %v2145_v7 }
 0x14e   : > { %v1765_v8 = vmul.f32 -0.5, %v5352_v18  ;;  %v1321_v36 = vand.u32 2147483647, %v5411_v42  ;;  %v5431_v24 = vadd.f32 %v5407_v37, %v5340_v2  ;;  %vm5439_vm10 = vcmp.lt.f32.partialorder %v1786_v28, 0.0004427343 }
 0x14f   : > { %v2122_v21 = vadd.f32 %v1554_v23, %v7004_v6  ;;  %v1563_v9 = vsel %vm5400_vm8, %v1560_v10, %v1557_v22  ;;  %4464 = vpow2.f32 %v1474_v3  ;;  %v5446_v50 = vadd.f32 %v5407_v37, %v4159_v48 }
 0x150   : > { %v5449_v2 = vadd.f32 %v5407_v37, %v1099_v41  ;;  %v1792_v31 = vmul.f32 -0.5, %v5361_v52  ;;  %v7008_v55 = vmax.f32 %v4866_v17, 0.0  ;;  %v1385_v58 = vsub.f32 0.0, %v1321_v36  ;;  %v4455_v47 = vpop.eup %4454 }
 0x151   : > { %v1319_v7 = vand.u32 2147483647, %v5431_v24  ;;  %v1743_v48 = vsel %vm5389_vm6, %v5355_v5, %v1737_v29  ;;  %v3915_v23 = vadd.f32 -0.6931472, %v2122_v21  ;;  %v1324_v14 = vand.u32 2147483647, %v5446_v50 }
 0x152   : > { %v2123_v28 = vadd.f32 %v1563_v9, %v7008_v55  ;;  %v1322_v41 = vand.u32 2147483647, %v5449_v2  ;;  %v1480_v10 = vmul.f32 1.442695, %v1385_v58  ;;  %v5461_v17 = vadd.f32 %v5407_v37, %v4160_v35 }
 0x153   : > { %v1383_v22 = vsub.f32 0.0, %v1319_v7  ;;  %v1768_v6 = vand.u32 2147483647, %v5352_v18  ;;  %v1388_v3 = vsub.f32 0.0, %v1324_v14  ;;  %v5471_v39 = vadd.f32 %v5407_v37, %v1102_v26 }
 0x154   : > { %v3916_v20 = vadd.f32 -0.6931472, %v2123_v28  ;;  %v1386_v5 = vsub.f32 0.0, %v1322_v41  ;;  %v1782_v29 = vmul.f32 0.6931472, %v4455_v47  ;;  %4466 = vpow2.f32 %v1480_v10 }
 0x155   : > { %v1476_v36 = vmul.f32 1.442695, %v1383_v22  ;;  %v7009_v9 = vmax.f32 %v5123_v56, 0.0  ;;  %v1766_v55 = vadd.f32 1.0, %v1765_v8  ;;  %v1486_v28 = vmul.f32 1.442695, %v1388_v3  ;;  %v4457_v47 = vpop.eup %4456 }
 0x156   : > { %v2250_v21 = vpack.c.bf16 %v3916_v20, %v3915_v23  ;;  %v1482_v58 = vmul.f32 1.442695, %v1386_v5  ;;  %v1793_v27 = vadd.f32 1.0, %v1792_v31  ;;  %v1325_v26 = vand.u32 2147483647, %v5461_v17 }
 0x157   : > { %v2143_v35 = vadd.f32 %v1743_v48, %v7009_v9  ;;  %4468 = vpow2.f32 %v1476_v36  ;;  %vm5482_vm11 = vcmp.lt.f32.partialorder %v1768_v6, 0.0004427343  ;;  %v1795_v56 = vand.u32 2147483647, %v5361_v52  ;;  %v4459_v14 = vpop.eup %4458 }
 0x158   : > { %4193 = vmatprep.mubr.msk.bf16.mxu1 %vm598_vm9, %v2250_v21  ;;  %v1774_v8 = vmul.f32 -0.5, %v5394_v60  ;;  %v7012_v48 = vpack.c.bf16 %v5017_v45, %v5006_v61  ;;  %4470 = vpow2.f32 %v1486_v28  ;;  %v1323_v31 = vand.u32 2147483647, %v5471_v39  ;;  %v4163_v61 = vpop.f32.mrf.mxu0 }
 0x159   : > { %v1788_v41 = vsel %vm5439_vm10, %v5379_v34, %v1782_v29  ;;  %v7013_v20 = vpack.c.bf16 %v5102_v30, %v5070_v53  ;;  %4472 = vpow2.f32 %v1482_v58  ;;  %v1389_v10 = vsub.f32 0.0, %v1325_v26  ;;  %v4461_v45 = vpop.eup %4460 }
 0x15a   : > { %4194 = vmatmul.mubr.msk.bf16.vlgmr.msra.gmra.mxu1 %vm598_vm9, %v7012_v48  ;;  %v2693_v22 = vlaneseq  ;;  %v5500_v6 = vadd.f32 -0.6931472, %v2143_v35  ;;  %v1767_v3 = vmul.f32 %v5352_v18, %v1766_v55  ;;  %v1387_v21 = vsub.f32 0.0, %v1323_v31  ;;  %v5510_v53 = vpop.eup %4462  ;;  %v1115_v48 = vpop.f32.mrf.mxu0 }
 0x15b   : > { %4197 = vmatprep.mubr.msk.bf16.mxu1 %vm598_vm9, %v7013_v20  ;;  %v1794_v30 = vmul.f32 %v5361_v52, %v1793_v27  ;;  %v1777_v34 = vand.u32 2147483647, %v5394_v60  ;;  %v1488_v4 = vmul.f32 1.442695, %v1389_v10  ;;  %v7014_v18 = vmax.f32 %v5164_v32, 0.0  ;;  %v5526_v27 = vld [vmem:[%s5508_s24] sm:$0xff] }
 0x15c   : > { %v5514_v29 = vshrl.u32 %v2693_v22, 7  ;;  %vm5518_vm12 = vcmp.lt.f32.partialorder %v1795_v56, 0.0004427343  ;;  %v1775_v35 = vadd.f32 1.0, %v1774_v8  ;;  %v1816_v55 = vadd.f32 1.0, %v5510_v53  ;;  %v5523_v28 = vpop.eup %4464  ;;  %7017 = vst [vmem:[#allocation4_spill] sm:$0xff] %v5526_v27 }
 0x15d   : > { %v2148_v36 = vadd.f32 %v1788_v41, %v7014_v18  ;;  %v1764_v58 = vmul.f32 0.6931472, %v4457_v47  ;;  %4474 = vpow2.f32 %v1488_v4  ;;  %v1484_v52 = vmul.f32 1.442695, %v1387_v21 }
 0x15e   : > { %v6933_v26 = vsub.s32 0, %v5514_v29  ;;  %v1791_v56 = vmul.f32 0.6931472, %v4459_v14  ;;  %v1773_v31 = vmul.f32 0.6931472, %v4461_v45  ;;  %v5532_v41 = vadd.f32 %v5407_v37, %v4163_v61 }
 0x15f   : > { %vm5534_vm13 = vcmp.lt.f32.partialorder %v1777_v34, 0.0004427343  ;;  %v1798_v47 = vadd.f32 1.0, %v5523_v28  ;;  %4476 = vpow2.f32 %v1484_v52  ;;  %v1776_v10 = vmul.f32 %v5394_v60, %v1775_v35 }
 0x160   : > { %7018 = vst [vmem:[#allocation5_spill] sm:$0xff] %v5532_v41  ;;  %4478 = vlog2.f32 %v1816_v55  ;;  %v7021_v22 = vpack.c.bf16 %v5086_v44, %v5058_v51  ;;  %v5548_v14 = vrot.slane %v5526_v27, %v6933_v26  ;;  %v5551_v61 = vadd.f32 %v5407_v37, %v1115_v48 }
 0x161   : > { %v5553_v45 = vadd.f32 -0.6931472, %v2148_v36  ;;  %v1770_v21 = vsel %vm5482_vm11, %v1767_v3, %v1764_v58  ;;  %v7023_v51 = vpack.c.bf16 %v5175_v12, %v5148_v11  ;;  %v5563_v44 = vpop.eup %4466  ;;  %v1797_v4 = vsel %vm5518_vm12, %v1794_v30, %v1791_v56 }
 0x162   : > { %4198 = vmatmul.mubr.msk.bf16.gmra.mxu1 %vm598_vm9, %v7021_v22  ;;  %7022 = vst [vmem:[#allocation6_spill] sm:$0xff] %v5551_v61  ;;  %v1779_v18 = vsel %vm5534_vm13, %v1776_v10, %v1773_v31  ;;  %2698 = vbcast.lane.b32.xlu0 %v5548_v14, 256  ;;  %v1328_v23 = vand.u32 2147483647, %v5532_v41  ;;  %v6931_v3 = vsub.s32 1, %v5514_v29  ;;  %v1819_v36 = vmul.f32 -0.5, %v5510_v53  ;;  %v4164_v22 = vpop.f32.mrf.mxu0 }
 0x163   : > { %4201 = vmatprep.mubr.msk.bf16.mxu1 %vm598_vm9, %v7023_v51  ;;  %4480 = vlog2.f32 %v1798_v47  ;;  %v1825_v11 = vadd.f32 1.0, %v5563_v44  ;;  %v7024_v30 = vmax.f32 %v5202_v0, 0.0  ;;  %v1326_v58 = vand.u32 2147483647, %v5551_v61 }
 0x164   : > { %v5575_v35 = vpop.eup %4468  ;;  %v5584_v52 = vrot.slane %v5526_v27, %v6931_v3  ;;  %v7026_v56 = vmax.f32 %v5210_v63, 0.0  ;;  %v7027_v8 = vmax.f32 %v5254_v33, 0.0  ;;  %v1822_v0 = vand.u32 2147483647, %v5510_v53 }
 0x165   : > { %v2146_v9 = vadd.f32 %v1770_v21, %v7024_v30  ;;  %v5586_v48 = vpop.eup %4470  ;;  %v1807_v10 = vadd.f32 1.0, %v5575_v35  ;;  %v1801_v51 = vmul.f32 -0.5, %v5523_v28  ;;  %4482 = vlog2.f32 %v1825_v11 }
 0x166   : > { %7025 = vst [vmem:[#allocation7_spill] sm:$0xff] %v5584_v52  ;;  %v2149_v31 = vadd.f32 %v1797_v4, %v7026_v56  ;;  %v2147_v47 = vadd.f32 %v1779_v18, %v7027_v8  ;;  %v5594_v21 = vpop.eup %4472  ;;  %v1852_v30 = vadd.f32 1.0, %v5586_v48  ;;  %v1392_v3 = vsub.f32 0.0, %v1328_v23  ;;  %2717 = vbcast.lane.b32.xlu1 %v5584_v52, 256  ;;  %2702 = vbcast.lane.b32.xlu0 %v5548_v14, 264  ;;  %v7028_v56 = vld [vmem:[#allocation3_spill] sm:$0xff] }
 0x167   : > { %v1820_v63 = vadd.f32 1.0, %v1819_v36  ;;  %v1828_v4 = vmul.f32 -0.5, %v5563_v44  ;;  %4484 = vlog2.f32 %v1807_v10  ;;  %v1834_v33 = vadd.f32 1.0, %v5594_v21 }
 0x168   : > { %v5602_v18 = vadd.f32 -0.6931472, %v2146_v9  ;;  %4486 = vlog2.f32 %v1852_v30  ;;  %v7029_v8 = vpack.c.bf16 %v5153_v54, %v7028_v56  ;;  %v1390_v11 = vsub.f32 0.0, %v1326_v58 }
 0x169   : > { %v5609_v23 = vadd.f32 %v5407_v37, %v4164_v22  ;;  %v5611_v36 = vadd.f32 -0.6931472, %v2149_v31  ;;  %v5613_v55 = vadd.f32 -0.6931472, %v2147_v47  ;;  %v1804_v10 = vand.u32 2147483647, %v5523_v28  ;;  %v1118_v31 = vpop.f32.mrf.mxu0 }
 0x16a   : > { %4202 = vmatmul.mubr.msk.bf16.gmra.mxu1 %vm598_vm9, %v7029_v8  ;;  %4488 = vlog2.f32 %v1834_v33  ;;  %v5620_v9 = vpop.eup %4474  ;;  %v1802_v54 = vadd.f32 1.0, %v1801_v51  ;;  %v1810_v58 = vmul.f32 -0.5, %v5575_v35  ;;  %v1494_v30 = vmul.f32 1.442695, %v1392_v3  ;;  %2721 = vbcast.lane.b32.xlu1 %v5584_v52, 264 }
 0x16b   : > { %7030 = vst [vmem:[#allocation3_spill] sm:$0xff] %v5609_v23  ;;  %4205 = vmatprep.mubr.msk.bf16.mxu1 %vm598_vm9, %v2256_v13  ;;  %v5626_v47 = vmul.f32 %v5510_v53, %v1820_v63  ;;  %vm5628_vm14 = vcmp.lt.f32.partialorder %v1822_v0, 0.0004427343  ;;  %v1829_v43 = vadd.f32 1.0, %v1828_v4  ;;  %v1813_v59 = vand.u32 2147483647, %v5575_v35  ;;  %v4167_v34 = vpop.f32.mrf.mxu0 }
 0x16c   : > { %v1861_v13 = vadd.f32 1.0, %v5620_v9  ;;  %v5634_v51 = vpop.eup %4476  ;;  %v1855_v56 = vmul.f32 -0.5, %v5586_v48  ;;  %v1490_v8 = vmul.f32 1.442695, %v1390_v11  ;;  %v1329_v22 = vand.u32 2147483647, %v5609_v23 }
 0x16d   : > { %v4479_v53 = vpop.eup %4478  ;;  %v1843_v63 = vadd.f32 1.0, %v5634_v51  ;;  %v5644_v7 = vmul.f32 %v5523_v28, %v1802_v54  ;;  %vm5646_vm15 = vcmp.lt.f32.partialorder %v1804_v10, 0.0004427343  ;;  %v1831_v11 = vand.u32 2147483647, %v5563_v44 }
 0x16e   : > { %4490 = vlog2.f32 %v1861_v13  ;;  %v1811_v3 = vadd.f32 1.0, %v1810_v58  ;;  %v5652_v20 = vmul.f32 %v5563_v44, %v1829_v43  ;;  %v1858_v13 = vand.u32 2147483647, %v5586_v48 }
 0x16f   : > { %4492 = vpow2.f32 %v1494_v30  ;;  %v1818_v28 = vmul.f32 0.6931472, %v4479_v53  ;;  %vm5656_vm0 = vcmp.lt.f32.partialorder %v1813_v59, 0.0004427343  ;;  %v1856_v54 = vadd.f32 1.0, %v1855_v56  ;;  %v1131_v53 = vpop.f32.mrf.mxu0 }
 0x170   : > { %4494 = vlog2.f32 %v1843_v63  ;;  %v4481_v0 = vpop.eup %4480  ;;  %v1393_v60 = vsub.f32 0.0, %v1329_v22  ;;  %v7037_v58 = vpack.c.bf16 %v5246_v15, %v5178_v57  ;;  %v1837_v44 = vmul.f32 -0.5, %v5594_v21 }
 0x171   : > { %4496 = vpow2.f32 %v1490_v8  ;;  %v1840_v30 = vand.u32 2147483647, %v5594_v21  ;;  %v5667_v43 = vadd.f32 %v5407_v37, %v1118_v31  ;;  %v6932_v59 = vsub.s32 2, %v5514_v29 }
 0x172   : > { %4206 = vmatmul.mubr.msk.bf16.gmra.mxu1 %vm598_vm9, %v7037_v58  ;;  %v7038_v56 = vpack.c.bf16 %v5348_v16, %v5346_v25  ;;  %v1812_v22 = vmul.f32 %v5575_v35, %v1811_v3  ;;  %v1864_v15 = vmul.f32 -0.5, %v5620_v9  ;;  %v1496_v57 = vmul.f32 1.442695, %v1393_v60  ;;  %v4483_v63 = vpop.eup %4482 }
 0x173   : > { %v5677_v8 = vadd.f32 %v5407_v37, %v4167_v34  ;;  %v1800_v58 = vmul.f32 0.6931472, %v4481_v0  ;;  %vm5679_vm1 = vcmp.lt.f32.partialorder %v1831_v11, 0.0004427343  ;;  %vm5683_vm2 = vcmp.lt.f32.partialorder %v1858_v13, 0.0004427343 }
 0x174   : > { %4209 = vmatprep.mubr.msk.bf16.mxu1 %vm598_vm9, %v7038_v56  ;;  %v1846_v25 = vmul.f32 -0.5, %v5634_v51  ;;  %v1327_v16 = vand.u32 2147483647, %v5667_v43  ;;  %v5692_v60 = vrot.slane %v5526_v27, %v6932_v59  ;;  %v5695_v34 = vld [vmem:[%s5508_s24 + $0x8] sm:$0xff]  ;;  %v4485_v35 = vpop.eup %4484  ;;  %v1824_v3 = vsel %vm5628_vm14, %v5626_v47, %v1818_v28 }
 0x175   : > { %v1867_v0 = vand.u32 2147483647, %v5620_v9  ;;  %4498 = vpow2.f32 %v1496_v57  ;;  %v1332_v11 = vand.u32 2147483647, %v5677_v8  ;;  %v4487_v13 = vpop.eup %4486  ;;  %v1809_v56 = vmul.f32 0.6931472, %v4485_v35 }
 0x176   : > { %7043 = vst [vmem:[#allocation8_spill] sm:$0xff] %v5692_v60  ;;  %v1838_v32 = vadd.f32 1.0, %v1837_v44  ;;  %v1391_v5 = vsub.f32 0.0, %v1327_v16  ;;  %2736 = vbcast.lane.b32.xlu0 %v5692_v60, 256  ;;  %v5704_v59 = vadd.f32 %v5407_v37, %v1131_v53  ;;  %2740 = vbcast.lane.b32.xlu1 %v5692_v60, 264  ;;  %v1865_v41 = vadd.f32 1.0, %v1864_v15  ;;  %v4168_v60 = vpop.f32.mrf.mxu0 }
 0x177   : > { %v4489_v26 = vpop.eup %4488  ;;  %v1849_v47 = vand.u32 2147483647, %v5634_v51  ;;  %v1396_v33 = vsub.f32 0.0, %v1332_v11  ;;  %v7044_v28 = vsub.s32 0, %v5514_v29  ;;  %v7045_v44 = vmax.f32 %v5359_v40, 0.0 }
 0x178   : > { %v1806_v53 = vsel %vm5646_vm15, %v5644_v7, %v1800_v58  ;;  %v1847_v35 = vadd.f32 1.0, %v1846_v25  ;;  %v1492_v23 = vmul.f32 1.442695, %v1391_v5  ;;  %v1827_v27 = vmul.f32 0.6931472, %v4483_v63 }
 0x179   : > { %v5711_v57 = vrot.slane %v5695_v34, %v7044_v28  ;;  %v2152_v16 = vadd.f32 %v1824_v3, %v7045_v44  ;;  %v1854_v15 = vmul.f32 0.6931472, %v4487_v13  ;;  %v1857_v61 = vmul.f32 %v5586_v48, %v1856_v54 }
 0x17a   : > { %v1502_v11 = vmul.f32 1.442695, %v1396_v33  ;;  %v7046_v52 = vpack.c.bf16 %v5342_v19, %v5332_v62  ;;  %v1815_v40 = vsel %vm5656_vm0, %v1812_v22, %v1809_v56  ;;  %v1836_v3 = vmul.f32 0.6931472, %v4489_v26 }
 0x17b   : > { %4500 = vpow2.f32 %v1492_v23  ;;  %v1330_v7 = vand.u32 2147483647, %v5704_v59  ;;  %2850 = vbcast.lane.b32.xlu0 %v5711_v57, 256  ;;  %2854 = vbcast.lane.b32.xlu1 %v5711_v57, 264  ;;  %v4491_v5 = vpop.eup %4490  ;;  %v7047_v12 = vmax.f32 %v5366_v46, 0.0  ;;  %v1839_v54 = vmul.f32 %v5594_v21, %v1838_v32  ;;  %v1134_v21 = vpop.f32.mrf.mxu0 }
 0x17c   : > { %4210 = vmatmul.mubr.msk.bf16.gmra.mxu1 %vm598_vm9, %v7046_v52  ;;  %vm5731_vm3 = vcmp.lt.f32.partialorder %v1840_v30, 0.0004427343  ;;  %vm5735_vm4 = vcmp.lt.f32.partialorder %v1867_v0, 0.0004427343  ;;  %v7052_v26 = vpack.c.bf16 %v5500_v6, %v5419_v1  ;;  %v5743_v52 = vpop.eup %4492  ;;  %v5745_v23 = vadd.f32 -0.6931472, %v2152_v16 }
 0x17d   : > { %v2150_v48 = vadd.f32 %v1806_v53, %v7047_v12  ;;  %v1866_v46 = vmul.f32 %v5620_v9, %v1865_v41  ;;  %vm5748_vm5 = vcmp.lt.f32.partialorder %v1849_v47, 0.0004427343  ;;  %4502 = vpow2.f32 %v1502_v11  ;;  %v4495_v10 = vpop.eup %4494  ;;  %v4171_v33 = vpop.f32.mrf.mxu0 }
 0x17e   : > { %4213 = vmatprep.mubr.msk.bf16.mxu1 %vm598_vm9, %v7052_v26  ;;  %v1833_v30 = vsel %vm5679_vm1, %v5652_v20, %v1827_v27  ;;  %v7055_v1 = vmax.f32 %v5431_v24, 0.0  ;;  %v1860_v22 = vsel %vm5683_vm2, %v1857_v61, %v1854_v15  ;;  %v1848_v63 = vmul.f32 %v5634_v51, %v1847_v35  ;;  %v5760_v41 = vpop.eup %4496 }
 0x17f   : > { %v1842_v9 = vsel %vm5731_vm3, %v1839_v54, %v1836_v3  ;;  %v1863_v58 = vmul.f32 0.6931472, %v4491_v5  ;;  %v1263_v25 = vmax.f32 %v5667_v43, 0.0  ;;  %v1394_v0 = vsub.f32 0.0, %v1330_v7 }
 0x180   : > { %v2151_v6 = vadd.f32 %v1815_v40, %v7055_v1  ;;  %v3943_v13 = vadd.f32 -0.6931472, %v2150_v48  ;;  %v1845_v31 = vmul.f32 0.6931472, %v4495_v10  ;;  %v1888_v27 = vadd.f32 1.0, %v5743_v52 }
 0x181   : > { %v1870_v24 = vadd.f32 1.0, %v5760_v41  ;;  %v7056_v20 = vmax.f32 %v5411_v42, 0.0  ;;  %v7057_v51 = vmax.f32 %v5446_v50, 0.0  ;;  %v1268_v56 = vmax.f32 %v5677_v8, 0.0 }
 0x182   : > { %v1498_v47 = vmul.f32 1.442695, %v1394_v0  ;;  %v3944_v28 = vadd.f32 -0.6931472, %v2151_v6  ;;  %v7058_v44 = vmax.f32 %v5449_v2, 0.0  ;;  %v1266_v53 = vmax.f32 %v5704_v59, 0.0  ;;  %v5779_v42 = vpop.eup %4498 }
 0x183   : > { %v2153_v61 = vadd.f32 %v1833_v30, %v7056_v20  ;;  %v2156_v4 = vadd.f32 %v1860_v22, %v7057_v51  ;;  %4504 = vlog2.f32 %v1870_v24  ;;  %v7059_v35 = vpack.c.bf16 %v5425_v49, %v5376_v38 }
 0x184   : > { %v2154_v16 = vadd.f32 %v1842_v9, %v7058_v44  ;;  %v1869_v50 = vsel %vm5735_vm4, %v1866_v46, %v1863_v58  ;;  %4506 = vpow2.f32 %v1498_v47  ;;  %v5784_v15 = vadd.f32 %v5407_v37, %v4168_v60 }
 0x185   : > { %4214 = vmatmul.mubr.msk.bf16.gmra.mxu1 %vm598_vm9, %v7059_v35  ;;  %v5787_v2 = vadd.f32 %v5407_v37, %v1134_v21  ;;  %v7060_v11 = vpack.c.bf16 %v5613_v55, %v5602_v18  ;;  %v1851_v38 = vsel %vm5748_vm5, %v1848_v63, %v1845_v31  ;;  %4508 = vlog2.f32 %v1888_v27  ;;  %v1147_v55 = vpop.f32.mrf.mxu0 }
 0x186   : > { %v1891_v49 = vmul.f32 -0.5, %v5743_v52  ;;  %v1897_v40 = vadd.f32 1.0, %v5779_v42  ;;  %v2263_v60 = vpack.c.bf16 %v5611_v36, %v5553_v45  ;;  %v5799_v3 = vadd.f32 -0.6931472, %v2153_v61 }
 0x187   : > { %4217 = vmatprep.mubr.msk.bf16.mxu1 %vm598_vm9, %v7060_v11  ;;  %v5801_v7 = vadd.f32 -0.6931472, %v2156_v4  ;;  %v1333_v5 = vand.u32 2147483647, %v5784_v15  ;;  %v2264_v18 = vpack.c.bf16 %v3944_v28, %v3943_v13  ;;  %v7061_v12 = vmax.f32 %v5461_v17, 0.0  ;;  %v4172_v63 = vpop.f32.mrf.mxu0  ;;  %v7064_v28 = vld [vmem:[#allocation7_spill] sm:$0xff] }
 0x188   : > { %4510 = vlog2.f32 %v1897_v40  ;;  %v1331_v54 = vand.u32 2147483647, %v5787_v2  ;;  %v5807_v62 = vadd.f32 -0.6931472, %v2154_v16  ;;  %v7062_v19 = vmax.f32 %v5471_v39, 0.0  ;;  %v5816_v32 = vpop.eup %4500 }
 0x189   : > { %v2157_v48 = vadd.f32 %v1869_v50, %v7061_v12  ;;  %v1397_v45 = vsub.f32 0.0, %v1333_v5  ;;  %v7063_v36 = vsub.s32 1, %v5514_v29  ;;  %v1892_v21 = vadd.f32 1.0, %v1891_v49 }
 0x18a   : > { %v2155_v26 = vadd.f32 %v1851_v38, %v7062_v19  ;;  %v1894_v17 = vand.u32 2147483647, %v5743_v52  ;;  %v1873_v10 = vmul.f32 -0.5, %v5760_v41  ;;  %v1395_v30 = vsub.f32 0.0, %v1331_v54  ;;  %v5830_v9 = vpop.eup %4502 }
 0x18b   : > { %v5814_v46 = vrot.slane %v5695_v34, %v7063_v36  ;;  %v1876_v1 = vand.u32 2147483647, %v5760_v41  ;;  %v1879_v6 = vadd.f32 1.0, %v5816_v32  ;;  %v5824_v39 = vadd.f32 %v5407_v37, %v4171_v33 }
 0x18c   : > { %v5827_v22 = vadd.f32 %v5407_v37, %v1147_v55  ;;  %v5832_v58 = vadd.f32 -0.6931472, %v2157_v48  ;;  %v1504_v0 = vmul.f32 1.442695, %v1397_v45  ;;  %v1500_v13 = vmul.f32 1.442695, %v1395_v30 }
 0x18d   : > { %2869 = vbcast.lane.b32.xlu0 %v5814_v46, 256  ;;  %2873 = vbcast.lane.b32.xlu1 %v5814_v46, 264  ;;  %v3948_v31 = vadd.f32 -0.6931472, %v2155_v26  ;;  %v1900_v27 = vmul.f32 -0.5, %v5779_v42  ;;  %4512 = vlog2.f32 %v1879_v6  ;;  %v1924_v24 = vadd.f32 1.0, %v5830_v9 }
 0x18e   : > { %4218 = vmatmul.mubr.msk.bf16.gmra.mxu1 %vm598_vm9, %v2263_v60  ;;  %v1874_v20 = vadd.f32 1.0, %v1873_v10  ;;  %v1903_v61 = vand.u32 2147483647, %v5779_v42  ;;  %4514 = vpow2.f32 %v1504_v0  ;;  %v5840_v51 = vadd.f32 %v5407_v37, %v4172_v63 }
 0x18f   : > { %4221 = vmatprep.mubr.msk.bf16.mxu1 %vm598_vm9, %v2264_v18  ;;  %v2265_v4 = vpack.c.bf16 %v5799_v3, %v5745_v23  ;;  %4516 = vlog2.f32 %v1924_v24  ;;  %v1336_v47 = vand.u32 2147483647, %v5824_v39  ;;  %v1334_v33 = vand.u32 2147483647, %v5827_v22  ;;  %v1150_v23 = vpop.f32.mrf.mxu0 }
 0x190   : > { %v2267_v44 = vpack.c.bf16 %v5832_v58, %v5801_v7  ;;  %v5851_v16 = vmul.f32 %v5743_v52, %v1892_v21  ;;  %vm5853_vm6 = vcmp.lt.f32.partialorder %v1876_v1, 0.0004427343  ;;  %4518 = vpow2.f32 %v1500_v13  ;;  %v4505_v50 = vpop.eup %4504 }
 0x191   : > { %2706 = vbcast.lane.b32.xlu0 %v5548_v14, 272  ;;  %2725 = vbcast.lane.b32.xlu1 %v7064_v28, 272  ;;  %v2266_v11 = vpack.c.bf16 %v3948_v31, %v5807_v62  ;;  %vm5858_vm7 = vcmp.lt.f32.partialorder %v1894_v17, 0.0004427343  ;;  %v1901_v49 = vadd.f32 1.0, %v1900_v27  ;;  %v1400_v40 = vsub.f32 0.0, %v1336_v47  ;;  %v5862_v3 = vpop.eup %4506  ;;  %v4175_v1 = vpop.f32.mrf.mxu0 }
 0x192   : > { %v1398_v60 = vsub.f32 0.0, %v1334_v33  ;;  %v1875_v52 = vmul.f32 %v5760_v41, %v1874_v20  ;;  %vm5865_vm8 = vcmp.lt.f32.partialorder %v1903_v61, 0.0004427343  ;;  %v1269_v55 = vmax.f32 %v5784_v15, 0.0  ;;  %v4509_v12 = vpop.eup %4508 }
 0x193   : > { %v1337_v18 = vand.u32 2147483647, %v5840_v51  ;;  %v1872_v48 = vmul.f32 0.6931472, %v4505_v50  ;;  %v1882_v54 = vmul.f32 -0.5, %v5816_v32  ;;  %v1906_v62 = vadd.f32 1.0, %v5862_v3  ;;  %v1163_v5 = vpop.f32.mrf.mxu0 }
 0x194   : > { %v5874_v19 = vadd.f32 %v5407_v37, %v1150_v23  ;;  %v1267_v26 = vmax.f32 %v5787_v2, 0.0  ;;  %v1510_v41 = vmul.f32 1.442695, %v1400_v40  ;;  %v1506_v45 = vmul.f32 1.442695, %v1398_v60  ;;  %v7073_v50 = vld [vmem:[#allocation6_spill] sm:$0xff] }
 0x195   : > { %v1401_v36 = vsub.f32 0.0, %v1337_v18  ;;  %v4511_v21 = vpop.eup %4510  ;;  %v1902_v17 = vmul.f32 %v5779_v42, %v1901_v49  ;;  %v1885_v10 = vand.u32 2147483647, %v5816_v32  ;;  %4520 = vlog2.f32 %v1906_v62  ;;  %v7075_v40 = vld [vmem:[#allocation4_spill] sm:$0xff]  ;;  %v4176_v58 = vpop.f32.mrf.mxu0  ;;  %v6038_v2 = vld [vmem:[%s6920_s5] ss:$0 sm:$0xff] }
 0x196   : > { %4222 = vmatmul.mubr.msk.bf16.gmra.mxu1 %vm598_vm9, %v2265_v4  ;;  %v1272_v30 = vmax.f32 %v5824_v39, 0.0  ;;  %v1890_v6 = vmul.f32 0.6931472, %v4509_v12  ;;  %v1899_v63 = vmul.f32 0.6931472, %v4511_v21  ;;  %4522 = vpow2.f32 %v1510_v41  ;;  %v7076_v12 = vld [vmem:[#allocation3_spill] sm:$0xff] }
 0x197   : > { %4225 = vmatprep.mubr.msk.bf16.mxu1 %vm598_vm9, %v2266_v11  ;;  %v1512_v0 = vmul.f32 1.442695, %v1401_v36  ;;  %v1878_v13 = vsel %vm5853_vm6, %v1875_v52, %v1872_v48  ;;  %v1883_v31 = vadd.f32 1.0, %v1882_v54  ;;  %4524 = vpow2.f32 %v1506_v45 }
 0x198   : > { %v1335_v27 = vand.u32 2147483647, %v5874_v19  ;;  %v1905_v42 = vsel %vm5865_vm8, %v1902_v17, %v1899_v63  ;;  %v2752_v24 = vsub.s32 3, %v5514_v29  ;;  %v5889_v20 = vadd.f32 %v5407_v37, %v4175_v1  ;;  %v7079_v1 = vld [vmem:[#allocation5_spill] sm:$0xff] }
 0x199   : > { %4526 = vpow2.f32 %v1512_v0  ;;  %vm5891_vm10 = vcmp.lt.f32.partialorder %v1885_v10, 0.0004427343  ;;  %v1927_v4 = vmul.f32 -0.5, %v5830_v9  ;;  %v1270_v47 = vmax.f32 %v5827_v22, 0.0 }
 0x19a   : > { %v1399_v33 = vsub.f32 0.0, %v1335_v27  ;;  %v4513_v35 = vpop.eup %4512  ;;  %v1896_v23 = vsel %vm5858_vm7, %v5851_v16, %v1890_v6  ;;  %v7074_v11 = vmax.f32 %v7073_v50, 0.0  ;;  %v5905_v60 = vrot.slane %v7075_v40, %v2752_v24 }
 0x19b   : > { %v1340_v52 = vand.u32 2147483647, %v5889_v20  ;;  %v5908_v18 = vpop.eup %4514  ;;  %v7077_v48 = vmax.f32 %v7076_v12, 0.0  ;;  %v1881_v62 = vmul.f32 0.6931472, %v4513_v35  ;;  %v1884_v38 = vmul.f32 %v5816_v32, %v1883_v31 }
 0x19c   : > { %v2158_v49 = vadd.f32 %v1878_v13, %v7074_v11  ;;  %v1508_v16 = vmul.f32 1.442695, %v1399_v33  ;;  %v4517_v41 = vpop.eup %4516  ;;  %v1930_v45 = vand.u32 2147483647, %v5830_v9  ;;  %v1933_v36 = vadd.f32 1.0, %v5908_v18  ;;  %2755 = vbcast.lane.b32.xlu0 %v5905_v60, 256 }
 0x19d   : > { %v2161_v54 = vadd.f32 %v1905_v42, %v7077_v48  ;;  %v1404_v21 = vsub.f32 0.0, %v1340_v52  ;;  %v7078_v17 = vsub.s32 2, %v5514_v29  ;;  %v5925_v32 = vpop.eup %4518  ;;  %v7080_v6 = vmax.f32 %v7079_v1, 0.0  ;;  %2759 = vbcast.lane.b32.xlu1 %v5905_v60, 264 }
 0x19e   : > { %4226 = vmatmul.mubr.msk.bf16.gmra.mxu1 %vm598_vm9, %v2267_v44  ;;  %v1887_v0 = vsel %vm5891_vm10, %v1884_v38, %v1881_v62  ;;  %v1928_v13 = vadd.f32 1.0, %v1927_v4  ;;  %4528 = vpow2.f32 %v1508_v16  ;;  %v3951_v31 = vadd.f32 -0.6931472, %v2158_v49  ;;  %v1166_v16 = vpop.f32.mrf.mxu0 }
 0x19f   : > { %v5919_v10 = vrot.slane %v5695_v34, %v7078_v17  ;;  %v2160_v63 = vadd.f32 %v1896_v23, %v7080_v6  ;;  %v2159_v27 = vadd.f32 %v1887_v0, %v1263_v25  ;;  %4530 = vlog2.f32 %v1933_v36  ;;  %v7083_v17 = vld [vmem:[#allocation8_spill] sm:$0xff] }
 0x1a0   : > { %v5935_v7 = vadd.f32 %v5407_v37, %v1163_v5  ;;  %v3954_v44 = vadd.f32 -0.6931472, %v2161_v54  ;;  %v1926_v42 = vmul.f32 0.6931472, %v4517_v41  ;;  %v1909_v33 = vmul.f32 -0.5, %v5862_v3 }
 0x1a1   : > { %v1915_v61 = vadd.f32 1.0, %v5925_v32  ;;  %v3952_v35 = vadd.f32 -0.6931472, %v2159_v27  ;;  %v1936_v4 = vmul.f32 -0.5, %v5908_v18  ;;  %v1518_v23 = vmul.f32 1.442695, %v1404_v21 }
 0x1a2   : > { %2888 = vbcast.lane.b32.xlu0 %v5919_v10, 256  ;;  %v3953_v50 = vadd.f32 -0.6931472, %v2160_v63  ;;  %vm5941_vm11 = vcmp.lt.f32.partialorder %v1930_v45, 0.0004427343  ;;  %v5946_v25 = vadd.f32 %v5407_v37, %v4176_v58  ;;  %2892 = vbcast.lane.b32.xlu1 %v5919_v10, 264  ;;  %v4521_v11 = vpop.eup %4520  ;;  %v1929_v52 = vmul.f32 %v5830_v9, %v1928_v13 }
 0x1a3   : > { %4532 = vlog2.f32 %v1915_v61  ;;  %v2268_v49 = vpack.c.bf16 %v3952_v35, %v3951_v31  ;;  %v1338_v5 = vand.u32 2147483647, %v5935_v7  ;;  %v5951_v12 = vpop.eup %4522  ;;  %v1910_v54 = vadd.f32 1.0, %v1909_v33 }
 0x1a4   : > { %4534 = vpow2.f32 %v1518_v23  ;;  %v2269_v48 = vpack.c.bf16 %v3954_v44, %v3953_v50  ;;  %v1912_v62 = vand.u32 2147483647, %v5862_v3  ;;  %v1273_v38 = vmax.f32 %v5840_v51, 0.0  ;;  %v5955_v41 = vpop.eup %4524  ;;  %v4179_v50 = vpop.f32.mrf.mxu0 }
 0x1a5   : > { %v1932_v45 = vsel %vm5941_vm11, %v1929_v52, %v1926_v42  ;;  %v1937_v36 = vadd.f32 1.0, %v1936_v4  ;;  %v1939_v9 = vand.u32 2147483647, %v5908_v18  ;;  %v1960_v21 = vadd.f32 1.0, %v5951_v12  ;;  %4229 = vmatprep.mubr.msk.bf16.mxu1 %vm598_vm9, %v2268_v49 }
 0x1a6   : > { %2744 = vbcast.lane.b32.xlu0 %v7083_v17, 272  ;;  %v5963_v1 = vpop.eup %4526  ;;  %v1918_v6 = vmul.f32 -0.5, %v5925_v32  ;;  %v1942_v63 = vadd.f32 1.0, %v5955_v41  ;;  %v1402_v0 = vsub.f32 0.0, %v1338_v5  ;;  %v1341_v13 = vand.u32 2147483647, %v5946_v25  ;;  %4230 = vmatmul.mubr.msk.bf16.gmra.mxu1 %vm598_vm9, %v2269_v48 }
 0x1a7   : > { %v1908_v31 = vmul.f32 0.6931472, %v4521_v11  ;;  %v1921_v27 = vand.u32 2147483647, %v5925_v32  ;;  %4536 = vlog2.f32 %v1960_v21  ;;  %v5971_v58 = vadd.f32 %v5407_v37, %v1166_v16  ;;  %v1179_v21 = vpop.f32.mrf.mxu0 }
 0x1a8   : > { %v2164_v44 = vadd.f32 %v1932_v45, %v1268_v56  ;;  %vm5975_vm12 = vcmp.lt.f32.partialorder %v1912_v62, 0.0004427343  ;;  %4538 = vlog2.f32 %v1942_v63  ;;  %v1969_v33 = vadd.f32 1.0, %v5963_v1 }
 0x1a9   : > { %v1911_v61 = vmul.f32 %v5862_v3, %v1910_v54  ;;  %v1938_v35 = vmul.f32 %v5908_v18, %v1937_v36  ;;  %vm5982_vm13 = vcmp.lt.f32.partialorder %v1939_v9, 0.0004427343  ;;  %v1271_v23 = vmax.f32 %v5874_v19, 0.0 }
 0x1aa   : > { %v1919_v8 = vadd.f32 1.0, %v1918_v6  ;;  %4540 = vlog2.f32 %v1969_v33  ;;  %v1514_v56 = vmul.f32 1.442695, %v1402_v0  ;;  %v1405_v43 = vsub.f32 0.0, %v1341_v13 }
 0x1ab   : > { %v5987_v11 = vpop.eup %4528  ;;  %v1914_v49 = vsel %vm5975_vm12, %v1911_v61, %v1908_v31  ;;  %vm5991_vm14 = vcmp.lt.f32.partialorder %v1921_v27, 0.0004427343  ;;  %v1945_v18 = vmul.f32 -0.5, %v5955_v41  ;;  %v1339_v52 = vand.u32 2147483647, %v5971_v58 }
 0x1ac   : > { %v4531_v5 = vpop.eup %4530  ;;  %v5997_v48 = vadd.f32 -0.6931472, %v2164_v44  ;;  %v1948_v54 = vand.u32 2147483647, %v5955_v41  ;;  %v1951_v62 = vadd.f32 1.0, %v5987_v11  ;;  %4542 = vpow2.f32 %v1514_v56 }
 0x1ad   : > { %v1935_v16 = vmul.f32 0.6931472, %v4531_v5  ;;  %v1963_v45 = vmul.f32 -0.5, %v5951_v12  ;;  %v1520_v36 = vmul.f32 1.442695, %v1405_v43  ;;  %v1403_v9 = vsub.f32 0.0, %v1339_v52 }
 0x1ae   : > { %v2162_v6 = vadd.f32 %v1914_v49, %v1266_v53  ;;  %v1920_v63 = vmul.f32 %v5925_v32, %v1919_v8  ;;  %4544 = vlog2.f32 %v1951_v62  ;;  %v6006_v0 = vadd.f32 %v5407_v37, %v4179_v50 }
 0x1af   : > { %v1941_v31 = vsel %vm5982_vm13, %v1938_v35, %v1935_v16  ;;  %v1946_v27 = vadd.f32 1.0, %v1945_v18  ;;  %4546 = vpow2.f32 %v1520_v36  ;;  %v1516_v44 = vmul.f32 1.442695, %v1403_v9  ;;  %v4180_v35 = vpop.f32.mrf.mxu0 }
 0x1b0   : > { %v4533_v13 = vpop.eup %4532  ;;  %v2165_v33 = vadd.f32 %v1941_v31, %v1269_v55  ;;  %v1972_v53 = vmul.f32 -0.5, %v5963_v1  ;;  %v6016_v32 = vadd.f32 %v5407_v37, %v1179_v21  ;;  %v1964_v61 = vadd.f32 1.0, %v1963_v45 }
 0x1b1   : > { %v6010_v42 = vpop.eup %4534  ;;  %v1917_v59 = vmul.f32 0.6931472, %v4533_v13  ;;  %v1966_v50 = vand.u32 2147483647, %v5951_v12  ;;  %vm6019_vm15 = vcmp.lt.f32.partialorder %v1948_v54, 0.0004427343  ;;  %4548 = vpow2.f32 %v1516_v44 }
 0x1b2   : > { %v3955_v8 = vadd.f32 -0.6931472, %v2162_v6  ;;  %v1996_v55 = vadd.f32 1.0, %v6010_v42  ;;  %v1344_v56 = vand.u32 2147483647, %v6006_v0  ;;  %v1947_v43 = vmul.f32 %v5955_v41, %v1946_v27  ;;  %v1182_v41 = vpop.f32.mrf.mxu0 }
 0x1b3   : > { %v1923_v15 = vsel %vm5991_vm14, %v1920_v63, %v1917_v59  ;;  %v1975_v49 = vand.u32 2147483647, %v5963_v1  ;;  %v1954_v18 = vmul.f32 -0.5, %v5987_v11  ;;  %v3958_v5 = vadd.f32 -0.6931472, %v2165_v33 }
 0x1b4   : > { %v2163_v37 = vadd.f32 %v1923_v15, %v1267_v26  ;;  %v4537_v52 = vpop.eup %4536  ;;  %v1973_v54 = vadd.f32 1.0, %v1972_v53  ;;  %v1342_v62 = vand.u32 2147483647, %v6016_v32  ;;  %v2771_v3 = vsub.s32 4, %v5514_v29 }
 0x1b5   : > { %v4539_v16 = vpop.eup %4538  ;;  %v1957_v36 = vand.u32 2147483647, %v5987_v11  ;;  %v1408_v9 = vsub.f32 0.0, %v1344_v56  ;;  %v6041_v26 = vadd.f32 %v6038_v2, %v4180_v35  ;;  %4550 = vlog2.f32 %v1996_v55 }
 0x1b6   : > { %v3956_v45 = vadd.f32 -0.6931472, %v2163_v37  ;;  %v1944_v21 = vmul.f32 0.6931472, %v4539_v16  ;;  %v1406_v6 = vsub.f32 0.0, %v1342_v62  ;;  %v6046_v63 = vrot.slane %v7075_v40, %v2771_v3 }
 0x1b7   : > { %v4541_v13 = vpop.eup %4540  ;;  %v1962_v27 = vmul.f32 0.6931472, %v4537_v52  ;;  %v1955_v44 = vadd.f32 1.0, %v1954_v18  ;;  %v1345_v33 = vand.u32 2147483647, %v6041_v26  ;;  %v2271_v59 = vpack.c.bf16 %v3958_v5, %v5997_v48  ;;  %v4183_v18 = vpop.f32.mrf.mxu0 }
 0x1b8   : > { %v2270_v31 = vpack.c.bf16 %v3956_v45, %v3955_v8  ;;  %v1971_v53 = vmul.f32 0.6931472, %v4541_v13  ;;  %v1974_v35 = vmul.f32 %v5963_v1, %v1973_v54  ;;  %vm6051_vm0 = vcmp.lt.f32.partialorder %v1975_v49, 0.0004427343  ;;  %2774 = vbcast.lane.b32.xlu1 %v6046_v63, 256  ;;  %2778 = vbcast.lane.b32.xlu0 %v6046_v63, 264 }
 0x1b9   : > { %v6057_v40 = vpop.eup %4542  ;;  %v1965_v8 = vmul.f32 %v5951_v12, %v1964_v61  ;;  %v1526_v55 = vmul.f32 1.442695, %v1408_v9  ;;  %v1522_v56 = vmul.f32 1.442695, %v1406_v6  ;;  %v1409_v37 = vsub.f32 0.0, %v1345_v33 }
 0x1ba   : > { %4233 = vmatprep.mubr.msk.bf16.mxu1 %vm598_vm9, %v2270_v31  ;;  %vm6061_vm1 = vcmp.lt.f32.partialorder %v1966_v50, 0.0004427343  ;;  %v1950_v48 = vsel %vm6019_vm15, %v1947_v43, %v1944_v21  ;;  %v1977_v49 = vsel %vm6051_vm0, %v1974_v35, %v1971_v53  ;;  %v1978_v52 = vadd.f32 1.0, %v6057_v40 }
 0x1bb   : > { %4234 = vmatmul.mubr.msk.bf16.gmra.mxu1 %vm598_vm9, %v2271_v59  ;;  %v4545_v12 = vpop.eup %4544  ;;  %v1968_v61 = vsel %vm6061_vm1, %v1965_v8, %v1962_v27  ;;  %v1956_v5 = vmul.f32 %v5987_v11, %v1955_v44  ;;  %vm6074_vm2 = vcmp.lt.f32.partialorder %v1957_v36, 0.0004427343  ;;  %4552 = vpow2.f32 %v1522_v56  ;;  %v1195_v36 = vpop.f32.mrf.mxu0 }
 0x1bc   : > { %v6078_v4 = vpop.eup %4546  ;;  %v2169_v43 = vadd.f32 %v1977_v49, %v1273_v38  ;;  %v1953_v54 = vmul.f32 0.6931472, %v4545_v12  ;;  %4554 = vlog2.f32 %v1978_v52  ;;  %v1528_v62 = vmul.f32 1.442695, %v1409_v37  ;;  %2858 = vbcast.lane.b32.xlu1 %v5711_v57, 272  ;;  %2877 = vbcast.lane.b32.xlu0 %v5814_v46, 272 }
 0x1bd   : > { %v2166_v16 = vadd.f32 %v1950_v48, %v1270_v47  ;;  %v1999_v11 = vmul.f32 -0.5, %v6010_v42  ;;  %v2005_v45 = vadd.f32 1.0, %v6078_v4  ;;  %4556 = vpow2.f32 %v1526_v55  ;;  %v4184_v27 = vpop.f32.mrf.mxu0 }
 0x1be   : > { %v6087_v9 = vpop.eup %4548  ;;  %v2168_v51 = vadd.f32 %v1968_v61, %v1272_v30  ;;  %v1959_v38 = vsel %vm6074_vm2, %v1956_v5, %v1953_v54  ;;  %4558 = vpow2.f32 %v1528_v62  ;;  %v6094_v21 = vadd.f32 %v6038_v2, %v1182_v41 }
 0x1bf   : > { %v2167_v22 = vadd.f32 %v1959_v38, %v1271_v23  ;;  %4560 = vlog2.f32 %v2005_v45  ;;  %v3962_v47 = vadd.f32 -0.6931472, %v2169_v43  ;;  %v2002_v6 = vand.u32 2147483647, %v6010_v42  ;;  %v1198_v49 = vpop.f32.mrf.mxu0 }
 0x1c0   : > { %v1987_v13 = vadd.f32 1.0, %v6087_v9  ;;  %v3959_v39 = vadd.f32 -0.6931472, %v2166_v16  ;;  %v1981_v31 = vmul.f32 -0.5, %v6057_v40  ;;  %v3961_v44 = vadd.f32 -0.6931472, %v2168_v51 }
 0x1c1   : > { %v3960_v30 = vadd.f32 -0.6931472, %v2167_v22  ;;  %v2000_v33 = vadd.f32 1.0, %v1999_v11  ;;  %v1343_v41 = vand.u32 2147483647, %v6094_v21  ;;  %v6105_v23 = vadd.f32 %v6038_v2, %v4183_v18 }
 0x1c2   : > { %4562 = vlog2.f32 %v1987_v13  ;;  %v4551_v59 = vpop.eup %4550  ;;  %v1984_v19 = vand.u32 2147483647, %v6057_v40  ;;  %v6108_v35 = vadd.f32 %v6038_v2, %v1195_v36  ;;  %v2273_v15 = vpack.c.bf16 %v3962_v47, %v3961_v44  ;;  %v4187_v36 = vpop.f32.mrf.mxu0 }
 0x1c3   : > { %v2272_v53 = vpack.c.bf16 %v3960_v30, %v3959_v39  ;;  %v2008_v8 = vmul.f32 -0.5, %v6078_v4  ;;  %v1407_v55 = vsub.f32 0.0, %v1343_v41  ;;  %v6114_v56 = vrot.slane %v5695_v34, %v2752_v24 }
 0x1c4   : > { %v1276_v37 = vmax.f32 %v5889_v20, 0.0  ;;  %v1982_v1 = vadd.f32 1.0, %v1981_v31  ;;  %v1348_v48 = vand.u32 2147483647, %v6105_v23  ;;  %v1346_v18 = vand.u32 2147483647, %v6108_v35 }
 0x1c5   : > { %4237 = vmatprep.mubr.msk.bf16.mxu1 %vm598_vm9, %v2272_v53  ;;  %v1998_v52 = vmul.f32 0.6931472, %v4551_v59  ;;  %v1274_v12 = vmax.f32 %v5935_v7, 0.0  ;;  %v1277_v61 = vmax.f32 %v5946_v25, 0.0  ;;  %v1990_v5 = vmul.f32 -0.5, %v6087_v9  ;;  %2907 = vbcast.lane.b32.xlu1 %v6114_v56, 256 }
 0x1c6   : > { %4238 = vmatmul.mubr.msk.bf16.gmra.mxu1 %vm598_vm9, %v2273_v15  ;;  %v1524_v34 = vmul.f32 1.442695, %v1407_v55  ;;  %v1412_v24 = vsub.f32 0.0, %v1348_v48  ;;  %v1410_v20 = vsub.f32 0.0, %v1346_v18  ;;  %2911 = vbcast.lane.b32.xlu0 %v6114_v56, 264  ;;  %v2001_v43 = vmul.f32 %v6010_v42, %v2000_v33 }
 0x1c7   : > { %vm6129_vm3 = vcmp.lt.f32.partialorder %v2002_v6, 0.0004427343  ;;  %v2009_v7 = vadd.f32 1.0, %v2008_v8  ;;  %v2011_v25 = vand.u32 2147483647, %v6078_v4  ;;  %v1983_v16 = vmul.f32 %v6057_v40, %v1982_v1 }
 0x1c8   : > { %v6126_v50 = vpop.eup %4552  ;;  %vm6135_vm4 = vcmp.lt.f32.partialorder %v1984_v19, 0.0004427343  ;;  %v1993_v45 = vand.u32 2147483647, %v6087_v9  ;;  %4564 = vpow2.f32 %v1524_v34  ;;  %v1534_v22 = vmul.f32 1.442695, %v1412_v24 }
 0x1c9   : > { %v4555_v62 = vpop.eup %4554  ;;  %v2014_v38 = vadd.f32 1.0, %v6126_v50  ;;  %v6144_v47 = vadd.f32 %v6038_v2, %v4184_v27  ;;  %v2004_v40 = vsel %vm6129_vm3, %v2001_v43, %v1998_v52  ;;  %v1275_v13 = vmax.f32 %v5971_v58, 0.0  ;;  %2710 = vbcast.lane.b32.xlu1 %v5548_v14, 280 }
 0x1ca   : > { %v6140_v51 = vpop.eup %4556  ;;  %v1980_v42 = vmul.f32 0.6931472, %v4555_v62  ;;  %v1991_v39 = vadd.f32 1.0, %v1990_v5  ;;  %v1530_v30 = vmul.f32 1.442695, %v1410_v20  ;;  %2729 = vbcast.lane.b32.xlu0 %v7064_v28, 280  ;;  %v2010_v27 = vmul.f32 %v6078_v4, %v2009_v7  ;;  %v1211_v28 = vpop.f32.mrf.mxu0 }
 0x1cb   : > { %v6146_v6 = vpop.eup %4558  ;;  %vm6156_vm5 = vcmp.lt.f32.partialorder %v2011_v25, 0.0004427343  ;;  %vm6161_vm6 = vcmp.lt.f32.partialorder %v1993_v45, 0.0004427343  ;;  %4566 = vpow2.f32 %v1534_v22  ;;  %v6166_v14 = vadd.f32 %v6038_v2, %v1198_v49 }
 0x1cc   : > { %v4561_v31 = vpop.eup %4560  ;;  %v1986_v44 = vsel %vm6135_vm4, %v1983_v16, %v1980_v42  ;;  %v2041_v41 = vadd.f32 1.0, %v6146_v6  ;;  %v2172_v53 = vadd.f32 %v2004_v40, %v1276_v37  ;;  %v2032_v19 = vadd.f32 1.0, %v6140_v51  ;;  %v4188_v34 = vpop.f32.mrf.mxu0  ;;  %v6190_v42 = vld [vmem:[%s5508_s24] sm:$0xff] }
 0x1cd   : > { %v2007_v59 = vmul.f32 0.6931472, %v4561_v31  ;;  %4568 = vlog2.f32 %v2014_v38  ;;  %v1349_v4 = vand.u32 2147483647, %v6144_v47  ;;  %v2170_v8 = vadd.f32 %v1986_v44, %v1274_v12  ;;  %2763 = vbcast.lane.b32.xlu1 %v5905_v60, 272 }
 0x1ce   : > { %v1992_v1 = vmul.f32 %v6087_v9, %v1991_v39  ;;  %4570 = vpow2.f32 %v1530_v30  ;;  %v1347_v37 = vand.u32 2147483647, %v6166_v14  ;;  %v6176_v52 = vadd.f32 %v6038_v2, %v4187_v36 }
 0x1cf   : > { %v4563_v15 = vpop.eup %4562  ;;  %v2013_v55 = vsel %vm6156_vm5, %v2010_v27, %v2007_v59  ;;  %4572 = vlog2.f32 %v2041_v41  ;;  %v1413_v49 = vsub.f32 0.0, %v1349_v4  ;;  %v6179_v5 = vadd.f32 %v6038_v2, %v1211_v28  ;;  %v1214_v59 = vpop.f32.mrf.mxu0 }
 0x1d0   : > { %v2173_v48 = vadd.f32 %v2013_v55, %v1277_v61  ;;  %v1989_v18 = vmul.f32 0.6931472, %v4563_v15  ;;  %v2790_v12 = vsub.s32 5, %v5514_v29  ;;  %v3965_v9 = vadd.f32 -0.6931472, %v2172_v53 }
 0x1d1   : > { %4574 = vlog2.f32 %v2032_v19  ;;  %v1536_v61 = vmul.f32 1.442695, %v1413_v49  ;;  %v1411_v54 = vsub.f32 0.0, %v1347_v37  ;;  %v1352_v7 = vand.u32 2147483647, %v6176_v52 }
 0x1d2   : > { %v1995_v24 = vsel %vm6161_vm6, %v1992_v1, %v1989_v18  ;;  %v3966_v20 = vadd.f32 -0.6931472, %v2173_v48  ;;  %v3963_v25 = vadd.f32 -0.6931472, %v2170_v8  ;;  %v1350_v62 = vand.u32 2147483647, %v6179_v5 }
 0x1d3   : > { %v2171_v43 = vadd.f32 %v1995_v24, %v1275_v13  ;;  %4576 = vpow2.f32 %v1536_v61  ;;  %v6187_v16 = vadd.f32 %v6038_v2, %v4188_v34  ;;  %v1532_v45 = vmul.f32 1.442695, %v1411_v54 }
 0x1d4   : > { %v1416_v36 = vsub.f32 0.0, %v1352_v7  ;;  %v6195_v38 = vrot.slane %v6190_v42, %v2790_v12  ;;  %v2035_v40 = vmul.f32 -0.5, %v6140_v51  ;;  %v2275_v13 = vpack.c.bf16 %v3966_v20, %v3965_v9 }
 0x1d5   : > { %v3964_v11 = vadd.f32 -0.6931472, %v2171_v43  ;;  %v6197_v22 = vpop.eup %4564  ;;  %v2044_v30 = vmul.f32 -0.5, %v6146_v6  ;;  %4578 = vpow2.f32 %v1532_v45  ;;  %v1414_v27 = vsub.f32 0.0, %v1350_v62 }
 0x1d6   : > { %v2023_v31 = vadd.f32 1.0, %v6197_v22  ;;  %2793 = vbcast.lane.b32.xlu0 %v6195_v38, 256  ;;  %2797 = vbcast.lane.b32.xlu1 %v6195_v38, 264  ;;  %v1542_v44 = vmul.f32 1.442695, %v1416_v36  ;;  %v2036_v28 = vadd.f32 1.0, %v2035_v40  ;;  %v6216_v18 = vadd.f32 %v6038_v2, %v1214_v59 }
 0x1d7   : > { %v2274_v39 = vpack.c.bf16 %v3964_v11, %v3963_v25  ;;  %v1353_v33 = vand.u32 2147483647, %v6187_v16  ;;  %v2017_v53 = vmul.f32 -0.5, %v6126_v50  ;;  %v2045_v4 = vadd.f32 1.0, %v2044_v30  ;;  %v6229_v11 = vld [vmem:[%s5508_s24 + $0x8] sm:$0xff]  ;;  %s591_s24 = scalar_lea.vmem %s6929_s14, %s3848_s21 }
 0x1d8   : > { %4580 = vlog2.f32 %v2023_v31  ;;  %v6206_v41 = vpop.eup %4566  ;;  %v1538_v15 = vmul.f32 1.442695, %v1414_v27  ;;  %v1280_v49 = vmax.f32 %v6006_v0, 0.0  ;;  %v2038_v37 = vand.u32 2147483647, %v6140_v51 }
 0x1d9   : > { %4241 = vmatprep.mubr.msk.bf16.mxu1 %vm598_vm9, %v2274_v39  ;;  %4582 = vpow2.f32 %v1542_v44  ;;  %v1417_v8 = vsub.f32 0.0, %v1353_v33  ;;  %v2068_v1 = vadd.f32 1.0, %v6206_v41  ;;  %v2020_v34 = vand.u32 2147483647, %v6126_v50 }
 0x1da   : > { %4242 = vmatmul.mubr.msk.bf16.gmra.mxu1 %vm598_vm9, %v2275_v13  ;;  %v4569_v58 = vpop.eup %4568  ;;  %2896 = vbcast.lane.b32.xlu0 %v5919_v10, 272  ;;  %v2026_v9 = vmul.f32 -0.5, %v6197_v22  ;;  %v2037_v61 = vmul.f32 %v6140_v51, %v2036_v28  ;;  %v2018_v20 = vadd.f32 1.0, %v2017_v53  ;;  %v2047_v43 = vand.u32 2147483647, %v6146_v6 }
 0x1db   : > { %v6211_v19 = vpop.eup %4570  ;;  %v2046_v2 = vmul.f32 %v6146_v6, %v2045_v4  ;;  %v1544_v7 = vmul.f32 1.442695, %v1417_v8  ;;  %v2016_v25 = vmul.f32 0.6931472, %v4569_v58  ;;  %v1351_v62 = vand.u32 2147483647, %v6216_v18 }
 0x1dc   : > { %v4573_v55 = vpop.eup %4572  ;;  %v2050_v48 = vadd.f32 1.0, %v6211_v19  ;;  %v6234_v51 = vrot.slane %v6229_v11, %v2771_v3  ;;  %v2027_v36 = vadd.f32 1.0, %v2026_v9  ;;  %v2019_v6 = vmul.f32 %v6126_v50, %v2018_v20 }
 0x1dd   : > { %v2043_v54 = vmul.f32 0.6931472, %v4573_v55  ;;  %vm6238_vm7 = vcmp.lt.f32.partialorder %v2047_v43, 0.0004427343  ;;  %v1415_v39 = vsub.f32 0.0, %v1351_v62  ;;  %v2809_v30 = vsub.s32 6, %v5514_v29 }
 0x1de   : > { %v4575_v24 = vpop.eup %4574  ;;  %4584 = vlog2.f32 %v2050_v48  ;;  %2926 = vbcast.lane.b32.xlu1 %v6234_v51, 256  ;;  %2930 = vbcast.lane.b32.xlu0 %v6234_v51, 264  ;;  %vm6245_vm8 = vcmp.lt.f32.partialorder %v2020_v34, 0.0004427343  ;;  %v2029_v50 = vand.u32 2147483647, %v6197_v22 }
 0x1df   : > { %4586 = vpow2.f32 %v1538_v15  ;;  %v2034_v45 = vmul.f32 0.6931472, %v4575_v24  ;;  %v2049_v31 = vsel %vm6238_vm7, %v2046_v2, %v2043_v54  ;;  %vm6254_vm10 = vcmp.lt.f32.partialorder %v2038_v37, 0.0004427343 }
 0x1e0   : > { %v6225_v0 = vpop.eup %4576  ;;  %4588 = vlog2.f32 %v2068_v1  ;;  %v2022_v33 = vsel %vm6245_vm8, %v2019_v6, %v2016_v25  ;;  %v1281_v59 = vmax.f32 %v6041_v26, 0.0  ;;  %v1540_v58 = vmul.f32 1.442695, %v1415_v39 }
 0x1e1   : > { %v2077_v40 = vadd.f32 1.0, %v6225_v0  ;;  %4590 = vpow2.f32 %v1544_v7  ;;  %v2040_v53 = vsel %vm6254_vm10, %v2037_v61, %v2034_v45  ;;  %v1278_v4 = vmax.f32 %v6016_v32, 0.0 }
 0x1e2   : > { %v6252_v44 = vpop.eup %4578  ;;  %v2028_v15 = vmul.f32 %v6197_v22, %v2027_v36  ;;  %v2177_v55 = vadd.f32 %v2049_v31, %v1281_v59  ;;  %2748 = vbcast.lane.b32.xlu1 %v7083_v17, 280  ;;  %2782 = vbcast.lane.b32.xlu0 %v6046_v63, 272  ;;  %v6271_v26 = vrot.slane %v6190_v42, %v2809_v30  ;;  %v1279_v32 = vmax.f32 %v6094_v21, 0.0 }
 0x1e3   : > { %4592 = vlog2.f32 %v2077_v40  ;;  %v2059_v8 = vadd.f32 1.0, %v6252_v44  ;;  %v2174_v37 = vadd.f32 %v2022_v33, %v1278_v4  ;;  %vm2030_vm11 = vcmp.lt.f32.partialorder %v2029_v50, 0.0004427343 }
 0x1e4   : > { %4594 = vpow2.f32 %v1540_v58  ;;  %v2176_v22 = vadd.f32 %v2040_v53, %v1280_v49  ;;  %v2053_v9 = vmul.f32 -0.5, %v6211_v19  ;;  %v2080_v17 = vmul.f32 -0.5, %v6225_v0 }
 0x1e5   : > { %v4581_v28 = vpop.eup %4580  ;;  %4596 = vlog2.f32 %v2059_v8  ;;  %v3970_v61 = vadd.f32 -0.6931472, %v2177_v55  ;;  %v2071_v20 = vmul.f32 -0.5, %v6206_v41  ;;  %v3967_v2 = vadd.f32 -0.6931472, %v2174_v37 }
 0x1e6   : > { %v2025_v1 = vmul.f32 0.6931472, %v4581_v28  ;;  %v6273_v48 = vpop.eup %4582  ;;  %2812 = vbcast.lane.b32.xlu1 %v6271_v26, 256  ;;  %2816 = vbcast.lane.b32.xlu0 %v6271_v26, 264  ;;  %v3969_v49 = vadd.f32 -0.6931472, %v2176_v22  ;;  %v6296_v59 = vrot.slane %v6229_v11, %v2790_v12 }
 0x1e7   : > { %v2104_v43 = vadd.f32 1.0, %v6273_v48  ;;  %v2054_v25 = vadd.f32 1.0, %v2053_v9  ;;  %v2056_v62 = vand.u32 2147483647, %v6211_v19  ;;  %v2081_v40 = vadd.f32 1.0, %v2080_v17 }
 0x1e8   : > { %v2031_v34 = vsel %vm2030_vm11, %v2028_v15, %v2025_v1  ;;  %v2062_v6 = vmul.f32 -0.5, %v6252_v44  ;;  %v2277_v3 = vpack.c.bf16 %v3970_v61, %v3969_v49  ;;  %v2072_v31 = vadd.f32 1.0, %v2071_v20 }
 0x1e9   : > { %v2175_v24 = vadd.f32 %v2031_v34, %v1279_v32  ;;  %v2083_v50 = vand.u32 2147483647, %v6225_v0  ;;  %4598 = vlog2.f32 %v2104_v43  ;;  %v2074_v27 = vand.u32 2147483647, %v6206_v41 }
 0x1ea   : > { %2862 = vbcast.lane.b32.xlu1 %v5711_v57, 280  ;;  %2881 = vbcast.lane.b32.xlu0 %v5814_v46, 280  ;;  %vm6299_vm12 = vcmp.lt.f32.partialorder %v2056_v62, 0.0004427343  ;;  %v1285_v57 = vmax.f32 %v6144_v47, 0.0  ;;  %v2055_v46 = vmul.f32 %v6211_v19, %v2054_v25  ;;  %v2082_v12 = vmul.f32 %v6225_v0, %v2081_v40 }
 0x1eb   : > { %v4585_v54 = vpop.eup %4584  ;;  %v3968_v7 = vadd.f32 -0.6931472, %v2175_v24  ;;  %v2063_v8 = vadd.f32 1.0, %v2062_v6  ;;  %v2073_v55 = vmul.f32 %v6206_v41, %v2072_v31  ;;  %vm2084_vm13 = vcmp.lt.f32.partialorder %v2083_v50, 0.0004427343 }
 0x1ec   : > { %v6282_v21 = vpop.eup %4586  ;;  %v2052_v33 = vmul.f32 0.6931472, %v4585_v54  ;;  %v2065_v1 = vand.u32 2147483647, %v6252_v44  ;;  %vm6313_vm14 = vcmp.lt.f32.partialorder %v2074_v27, 0.0004427343 }
 0x1ed   : > { %v4589_v45 = vpop.eup %4588  ;;  %v2276_v36 = vpack.c.bf16 %v3968_v7, %v3967_v2  ;;  %v2086_v13 = vadd.f32 1.0, %v6282_v21  ;;  %v2828_v41 = vsub.s32 7, %v5514_v29  ;;  %v1282_v34 = vmax.f32 %v6108_v35, 0.0  ;;  %v6329_v2 = vpop.permute.xlu0 %2698 }
 0x1ee   : > { %v6287_v39 = vpop.eup %4590  ;;  %v2070_v28 = vmul.f32 0.6931472, %v4589_v45  ;;  %2915 = vbcast.lane.b32.xlu1 %v6114_v56, 272  ;;  %v2058_v19 = vsel %vm6299_vm12, %v2055_v46, %v2052_v33  ;;  %2945 = vbcast.lane.b32.xlu0 %v6296_v59, 256  ;;  %v1284_v24 = vmax.f32 %v6105_v23, 0.0  ;;  %v2064_v20 = vmul.f32 %v6252_v44, %v2063_v8 }
 0x1ef   : > { %4600 = vlog2.f32 %v2086_v13  ;;  %4245 = vmatprep.mubr.msk.bf16.mxu1 %vm598_vm9, %v2276_v36  ;;  %v2113_v4 = vadd.f32 1.0, %v6287_v39  ;;  %v2178_v43 = vadd.f32 %v2058_v19, %v1282_v34  ;;  %v1283_v54 = vmax.f32 %v6166_v14, 0.0 }
 0x1f0   : > { %v4593_v58 = vpop.eup %4592  ;;  %4246 = vmatmul.mubr.msk.bf16.gmra.mxu1 %vm598_vm9, %v2277_v3  ;;  %v2076_v22 = vsel %vm6313_vm14, %v2073_v55, %v2070_v28  ;;  %vm2066_vm15 = vcmp.lt.f32.partialorder %v2065_v1, 0.0004427343  ;;  %v6335_v23 = vrot.slane %v6190_v42, %v2828_v41  ;;  %v2089_v44 = vmul.f32 -0.5, %v6282_v21  ;;  %v3394_v42 = vld [vmem:[%s6923_s8 + $0x18] sm:$0xff] }
 0x1f1   : > { %v2079_v15 = vmul.f32 0.6931472, %v4593_v58  ;;  %4602 = vlog2.f32 %v2113_v4  ;;  %v6311_v37 = vpop.eup %4594  ;;  %v2180_v7 = vadd.f32 %v2076_v22, %v1284_v24  ;;  %v2116_v14 = vmul.f32 -0.5, %v6287_v39  ;;  %v6348_v33 = vpop.permute.xlu0 %2702  ;;  %4257 = vmatprep.subr.mxu0 %v3394_v42 }
 0x1f2   : > { %v4597_v0 = vpop.eup %4596  ;;  %v2095_v9 = vadd.f32 1.0, %v6311_v37  ;;  %2949 = vbcast.lane.b32.xlu1 %v6296_v59, 264  ;;  %2767 = vbcast.lane.b32.xlu0 %v5905_v60, 280  ;;  %v2107_v62 = vmul.f32 -0.5, %v6273_v48  ;;  %v3971_v45 = vadd.f32 -0.6931472, %v2178_v43  ;;  %v6342_v60 = vpop.permute.xlu1 %2717  ;;  %v6359_v8 = vrot.slane %v6229_v11, %v2809_v30 }
 0x1f3   : > { %v2085_v32 = vsel %vm2084_vm13, %v2082_v12, %v2079_v15  ;;  %v2061_v61 = vmul.f32 0.6931472, %v4597_v0  ;;  %v3973_v6 = vadd.f32 -0.6931472, %v2180_v7  ;;  %v2090_v31 = vadd.f32 1.0, %v2089_v44  ;;  %4258 = vmatpush3.msra.mxu0 %v3394_v42 }
 0x1f4   : > { %v2181_v17 = vadd.f32 %v2085_v32, %v1285_v57  ;;  %4604 = vlog2.f32 %v2095_v9  ;;  %v2117_v50 = vadd.f32 1.0, %v2116_v14  ;;  %v2098_v27 = vmul.f32 -0.5, %v6311_v37 }
 0x1f5   : > { %v2067_v49 = vsel %vm2066_vm15, %v2064_v20, %v2061_v61  ;;  %v2108_v28 = vadd.f32 1.0, %v2107_v62  ;;  %v2092_v53 = vand.u32 2147483647, %v6282_v21  ;;  %v2119_v57 = vand.u32 2147483647, %v6287_v39 }
 0x1f6   : > { %v2179_v35 = vadd.f32 %v2067_v49, %v1283_v54  ;;  %v3974_v25 = vadd.f32 -0.6931472, %v2181_v17  ;;  %2801 = vbcast.lane.b32.xlu1 %v6195_v38, 272  ;;  %v4599_v40 = vpop.eup %4598  ;;  %2831 = vbcast.lane.b32.xlu0 %v6335_v23, 256  ;;  %v2110_v4 = vand.u32 2147483647, %v6273_v48  ;;  %v2091_v55 = vmul.f32 %v6282_v21, %v2090_v31  ;;  %v6370_v22 = vpop.permute.xlu1 %2721 }
 0x1f7   : > { %v2106_v12 = vmul.f32 0.6931472, %v4599_v40  ;;  %v2118_v47 = vmul.f32 %v6287_v39, %v2117_v50  ;;  %v2099_v19 = vadd.f32 1.0, %v2098_v27  ;;  %v2109_v32 = vmul.f32 %v6273_v48, %v2108_v28  ;;  %v6380_v48 = vpop.permute.xlu0 %2736  ;;  %v6436_v50 = vld [vmem:[%s6916_s1 + $0x8] sm:$0xff]  }
 0x1f8   : > { %v3972_v36 = vadd.f32 -0.6931472, %v2179_v35  ;;  %v2279_v58 = vpack.c.bf16 %v3974_v25, %v3973_v6  ;;  %vm6365_vm0 = vcmp.lt.f32.partialorder %v2092_v53, 0.0004427343  ;;  %vm2120_vm1 = vcmp.lt.f32.partialorder %v2119_v57, 0.0004427343 }
 0x1f9   : > { %vm6372_vm2 = vcmp.lt.f32.partialorder %v2110_v4, 0.0004427343  ;;  %v1289_v39 = vmax.f32 %v6187_v16, 0.0  ;;  %v1286_v17 = vmax.f32 %v6179_v5, 0.0  ;;  %v1288_v61 = vmax.f32 %v6176_v52, 0.0 }
 0x1fa   : > { %v2278_v3 = vpack.c.bf16 %v3972_v36, %v3971_v45  ;;  %2835 = vbcast.lane.b32.xlu1 %v6335_v23, 264  ;;  %2900 = vbcast.lane.b32.xlu0 %v5919_v10, 280  ;;  %v2101_v10 = vand.u32 2147483647, %v6311_v37  ;;  %v2112_v24 = vsel %vm6372_vm2, %v2109_v32, %v2106_v12  ;;  %v2100_v54 = vmul.f32 %v6311_v37, %v2099_v19  ;;  %v6391_v5 = vpop.permute.xlu1 %2740 }
 0x1fb   : > { %v1287_v7 = vmax.f32 %v6216_v18, 0.0  ;;  %v2184_v49 = vadd.f32 %v2112_v24, %v1288_v61  ;;  %v6393_v25 = vpop.permute.xlu0 %2850  ;;  %v2981_v18 = vrot.slane %v6229_v11, %v2828_v41  ;;  %v4643_v53 = vmov 0.0   ;;  %v3392_v24 = vld [vmem:[%s6923_s8 + $0x8] sm:$0xff] }
 0x1fc   : > { %v4601_v13 = vpop.eup %4600  ;;  %4249 = vmatprep.mubr.msk.bf16.mxu1 %vm598_vm9, %v2278_v3  ;;  %vm2102_vm3 = vcmp.lt.f32.partialorder %v2101_v10, 0.0004427343  ;;  %599 = vst.msk [vmem:[#allocation2] sm:$0xff] %vm598_vm9, %v4643_v53  ;;  %600 = vst.msk [vmem:[#allocation2 + $0x8] sm:$0xff] %vm598_vm9, %v4643_v53  ;;  %v6447_v4 = vunpack.c.l.bf16 %v6436_v50  ;;  %vm3359_vm4 = vcmask 1041409   ;;  %vm3361_vm5 = vcmask 1042434  }
 0x1fd   : > { %v2088_v46 = vmul.f32 0.6931472, %v4601_v13  ;;  %4250 = vmatmul.mubr.msk.bf16.gmra.mxu1 %vm598_vm9, %v2279_v58  ;;  %v3977_v45 = vadd.f32 -0.6931472, %v2184_v49  ;;  %vm3363_vm6 = vcmask 1043459   ;;  %vm3365_vm7 = vcmask 1044484  }
 0x1fe   : > { %v4603_v15 = vpop.eup %4602  ;;  %2934 = vbcast.lane.b32.xlu1 %v6234_v51, 272  ;;  %2964 = vbcast.lane.b32.xlu0 %v6359_v8, 256  ;;  %vm3367_vm8 = vcmask 1045509   ;;  %vm3369_vm10 = vcmask 1046534   ;;  %vm3371_vm11 = vcmask 1047559   ;;  %vm4644_vm14 = vmmov 0  }
 0x1ff   : > { %v2115_v1 = vmul.f32 0.6931472, %v4603_v15  ;;  %v2094_v21 = vsel %vm6365_vm0, %v2091_v55, %v2088_v46  ;;  %v6405_v40 = vpop.permute.xlu0 %2869  ;;  %vm3682_vm15 = vcmask 257024  }
 0x200   : > { %v2182_v16 = vadd.f32 %v2094_v21, %v1286_v17 }
 0x201   : > { %v2121_v34 = vsel %vm2120_vm1, %v2118_v47, %v2115_v1  ;;  %v4605_v9 = vpop.eup %4604 }
 0x202   : > { %v2185_v20 = vadd.f32 %v2121_v34, %v1289_v39  ;;  %v2097_v43 = vmul.f32 0.6931472, %v4605_v9  ;;  %2968 = vbcast.lane.b32.xlu1 %v6359_v8, 264  ;;  %2786 = vbcast.lane.b32.xlu0 %v6046_v63, 280  ;;  %v3975_v52 = vadd.f32 -0.6931472, %v2182_v16  ;;  %v6401_v63 = vpop.permute.xlu1 %2854 }
 0x203   : > { %v2707_v29 = vpop.permute.xlu0 %2706  ;;  %v3393_v9 = vld [vmem:[%s6923_s8 + $0x10] sm:$0xff] }
 0x204   : > { %v2103_v35 = vsel %vm2102_vm3, %v2100_v54, %v2097_v43  ;;  %v3978_v14 = vadd.f32 -0.6931472, %v2185_v20  ;;  %4259 = vmatprep.subr.mxu0 %v3393_v9 }
 0x205   : > { %v2183_v44 = vadd.f32 %v2103_v35, %v1287_v7  ;;  %4260 = vmatpush3.msra.mxu0 %v3393_v9 }
 0x206   : > { %2820 = vbcast.lane.b32.xlu1 %v6271_v26, 272  ;;  %2919 = vbcast.lane.b32.xlu0 %v6114_v56, 280  ;;  %v2281_v36 = vpack.c.bf16 %v3978_v14, %v3977_v45  ;;  %v6408_v56 = vpop.permute.xlu1 %2873 }
 0x207   : > { %v3976_v62 = vadd.f32 -0.6931472, %v2183_v44  ;;  %4261 = vmatprep.subr.mxu0 %v3392_v24 }
 0x208   : > { %4262 = vmatpush3.msra.mxu0 %v3392_v24 }
 0x209   : > { %v2280_v37 = vpack.c.bf16 %v3976_v62, %v3975_v52 }
 0x20a   : > { %2953 = vbcast.lane.b32.xlu1 %v6296_v59, 272  ;;  %2983 = vbcast.lane.b32.xlu0 %v2981_v18, 256  ;;  %v6412_v11 = vpop.permute.xlu1 %2725 }
 0x20b   : > { %4253 = vmatprep.mubr.msk.bf16.mxu1 %vm598_vm9, %v2280_v37 }
 0x20c   : > { %4254 = vmatmul.mubr.msk.bf16.gmra.mxu1 %vm598_vm9, %v2281_v36 }
 0x20e   : > { %2987 = vbcast.lane.b32.xlu1 %v2981_v18, 264  ;;  %2805 = vbcast.lane.b32.xlu0 %v6195_v38, 280  ;;  %v6415_v41 = vpop.permute.xlu0 %2755  ;;  %v6421_v38 = vld [vmem:[%s6922_s7] ss:$0 sm:$0xff] }
 0x20f   : > { %v6427_v13 = vpop.permute.xlu1 %2759 }
 0x212   : > { %2839 = vbcast.lane.b32.xlu1 %v6335_v23, 272  ;;  %2938 = vbcast.lane.b32.xlu0 %v6234_v51, 280  ;;  %v4033_v51 = vld [vmem:[%s6916_s1] sm:$0xff]  }
 0x213   : > { %v6439_v58 = vunpack.c.l.bf16 %v4033_v51  ;;  %v6451_v46 = vunpack.c.h.bf16 %v4033_v51 }
 0x214   : > { %v6431_v31 = vpop.permute.xlu0 %2888 }
 0x216   : > { %2972 = vbcast.lane.b32.xlu1 %v6359_v8, 272  ;;  %2824 = vbcast.lane.b32.xlu0 %v6271_v26, 280 }
 0x218   : > { %v6457_v1 = vpop.permute.xlu0 %2744 }
 0x21a   : > { %v4195_v6 = vpop.f32.mrf.mxu1  ;;  %2957 = vbcast.lane.b32.xlu1 %v6296_v59, 280  ;;  %2991 = vbcast.lane.b32.xlu0 %v2981_v18, 272 }
 0x21b   : > { %v2445_v3 = vadd.f32 %v4195_v6, %v6421_v38 }
 0x21c   : > { %v2436_v42 = vpop.f32.mrf.mxu1 }
 0x21d   : > { %v2437_v26 = vadd.f32 %v6421_v38, %v2436_v42  ;;  %v2999_v57 = vmul.f32 %v2707_v29, %v2445_v3 }
 0x21e   : > { %v4196_v59 = vpop.f32.mrf.mxu1  ;;  %2843 = vbcast.lane.b32.xlu1 %v6335_v23, 280  ;;  %2976 = vbcast.lane.b32.xlu0 %v6359_v8, 280  ;;  %v6453_v23 = vpop.permute.xlu1 %2892 }
 0x21f   : > { %v2997_v27 = vmul.f32 %v6329_v2, %v2437_v26  ;;  %v3073_v19 = vmul.f32 %v6447_v4, %v2999_v57  ;;  %v6506_v57 = vunpack.c.h.bf16 %v6436_v50 }
 0x220   : > { %v2439_v28 = vpop.f32.mrf.mxu1 }
 0x221   : > { %v2440_v2 = vadd.f32 %v6421_v38, %v2439_v28  ;;  %v3071_v12 = vmul.f32 %v6439_v58, %v2997_v27  ;;  %v3138_v34 = vsel %vm598_vm9, %v3073_v19, 0.0 }
 0x222   : > { %v4199_v15 = vpop.f32.mrf.mxu1  ;;  %2995 = vbcast.lane.b32.xlu1 %v2981_v18, 280 }
 0x223   : > { %v2998_v55 = vmul.f32 %v6348_v33, %v2440_v2  ;;  %v3135_v0 = vsel %vm598_vm9, %v3071_v12, 0.0  ;;  %v2461_v35 = vadd.f32 %v4199_v15, %v6421_v38 }
 0x224   : > { %v2452_v47 = vpop.f32.mrf.mxu1 }
 0x225   : > { %v3072_v32 = vmul.f32 %v6451_v46, %v2998_v55  ;;  %v2453_v43 = vadd.f32 %v6421_v38, %v2452_v47  ;;  %v3003_v37 = vmul.f32 %v6412_v11, %v2461_v35 }
 0x226   : > { %v4200_v8 = vpop.f32.mrf.mxu1 }
 0x227   : > { %v3136_v10 = vsel %vm598_vm9, %v3072_v32, 0.0  ;;  %v3001_v44 = vmul.f32 %v6342_v60, %v2453_v43  ;;  %v2448_v60 = vadd.f32 %v4196_v59, %v6421_v38  ;;  %v3077_v51 = vmul.f32 %v6447_v4, %v3003_v37 }
 0x228   : > { %v3137_v30 = vadd.f32 %v3136_v10, %v3135_v0  ;;  %v2455_v21 = vpop.f32.mrf.mxu1  ;;  %v2464_v26 = vadd.f32 %v4200_v8, %v6421_v38 }
 0x229   : > { %v2456_v33 = vadd.f32 %v6421_v38, %v2455_v21  ;;  %v3075_v18 = vmul.f32 %v6439_v58, %v3001_v44  ;;  %v3151_v47 = vsel %vm598_vm9, %v3077_v51, 0.0 }
 0x22a   : > { %v6463_v39 = vpop.permute.xlu1 %2774  ;;  %v6473_v17 = vpop.permute.xlu0 %2778  ;;  %v3139_v61 = vadd.f32 %v3138_v34, %v3137_v30 }
 0x22b   : > { %v6475_v20 = vpop.f32.mrf.mxu1  ;;  %v3002_v16 = vmul.f32 %v6370_v22, %v2456_v33  ;;  %v3148_v3 = vsel %vm598_vm9, %v3075_v18, 0.0 }
 0x22d   : > { %v6478_v54 = vpop.f32.mrf.mxu1  ;;  %v3076_v62 = vmul.f32 %v6451_v46, %v3002_v16 }
 0x22e   : > { %v6483_v49 = vpop.permute.xlu1 %2858  ;;  %v6487_v14 = vpop.permute.xlu0 %2877 }
 0x22f   : > { %v6481_v7 = vpop.f32.mrf.mxu1  ;;  %v3149_v36 = vsel %vm598_vm9, %v3076_v62, 0.0 }
 0x230   : > { %v3150_v27 = vadd.f32 %v3149_v36, %v3148_v3 }
 0x231   : > { %v2471_v52 = vpop.f32.mrf.mxu1 }
 0x232   : > { %v3152_v0 = vadd.f32 %v3151_v47, %v3150_v27 }
 0x233   : > { %v4207_v45 = vpop.f32.mrf.mxu1 }
 0x234   : > { %v2493_v32 = vadd.f32 %v4207_v45, %v6421_v38 }
 0x235   : > { %v2484_v22 = vpop.f32.mrf.mxu1 }
 0x236   : > { %v2485_v29 = vadd.f32 %v6421_v38, %v2484_v22 }
 0x237   : > { %v6494_v6 = vpop.permute.xlu1 %2907  ;;  %v6502_v11 = vpop.f32.mrf.mxu1 }
 0x238   : > { %v6496_v42 = vpop.permute.xlu0 %2911  ;;  %v3009_v28 = vmul.f32 %v6415_v41, %v2485_v29 }
 0x239   : > { %v2487_v2 = vpop.f32.mrf.mxu1 }
 0x23a   : > { %v2488_v55 = vadd.f32 %v6421_v38, %v2487_v2  ;;  %v3083_v10 = vmul.f32 %v6439_v58, %v3009_v28  ;;  %v2472_v2 = vadd.f32 %v6421_v38, %v2471_v52 }
 0x23b   : > { %v2711_v15 = vpop.permute.xlu1 %2710 }
 0x23c   : > { %v2730_v12 = vpop.permute.xlu0 %2729  ;;  %v3000_v59 = vmul.f32 %v2711_v15, %v2448_v60  ;;  %v6511_v8 = vpop.f32.mrf.mxu1  ;;  %v3010_v41 = vmul.f32 %v6427_v13, %v2488_v55  ;;  %v3174_v13 = vsel %vm598_vm9, %v3083_v10, 0.0  ;;  %v3006_v52 = vmul.f32 %v6391_v5, %v2472_v2 }
 0x23d   : > { %v3004_v19 = vmul.f32 %v2730_v12, %v2464_v26 }
 0x23e   : > { %v3074_v50 = vmul.f32 %v6506_v57, %v3000_v59  ;;  %v2500_v21 = vpop.f32.mrf.mxu1  ;;  %v3084_v33 = vmul.f32 %v6451_v46, %v3010_v41 }
 0x23f   : > { %v3078_v30 = vmul.f32 %v6506_v57, %v3004_v19  ;;  %v2764_v34 = vpop.permute.xlu1 %2763  ;;  %v2501_v9 = vadd.f32 %v6421_v38, %v2500_v21  ;;  %v2469_v19 = vadd.f32 %v6421_v38, %v6478_v54  ;;  %v2477_v54 = vadd.f32 %v6475_v20, %v6421_v38 }
 0x240   : > { %v3140_v24 = vsel %vm598_vm9, %v3074_v50, 0.0  ;;  %v3011_v16 = vmul.f32 %v2764_v34, %v2493_v32  ;;  %v6521_v35 = vpop.f32.mrf.mxu1  ;;  %v3175_v45 = vsel %vm598_vm9, %v3084_v33, 0.0 }
 0x241   : > { %v3153_v43 = vsel %vm598_vm9, %v3078_v30, 0.0  ;;  %v3141_v44 = vadd.f32 %v3140_v24, %v3139_v61  ;;  %v3176_v18 = vadd.f32 %v3175_v45, %v3174_v13  ;;  %v3013_v22 = vmul.f32 %v6463_v39, %v2501_v9 }
 0x242   : > { %v3154_v62 = vadd.f32 %v3153_v43, %v3152_v0  ;;  %v3085_v37 = vmul.f32 %v6447_v4, %v3011_v16  ;;  %v2503_v36 = vpop.f32.mrf.mxu1  ;;  %v3005_v9 = vmul.f32 %v6380_v48, %v2469_v19 }
 0x243   : > { %v3142_v29 = vrot.slane %v3141_v44, 4  ;;  %v2504_v51 = vadd.f32 %v6421_v38, %v2503_v36  ;;  %v3087_v15 = vmul.f32 %v6439_v58, %v3013_v22 }
 0x244   : > { %v3155_v60 = vrot.slane %v3154_v62, 4  ;;  %v3177_v3 = vsel %vm598_vm9, %v3085_v37, 0.0  ;;  %v3007_v37 = vmul.f32 %v6457_v1, %v2477_v54  ;;  %v3079_v20 = vmul.f32 %v6439_v58, %v3005_v9 }
 0x245   : > { %v6529_v26 = vpop.f32.mrf.mxu1  ;;  %v3143_v61 = vadd.f32 %v3142_v29, %v3141_v44  ;;  %v6531_v28 = vadd.f32 %v3177_v3, %v3176_v18  ;;  %v3014_v12 = vmul.f32 %v6473_v17, %v2504_v51  ;;  %v3187_v50 = vsel %vm598_vm9, %v3087_v15, 0.0 }
 0x246   : > { %v3156_v27 = vadd.f32 %v3155_v60, %v3154_v62  ;;  %v3080_v62 = vmul.f32 %v6451_v46, %v3006_v52  ;;  %v3081_v60 = vmul.f32 %v6447_v4, %v3007_v37  ;;  %v3161_v51 = vsel %vm598_vm9, %v3079_v20, 0.0 }
 0x247   : > { %v6536_v39 = vpop.f32.mrf.mxu1  ;;  %v3144_v59 = vrot.slane %v3143_v61, 2  ;;  %v3088_v32 = vmul.f32 %v6451_v46, %v3014_v12  ;;  %v2480_v3 = vadd.f32 %v6481_v7, %v6421_v38 }
 0x248   : > { %v6538_v55 = vpop.permute.xlu0 %2793  ;;  %v3157_v47 = vrot.slane %v3156_v27, 2  ;;  %v6557_v43 = vpop.permute.xlu1 %2797  ;;  %v3162_v18 = vsel %vm598_vm9, %v3080_v62, 0.0  ;;  %v3164_v12 = vsel %vm598_vm9, %v3081_v60, 0.0 }
 0x249   : > { %v6543_v0 = vpop.f32.mrf.mxu1  ;;  %v3145_v10 = vadd.f32 %v3144_v59, %v3143_v61  ;;  %v3188_v17 = vsel %vm598_vm9, %v3088_v32, 0.0  ;;  %v3163_v61 = vadd.f32 %v3162_v18, %v3161_v51 }
 0x24a   : > { %v3158_v41 = vadd.f32 %v3157_v47, %v3156_v27  ;;  %v6550_v33 = vadd.f32 %v3188_v17, %v3187_v50 }
 0x24b   : > { %v6548_v30 = vpop.f32.mrf.mxu1  ;;  %v3146_v21 = vrot.slane %v3145_v10, 1  ;;  %v3165_v19 = vadd.f32 %v3164_v12, %v3163_v61 }
 0x24c   : > { %v3159_v34 = vrot.slane %v3158_v41, 1  ;;  %v6559_v5 = vpop.permute.xlu0 %2896 }
 0x24d   : > { %v3147_v16 = vadd.f32 %v3146_v21, %v3145_v10 }
 0x24e   : > { %v6555_v24 = vpop.f32.mrf.mxu1  ;;  %v3160_v44 = vadd.f32 %v3159_v34, %v3158_v41 }
 0x250   : > { %v6562_v13 = vpop.f32.mrf.mxu1  ;;  %v6565_v45 = vsel %vm3359_vm4, %v3160_v44, %v3147_v16  ;;  %v6574_v36 = vpop.permute.xlu1 %2926 }
 0x251   : > { %v6576_v29 = vpop.permute.xlu0 %2930 }
 0x252   : > { %v6569_v48 = vpop.f32.mrf.mxu1 }
 0x254   : > { %v6572_v22 = vpop.f32.mrf.mxu1  ;;  %v2749_v2 = vpop.permute.xlu1 %2748 }
 0x255   : > { %v6586_v15 = vpop.permute.xlu0 %2782  ;;  %v3008_v59 = vmul.f32 %v2749_v2, %v2480_v3 }
 0x256   : > { %v6582_v1 = vpop.f32.mrf.mxu1 }
 0x257   : > { %v3082_v32 = vmul.f32 %v6506_v57, %v3008_v59 }
 0x258   : > { %v6584_v27 = vpop.f32.mrf.mxu1  ;;  %v6594_v41 = vpop.permute.xlu1 %2812 }
 0x259   : > { %v6596_v7 = vpop.permute.xlu0 %2816  ;;  %v3166_v52 = vsel %vm598_vm9, %v3082_v32, 0.0 }
 0x25a   : > { %v6589_v47 = vpop.f32.mrf.mxu1  ;;  %v3167_v17 = vadd.f32 %v3166_v52, %v3165_v19  ;;  %v2496_v52 = vadd.f32 %v6502_v11, %v6421_v38  ;;  %v2509_v11 = vadd.f32 %v6511_v8, %v6421_v38 }
 0x25c   : > { %v6592_v10 = vpop.f32.mrf.mxu1  ;;  %v2863_v54 = vpop.permute.xlu1 %2862  ;;  %v3168_v9 = vrot.slane %v3167_v17, 4 }
 0x25d   : > { %v2882_v44 = vpop.permute.xlu0 %2881 }
 0x25e   : > { %v4227_v50 = vpop.f32.mrf.mxu1  ;;  %v3169_v37 = vadd.f32 %v3168_v9, %v3167_v17 }
 0x25f   : > { %v2573_v21 = vadd.f32 %v4227_v50, %v6421_v38 }
 0x260   : > { %v2564_v34 = vpop.f32.mrf.mxu1  ;;  %v6604_v3 = vpop.permute.xlu1 %2915  ;;  %v3170_v61 = vrot.slane %v3169_v37, 2 }
 0x261   : > { %v2565_v16 = vadd.f32 %v6421_v38, %v2564_v34  ;;  %v3031_v18 = vmul.f32 %v6483_v49, %v2573_v21  ;;  %v6607_v12 = vpop.permute.xlu0 %2945 }
 0x262   : > { %v4228_v62 = vpop.f32.mrf.mxu1  ;;  %v3171_v32 = vadd.f32 %v3170_v61, %v3169_v37 }
 0x263   : > { %v3029_v20 = vmul.f32 %v6393_v25, %v2565_v16  ;;  %v2576_v60 = vadd.f32 %v4228_v62, %v6421_v38  ;;  %v3105_v50 = vmul.f32 %v6447_v4, %v3031_v18 }
 0x264   : > { %v2567_v51 = vpop.f32.mrf.mxu1  ;;  %v6614_v21 = vpop.permute.xlu1 %2949  ;;  %v3172_v34 = vrot.slane %v3171_v32, 1 }
 0x265   : > { %v2568_v2 = vadd.f32 %v6421_v38, %v2567_v51  ;;  %v3032_v59 = vmul.f32 %v2863_v54, %v2576_v60  ;;  %v3103_v25 = vmul.f32 %v6439_v58, %v3029_v20  ;;  %v2768_v62 = vpop.permute.xlu0 %2767  ;;  %v3242_v61 = vsel %vm598_vm9, %v3105_v50, 0.0 }
 0x266   : > { %v4231_v19 = vpop.f32.mrf.mxu1  ;;  %v3173_v20 = vadd.f32 %v3172_v34, %v3171_v32  ;;  %v3012_v18 = vmul.f32 %v2768_v62, %v2496_v52  ;;  %v2520_v50 = vadd.f32 %v6421_v38, %v6548_v30 }
 0x267   : > { %v3030_v49 = vmul.f32 %v6401_v63, %v2568_v2  ;;  %v2589_v16 = vadd.f32 %v4231_v19, %v6421_v38  ;;  %v3106_v37 = vmul.f32 %v6506_v57, %v3032_v59  ;;  %v3239_v60 = vsel %vm598_vm9, %v3103_v25, 0.0 }
 0x268   : > { %v2580_v17 = vpop.f32.mrf.mxu1  ;;  %v6629_v8 = vsel %vm3361_vm5, %v3173_v20, %v6565_v45  ;;  %v6631_v59 = vpop.permute.xlu1 %2801  ;;  %v3086_v32 = vmul.f32 %v6506_v57, %v3012_v18 }
 0x269   : > { %v3104_v9 = vmul.f32 %v6451_v46, %v3030_v49  ;;  %v2581_v54 = vadd.f32 %v6421_v38, %v2580_v17  ;;  %v3035_v52 = vmul.f32 %v6487_v14, %v2589_v16  ;;  %v6636_v34 = vpop.permute.xlu0 %2831 }
 0x26a   : > { %v4232_v63 = vpop.f32.mrf.mxu1 }
 0x26b   : > { %v3240_v51 = vsel %vm598_vm9, %v3104_v9, 0.0  ;;  %v3033_v19 = vmul.f32 %v6405_v40, %v2581_v54  ;;  %v2592_v49 = vadd.f32 %v4232_v63, %v6421_v38  ;;  %v2517_v40 = vadd.f32 %v6421_v38, %v6536_v39 }
 0x26c   : > { %v3241_v2 = vadd.f32 %v3240_v51, %v3239_v60  ;;  %v2583_v17 = vpop.f32.mrf.mxu1  ;;  %v3244_v9 = vsel %vm598_vm9, %v3106_v37, 0.0  ;;  %v3179_v54 = vsel %vm598_vm9, %v3086_v32, 0.0  ;;  %v6647_v18 = vpop.permute.xlu1 %2835  ;;  %v3109_v39 = vmul.f32 %v6447_v4, %v3035_v52 }
 0x26d   : > { %v2584_v25 = vadd.f32 %v6421_v38, %v2583_v17  ;;  %v3107_v62 = vmul.f32 %v6439_v58, %v3033_v19  ;;  %v3036_v63 = vmul.f32 %v2882_v44, %v2592_v49  ;;  %v3180_v16 = vadd.f32 %v3179_v54, %v6531_v28  ;;  %v6651_v30 = vpop.permute.xlu0 %2900 }
 0x26e   : > { %v3243_v45 = vadd.f32 %v3242_v61, %v3241_v2  ;;  %v3015_v51 = vmul.f32 %v6586_v15, %v2509_v11  ;;  %v3017_v61 = vmul.f32 %v6538_v55, %v2517_v40  ;;  %v3018_v28 = vmul.f32 %v6557_v43, %v2520_v50 }
 0x26f   : > { %v3034_v14 = vmul.f32 %v6408_v56, %v2584_v25  ;;  %v3181_v37 = vrot.slane %v3180_v16, 4  ;;  %v3391_v56 = vld [vmem:[%s6923_s8] sm:$0xff]  ;;  %v3252_v44 = vsel %vm598_vm9, %v3107_v62, 0.0  ;;  %v3110_v19 = vmul.f32 %v6506_v57, %v3036_v63 }
 0x270   : > { %v3245_v20 = vadd.f32 %v3244_v9, %v3243_v45  ;;  %4263 = vmatprep.subr.mxu0 %v3391_v56  ;;  %v6662_v15 = vpop.permute.xlu1 %2934  ;;  %v3255_v55 = vsel %vm598_vm9, %v3109_v39, 0.0  ;;  %v3089_v43 = vmul.f32 %v6447_v4, %v3015_v51  ;;  %v3091_v40 = vmul.f32 %v6439_v58, %v3017_v61 }
 0x271   : > { %v3108_v60 = vmul.f32 %v6451_v46, %v3034_v14  ;;  %v3182_v17 = vadd.f32 %v3181_v37, %v3180_v16  ;;  %4264 = vmatpush3.msra.mxu0 %v3391_v56  ;;  %v6666_v25 = vpop.permute.xlu0 %2964  ;;  %v2512_v9 = vadd.f32 %v6521_v35, %v6421_v38  ;;  %v3092_v45 = vmul.f32 %v6451_v46, %v3018_v28  ;;  %v3518_v56 = vld [vmem:[%s6925_s10 + $0x18] sm:$0xff] }
 0x272   : > { %v3246_v2 = vrot.slane %v3245_v20, 4  ;;  %4279 = vmatprep.subr.bf16.mxu0 %v4643_v53  ;;  %v2533_v54 = vadd.f32 %v6421_v38, %v6562_v13  ;;  %v3257_v62 = vsel %vm598_vm9, %v3110_v19, 0.0  ;;  %v2536_v14 = vadd.f32 %v6421_v38, %v6572_v22  ;;  %4268 = vmatprep.subr.mxu1 %v3518_v56 }
 0x273   : > { %v3253_v49 = vsel %vm598_vm9, %v3108_v60, 0.0  ;;  %v3183_v11 = vrot.slane %v3182_v17, 2  ;;  %v2525_v60 = vadd.f32 %v6529_v26, %v6421_v38  ;;  %v6684_v35 = vadd.f32 %v6543_v0, %v6421_v38  ;;  %v3517_v26 = vld [vmem:[%s6925_s10 + $0x10] sm:$0xff]  ;;  %4269 = vmatpush3.msra.mxu1 %v3518_v56 }
 0x274   : > { %v3247_v32 = vadd.f32 %v3246_v2, %v3245_v20  ;;  %v3254_v52 = vadd.f32 %v3253_v49, %v3252_v44  ;;  %v6678_v39 = vpop.permute.xlu1 %2968  ;;  %v3190_v13 = vsel %vm598_vm9, %v3089_v43, 0.0  ;;  %v3200_v61 = vsel %vm598_vm9, %v3091_v40, 0.0  ;;  %v3516_v43 = vld [vmem:[%s6925_s10 + $0x8] sm:$0xff]  ;;  %4270 = vmatprep.subr.mxu1 %v3517_v26 }
 0x275   : > { %v3184_v63 = vadd.f32 %v3183_v11, %v3182_v17  ;;  %v2787_v51 = vpop.permute.xlu0 %2786  ;;  %v3191_v0 = vadd.f32 %v3190_v13, %v6550_v33  ;;  %v3201_v44 = vsel %vm598_vm9, %v3092_v45, 0.0  ;;  %v3021_v19 = vmul.f32 %v6594_v41, %v2533_v54  ;;  %4271 = vmatpush3.msra.mxu1 %v3517_v26 }
 0x276   : > { %v3256_v50 = vadd.f32 %v3255_v55, %v3254_v52  ;;  %v3248_v16 = vrot.slane %v3247_v32, 2  ;;  %v3016_v28 = vmul.f32 %v2787_v51, %v2512_v9  ;;  %v3022_v17 = vmul.f32 %v6596_v7, %v2536_v14  ;;  %4272 = vmatprep.subr.mxu1 %v3516_v43 }
 0x277   : > { %v3185_v37 = vrot.slane %v3184_v63, 1  ;;  %v3019_v33 = vmul.f32 %v6631_v59, %v2525_v60  ;;  %v6715_v54 = vadd.f32 %v6569_v48, %v6421_v38  ;;  %v3202_v14 = vadd.f32 %v3201_v44, %v3200_v61  ;;  %4273 = vmatpush3.msra.mxu1 %v3516_v43 }
 0x278   : > { %v3258_v20 = vadd.f32 %v3257_v62, %v3256_v50  ;;  %v3249_v52 = vadd.f32 %v3248_v16, %v3247_v32  ;;  %v3090_v40 = vmul.f32 %v6506_v57, %v3016_v28  ;;  %v2821_v50 = vpop.permute.xlu1 %2820  ;;  %v2541_v32 = vadd.f32 %v6555_v24, %v6421_v38 }
 0x279   : > { %v3186_v49 = vadd.f32 %v3185_v37, %v3184_v63  ;;  %v6705_v45 = vpop.permute.xlu0 %2919  ;;  %v3095_v60 = vmul.f32 %v6439_v58, %v3021_v19  ;;  %v3093_v48 = vmul.f32 %v6447_v4, %v3019_v33  ;;  %v2557_v26 = vadd.f32 %v6582_v1, %v6421_v38 }
 0x27a   : > { %v3259_v2 = vrot.slane %v3258_v20, 4  ;;  %v3192_v63 = vsel %vm598_vm9, %v3090_v40, 0.0  ;;  %v3250_v37 = vrot.slane %v3249_v52, 1  ;;  %v2552_v28 = vadd.f32 %v6421_v38, %v6592_v10 }
 0x27b   : > { %v4235_v22 = vpop.f32.mrf.mxu1  ;;  %v6709_v7 = vsel %vm3363_vm6, %v3186_v49, %v6629_v8  ;;  %v3193_v8 = vadd.f32 %v3192_v63, %v3191_v0  ;;  %v2549_v44 = vadd.f32 %v6421_v38, %v6584_v27  ;;  %v3203_v1 = vsel %vm598_vm9, %v3093_v48, 0.0 }
 0x27c   : > { %v3260_v55 = vadd.f32 %v3259_v2, %v3258_v20  ;;  %v2605_v9 = vadd.f32 %v4235_v22, %v6421_v38  ;;  %v6722_v51 = vpop.permute.xlu1 %2953  ;;  %v3096_v2 = vmul.f32 %v6451_v46, %v3022_v17 }
 0x27d   : > { %v2596_v11 = vpop.f32.mrf.mxu1  ;;  %v3194_v22 = vrot.slane %v3193_v8, 4  ;;  %v6727_v56 = vpop.permute.xlu0 %2983 }
 0x27e   : > { %v2597_v41 = vadd.f32 %v6421_v38, %v2596_v11  ;;  %v3261_v62 = vrot.slane %v3260_v55, 2  ;;  %v3039_v61 = vmul.f32 %v6559_v5, %v2605_v9  ;;  %v3251_v11 = vadd.f32 %v3250_v37, %v3249_v52 }
 0x27f   : > { %v4236_v59 = vpop.f32.mrf.mxu1  ;;  %v3195_v17 = vadd.f32 %v3194_v22, %v3193_v8  ;;  %v3214_v10 = vsel %vm598_vm9, %v3096_v2, 0.0  ;;  %v3025_v37 = vmul.f32 %v6636_v34, %v2549_v44 }
 0x280   : > { %v3037_v16 = vmul.f32 %v6431_v31, %v2597_v41  ;;  %v2608_v20 = vadd.f32 %v4236_v59, %v6421_v38  ;;  %v3262_v24 = vadd.f32 %v3261_v62, %v3260_v55  ;;  %v3213_v55 = vsel %vm598_vm9, %v3095_v60, 0.0  ;;  %v6740_v40 = vpop.permute.xlu1 %2987 }
 0x281   : > { %v2599_v13 = vpop.f32.mrf.mxu1  ;;  %v3113_v33 = vmul.f32 %v6447_v4, %v3039_v61  ;;  %v3196_v9 = vrot.slane %v3195_v17, 2  ;;  %v2806_v41 = vpop.permute.xlu0 %2805  ;;  %v3204_v60 = vadd.f32 %v3203_v1, %v3202_v14 }
 0x282   : > { %v2600_v31 = vadd.f32 %v6421_v38, %v2599_v13  ;;  %v3263_v0 = vrot.slane %v3262_v24, 1  ;;  %v3111_v19 = vmul.f32 %v6439_v58, %v3037_v16  ;;  %v3040_v5 = vmul.f32 %v6651_v30, %v2608_v20 }
 0x283   : > { %v3023_v30 = vmul.f32 %v2821_v50, %v2541_v32  ;;  %v3020_v59 = vmul.f32 %v2806_v41, %v6684_v35  ;;  %v3197_v8 = vadd.f32 %v3196_v9, %v3195_v17  ;;  %v3268_v13 = vsel %vm598_vm9, %v3113_v33, 0.0 }
 0x284   : > { %v3038_v49 = vmul.f32 %v6453_v23, %v2600_v31  ;;  %v3264_v43 = vadd.f32 %v3263_v0, %v3262_v24  ;;  %v3026_v23 = vmul.f32 %v6647_v18, %v2552_v28  ;;  %v3265_v63 = vsel %vm598_vm9, %v3111_v19, 0.0  ;;  %v2840_v32 = vpop.permute.xlu1 %2839 }
 0x285   : > { %v3114_v16 = vmul.f32 %v6506_v57, %v3040_v5  ;;  %v3094_v18 = vmul.f32 %v6506_v57, %v3020_v59  ;;  %v3198_v2 = vrot.slane %v3197_v8, 1  ;;  %v6758_v61 = vpop.permute.xlu0 %2938  ;;  %v3215_v31 = vadd.f32 %v3214_v10, %v3213_v55 }
 0x286   : > { %v3112_v27 = vmul.f32 %v6451_v46, %v3038_v49  ;;  %v6747_v62 = vsel %vm3359_vm4, %v3264_v43, %v3251_v11  ;;  %v4239_v52 = vpop.f32.mrf.mxu1  ;;  %v3100_v22 = vmul.f32 %v6451_v46, %v3026_v23  ;;  %v3097_v0 = vmul.f32 %v6447_v4, %v3023_v30 }
 0x287   : > { %v2621_v48 = vadd.f32 %v4239_v52, %v6421_v38  ;;  %v3205_v34 = vsel %vm598_vm9, %v3094_v18, 0.0  ;;  %v3270_v44 = vsel %vm598_vm9, %v3114_v16, 0.0  ;;  %v3199_v5 = vadd.f32 %v3198_v2, %v3197_v8 }
 0x288   : > { %v3266_v20 = vsel %vm598_vm9, %v3112_v27, 0.0  ;;  %v2612_v50 = vpop.f32.mrf.mxu1  ;;  %v3206_v49 = vadd.f32 %v3205_v34, %v3204_v60  ;;  %v6766_v1 = vpop.permute.xlu1 %2972  ;;  %v3099_v55 = vmul.f32 %v6439_v58, %v3025_v37  ;;  %v3227_v41 = vsel %vm598_vm9, %v3100_v22, 0.0 }
 0x289   : > { %v3267_v24 = vadd.f32 %v3266_v20, %v3265_v63  ;;  %v2613_v35 = vadd.f32 %v6421_v38, %v2612_v50  ;;  %v3043_v10 = vmul.f32 %v6604_v3, %v2621_v48  ;;  %v6773_v27 = vsel %vm3365_vm7, %v3199_v5, %v6709_v7  ;;  %v2825_v9 = vpop.permute.xlu0 %2824 }
 0x28a   : > { %v4240_v28 = vpop.f32.mrf.mxu1  ;;  %v3207_v23 = vrot.slane %v3206_v49, 4  ;;  %v3216_v52 = vsel %vm598_vm9, %v3097_v0, 0.0  ;;  %v3024_v59 = vmul.f32 %v2825_v9, %v6715_v54  ;;  %v3226_v54 = vsel %vm598_vm9, %v3099_v55, 0.0 }
 0x28b   : > { %v3269_v14 = vadd.f32 %v3268_v13, %v3267_v24  ;;  %v3041_v19 = vmul.f32 %v6494_v6, %v2613_v35  ;;  %v2624_v11 = vadd.f32 %v4240_v28, %v6421_v38  ;;  %v3027_v6 = vmul.f32 %v2840_v32, %v2557_v26 }
 0x28c   : > { %v2615_v43 = vpop.f32.mrf.mxu1  ;;  %v3217_v16 = vadd.f32 %v3216_v52, %v3215_v31  ;;  %v3098_v7 = vmul.f32 %v6506_v57, %v3024_v59  ;;  %v6782_v60 = vpop.permute.xlu1 %2957  ;;  %v2560_v26 = vadd.f32 %v6589_v47, %v6421_v38  ;;  %v3117_v37 = vmul.f32 %v6447_v4, %v3043_v10 }
 0x28d   : > { %v3271_v17 = vadd.f32 %v3270_v44, %v3269_v14  ;;  %v2616_v33 = vadd.f32 %v6421_v38, %v2615_v43  ;;  %v3115_v63 = vmul.f32 %v6439_v58, %v3041_v19  ;;  %v3044_v20 = vmul.f32 %v6705_v45, %v2624_v11 }
 0x28e   : > { %v3101_v24 = vmul.f32 %v6447_v4, %v3027_v6  ;;  %v3208_v32 = vadd.f32 %v3207_v23, %v3206_v49  ;;  %v3218_v45 = vsel %vm598_vm9, %v3098_v7, 0.0  ;;  %v3281_v22 = vsel %vm598_vm9, %v3117_v37, 0.0 }
 0x28f   : > { %v3272_v30 = vrot.slane %v3271_v17, 4  ;;  %v3042_v8 = vmul.f32 %v6496_v42, %v2616_v33  ;;  %v3228_v42 = vadd.f32 %v3227_v41, %v3226_v54  ;;  %v3278_v13 = vsel %vm598_vm9, %v3115_v63, 0.0 }
 0x290   : > { %v3219_v48 = vadd.f32 %v3218_v45, %v3217_v16  ;;  %v3118_v2 = vmul.f32 %v6506_v57, %v3044_v20  ;;  %v2844_v31 = vpop.permute.xlu1 %2843  ;;  %v3229_v34 = vsel %vm598_vm9, %v3101_v24, 0.0  ;;  %v3209_v19 = vrot.slane %v3208_v32, 2 }
 0x291   : > { %v3273_v3 = vadd.f32 %v3272_v30, %v3271_v17  ;;  %v3116_v18 = vmul.f32 %v6451_v46, %v3042_v8  ;;  %v3028_v0 = vmul.f32 %v2844_v31, %v2560_v26  ;;  %v3230_v5 = vadd.f32 %v3229_v34, %v3228_v42 }
 0x292   : > { %v3220_v28 = vrot.slane %v3219_v48, 4  ;;  %v3283_v55 = vsel %vm598_vm9, %v3118_v2, 0.0  ;;  %v3210_v30 = vadd.f32 %v3209_v19, %v3208_v32 }
 0x293   : > { %v3274_v50 = vrot.slane %v3273_v3, 2  ;;  %v3279_v47 = vsel %vm598_vm9, %v3116_v18, 0.0  ;;  %v3102_v11 = vmul.f32 %v6506_v57, %v3028_v0 }
 0x294   : > { %v3280_v14 = vadd.f32 %v3279_v47, %v3278_v13  ;;  %v3221_v17 = vadd.f32 %v3220_v28, %v3219_v48  ;;  %v3211_v26 = vrot.slane %v3210_v30, 1 }
 0x295   : > { %v3275_v35 = vadd.f32 %v3274_v50, %v3273_v3  ;;  %v3231_v9 = vsel %vm598_vm9, %v3102_v11, 0.0 }
 0x296   : > { %v3282_v49 = vadd.f32 %v3281_v22, %v3280_v14  ;;  %v3222_v33 = vrot.slane %v3221_v17, 2  ;;  %v3232_v23 = vadd.f32 %v3231_v9, %v3230_v5  ;;  %v3212_v48 = vadd.f32 %v3211_v26, %v3210_v30 }
 0x297   : > { %v3276_v44 = vrot.slane %v3275_v35, 1 }
 0x298   : > { %v3284_v10 = vadd.f32 %v3283_v55, %v3282_v49  ;;  %v3223_v59 = vadd.f32 %v3222_v33, %v3221_v17  ;;  %v3233_v16 = vrot.slane %v3232_v23, 4  ;;  %v3368_v0 = vsel %vm3367_vm8, %v3212_v48, %v6773_v27 }
 0x299   : > { %v3277_v43 = vadd.f32 %v3276_v44, %v3275_v35  ;;  %v3069_v44 = vld [vmem:[#allocation2] sm:$0xff] }
 0x29a   : > { %v4243_v41 = vpop.f32.mrf.mxu1  ;;  %v3285_v52 = vrot.slane %v3284_v10, 4  ;;  %v3234_v37 = vadd.f32 %v3233_v16, %v3232_v23  ;;  %v3224_v54 = vrot.slane %v3223_v59, 1 }
 0x29b   : > { %v3374_v6 = vsel %vm3361_vm5, %v3277_v43, %v6747_v62  ;;  %v2637_v8 = vadd.f32 %v4243_v41, %v6421_v38 }
 0x29c   : > { %v2628_v63 = vpop.f32.mrf.mxu1  ;;  %v3286_v3 = vadd.f32 %v3285_v52, %v3284_v10  ;;  %v3235_v32 = vrot.slane %v3234_v37, 2  ;;  %v3225_v47 = vadd.f32 %v3224_v54, %v3223_v59 }
 0x29d   : > { %v2629_v20 = vadd.f32 %v6421_v38, %v2628_v63  ;;  %v3047_v42 = vmul.f32 %v6662_v15, %v2637_v8 }
 0x29e   : > { %v4244_v7 = vpop.f32.mrf.mxu1  ;;  %v3287_v24 = vrot.slane %v3286_v3, 2  ;;  %v3236_v35 = vadd.f32 %v3235_v32, %v3234_v37  ;;  %v3370_v49 = vsel %vm3369_vm10, %v3225_v47, %v3368_v0 }
 0x29f   : > { %v3045_v50 = vmul.f32 %v6574_v36, %v2629_v20  ;;  %v2640_v62 = vadd.f32 %v4244_v7, %v6421_v38  ;;  %v3121_v34 = vmul.f32 %v6447_v4, %v3047_v42 }
 0x2a0   : > { %v2631_v18 = vpop.f32.mrf.mxu1  ;;  %v3288_v45 = vadd.f32 %v3287_v24, %v3286_v3  ;;  %v3237_v14 = vrot.slane %v3236_v35, 1 }
 0x2a1   : > { %v2632_v13 = vadd.f32 %v6421_v38, %v2631_v18  ;;  %v3119_v31 = vmul.f32 %v6439_v58, %v3045_v50  ;;  %v3048_v22 = vmul.f32 %v6758_v61, %v2640_v62  ;;  %v3294_v10 = vsel %vm598_vm9, %v3121_v34, 0.0 }
 0x2a2   : > { %v3289_v2 = vrot.slane %v3288_v45, 1  ;;  %v3238_v19 = vadd.f32 %v3237_v14, %v3236_v35 }
 0x2a3   : > { %v3046_v36 = vmul.f32 %v6576_v29, %v2632_v13  ;;  %v3291_v61 = vsel %vm598_vm9, %v3119_v31, 0.0  ;;  %v3122_v29 = vmul.f32 %v6506_v57, %v3048_v22  ;;  %v2992_v31 = vpop.permute.xlu0 %2991 }
 0x2a4   : > { %v3290_v28 = vadd.f32 %v3289_v2, %v3288_v45  ;;  %v3372_v11 = vsel %vm3371_vm11, %v3238_v19, %v3370_v49 }
 0x2a5   : > { %v3120_v15 = vmul.f32 %v6451_v46, %v3046_v36  ;;  %v3382_v55 = vadd.f32 %v3372_v11, %v3069_v44  ;;  %v3296_v27 = vsel %vm598_vm9, %v3122_v29, 0.0  ;;  %v4618_v44 = vld [vmem:[%s6922_s7] ss:$0 sm:$0xff] }
 0x2a6   : > { %v3375_v5 = vsel %vm3363_vm6, %v3290_v28, %v3374_v6 }
 0x2a7   : > { %v3292_v17 = vsel %vm598_vm9, %v3120_v15, 0.0  ;;  %3384 = vst.msk [vmem:[#allocation2] sm:$0xff] %vm598_vm9, %v3382_v55  ;;  %v2977_v49 = vpop.permute.xlu0 %2976 }
 0x2a8   : > { %v3293_v43 = vadd.f32 %v3292_v17, %v3291_v61 }
 0x2aa   : > { %v3295_v33 = vadd.f32 %v3294_v10, %v3293_v43 }
 0x2ac   : > { %v3297_v9 = vadd.f32 %v3296_v27, %v3295_v33 }
 0x2ae   : > { %v3298_v6 = vrot.slane %v3297_v9, 4  ;;  %v3389_v23 = vld [vmem:[#allocation2] sm:$0xff] }
 0x2af   : > { %4265 = vmatprep.mubr.msk.f32.mxu0 %vm598_vm9, %v3389_v23 }
 0x2b0   : > { %v3299_v41 = vadd.f32 %v3298_v6, %v3297_v9  ;;  %v4247_v30 = vpop.f32.mrf.mxu1 }
 0x2b1   : > { %v2653_v63 = vadd.f32 %v4247_v30, %v6421_v38 }
 0x2b2   : > { %v3300_v52 = vrot.slane %v3299_v41, 2  ;;  %v2644_v59 = vpop.f32.mrf.mxu1 }
 0x2b3   : > { %v2645_v16 = vadd.f32 %v6421_v38, %v2644_v59  ;;  %v3051_v24 = vmul.f32 %v6722_v51, %v2653_v63 }
 0x2b4   : > { %v3301_v3 = vadd.f32 %v3300_v52, %v3299_v41  ;;  %v4248_v20 = vpop.f32.mrf.mxu1 }
 0x2b5   : > { %v3049_v8 = vmul.f32 %v6607_v12, %v2645_v16  ;;  %v2656_v7 = vadd.f32 %v4248_v20, %v6421_v38  ;;  %v3125_v42 = vmul.f32 %v6447_v4, %v3051_v24 }
 0x2b6   : > { %v3302_v26 = vrot.slane %v3301_v3, 1  ;;  %v2647_v37 = vpop.f32.mrf.mxu1 }
 0x2b7   : > { %v2648_v54 = vadd.f32 %v6421_v38, %v2647_v37  ;;  %v3123_v62 = vmul.f32 %v6439_v58, %v3049_v8  ;;  %v3052_v18 = vmul.f32 %v6782_v60, %v2656_v7  ;;  %v3307_v2 = vsel %vm598_vm9, %v3125_v42, 0.0 }
 0x2b8   : > { %v3303_v50 = vadd.f32 %v3302_v26, %v3301_v3 }
 0x2b9   : > { %v3050_v32 = vmul.f32 %v6614_v21, %v2648_v54  ;;  %v3304_v13 = vsel %vm598_vm9, %v3123_v62, 0.0  ;;  %v3126_v48 = vmul.f32 %v6506_v57, %v3052_v18 }
 0x2ba   : > { %v3376_v45 = vsel %vm3365_vm7, %v3303_v50, %v3375_v5  ;;  %v2996_v50 = vpop.permute.xlu1 %2995 }
 0x2bb   : > { %v3124_v12 = vmul.f32 %v6451_v46, %v3050_v32  ;;  %v3309_v21 = vsel %vm598_vm9, %v3126_v48, 0.0 }
 0x2bd   : > { %v3305_v51 = vsel %vm598_vm9, %v3124_v12, 0.0  ;;  %v4251_v47 = vpop.f32.mrf.mxu1 }
 0x2be   : > { %v3306_v35 = vadd.f32 %v3305_v51, %v3304_v13  ;;  %v2669_v14 = vadd.f32 %v4251_v47, %v6421_v38 }
 0x2bf   : > { %v2660_v22 = vpop.f32.mrf.mxu1 }
 0x2c0   : > { %v3308_v60 = vadd.f32 %v3307_v2, %v3306_v35  ;;  %v2661_v28 = vadd.f32 %v6421_v38, %v2660_v22  ;;  %v3055_v29 = vmul.f32 %v6766_v1, %v2669_v14 }
 0x2c1   : > { %v4252_v34 = vpop.f32.mrf.mxu1 }
 0x2c2   : > { %v3310_v36 = vadd.f32 %v3309_v21, %v3308_v60  ;;  %v3053_v0 = vmul.f32 %v6666_v25, %v2661_v28  ;;  %v2672_v19 = vadd.f32 %v4618_v44, %v4252_v34  ;;  %v3129_v25 = vmul.f32 %v6447_v4, %v3055_v29 }
 0x2c3   : > { %v2663_v5 = vpop.f32.mrf.mxu1 }
 0x2c4   : > { %v3311_v15 = vrot.slane %v3310_v36, 4  ;;  %v2664_v17 = vadd.f32 %v4618_v44, %v2663_v5  ;;  %v3127_v43 = vmul.f32 %v6439_v58, %v3053_v0  ;;  %v3056_v55 = vmul.f32 %v2977_v49, %v2672_v19  ;;  %v3070_v0 = vld [vmem:[#allocation2 + $0x8] sm:$0xff]  ;;  %v3515_v49 = vld [vmem:[%s6925_s10] sm:$0xff] }
 0x2c5   : > { %v3320_v23 = vsel %vm598_vm9, %v3129_v25, 0.0  ;;  %4274 = vmatprep.subr.mxu1 %v3515_v49 }
 0x2c6   : > { %v3312_v61 = vadd.f32 %v3311_v15, %v3310_v36  ;;  %v3054_v38 = vmul.f32 %v6678_v39, %v2664_v17  ;;  %v3317_v9 = vsel %vm598_vm9, %v3127_v43, 0.0  ;;  %v3130_v41 = vmul.f32 %v6506_v57, %v3056_v55  ;;  %4275 = vmatpush3.msra.mxu1 %v3515_v49 }
 0x2c8   : > { %v3313_v11 = vrot.slane %v3312_v61, 2  ;;  %v3128_v33 = vmul.f32 %v6451_v46, %v3054_v38  ;;  %v3322_v63 = vsel %vm598_vm9, %v3130_v41, 0.0 }
 0x2ca   : > { %v3314_v10 = vadd.f32 %v3313_v11, %v3312_v61  ;;  %v3318_v6 = vsel %vm598_vm9, %v3128_v33, 0.0  ;;  %v4014_v61 = vld [vmem:[%s6924_s9] ss:$0 sm:$0xff] }
 0x2cb   : > { %v3319_v1 = vadd.f32 %v3318_v6, %v3317_v9 }
 0x2cc   : > { %v3315_v27 = vrot.slane %v3314_v10, 1  ;;  %v4255_v52 = vpop.f32.mrf.mxu1 }
 0x2cd   : > { %v3321_v59 = vadd.f32 %v3320_v23, %v3319_v1  ;;  %v2685_v20 = vadd.f32 %v4618_v44, %v4255_v52 }
 0x2ce   : > { %v3316_v30 = vadd.f32 %v3315_v27, %v3314_v10  ;;  %v2676_v16 = vpop.f32.mrf.mxu1 }
 0x2cf   : > { %v3323_v3 = vadd.f32 %v3322_v63, %v3321_v59  ;;  %v2677_v8 = vadd.f32 %v4618_v44, %v2676_v16  ;;  %v3059_v18 = vmul.f32 %v2992_v31, %v2685_v20 }
 0x2d0   : > { %v3377_v39 = vsel %vm3367_vm8, %v3316_v30, %v3376_v45  ;;  %v4256_v7 = vpop.f32.mrf.mxu1 }
 0x2d1   : > { %v3324_v26 = vrot.slane %v3323_v3, 4  ;;  %v3057_v37 = vmul.f32 %v6727_v56, %v2677_v8  ;;  %v2688_v24 = vadd.f32 %v4618_v44, %v4256_v7  ;;  %v3133_v51 = vmul.f32 %v6447_v4, %v3059_v18 }
 0x2d2   : > { %v2679_v54 = vpop.f32.mrf.mxu1 }
 0x2d3   : > { %v3325_v62 = vadd.f32 %v3324_v26, %v3323_v3  ;;  %v2680_v32 = vadd.f32 %v4618_v44, %v2679_v54  ;;  %v3131_v12 = vmul.f32 %v6439_v58, %v3057_v37  ;;  %v3060_v13 = vmul.f32 %v2996_v50, %v2688_v24 }
 0x2d4   : > { %v3333_v22 = vsel %vm598_vm9, %v3133_v51, 0.0 }
 0x2d5   : > { %v3326_v42 = vrot.slane %v3325_v62, 2  ;;  %v3058_v45 = vmul.f32 %v6740_v40, %v2680_v32  ;;  %v3330_v56 = vsel %vm598_vm9, %v3131_v12, 0.0  ;;  %v3134_v60 = vmul.f32 %v6506_v57, %v3060_v13  ;;  %v4348_v12 = vld [vmem:[%s6927_s12 + $0x8] sm:$0xff]   ;;  %v4019_v13 = vld [vmem:[%s6926_s11] ss:$0 sm:$0xff] }
 0x2d7   : > { %v3327_v48 = vadd.f32 %v3326_v42, %v3325_v62  ;;  %v3132_v35 = vmul.f32 %v6451_v46, %v3058_v45  ;;  %v3335_v36 = vsel %vm598_vm9, %v3134_v60, 0.0  ;;  %v4349_v45 = vld [vmem:[%s6927_s12] sm:$0xff]  }
 0x2d9   : > { %v3328_v2 = vrot.slane %v3327_v48, 1  ;;  %v3331_v47 = vsel %vm598_vm9, %v3132_v35, 0.0  ;;  %v3608_v35 = vld [vmem:[%s552_s28 + $0x8] sm:$0xff] }
 0x2da   : > { %v3332_v31 = vadd.f32 %v3331_v47, %v3330_v56  ;;  %v3607_v56 = vld [vmem:[%s552_s28] sm:$0xff] }
 0x2db   : > { %v3329_v21 = vadd.f32 %v3328_v2, %v3327_v48 }
 0x2dc   : > { %v3334_v58 = vadd.f32 %v3333_v22, %v3332_v31 }
 0x2dd   : > { %v3378_v40 = vsel %vm3369_vm10, %v3329_v21, %v3377_v39 }
 0x2de   : > { %v3336_v14 = vadd.f32 %v3335_v36, %v3334_v58 }
 0x2e0   : > { %v3337_v4 = vrot.slane %v3336_v14, 4 }
 0x2e2   : > { %v3338_v28 = vadd.f32 %v3337_v4, %v3336_v14 }
 0x2e4   : > { %v3339_v46 = vrot.slane %v3338_v28, 2 }
 0x2e6   : > { %v3340_v34 = vadd.f32 %v3339_v46, %v3338_v28 }
 0x2e8   : > { %v3341_v15 = vrot.slane %v3340_v34, 1 }
 0x2ea   : > { %v3342_v44 = vadd.f32 %v3341_v15, %v3340_v34 }
 0x2ec   : > { %v3379_v19 = vsel %vm3371_vm11, %v3342_v44, %v3378_v40 }
 0x2ed   : > { %v3383_v57 = vadd.f32 %v3379_v19, %v3070_v0 }
 0x2ef   : > { %3385 = vst.msk [vmem:[#allocation2 + $0x8] sm:$0xff] %vm598_vm9, %v3383_v57 }
 0x2f6   : > { %v3390_v5 = vld [vmem:[#allocation2 + $0x8] sm:$0xff] }
 0x2f7   : > { %4266 = vmatmul.mubr.msk.f32.vlgmr.msra.gmra.mxu0 %vm598_vm9, %v3390_v5 }
 0x2f8   : > { %4280 = vmatpush3.bf16.msra.mxu0 %v4348_v12  ;;  %4283 = vmatprep.mubr.msk.bf16.mxu0 %vm4644_vm14, %v4643_v53 }
 0x2f9   : > { %4281 = vmatprep.subr.bf16.mxu0 %v4643_v53 }
 0x2fc   : > { %4282 = vmatpush3.bf16.msra.mxu0 %v4349_v45 }
 0x3b7   : > { %v4267_v29 = vpop.f32.mrf.mxu0 }
 0x3b8   : > { %v3480_v17 = vadd.f32 %v4267_v29, %v4014_v61 }
 0x3b9   : > { %v3474_v11 = vpop.f32.mrf.mxu0 }
 0x3ba   : > { %v3486_v43 = vand.u32 2147483647, %v3480_v17  ;;  %v3475_v38 = vadd.f32 %v4014_v61, %v3474_v11  ;;  %v3484_v7 = vmax.f32 %v3480_v17, 0.0 }
 0x3bc   : > { %v3488_v55 = vsub.f32 0.0, %v3486_v43  ;;  %v3485_v10 = vand.u32 2147483647, %v3475_v38  ;;  %v3483_v54 = vmax.f32 %v3475_v38, 0.0 }
 0x3be   : > { %v3491_v25 = vmul.f32 1.442695, %v3488_v55  ;;  %v3487_v33 = vsub.f32 0.0, %v3485_v10 }
 0x3c0   : > { %4606 = vpow2.f32 %v3491_v25  ;;  %v3489_v27 = vmul.f32 1.442695, %v3487_v33 }
 0x3c2   : > { %4608 = vpow2.f32 %v3489_v27 }
 0x3cd   : > { %v4607_v9 = vpop.eup %4606 }
 0x3ce   : > { %v3502_v6 = vadd.f32 1.0, %v4607_v9  ;;  %v3505_v30 = vmul.f32 -0.5, %v4607_v9  ;;  %v3508_v59 = vand.u32 2147483647, %v4607_v9 }
 0x3cf   : > { %v4609_v41 = vpop.eup %4608 }
 0x3d0   : > { %4610 = vlog2.f32 %v3502_v6  ;;  %v3493_v1 = vadd.f32 1.0, %v4609_v41  ;;  %v3496_v23 = vmul.f32 -0.5, %v4609_v41  ;;  %v3506_v52 = vadd.f32 1.0, %v3505_v30 }
 0x3d1   : > { %v3499_v16 = vand.u32 2147483647, %v4609_v41  ;;  %vm3509_vm12 = vcmp.lt.f32.partialorder %v3508_v59, 0.0004427343 }
 0x3d2   : > { %4612 = vlog2.f32 %v3493_v1  ;;  %v3497_v39 = vadd.f32 1.0, %v3496_v23  ;;  %v3507_v20 = vmul.f32 %v4607_v9, %v3506_v52 }
 0x3d3   : > { %vm3500_vm13 = vcmp.lt.f32.partialorder %v3499_v16, 0.0004427343 }
 0x3d4   : > { %v3498_v24 = vmul.f32 %v4609_v41, %v3497_v39 }
 0x3dd   : > { %v4611_v63 = vpop.eup %4610 }
 0x3de   : > { %v3504_v3 = vmul.f32 0.6931472, %v4611_v63 }
 0x3df   : > { %v4613_v8 = vpop.eup %4612 }
 0x3e0   : > { %v3510_v26 = vsel %vm3509_vm12, %v3507_v20, %v3504_v3  ;;  %v3495_v37 = vmul.f32 0.6931472, %v4613_v8 }
 0x3e1   : > { %v3512_v50 = vadd.f32 %v3510_v26, %v3484_v7 }
 0x3e2   : > { %v3501_v62 = vsel %vm3500_vm13, %v3498_v24, %v3495_v37 }
 0x3e3   : > { %v3511_v18 = vadd.f32 %v3501_v62, %v3483_v54  ;;  %v4018_v42 = vadd.f32 -0.6931472, %v3512_v50 }
 0x3e5   : > { %v4017_v32 = vadd.f32 -0.6931472, %v3511_v18 }
 0x3e7   : > { %4276 = vmatprep.mubr.msk.f32.mxu1 %vm598_vm9, %v4017_v32 }
 0x3e8   : > { %4277 = vmatmul.mubr.msk.f32.vlgmr.msra.gmra.mxu1 %vm598_vm9, %v4018_v42 }
 0x4a8   : > { %v4278_v48 = vpop.f32.mrf.mxu1 }
 0x4a9   : > { %v3604_v51 = vadd.f32 %v4278_v48, %v4019_v13 }
 0x4aa   : > { %v3598_v2 = vpop.f32.mrf.mxu1 }
 0x4ab   : > { %v3599_v47 = vadd.f32 %v4019_v13, %v3598_v2  ;;  %v3610_v53 = vadd.f32 %v3608_v35, %v3604_v51 }
 0x4ad   : > { %v3609_v60 = vadd.f32 %v3607_v56, %v3599_v47  ;;  %3612 = vst.msk [vmem:[%s585_s19 + $0x8] sm:$0xff] %vm598_vm9, %v3610_v53 }
 0x4af   : > { %3611 = vst.msk [vmem:[%s585_s19] sm:$0xff] %vm598_vm9, %v3609_v60  ;;  %v3613_v31 = vpack.c.bf16 %v3610_v53, %v3609_v60 }
 0x4b1   : > { %4284 = vmatmul.mubr.msk.bf16.vlgmr.msra.gmra.mxu0 %vm598_vm9, %v3613_v31 }
 0x571   : > { %v3667_v21 = vpop.f32.mrf.mxu0 }
 0x572   : > { %v4030_v22 = vpack.c.bf16 %v3667_v21, %v3667_v21 }
 0x573   : > { %v4285_v58 = vpop.f32.mrf.mxu0 }
 0x574   : > { %3683 = vst.msk [vmem:[%s591_s24] sm:$0xf] %vm3682_vm15, %v4030_v22 }
 0x575   : > { %v3670_v40 = vpop.f32.mrf.mxu0 }
 0x576   : > { %v4031_v36 = vpack.c.bf16 %v3670_v40, %v3670_v40 }
 0x577   : > { %v4286_v14 = vpop.f32.mrf.mxu0 }
 0x578   : > { %3684 = vst.msk [vmem:[%s591_s24 + $0x4] sm:$0xf] %vm3682_vm15, %v4031_v36 }
 0x579 PF: > { %s25_s15 = sadd.s32 1, %s4641_s15   ;;  %s7120_s29 = smov %s4637_s30 }
 0x57a   : > { %p22_p6 = scmp.ge.s32.totalorder %s25_s15, 4   ;;  %s7121_s30 = smov %s7123_s16 }
 0x57c   :  { %24 = sbr.rel (!%p22_p6) target bundleno = 2 (0x2), region = 131 }

</bundles_post_ra>
